<compile_context>
chip_gen: v7x
topology: tpu7x:2x2x1
jax: 0.10.0
libtpu: 0.0.40
codegen_flags: <defaults>
</compile_context>

<pallas_src>
import jax
import jax.numpy as jnp
from jax import lax
from jax.experimental import pallas as pl
from jax.experimental.pallas import tpu as pltpu

H_DIM = 400     # logical hidden width (matches the PyTorch module)
H_PAD = 512     # zero-padded hidden width (multiple of 128)
IN_DIM = 2
IN_PAD = 8      # input features padded to one sublane tile
OUT_DIM = 1


def _cdiv(a, b):
    return (a + b - 1) // b


def _round_up(n, m):
    return ((n + m - 1) // m) * m


# --------------------------------------------------------------------------
# Kernels. Activations are (features, batch_tile): batch on the 128-wide lane
# axis, features on sublanes.
# --------------------------------------------------------------------------

def _disc_kernel_mxu(x_ref, edge_ref, w2_ref, w3_ref, bias_ref, b4_ref, out_ref):
    """v6e/v7x path: layers 1 & 4 on the MXU, bf16 inter-layer elementwise."""
    x = x_ref[...].astype(jnp.bfloat16)                  # (8, T)
    w1t = edge_ref[0:8, :]                               # (8, H_PAD) bf16 (rows 0-1 real)
    w4t = edge_ref[8:16, :]                              # (8, H_PAD) bf16 (row 0 real)
    b1 = bias_ref[:, 0:1]                                # (H_PAD, 1) bf16
    b2 = bias_ref[:, 1:2]
    b3 = bias_ref[:, 2:3]

    # Layer 1: transposed-lhs MXU dot, K = 8 (padded from 2).
    h = lax.dot_general(w1t, x, (((0,), (0,)), ((), ())),
                        preferred_element_type=jnp.float32)        # (H_PAD, T) f32
    h = jnp.maximum(h.astype(jnp.bfloat16) + b1, 0)                # bf16

    # Layers 2-3: MXU matmuls, bf16 weights/activations, f32 accumulation.
    h = jnp.dot(w2_ref[...], h, preferred_element_type=jnp.float32)
    h = jnp.maximum(h.astype(jnp.bfloat16) + b2, 0)
    h = jnp.dot(w3_ref[...], h, preferred_element_type=jnp.float32)
    h = jnp.maximum(h.astype(jnp.bfloat16) + b3, 0)

    # Layer 4: (8, H_PAD) x (H_PAD, T) MXU pass; row 0 is the real output.
    l4 = jnp.dot(w4t, h, preferred_element_type=jnp.float32)       # (8, T) f32
    logit = l4[0:1, :] + b4_ref[0, 0]
    out_ref[...] = jax.nn.sigmoid(logit)                           # (1, T) lane-dense


def _disc_kernel_vpu(x_ref, pk_ref, w2_ref, w3_ref, b4_ref, out_ref):
    """v5e path: MXU binds, so edge layers stay on the VPU, f32 elementwise."""
    x = x_ref[...]                                       # (8, T) f32, rows 0-1 real
    w1a = pk_ref[:, 0:1]                                 # (H_PAD, 1) f32
    w1b = pk_ref[:, 1:2]
    b1 = pk_ref[:, 2:3]
    b2 = pk_ref[:, 3:4]
    b3 = pk_ref[:, 4:5]
    w4 = pk_ref[:, 5:6]

    # Layer 1 (K=2): two broadcast FMAs on the VPU.
    h = w1a * x[0:1, :] + w1b * x[1:2, :] + b1
    h = jnp.maximum(h, 0.0)

    # Layers 2-3: MXU, bf16 weights, f32 accumulation + f32 elementwise.
    h = jnp.dot(w2_ref[...], h.astype(w2_ref.dtype),
                preferred_element_type=jnp.float32) + b2
    h = jnp.maximum(h, 0.0)
    h = jnp.dot(w3_ref[...], h.astype(w3_ref.dtype),
                preferred_element_type=jnp.float32) + b3
    h = jnp.maximum(h, 0.0)

    # Layer 4 (N=1): VPU multiply + XLU sublane reduction.
    logit = jnp.sum(h * w4, axis=0, keepdims=True) + b4_ref[0, 0]
    out_ref[...] = jax.nn.sigmoid(logit)


# --------------------------------------------------------------------------
# Parameter init / layout preparation.
# --------------------------------------------------------------------------

def init_params(key):
    """PyTorch nn.Linear-style init/layout: w is [out, in], b is [out],
    uniform(-1/sqrt(fan_in), 1/sqrt(fan_in))."""
    dims = [(H_DIM, IN_DIM), (H_DIM, H_DIM), (H_DIM, H_DIM), (OUT_DIM, H_DIM)]
    params = []
    for (fan_out, fan_in) in dims:
        key, kw, kb = jax.random.split(key, 3)
        bound = 1.0 / (fan_in ** 0.5)
        w = jax.random.uniform(kw, (fan_out, fan_in), jnp.float32, -bound, bound)
        b = jax.random.uniform(kb, (fan_out,), jnp.float32, -bound, bound)
        params.append((w, b))
    return params


def prepare_params(params, *, mxu_edges=True, weight_dtype=jnp.bfloat16):
    """Zero-pad 400 -> 512 and lay parameters out for the chosen kernel path."""
    (w1, b1), (w2, b2), (w3, b3), (w4, b4) = params
    ph = H_PAD - H_DIM

    w2p = jnp.pad(w2, ((0, ph), (0, ph))).astype(weight_dtype)      # (H_PAD, H_PAD)
    w3p = jnp.pad(w3, ((0, ph), (0, ph))).astype(weight_dtype)
    b4p = b4.reshape(1, 1).astype(jnp.float32)                      # SMEM scalar

    if mxu_edges:
        # edge_w rows 0-7: w1^T padded (2 -> 8 contraction rows);
        # rows 8-15: w4 padded (1 -> 8 output rows, row 8 is the real one).
        w1t = jnp.pad(w1.T, ((0, IN_PAD - IN_DIM), (0, ph)))        # (8, H_PAD)
        w4t = jnp.pad(w4, ((0, IN_PAD - OUT_DIM), (0, ph)))         # (8, H_PAD)
        edge_w = jnp.concatenate([w1t, w4t], axis=0).astype(weight_dtype)  # (16, H_PAD)
        # Biases packed into one (H_PAD, 8) bf16 slab (cols 0-2 used).
        bias3 = jnp.zeros((H_PAD, 8), jnp.float32)
        bias3 = bias3.at[:H_DIM, 0].set(b1)
        bias3 = bias3.at[:H_DIM, 1].set(b2)
        bias3 = bias3.at[:H_DIM, 2].set(b3)
        bias3 = bias3.astype(weight_dtype)
        return ("mxu", (edge_w, w2p, w3p, bias3, b4p))

    # VPU-edge path: pack w1 columns, biases and w4 into one (H_PAD, 8) f32 slab.
    pk = jnp.zeros((H_PAD, 8), jnp.float32)
    pk = pk.at[:H_DIM, 0].set(w1[:, 0])
    pk = pk.at[:H_DIM, 1].set(w1[:, 1])
    pk = pk.at[:H_DIM, 2].set(b1)
    pk = pk.at[:H_DIM, 3].set(b2)
    pk = pk.at[:H_DIM, 4].set(b3)
    pk = pk.at[:H_DIM, 5].set(w4[0, :])
    return ("vpu", (pk, w2p, w3p, b4p))


# --------------------------------------------------------------------------
# Forward pass wrapper.
# --------------------------------------------------------------------------

def _pick_tile(B, two_steps, max_tile):
    if two_steps and B > 256:
        tile = _round_up(max(_cdiv(B, 2), 1), 256)   # 2 equal tiles for 2 TCs
    else:
        tile = _round_up(B, 128)                     # whole batch in one step
    tile = max(128, min(_round_up(tile, 128), max_tile))
    num_tiles = _cdiv(B, tile)
    return tile, num_tiles


def discriminator_forward(x, prepared, *, max_tile=2048):
    """x: [B, 2] float32. Returns [B] float32 (same as PyTorch .view(-1))."""
    mode, arrs = prepared
    B = x.shape[0]

    kind = jax.devices()[0].device_kind.lower()
    two_steps = ("v7" in kind)                       # only v7x has 2 TensorCores
    tile, num_tiles = _pick_tile(B, two_steps, max_tile)
    b_pad = tile * num_tiles

    # Batch on lanes; input features padded to one full sublane tile (8).
    x8 = jnp.zeros((IN_PAD, b_pad), x.dtype).at[:IN_DIM, :B].set(x.T)

    def full_spec(a):
        return pl.BlockSpec(a.shape, lambda i: (0, 0))

    x_spec = pl.BlockSpec((IN_PAD, tile), lambda i: (0, i))
    out_spec = pl.BlockSpec((1, tile), lambda i: (0, i))      # lane-dense row block
    smem_spec = pl.BlockSpec(memory_space=pltpu.MemorySpace.SMEM)

    if mode == "mxu":
        edge_w, w2p, w3p, bias3, b4p = arrs
        kernel = _disc_kernel_mxu
        ins = (x8, edge_w, w2p, w3p, bias3, b4p)
        in_specs = [x_spec, full_spec(edge_w), full_spec(w2p), full_spec(w3p),
                    full_spec(bias3), smem_spec]
    else:
        pk, w2p, w3p, b4p = arrs
        kernel = _disc_kernel_vpu
        ins = (x8, pk, w2p, w3p, b4p)
        in_specs = [x_spec, full_spec(pk), full_spec(w2p), full_spec(w3p), smem_spec]

    flops = 2 * b_pad * (IN_PAD * H_PAD + 2 * H_PAD * H_PAD + IN_PAD * H_PAD)
    bytes_accessed = int(sum(int(a.size) * a.dtype.itemsize for a in ins) + b_pad * 4)
    cost = pl.CostEstimate(flops=flops, transcendentals=2 * b_pad,
                           bytes_accessed=bytes_accessed)

    # Explicit scoped-VMEM limit sized from live buffers (+headroom), so large
    # tiles never hit the default limit; 32..48 MiB fits every generation.
    vmem_need = (
        4 * H_PAD * tile * 4                 # live f32/bf16 activation buffers
        + 2 * 2 * H_PAD * H_PAD * 2          # double-buffered bf16 w2, w3
        + 4 * (16 * H_PAD * 4 + H_PAD * 128 * 4 + IN_PAD * tile * 4 + tile * 4)
    )
    vmem_limit = int(min(max(2 * vmem_need, 32 << 20), 48 << 20))

    out = pl.pallas_call(
        kernel,
        out_shape=jax.ShapeDtypeStruct((1, b_pad), jnp.float32),
        grid_spec=pltpu.PrefetchScalarGridSpec(
            num_scalar_prefetch=0,
            grid=(num_tiles,),
            in_specs=in_specs,
            out_specs=out_spec,
        ),
        compiler_params=pltpu.CompilerParams(
            dimension_semantics=("parallel",),       # batch tiles -> 2 TCs on v7x
            vmem_limit_bytes=vmem_limit,
        ),
        cost_estimate=cost,
    )(*ins)

    return out[0, :B]


# --------------------------------------------------------------------------
# References.
# --------------------------------------------------------------------------

def reference_forward(x, params):
    """Pure-JAX f32 reference matching the PyTorch module exactly."""
    h = x
    for i, (w, b) in enumerate(params):
        h = h @ w.T + b
        if i < len(params) - 1:
            h = jnp.maximum(h, 0.0)
    return jax.nn.sigmoid(h).reshape(-1)


def matched_reference(x, prepared):
    """Pure-JAX reference mirroring the kernel's exact dtype handling."""
    mode, arrs = prepared
    xt = x.T
    if mode == "mxu":
        edge_w, w2p, w3p, bias3, b4p = arrs
        x8 = jnp.zeros((IN_PAD, x.shape[0]), x.dtype).at[:IN_DIM].set(xt)
        x8 = x8.astype(jnp.bfloat16)
        w1t, w4t = edge_w[0:8], edge_w[8:16]
        h = lax.dot_general(w1t, x8, (((0,), (0,)), ((), ())),
                            preferred_element_type=jnp.float32)
        h = jnp.maximum(h.astype(jnp.bfloat16) + bias3[:, 0:1], 0)
        h = jnp.dot(w2p, h, preferred_element_type=jnp.float32)
        h = jnp.maximum(h.astype(jnp.bfloat16) + bias3[:, 1:2], 0)
        h = jnp.dot(w3p, h, preferred_element_type=jnp.float32)
        h = jnp.maximum(h.astype(jnp.bfloat16) + bias3[:, 2:3], 0)
        logit = jnp.dot(w4t, h, preferred_element_type=jnp.float32)[0:1] + b4p[0, 0]
    else:
        pk, w2p, w3p, b4p = arrs
        h = pk[:, 0:1] * xt[0:1] + pk[:, 1:2] * xt[1:2] + pk[:, 2:3]
        h = jnp.maximum(h, 0.0)
        h = jnp.dot(w2p, h.astype(w2p.dtype), preferred_element_type=jnp.float32) + pk[:, 3:4]
        h = jnp.maximum(h, 0.0)
        h = jnp.dot(w3p, h.astype(w3p.dtype), preferred_element_type=jnp.float32) + pk[:, 4:5]
        h = jnp.maximum(h, 0.0)
        logit = jnp.sum(h * pk[:, 5:6], axis=0, keepdims=True) + b4p[0, 0]
    return jax.nn.sigmoid(logit).reshape(-1)


if __name__ == "__main__":
    key = jax.random.PRNGKey(0)
    kp, kx = jax.random.split(key)

    params = init_params(kp)

    # Per-generation path selection: v5* keeps edge layers on the VPU (MXU is
    # the binding unit there); v6e/v7x offload layers 1/4 to the idle MXU.
    kind = jax.devices()[0].device_kind.lower()
    mxu_edges = "v5" not in kind
    prepared = prepare_params(params, mxu_edges=mxu_edges)

    B = 512
    x = jax.random.normal(kx, (B, IN_DIM), jnp.float32)

    out = jax.block_until_ready(discriminator_forward(x, prepared))
    assert out.shape == (B,)
    assert bool(jnp.all(jnp.isfinite(out)))

    ref_matched = matched_reference(x, prepared)       # same dtype handling
    ref_f32 = reference_forward(x, params)             # exact module semantics
    assert jnp.allclose(out, ref_matched, atol=2e-3, rtol=2e-3), \
        "mismatch vs matched (bf16) reference"
    assert jnp.allclose(out, ref_f32, atol=5e-2), \
        "mismatch vs f32 reference"

    print("KERNEL_OK")
</pallas_src>

<mosaic_0001>
module attributes {stable_mosaic.version = 11 : i64} {
  func.func @_disc_kernel_mxu(%arg0: i32, %arg1: memref<8x512xf32, #tpu.memory_space<vmem>>, %arg2: memref<16x512xbf16, #tpu.memory_space<vmem>>, %arg3: memref<512x512xbf16, #tpu.memory_space<vmem>>, %arg4: memref<512x512xbf16, #tpu.memory_space<vmem>>, %arg5: memref<512x8xbf16, #tpu.memory_space<vmem>>, %arg6: memref<1x1xf32, #tpu.memory_space<smem>>, %arg7: memref<1x512xf32, #tpu.memory_space<vmem>>) attributes {dimension_semantics = [#tpu.dimension_semantics<parallel>], iteration_bounds = array<i64: 1>, scalar_prefetch = 0 : i64, scratch_operands = 0 : i64, tpu.core_type = #tpu.core_type<tc>, window_params = [{transform_indices = @transform_0, window_bounds = array<i64: 8, 512>}, {pipeline_mode = #tpu.pipeline_mode<synchronous>, transform_indices = @transform_1, window_bounds = array<i64: 16, 512>}, {pipeline_mode = #tpu.pipeline_mode<synchronous>, transform_indices = @transform_2, window_bounds = array<i64: 512, 512>}, {pipeline_mode = #tpu.pipeline_mode<synchronous>, transform_indices = @transform_3, window_bounds = array<i64: 512, 512>}, {pipeline_mode = #tpu.pipeline_mode<synchronous>, transform_indices = @transform_4, window_bounds = array<i64: 512, 8>}, {transform_indices = @transform_5, window_bounds = array<i64: 1, 1>}, {transform_indices = @transform_6, window_bounds = array<i64: 1, 512>}]} {
    %c0 = arith.constant 0 : index
    %c0_0 = arith.constant 0 : index
    %0 = vector.load %arg1[%c0, %c0_0] : memref<8x512xf32, #tpu.memory_space<vmem>>, vector<8x512xf32>
    %1 = arith.truncf %0 : vector<8x512xf32> to vector<8x512xbf16>
    %c0_1 = arith.constant 0 : index
    %c0_2 = arith.constant 0 : index
    %2 = vector.load %arg2[%c0_1, %c0_2] : memref<16x512xbf16, #tpu.memory_space<vmem>>, vector<8x512xbf16>
    %c8 = arith.constant 8 : index
    %c0_3 = arith.constant 0 : index
    %3 = vector.load %arg2[%c8, %c0_3] : memref<16x512xbf16, #tpu.memory_space<vmem>>, vector<8x512xbf16>
    %c0_4 = arith.constant 0 : index
    %c0_5 = arith.constant 0 : index
    %4 = vector.load %arg5[%c0_4, %c0_5] : memref<512x8xbf16, #tpu.memory_space<vmem>>, vector<512x1xbf16>
    %c0_6 = arith.constant 0 : index
    %c1 = arith.constant 1 : index
    %5 = vector.load %arg5[%c0_6, %c1] : memref<512x8xbf16, #tpu.memory_space<vmem>>, vector<512x1xbf16>
    %c0_7 = arith.constant 0 : index
    %c2 = arith.constant 2 : index
    %6 = vector.load %arg5[%c0_7, %c2] : memref<512x8xbf16, #tpu.memory_space<vmem>>, vector<512x1xbf16>
    %cst = arith.constant dense<0.000000e+00> : vector<512x512xf32>
    %7 = tpu.matmul %2, %1, %cst {dimension_numbers = #tpu.dot_dimension_numbers<[0], [0], [1], [1], [0, 1, 1, 1], [], []>} : vector<8x512xbf16>, vector<8x512xbf16>, vector<512x512xf32> -> vector<512x512xf32>
    %8 = arith.truncf %7 : vector<512x512xf32> to vector<512x512xbf16>
    %9 = vector.broadcast %4 : vector<512x1xbf16> to vector<512x512xbf16>
    %10 = arith.addf %8, %9 : vector<512x512xbf16>
    %cst_8 = arith.constant 0.000000e+00 : bf16
    %11 = vector.broadcast %cst_8 : bf16 to vector<512x512xbf16>
    %12 = arith.maximumf %10, %11 : vector<512x512xbf16>
    %c0_9 = arith.constant 0 : index
    %c0_10 = arith.constant 0 : index
    %13 = vector.load %arg3[%c0_9, %c0_10] : memref<512x512xbf16, #tpu.memory_space<vmem>>, vector<512x512xbf16>
    %cst_11 = arith.constant dense<0.000000e+00> : vector<512x512xf32>
    %14 = tpu.matmul %13, %12, %cst_11 {dimension_numbers = #tpu.dot_dimension_numbers<[1], [0], [0], [1], [0, 0, 1, 1], [], []>} : vector<512x512xbf16>, vector<512x512xbf16>, vector<512x512xf32> -> vector<512x512xf32>
    %15 = arith.truncf %14 : vector<512x512xf32> to vector<512x512xbf16>
    %16 = vector.broadcast %5 : vector<512x1xbf16> to vector<512x512xbf16>
    %17 = arith.addf %15, %16 : vector<512x512xbf16>
    %cst_12 = arith.constant 0.000000e+00 : bf16
    %18 = vector.broadcast %cst_12 : bf16 to vector<512x512xbf16>
    %19 = arith.maximumf %17, %18 : vector<512x512xbf16>
    %c0_13 = arith.constant 0 : index
    %c0_14 = arith.constant 0 : index
    %20 = vector.load %arg4[%c0_13, %c0_14] : memref<512x512xbf16, #tpu.memory_space<vmem>>, vector<512x512xbf16>
    %cst_15 = arith.constant dense<0.000000e+00> : vector<512x512xf32>
    %21 = tpu.matmul %20, %19, %cst_15 {dimension_numbers = #tpu.dot_dimension_numbers<[1], [0], [0], [1], [0, 0, 1, 1], [], []>} : vector<512x512xbf16>, vector<512x512xbf16>, vector<512x512xf32> -> vector<512x512xf32>
    %22 = arith.truncf %21 : vector<512x512xf32> to vector<512x512xbf16>
    %23 = vector.broadcast %6 : vector<512x1xbf16> to vector<512x512xbf16>
    %24 = arith.addf %22, %23 : vector<512x512xbf16>
    %cst_16 = arith.constant 0.000000e+00 : bf16
    %25 = vector.broadcast %cst_16 : bf16 to vector<512x512xbf16>
    %26 = arith.maximumf %24, %25 : vector<512x512xbf16>
    %cst_17 = arith.constant dense<0.000000e+00> : vector<8x512xf32>
    %27 = tpu.matmul %3, %26, %cst_17 {dimension_numbers = #tpu.dot_dimension_numbers<[1], [0], [0], [1], [0, 0, 1, 1], [], []>} : vector<8x512xbf16>, vector<512x512xbf16>, vector<8x512xf32> -> vector<8x512xf32>
    %28 = vector.extract_strided_slice %27 {offsets = [0, 0], sizes = [1, 512], strides = [1, 1]} : vector<8x512xf32> to vector<1x512xf32>
    %c0_18 = arith.constant 0 : index
    %c0_19 = arith.constant 0 : index
    %29 = memref.load %arg6[%c0_18, %c0_19] : memref<1x1xf32, #tpu.memory_space<smem>>
    %30 = vector.broadcast %29 : f32 to vector<1x512xf32>
    %31 = arith.addf %28, %30 : vector<1x512xf32>
    %32 = arith.negf %31 : vector<1x512xf32>
    %33 = math.exp %32 : vector<1x512xf32>
    %cst_20 = arith.constant 1.000000e+00 : f32
    %34 = vector.broadcast %cst_20 : f32 to vector<1x512xf32>
    %35 = arith.addf %34, %33 : vector<1x512xf32>
    %36 = arith.divf %34, %35 : vector<1x512xf32>
    %c0_21 = arith.constant 0 : index
    %c0_22 = arith.constant 0 : index
    %37 = vector.load %arg7[%c0_21, %c0_22] : memref<1x512xf32, #tpu.memory_space<vmem>>, vector<1x512xf32>
    tpu.vector_store %arg7[%c0_21, %c0_22], %36 {strides = array<i32>} : memref<1x512xf32, #tpu.memory_space<vmem>>, vector<1x512xf32>,
    return
  }
  func.func @transform_0(%arg0: i32) -> (i32, i32) {
    %c0_i32 = arith.constant 0 : i32
    %c0_i32_0 = arith.constant 0 : i32
    return %c0_i32, %arg0 : i32, i32
  }
  func.func @transform_1(%arg0: i32) -> (i32, i32) {
    %c0_i32 = arith.constant 0 : i32
    %c0_i32_0 = arith.constant 0 : i32
    %c0_i32_1 = arith.constant 0 : i32
    return %c0_i32, %c0_i32_0 : i32, i32
  }
  func.func @transform_2(%arg0: i32) -> (i32, i32) {
    %c0_i32 = arith.constant 0 : i32
    %c0_i32_0 = arith.constant 0 : i32
    %c0_i32_1 = arith.constant 0 : i32
    return %c0_i32, %c0_i32_0 : i32, i32
  }
  func.func @transform_3(%arg0: i32) -> (i32, i32) {
    %c0_i32 = arith.constant 0 : i32
    %c0_i32_0 = arith.constant 0 : i32
    %c0_i32_1 = arith.constant 0 : i32
    return %c0_i32, %c0_i32_0 : i32, i32
  }
  func.func @transform_4(%arg0: i32) -> (i32, i32) {
    %c0_i32 = arith.constant 0 : i32
    %c0_i32_0 = arith.constant 0 : i32
    %c0_i32_1 = arith.constant 0 : i32
    return %c0_i32, %c0_i32_0 : i32, i32
  }
  func.func @transform_5(%arg0: i32) -> (i32, i32) {
    %c0_i32 = arith.constant 0 : i32
    %c0_i32_0 = arith.constant 0 : i32
    %c0_i32_1 = arith.constant 0 : i32
    return %c0_i32, %c0_i32_0 : i32, i32
  }
  func.func @transform_6(%arg0: i32) -> (i32, i32) {
    %c0_i32 = arith.constant 0 : i32
    %c0_i32_0 = arith.constant 0 : i32
    return %c0_i32, %arg0 : i32, i32
  }
}

</mosaic_0001>

<bundles_post_ra>
// kernel: tpu_custom_call.1
= control target key start
LH: loop header
LB: loop body
LE: loop exit
PB: predicated region body
PF: predicated region fallthrough
CT: control target
= control target key end

     0   :  { %12 = vsyncpa [#allocation4], 0  ;;  %s13053_s0 = inlined_call_operand.vmem [shape: f32[8,512], index: 0, kind: input, shape index: {}]   ;;  %s13054_s1 = inlined_call_operand.vmem [shape: bf16[16,512], index: 1, kind: input, shape index: {}]   ;;  %s13055_s2 = inlined_call_operand.hbm [shape: bf16[512,512], index: 2, kind: input, shape index: {}]   ;;  %s13056_s3 = inlined_call_operand.hbm [shape: bf16[512,512], index: 3, kind: input, shape index: {}]   ;;  %s13057_s4 = inlined_call_operand.vmem [shape: bf16[512,8], index: 4, kind: input, shape index: {}]   ;;  %s13058_s5 = inlined_call_operand.<no memory space> [shape: f32[1,1], index: 5, kind: input, shape index: {}]   ;;  %s13059_s6 = inlined_call_operand.hbm [shape: f32[1,512], index: 6, kind: output, shape index: {}]  }
   0x1   :  { %13 = vsyncpa [#allocation7], 0 }
   0x2   :  { %14 = vsyncpa [#allocation5], 0  ;;  %s11112_s21 = smov [#allocation3]   ;;  %s11040_s25 = scalar_lea.hbm %s13055_s2, 16384 }
   0x3   :  { %s24_s22 = sshll.u32 %s11112_s21, 4  ;;  %p11041_p0 = scmp.ne.s32.totalorder %s13055_s2, %s11040_s25  ;;  %s25_s22 = int_to_ptr.vmem [resolvable:$true] %s24_s22 }
   0x4   :  { %p11044_p1 = scmp.lt.u32.totalorder %s11040_s25, %s13055_s2 }
   0x6   :  { %p11046_p2 = pnand %p11044_p1, %p11041_p0 }
   0x8   :  { %11049 = shalt.err (!%p11046_p2)
}
   0x9   :  { %s11050_s30 = scalar_lea.vmem %s25_s22, 16384  ;;  %p11055_p4 = scmp.lt.s32.totalorder %s25_s22, %s25_s22 }
   0xa   :  { %p11051_p3 = scmp.ne.s32.totalorder %s25_s22, %s11050_s30  ;;  %p11056_p5 = scmp.lt.s32.totalorder %s11050_s30, %s11050_s30 }
   0xc   :  { %p11057_p6 = por %p11056_p5, %p11055_p4 }
   0xe   :  { %p11058_p7 = pnand %p11057_p6, %p11051_p3 }
  0x10   :  { %11061 = shalt.err (!%p11058_p7)
}
  0x11   :  { %s11113_s7 = smov 256   ;;  %s11114_s8 = smov 16  }
  0x12   :  { %30 = dma.hbm_to_vmem [thread:$0]  %s13055_s2, 16384, %s25_s22, [#allocation4], %s11113_s7, %s11113_s7, %s11114_s8  }
  0x13   :  { %s11115_s11 = smov [#allocation6]   ;;  %s11062_s15 = scalar_lea.hbm %s13056_s3, 16384 }
  0x14   :  { %s36_s12 = sshll.u32 %s11115_s11, 4  ;;  %p11063_p8 = scmp.ne.s32.totalorder %s13056_s3, %s11062_s15  ;;  %s37_s12 = int_to_ptr.vmem [resolvable:$true] %s36_s12 }
  0x15   :  { %p11066_p9 = scmp.lt.u32.totalorder %s11062_s15, %s13056_s3 }
  0x17   :  { %p11068_p10 = pnand %p11066_p9, %p11063_p8 }
  0x19   :  { %11071 = shalt.err (!%p11068_p10)
}
  0x1a   :  { %s11072_s20 = scalar_lea.vmem %s37_s12, 16384  ;;  %p11077_p12 = scmp.lt.s32.totalorder %s37_s12, %s37_s12 }
  0x1b   :  { %p11073_p11 = scmp.ne.s32.totalorder %s37_s12, %s11072_s20  ;;  %p11078_p13 = scmp.lt.s32.totalorder %s11072_s20, %s11072_s20 }
  0x1d   :  { %p11079_p0 = por %p11078_p13, %p11077_p12 }
  0x1f   :  { %p11080_p1 = pnand %p11079_p0, %p11073_p11 }
  0x21   :  { %11083 = shalt.err (!%p11080_p1)
}
  0x22   :  { %42 = dma.hbm_to_vmem [thread:$0]  %s13056_s3, 16384, %s37_s12, [#allocation7], %s11113_s7, %s11113_s7, %s11114_s8  }
  0x23   :  { %11106 = dma.done.wait [#allocation4], 16384  }
  0x24   :  { %11107 = vsyncadd [#allocation4], 4294950912 }
  0x25   :  { %11108 = dma.done.wait [#allocation7], 16384  }
  0x26   :  { %11109 = vsyncadd [#allocation7], 4294950912  ;;  %v13061_v0 = vmov 0   ;;  %v11186_v1 = vld [vmem:[%s13054_s1 + $0x8] sm:$0xff]  ;;  %v62_v2 = vld [vmem:[%s13054_s1] sm:$0xff]  ;;  %vm305_vm0 = vcmask 1043456  }
  0x27   :  { %350 = vmatprep.mubr.bf16.mxu0 %v13061_v0  ;;  %703 = vmatprep.mubr.bf16.mxu1 %v13061_v0  ;;  %v9548_v3 = vcombine.low %v11186_v1, %v11186_v1  ;;  %v9546_v4 = vcombine.low %v62_v2, %v62_v2  ;;  %v55_v5 = vld [vmem:[%s13053_s0 + $0x8] sm:$0xff]  ;;  %v57_v6 = vld [vmem:[%s13053_s0 + $0x18] sm:$0xff]  ;;  %v54_v7 = vld [vmem:[%s13053_s0] sm:$0xff]  ;;  %v9547_v15 = vcombine.high %v62_v2, %v62_v2  ;;  %vm208_vm1 = vcmask 64512  }
  0x28   :  { %v59_v8 = vpack.c.bf16 %v55_v5, %v55_v5  ;;  %v61_v9 = vpack.c.bf16 %v57_v6, %v57_v6  ;;  %v58_v10 = vpack.c.bf16 %v54_v7, %v54_v7  ;;  %v56_v11 = vld [vmem:[%s13053_s0 + $0x10] sm:$0xff]  ;;  %v66_v16 = vld [vmem:[%s13057_s4] sm:$0xf]  ;;  %v68_v17 = vld [vmem:[%s13057_s4 + $0x8] sm:$0xf]  ;;  %v9549_v43 = vcombine.high %v11186_v1, %v11186_v1 }
  0x29   :  { %176 = vxpose.xlu1.c.b16.start.end [1/1] (short) %v9548_v3, 128  ;;  %144 = vxpose.xlu0.c.b16.start.end [1/1] (short) %v9546_v4, 128  ;;  %v60_v12 = vpack.c.bf16 %v56_v11, %v56_v11  ;;  %v69_v18 = vld [vmem:[%s13057_s4 + $0xc] sm:$0xf]  ;;  %v70_v19 = vld [vmem:[%s13057_s4 + $0x10] sm:$0xf]  ;;  %v71_v20 = vld [vmem:[%s13057_s4 + $0x14] sm:$0xf] }
  0x2a   :  { %9550 = vmatprep.subr.msk.bf16.mxu0 %vm305_vm0, %v59_v8  ;;  %9583 = vmatprep.subr.msk.bf16.mxu1 %vm305_vm0, %v61_v9  ;;  %v307_v13 = vsel %vm305_vm0, %v58_v10, 0  ;;  %v72_v21 = vld [vmem:[%s13057_s4 + $0x18] sm:$0xf]  ;;  %v73_v22 = vld [vmem:[%s13057_s4 + $0x1c] sm:$0xf] }
  0x2b   :  { %319 = vmatpush1.bf16.msra.mxu0 %v307_v13  ;;  %v313_v14 = vsel %vm305_vm0, %v60_v12, 0  ;;  %v74_v23 = vld [vmem:[%s13057_s4 + $0x20] sm:$0xf]  ;;  %v75_v24 = vld [vmem:[%s13057_s4 + $0x24] sm:$0xf] }
  0x2c   :  { %672 = vmatpush1.bf16.msra.mxu1 %v313_v14  ;;  %v67_v25 = vld [vmem:[%s13057_s4 + $0x4] sm:$0xf]  ;;  %v76_v26 = vld [vmem:[%s13057_s4 + $0x28] sm:$0xf]  ;;  %v77_v27 = vld [vmem:[%s13057_s4 + $0x2c] sm:$0xf] }
  0x2d   :  { %10498 = vset.pattern.permute.xlu1 %v13061_v0  ;;  %v78_v28 = vld [vmem:[%s13057_s4 + $0x30] sm:$0xf]  ;;  %v79_v29 = vld [vmem:[%s13057_s4 + $0x34] sm:$0xf]  ;;  %v80_v30 = vld [vmem:[%s13057_s4 + $0x38] sm:$0xf] }
  0x2e   :  { %v81_v31 = vld [vmem:[%s13057_s4 + $0x3c] sm:$0xf]  ;;  %v82_v32 = vld [vmem:[%s13057_s4 + $0x40] sm:$0xf]  ;;  %v83_v33 = vld [vmem:[%s13057_s4 + $0x44] sm:$0xf] }
  0x2f   :  { %v84_v34 = vld [vmem:[%s13057_s4 + $0x48] sm:$0xf]  ;;  %v85_v35 = vld [vmem:[%s13057_s4 + $0x4c] sm:$0xf]  ;;  %v86_v36 = vld [vmem:[%s13057_s4 + $0x50] sm:$0xf] }
  0x30   :  { %v87_v37 = vld [vmem:[%s13057_s4 + $0x54] sm:$0xf]  ;;  %v88_v38 = vld [vmem:[%s13057_s4 + $0x58] sm:$0xf]  ;;  %v89_v39 = vld [vmem:[%s13057_s4 + $0x5c] sm:$0xf] }
  0x31   :  { %v90_v41 = vld [vmem:[%s13057_s4 + $0x60] sm:$0xf]  ;;  %v91_v44 = vld [vmem:[%s13057_s4 + $0x64] sm:$0xf]  ;;  %v92_v45 = vld [vmem:[%s13057_s4 + $0x68] sm:$0xf] }
  0x32   :  { %v94_v47 = vld [vmem:[%s13057_s4 + $0x70] sm:$0xf]  ;;  %v95_v48 = vld [vmem:[%s13057_s4 + $0x74] sm:$0xf]  ;;  %v96_v50 = vld [vmem:[%s13057_s4 + $0x78] sm:$0xf] }
  0x33   :  { %v97_v51 = vld [vmem:[%s13057_s4 + $0x7c] sm:$0xf]  ;;  %v98_v53 = vld [vmem:[%s13057_s4 + $0x80] sm:$0xf]  ;;  %v99_v54 = vld [vmem:[%s13057_s4 + $0x84] sm:$0xf] }
  0x34   :  { %v100_v56 = vld [vmem:[%s13057_s4 + $0x88] sm:$0xf]  ;;  %v93_v57 = vld [vmem:[%s13057_s4 + $0x6c] sm:$0xf]  ;;  %v102_v60 = vld [vmem:[%s13057_s4 + $0x90] sm:$0xf] }
  0x35   :  { %v101_v58 = vld [vmem:[%s13057_s4 + $0x8c] sm:$0xf]  ;;  %v103_v61 = vld [vmem:[%s13057_s4 + $0x94] sm:$0xf]  ;;  %v104_v62 = vld [vmem:[%s13057_s4 + $0x98] sm:$0xf] }
  0x36   :  { %v105_v63 = vld [vmem:[%s13057_s4 + $0x9c] sm:$0xf]  ;;  %v106_v2 = vld [vmem:[%s13057_s4 + $0xa0] sm:$0xf]  ;;  %v107_v3 = vld [vmem:[%s13057_s4 + $0xa4] sm:$0xf] }
  0x37   :  { %v108_v4 = vld [vmem:[%s13057_s4 + $0xa8] sm:$0xf]  ;;  %v109_v5 = vld [vmem:[%s13057_s4 + $0xac] sm:$0xf]  ;;  %v110_v6 = vld [vmem:[%s13057_s4 + $0xb0] sm:$0xf] }
  0x38   :  { %v111_v8 = vld [vmem:[%s13057_s4 + $0xb4] sm:$0xf]  ;;  %v112_v10 = vld [vmem:[%s13057_s4 + $0xb8] sm:$0xf]  ;;  %v113_v11 = vld [vmem:[%s13057_s4 + $0xbc] sm:$0xf] }
  0x39   :  { %v114_v12 = vld [vmem:[%s13057_s4 + $0xc0] sm:$0xf] }
  0x46   :  { %160 = vxpose.xlu0.c.b16.start.end [1/1] (short) %v9547_v15, 128  ;;  %v115_v15 = vld [vmem:[%s13057_s4 + $0xc4] sm:$0xf] }
  0x49   :  { %1154 = vperm.xlu1 %10498, %v66_v16   ;;  %v116_v16 = vld [vmem:[%s13057_s4 + $0xc8] sm:$0xf] }
  0x4d   :  { %1178 = vperm.xlu1 %10498, %v68_v17   ;;  %v117_v17 = vld [vmem:[%s13057_s4 + $0xcc] sm:$0xf] }
  0x4f   :  { %10499 = vset.pattern.permute.xlu0 %v13061_v0 }
  0x51   :  { %1190 = vperm.xlu1 %10498, %v69_v18  }
  0x55   :  { %1202 = vperm.xlu1 %10498, %v70_v19   ;;  %v118_v19 = vld [vmem:[%s13057_s4 + $0xd0] sm:$0xf] }
  0x59   :  { %1214 = vperm.xlu1 %10498, %v71_v20  }
  0x5d   :  { %1226 = vperm.xlu1 %10498, %v72_v21   ;;  %v119_v21 = vld [vmem:[%s13057_s4 + $0xd4] sm:$0xf] }
  0x61   :  { %1238 = vperm.xlu1 %10498, %v73_v22   ;;  %v120_v22 = vld [vmem:[%s13057_s4 + $0xd8] sm:$0xf] }
  0x65   :  { %1250 = vperm.xlu1 %10498, %v74_v23  }
  0x69   :  { %1262 = vperm.xlu1 %10498, %v75_v24   ;;  %v121_v24 = vld [vmem:[%s13057_s4 + $0xdc] sm:$0xf] }
  0x6b   :  { %1166 = vperm.xlu0 %10499, %v67_v25   ;;  %v122_v25 = vld [vmem:[%s13057_s4 + $0xe0] sm:$0xf] }
  0x6d   :  { %1274 = vperm.xlu1 %10498, %v76_v26  }
  0x6f   :  { %1286 = vperm.xlu0 %10499, %v77_v27   ;;  %v123_v27 = vld [vmem:[%s13057_s4 + $0xe4] sm:$0xf] }
  0x71   :  { %1298 = vperm.xlu1 %10498, %v78_v28  }
  0x73   :  { %1310 = vperm.xlu0 %10499, %v79_v29   ;;  %v124_v29 = vld [vmem:[%s13057_s4 + $0xe8] sm:$0xf] }
  0x75   :  { %1322 = vperm.xlu1 %10498, %v80_v30   ;;  %v125_v30 = vld [vmem:[%s13057_s4 + $0xec] sm:$0xf] }
  0x77   :  { %1334 = vperm.xlu0 %10499, %v81_v31   ;;  %v126_v31 = vld [vmem:[%s13057_s4 + $0xf0] sm:$0xf] }
  0x79   :  { %1346 = vperm.xlu1 %10498, %v82_v32  }
  0x7b   :  { %1358 = vperm.xlu0 %10499, %v83_v33  }
  0x7f   :  { %1370 = vperm.xlu0 %10499, %v84_v34   ;;  %v127_v34 = vld [vmem:[%s13057_s4 + $0xf4] sm:$0xf] }
  0x83   :  { %1382 = vperm.xlu0 %10499, %v85_v35   ;;  %v128_v35 = vld [vmem:[%s13057_s4 + $0xf8] sm:$0xf] }
  0x87   :  { %1394 = vperm.xlu0 %10499, %v86_v36   ;;  %v129_v36 = vld [vmem:[%s13057_s4 + $0xfc] sm:$0xf] }
  0x8b   :  { %1406 = vperm.xlu0 %10499, %v87_v37  }
  0x8f   :  { %1418 = vperm.xlu0 %10499, %v88_v38   ;;  %v152_v40 = vpop.trf.xlu0  ;;  %v11380_v9 = vpop.trf.xlu1 }
  0x90   :  { %9551 = vmatmul.mubr.msk.bf16.vlgmr.msra.gmra.mrb[0].mxu0 %vm208_vm1, %v152_v40  ;;  %9584 = vmatmul.mubr.msk.bf16.vlgmr.msra.gmra.mrb[0].mxu1 %vm208_vm1, %v152_v40 }
  0x91   :  { %360 = vmatprep.mubr.bf16.mxu0 %v13061_v0  ;;  %713 = vmatprep.mubr.bf16.mxu1 %v13061_v0 }
  0x93   :  { %1430 = vperm.xlu0 %10499, %v89_v39   ;;  %v153_v42 = vpop.trf.xlu0  ;;  %v11394_v13 = vpop.trf.xlu1 }
  0x97   :  { %1442 = vperm.xlu0 %10499, %v90_v41   ;;  %v154_v46 = vpop.trf.xlu0  ;;  %v11409_v18 = vpop.trf.xlu1 }
  0x98   :  { %9552 = vmatmul.mubr.msk.bf16.gmra.mrb[4].mxu0 %vm208_vm1, %v153_v42  ;;  %9585 = vmatmul.mubr.msk.bf16.gmra.mrb[4].mxu1 %vm208_vm1, %v153_v42 }
  0x99   :  { %370 = vmatprep.mubr.bf16.mxu0 %v13061_v0  ;;  %723 = vmatprep.mubr.bf16.mxu1 %v13061_v0 }
  0x9b   :  { %1454 = vperm.xlu0 %10499, %v91_v44   ;;  %v155_v49 = vpop.trf.xlu0  ;;  %v11424_v23 = vpop.trf.xlu1 }
  0x9c   :  { %192 = vxpose.xlu1.c.b16.start.end [1/1] (short) %v9549_v43, 128 }
  0x9f   :  { %1466 = vperm.xlu0 %10499, %v92_v45   ;;  %v156_v52 = vpop.trf.xlu0  ;;  %v11436_v28 = vpop.trf.xlu1 }
  0xa0   :  { %9553 = vmatmul.mubr.msk.bf16.gmra.mrb[8].mxu0 %vm208_vm1, %v154_v46  ;;  %9586 = vmatmul.mubr.msk.bf16.gmra.mrb[8].mxu1 %vm208_vm1, %v154_v46 }
  0xa1   :  { %380 = vmatprep.mubr.bf16.mxu0 %v13061_v0  ;;  %733 = vmatprep.mubr.bf16.mxu1 %v13061_v0 }
  0xa3   :  { %1490 = vperm.xlu0 %10499, %v94_v47   ;;  %v157_v55 = vpop.trf.xlu0  ;;  %v189_v33 = vpop.trf.xlu1 }
  0xa7   :  { %1502 = vperm.xlu0 %10499, %v95_v48   ;;  %v158_v59 = vpop.trf.xlu0  ;;  %v190_v37 = vpop.trf.xlu1 }
  0xa8   :  { %9554 = vmatmul.mubr.msk.bf16.gmra.mrb[12].mxu0 %vm208_vm1, %v155_v49  ;;  %9587 = vmatmul.mubr.msk.bf16.gmra.mrb[12].mxu1 %vm208_vm1, %v155_v49 }
  0xa9   :  { %390 = vmatprep.mubr.bf16.mxu0 %v13061_v0  ;;  %743 = vmatprep.mubr.bf16.mxu1 %v13061_v0 }
  0xab   :  { %1514 = vperm.xlu0 %10499, %v96_v50   ;;  %v159_v1 = vpop.trf.xlu0  ;;  %v191_v39 = vpop.trf.xlu1 }
  0xaf   :  { %1526 = vperm.xlu0 %10499, %v97_v51   ;;  %v168_v7 = vpop.trf.xlu0 }
  0xb0   :  { %9555 = vmatmul.mubr.msk.bf16.gmra.mrb[16].mxu0 %vm208_vm1, %v156_v52  ;;  %9588 = vmatmul.mubr.msk.bf16.gmra.mrb[16].mxu1 %vm208_vm1, %v156_v52 }
  0xb1   :  { %400 = vmatprep.mubr.bf16.mxu0 %v13061_v0  ;;  %753 = vmatprep.mubr.bf16.mxu1 %v13061_v0 }
  0xb3   :  { %1538 = vperm.xlu0 %10499, %v98_v53   ;;  %v169_v14 = vpop.trf.xlu0 }
  0xb7   :  { %1550 = vperm.xlu0 %10499, %v99_v54   ;;  %v170_v20 = vpop.trf.xlu0 }
  0xb8   :  { %9556 = vmatmul.mubr.msk.bf16.gmra.mrb[20].mxu0 %vm208_vm1, %v157_v55  ;;  %9589 = vmatmul.mubr.msk.bf16.gmra.mrb[20].mxu1 %vm208_vm1, %v157_v55 }
  0xb9   :  { %410 = vmatprep.mubr.bf16.mxu0 %v13061_v0  ;;  %763 = vmatprep.mubr.bf16.mxu1 %v13061_v0 }
  0xbb   :  { %1562 = vperm.xlu0 %10499, %v100_v56   ;;  %v171_v26 = vpop.trf.xlu0 }
  0xbc   :  { %1478 = vperm.xlu1 %10498, %v93_v57  }
  0xbf   :  { %1574 = vperm.xlu0 %10499, %v101_v58   ;;  %v172_v32 = vpop.trf.xlu0  ;;  %v11117_v58 = vmov 839922192  }
  0xc0   :  { %1586 = vperm.xlu1 %10498, %v102_v60   ;;  %9557 = vmatmul.mubr.msk.bf16.gmra.mrb[24].mxu0 %vm208_vm1, %v158_v59  ;;  %v13060_v60 = vlaneseq }
  0xc1   :  { %9590 = vmatmul.mubr.msk.bf16.gmra.mrb[24].mxu1 %vm208_vm1, %v158_v59  ;;  %420 = vmatprep.mubr.bf16.mxu0 %v13061_v0  ;;  %v1158_v59 = vunpack.c.l.s4 %v11117_v58 }
  0xc2   :  { %773 = vmatprep.mubr.bf16.mxu1 %v13061_v0 }
  0xc3   :  { %1598 = vperm.xlu0 %10499, %v103_v61   ;;  %v173_v38 = vpop.trf.xlu0 }
  0xc4   :  { %1610 = vperm.xlu1 %10498, %v104_v62  }
  0xc7   :  { %1622 = vperm.xlu0 %10499, %v105_v63   ;;  %v174_v40 = vpop.trf.xlu0  ;;  %v1159_v63 = vunpack.c.0.s8 %v1158_v59 }
  0xc8   :  { %1634 = vperm.xlu1 %10498, %v106_v2   ;;  %9558 = vmatmul.mubr.msk.bf16.gmra.mrb[28].mxu0 %vm208_vm1, %v159_v1  ;;  %v11468_v41 = vpop.permute.xlu1 %1154 }
  0xc9   :  { %9591 = vmatmul.mubr.msk.bf16.gmra.mrb[28].mxu1 %vm208_vm1, %v159_v1  ;;  %430 = vmatprep.mubr.bf16.mxu0 %v13061_v0  ;;  %v11556_v1 = vshrl.u32 %v13060_v60, 7 }
  0xca   :  { %783 = vmatprep.mubr.bf16.mxu1 %v13061_v0 }
  0xcb   :  { %1646 = vperm.xlu0 %10499, %v107_v3   ;;  %v175_v42 = vpop.trf.xlu0  ;;  %13071 = vst [vmem:[#allocation12_spill] sm:$0xff] %v11556_v1  ;;  %v11561_v3 = vsub.s32 %v1159_v63, %v11556_v1 }
  0xcc   :  { %1658 = vperm.xlu1 %10498, %v108_v4   ;;  %v11473_v43 = vpop.permute.xlu1 %1178 }
  0xcf   :  { %1670 = vperm.xlu0 %10499, %v109_v5   ;;  %v1163_v5 = vrot.slane %v11468_v41, %v11561_v3 }
  0xd0   :  { %1682 = vperm.xlu1 %10498, %v110_v6   ;;  %9559 = vmatmul.mubr.msk.bf16.gmra.mrb[32].mxu0 %vm208_vm1, %v168_v7  ;;  %v11479_v44 = vpop.permute.xlu1 %1190 }
  0xd1   :  { %9592 = vmatmul.mubr.msk.bf16.gmra.mrb[32].mxu1 %vm208_vm1, %v168_v7  ;;  %440 = vmatprep.mubr.bf16.mxu0 %v13061_v0 }
  0xd2   :  { %793 = vmatprep.mubr.bf16.mxu1 %v13061_v0 }
  0xd3   :  { %1694 = vperm.xlu0 %10499, %v111_v8  }
  0xd4   :  { %1706 = vperm.xlu1 %10498, %v112_v10   ;;  %v11487_v45 = vpop.permute.xlu1 %1202 }
  0xd7   :  { %1718 = vperm.xlu0 %10499, %v113_v11  }
  0xd8   :  { %1730 = vperm.xlu1 %10498, %v114_v12   ;;  %9560 = vmatmul.mubr.msk.bf16.gmra.mrb[36].mxu0 %vm208_vm1, %v169_v14  ;;  %v11491_v46 = vpop.permute.xlu1 %1214 }
  0xd9   :  { %9593 = vmatmul.mubr.msk.bf16.gmra.mrb[36].mxu1 %vm208_vm1, %v169_v14  ;;  %450 = vmatprep.mubr.bf16.mxu0 %v13061_v0 }
  0xda   :  { %803 = vmatprep.mubr.bf16.mxu1 %v13061_v0 }
  0xdb   :  { %1742 = vperm.xlu0 %10499, %v115_v15  }
  0xdc   :  { %1754 = vperm.xlu1 %10498, %v116_v16   ;;  %v11497_v47 = vpop.permute.xlu1 %1226 }
  0xdf   :  { %1766 = vperm.xlu0 %10499, %v117_v17  }
  0xe0   :  { %1778 = vperm.xlu1 %10498, %v118_v19   ;;  %9561 = vmatmul.mubr.msk.bf16.gmra.mrb[40].mxu0 %vm208_vm1, %v170_v20  ;;  %v11505_v48 = vpop.permute.xlu1 %1238 }
  0xe1   :  { %9594 = vmatmul.mubr.msk.bf16.gmra.mrb[40].mxu1 %vm208_vm1, %v170_v20  ;;  %460 = vmatprep.mubr.bf16.mxu0 %v13061_v0 }
  0xe2   :  { %813 = vmatprep.mubr.bf16.mxu1 %v13061_v0 }
  0xe3   :  { %1790 = vperm.xlu0 %10499, %v119_v21  }
  0xe4   :  { %1802 = vperm.xlu1 %10498, %v120_v22   ;;  %v11513_v49 = vpop.permute.xlu1 %1250 }
  0xe7   :  { %1814 = vperm.xlu0 %10499, %v121_v24  }
  0xe8   :  { %1826 = vperm.xlu1 %10498, %v122_v25   ;;  %9562 = vmatmul.mubr.msk.bf16.gmra.mrb[44].mxu0 %vm208_vm1, %v171_v26  ;;  %v11517_v50 = vpop.permute.xlu1 %1262 }
  0xe9   :  { %9595 = vmatmul.mubr.msk.bf16.gmra.mrb[44].mxu1 %vm208_vm1, %v171_v26  ;;  %470 = vmatprep.mubr.bf16.mxu0 %v13061_v0  ;;  %v1187_v26 = vrot.slane %v11473_v43, %v11561_v3 }
  0xea   :  { %823 = vmatprep.mubr.bf16.mxu1 %v13061_v0  ;;  %v1167_v55 = vpop.permute.xlu0 %1166 }
  0xeb   :  { %1838 = vperm.xlu0 %10499, %v123_v27   ;;  %v1175_v6 = vrot.slane %v1167_v55, %v11561_v3  ;;  %v1199_v27 = vrot.slane %v11479_v44, %v11561_v3 }
  0xec   :  { %1850 = vperm.xlu1 %10498, %v124_v29   ;;  %v11523_v51 = vpop.permute.xlu1 %1274 }
  0xed   :  { %v9616_v16 = vcombine.low %v1163_v5, %v1175_v6  ;;  %v9617_v41 = vcombine.low %v1187_v26, %v1199_v27  ;;  %v1223_v5 = vrot.slane %v11491_v46, %v11561_v3  ;;  %v1235_v26 = vrot.slane %v11497_v47, %v11561_v3 }
  0xee   :  { %v11544_v57 = vpop.permute.xlu0 %1286  ;;  %v1247_v27 = vrot.slane %v11505_v48, %v11561_v3 }
  0xef   :  { %1862 = vperm.xlu0 %10499, %v125_v30  }
  0xf0   :  { %1874 = vperm.xlu1 %10498, %v126_v31   ;;  %9563 = vmatmul.mubr.msk.bf16.gmra.mrb[48].mxu0 %vm208_vm1, %v172_v32  ;;  %v11529_v52 = vpop.permute.xlu1 %1298 }
  0xf1   :  { %9596 = vmatmul.mubr.msk.bf16.gmra.mrb[48].mxu1 %vm208_vm1, %v172_v32  ;;  %480 = vmatprep.mubr.bf16.mxu0 %v13061_v0 }
  0xf2   :  { %833 = vmatprep.mubr.bf16.mxu1 %v13061_v0  ;;  %v11549_v61 = vpop.permute.xlu0 %1310 }
  0xf3   :  { %1886 = vperm.xlu0 %10499, %v127_v34  }
  0xf4   :  { %1898 = vperm.xlu1 %10498, %v128_v35   ;;  %v11535_v53 = vpop.permute.xlu1 %1322 }
  0xf6   :  { %v11558_v2 = vpop.permute.xlu0 %1334 }
  0xf7   :  { %1910 = vperm.xlu0 %10499, %v129_v36  }
  0xf8   :  { %9564 = vmatmul.mubr.msk.bf16.gmra.mrb[52].mxu0 %vm208_vm1, %v173_v38  ;;  %v11538_v54 = vpop.permute.xlu1 %1346 }
  0xf9   :  { %9597 = vmatmul.mubr.msk.bf16.gmra.mrb[52].mxu1 %vm208_vm1, %v173_v38  ;;  %490 = vmatprep.mubr.bf16.mxu0 %v13061_v0 }
  0xfa   :  { %843 = vmatprep.mubr.bf16.mxu1 %v13061_v0  ;;  %v11570_v7 = vpop.permute.xlu0 %1358 }
  0xfe   :  { %v11580_v30 = vpop.permute.xlu0 %1370 }
 0x100   :  { %9565 = vmatmul.mubr.msk.bf16.gmra.mrb[56].mxu0 %vm208_vm1, %v174_v40 }
 0x101   :  { %9598 = vmatmul.mubr.msk.bf16.gmra.mrb[56].mxu1 %vm208_vm1, %v174_v40  ;;  %500 = vmatprep.mubr.bf16.mxu0 %v13061_v0 }
 0x102   :  { %853 = vmatprep.mubr.bf16.mxu1 %v13061_v0  ;;  %v200_v56 = vpop.trf.xlu1 }
 0x106   :  { %v201_v62 = vpop.trf.xlu1 }
 0x108   :  { %9566 = vmatmul.mubr.msk.bf16.gmra.mrb[60].mxu0 %vm208_vm1, %v175_v42 }
 0x109   :  { %9599 = vmatmul.mubr.msk.bf16.gmra.mrb[60].mxu1 %vm208_vm1, %v175_v42  ;;  %510 = vmatprep.mubr.bf16.mxu0 %v13061_v0 }
 0x10a   :  { %863 = vmatprep.mubr.bf16.mxu1 %v13061_v0  ;;  %v202_v4 = vpop.trf.xlu1 }
 0x110   :  { %9567 = vmatmul.mubr.msk.bf16.gmra.mrb[64].mxu0 %vm208_vm1, %v11380_v9 }
 0x111   :  { %9600 = vmatmul.mubr.msk.bf16.gmra.mrb[64].mxu1 %vm208_vm1, %v11380_v9  ;;  %520 = vmatprep.mubr.bf16.mxu0 %v13061_v0 }
 0x112   :  { %873 = vmatprep.mubr.bf16.mxu1 %v13061_v0 }
 0x118   :  { %9568 = vmatmul.mubr.msk.bf16.gmra.mrb[68].mxu0 %vm208_vm1, %v11394_v13 }
 0x119   :  { %9601 = vmatmul.mubr.msk.bf16.gmra.mrb[68].mxu1 %vm208_vm1, %v11394_v13  ;;  %530 = vmatprep.mubr.bf16.mxu0 %v13061_v0  ;;  %v203_v13 = vpop.trf.xlu1 }
 0x11a   :  { %883 = vmatprep.mubr.bf16.mxu1 %v13061_v0 }
 0x11d   :  { %v204_v38 = vpop.trf.xlu1 }
 0x120   :  { %9569 = vmatmul.mubr.msk.bf16.gmra.mrb[72].mxu0 %vm208_vm1, %v11409_v18 }
 0x121   :  { %9602 = vmatmul.mubr.msk.bf16.gmra.mrb[72].mxu1 %vm208_vm1, %v11409_v18  ;;  %540 = vmatprep.mubr.bf16.mxu0 %v13061_v0 }
 0x122   :  { %893 = vmatprep.mubr.bf16.mxu1 %v13061_v0 }
 0x128   :  { %9570 = vmatmul.mubr.msk.bf16.gmra.mrb[76].mxu0 %vm208_vm1, %v11424_v23 }
 0x129   :  { %9603 = vmatmul.mubr.msk.bf16.gmra.mrb[76].mxu1 %vm208_vm1, %v11424_v23  ;;  %550 = vmatprep.mubr.bf16.mxu0 %v13061_v0 }
 0x12a   :  { %903 = vmatprep.mubr.bf16.mxu1 %v13061_v0 }
 0x130   :  { %9571 = vmatmul.mubr.msk.bf16.gmra.mrb[80].mxu0 %vm208_vm1, %v11436_v28 }
 0x131   :  { %9604 = vmatmul.mubr.msk.bf16.gmra.mrb[80].mxu1 %vm208_vm1, %v11436_v28  ;;  %560 = vmatprep.mubr.bf16.mxu0 %v13061_v0 }
 0x132   :  { %913 = vmatprep.mubr.bf16.mxu1 %v13061_v0 }
 0x138   :  { %9572 = vmatmul.mubr.msk.bf16.gmra.mrb[84].mxu0 %vm208_vm1, %v189_v33 }
 0x139   :  { %9605 = vmatmul.mubr.msk.bf16.gmra.mrb[84].mxu1 %vm208_vm1, %v189_v33  ;;  %570 = vmatprep.mubr.bf16.mxu0 %v13061_v0 }
 0x13a   :  { %923 = vmatprep.mubr.bf16.mxu1 %v13061_v0 }
 0x140   :  { %9573 = vmatmul.mubr.msk.bf16.gmra.mrb[88].mxu0 %vm208_vm1, %v190_v37 }
 0x141   :  { %9606 = vmatmul.mubr.msk.bf16.gmra.mrb[88].mxu1 %vm208_vm1, %v190_v37  ;;  %580 = vmatprep.mubr.bf16.mxu0 %v13061_v0 }
 0x142   :  { %933 = vmatprep.mubr.bf16.mxu1 %v13061_v0 }
 0x148   :  { %9574 = vmatmul.mubr.msk.bf16.gmra.mrb[92].mxu0 %vm208_vm1, %v191_v39 }
 0x149   :  { %9607 = vmatmul.mubr.msk.bf16.gmra.mrb[92].mxu1 %vm208_vm1, %v191_v39  ;;  %590 = vmatprep.mubr.bf16.mxu0 %v13061_v0 }
 0x14a   :  { %943 = vmatprep.mubr.bf16.mxu1 %v13061_v0 }
 0x150   :  { %9575 = vmatmul.mubr.msk.bf16.gmra.mrb[96].mxu0 %vm208_vm1, %v200_v56 }
 0x151   :  { %9608 = vmatmul.mubr.msk.bf16.gmra.mrb[96].mxu1 %vm208_vm1, %v200_v56  ;;  %600 = vmatprep.mubr.bf16.mxu0 %v13061_v0 }
 0x152   :  { %953 = vmatprep.mubr.bf16.mxu1 %v13061_v0 }
 0x158   :  { %9576 = vmatmul.mubr.msk.bf16.gmra.mrb[100].mxu0 %vm208_vm1, %v201_v62 }
 0x159   :  { %9609 = vmatmul.mubr.msk.bf16.gmra.mrb[100].mxu1 %vm208_vm1, %v201_v62  ;;  %610 = vmatprep.mubr.bf16.mxu0 %v13061_v0 }
 0x15a   :  { %963 = vmatprep.mubr.bf16.mxu1 %v13061_v0 }
 0x160   :  { %9577 = vmatmul.mubr.msk.bf16.gmra.mrb[104].mxu0 %vm208_vm1, %v202_v4 }
 0x161   :  { %9610 = vmatmul.mubr.msk.bf16.gmra.mrb[104].mxu1 %vm208_vm1, %v202_v4  ;;  %620 = vmatprep.mubr.bf16.mxu0 %v13061_v0  ;;  %v1211_v4 = vrot.slane %v11487_v45, %v11561_v3 }
 0x162   :  { %973 = vmatprep.mubr.bf16.mxu1 %v13061_v0 }
 0x163   :  { %v352_v8 = vpop.f32.mrb[0].mxu0  ;;  %v705_v9 = vpop.f32.mrb[0].mxu1  ;;  %v9618_v46 = vcombine.low %v1211_v4, %v1223_v5  ;;  %v1259_v5 = vrot.slane %v11513_v49, %v11561_v3 }
 0x164   :  { %v354_v10 = vpop.f32.mrb[1].mxu0  ;;  %v707_v11 = vpop.f32.mrb[1].mxu1 }
 0x165   :  { %v356_v12 = vpop.f32.mrb[2].mxu0  ;;  %v709_v15 = vpop.f32.mrb[2].mxu1 }
 0x166   :  { %v1024_v14 = vpack.c.bf16 %v356_v12, %v352_v8  ;;  %v1026_v17 = vpack.c.bf16 %v709_v15, %v705_v9  ;;  %v358_v18 = vpop.f32.mrb[3].mxu0  ;;  %v711_v19 = vpop.f32.mrb[3].mxu1 }
 0x167   :  { %v1025_v20 = vpack.c.bf16 %v358_v18, %v354_v10  ;;  %v1027_v21 = vpack.c.bf16 %v711_v19, %v707_v11  ;;  %v11594_v9 = vpop.permute.xlu0 %1382 }
 0x168   :  { %9578 = vmatmul.mubr.msk.bf16.gmra.mrb[108].mxu0 %vm208_vm1, %v203_v13  ;;  %v2112_v22 = vadd.bf16 %v9616_v16, %v1024_v14  ;;  %v2114_v23 = vadd.bf16 %v9616_v16, %v1026_v17  ;;  %v205_v17 = vpop.trf.xlu1 }
 0x169   :  { %9611 = vmatmul.mubr.msk.bf16.gmra.mrb[108].mxu1 %vm208_vm1, %v203_v13  ;;  %630 = vmatprep.mubr.bf16.mxu0 %v13061_v0  ;;  %v2113_v24 = vadd.bf16 %v9616_v16, %v1025_v20  ;;  %v2115_v25 = vadd.bf16 %v9616_v16, %v1027_v21 }
 0x16a   :  { %983 = vmatprep.mubr.bf16.mxu1 %v13061_v0  ;;  %v2240_v36 = vmax.bf16 %v13061_v0, %v2112_v22  ;;  %v2242_v37 = vmax.bf16 %v13061_v0, %v2114_v23 }
 0x16b   :  { %v362_v28 = vpop.f32.mrb[4].mxu0  ;;  %v715_v29 = vpop.f32.mrb[4].mxu1  ;;  %v2241_v32 = vmax.bf16 %v13061_v0, %v2113_v24  ;;  %v2243_v33 = vmax.bf16 %v13061_v0, %v2115_v25 }
 0x16c   :  { %v364_v31 = vpop.f32.mrb[5].mxu0  ;;  %v717_v34 = vpop.f32.mrb[5].mxu1 }
 0x16d   :  { %v366_v35 = vpop.f32.mrb[6].mxu0  ;;  %v719_v40 = vpop.f32.mrb[6].mxu1  ;;  %3136 = vmatprep.subr.bf16.mxu0 %v2241_v32  ;;  %3842 = vmatprep.subr.bf16.mxu1 %v2243_v33 }
 0x16e   :  { %v1028_v39 = vpack.c.bf16 %v366_v35, %v362_v28  ;;  %v1030_v42 = vpack.c.bf16 %v719_v40, %v715_v29  ;;  %v368_v43 = vpop.f32.mrb[7].mxu0  ;;  %v721_v44 = vpop.f32.mrb[7].mxu1  ;;  %3137 = vmatpush1.bf16.msra.mxu0 %v2240_v36  ;;  %3843 = vmatpush1.bf16.msra.mxu1 %v2242_v37  ;;  %v9619_v40 = vcombine.low %v1235_v26, %v1247_v27 }
 0x16f   :  { %v1029_v55 = vpack.c.bf16 %v368_v43, %v364_v31  ;;  %v1031_v56 = vpack.c.bf16 %v721_v44, %v717_v34  ;;  %v11607_v28 = vpop.permute.xlu0 %1394 }
 0x170   :  { %9579 = vmatmul.mubr.msk.bf16.gmra.mrb[112].mxu0 %vm208_vm1, %v204_v38  ;;  %v2116_v58 = vadd.bf16 %v9617_v41, %v1028_v39  ;;  %v2118_v59 = vadd.bf16 %v9617_v41, %v1030_v42 }
 0x171   :  { %9612 = vmatmul.mubr.msk.bf16.gmra.mrb[112].mxu1 %vm208_vm1, %v204_v38  ;;  %640 = vmatprep.mubr.bf16.mxu0 %v13061_v0  ;;  %v2117_v62 = vadd.bf16 %v9617_v41, %v1029_v55  ;;  %v2119_v63 = vadd.bf16 %v9617_v41, %v1031_v56  ;;  %v206_v55 = vpop.trf.xlu1 }
 0x172   :  { %993 = vmatprep.mubr.bf16.mxu1 %v13061_v0  ;;  %v2244_v15 = vmax.bf16 %v13061_v0, %v2116_v58  ;;  %v2246_v16 = vmax.bf16 %v13061_v0, %v2118_v59 }
 0x173   :  { %v372_v6 = vpop.f32.mrb[8].mxu0  ;;  %v725_v8 = vpop.f32.mrb[8].mxu1  ;;  %v2245_v11 = vmax.bf16 %v13061_v0, %v2117_v62  ;;  %v2247_v12 = vmax.bf16 %v13061_v0, %v2119_v63 }
 0x174   :  { %v374_v10 = vpop.f32.mrb[9].mxu0  ;;  %v727_v13 = vpop.f32.mrb[9].mxu1 }
 0x175   :  { %v376_v14 = vpop.f32.mrb[10].mxu0  ;;  %v729_v18 = vpop.f32.mrb[10].mxu1  ;;  %3138 = vmatprep.subr.bf16.mxu0 %v2245_v11  ;;  %3844 = vmatprep.subr.bf16.mxu1 %v2247_v12 }
 0x176   :  { %v1032_v45 = vpack.c.bf16 %v376_v14, %v372_v6  ;;  %v1034_v19 = vpack.c.bf16 %v729_v18, %v725_v8  ;;  %v378_v20 = vpop.f32.mrb[11].mxu0  ;;  %v731_v21 = vpop.f32.mrb[11].mxu1  ;;  %3139 = vmatpush1.bf16.msra.mxu0 %v2244_v15  ;;  %3845 = vmatpush1.bf16.msra.mxu1 %v2246_v16  ;;  %v1271_v6 = vrot.slane %v11517_v50, %v11561_v3  ;;  %v10510_v50 = vld [vmem:[#allocation3 + $0x4] ss:$16 sps:$4 sm:$0xff]  }
 0x177   :  { %v1033_v22 = vpack.c.bf16 %v378_v20, %v374_v10  ;;  %v1035_v23 = vpack.c.bf16 %v731_v21, %v727_v13  ;;  %v11621_v8 = vpop.permute.xlu0 %1406 }
 0x178   :  { %9580 = vmatmul.mubr.msk.bf16.gmra.mrb[116].mxu0 %vm208_vm1, %v205_v17  ;;  %v2120_v24 = vadd.bf16 %v9618_v46, %v1032_v45  ;;  %v2122_v25 = vadd.bf16 %v9618_v46, %v1034_v19  ;;  %v9620_v18 = vcombine.low %v1259_v5, %v1271_v6  ;;  %v1307_v5 = vrot.slane %v11529_v52, %v11561_v3 }
 0x179   :  { %9613 = vmatmul.mubr.msk.bf16.gmra.mrb[116].mxu1 %vm208_vm1, %v205_v17  ;;  %650 = vmatprep.mubr.bf16.mxu0 %v13061_v0  ;;  %v2121_v29 = vadd.bf16 %v9618_v46, %v1033_v22  ;;  %v2123_v31 = vadd.bf16 %v9618_v46, %v1035_v23  ;;  %v207_v22 = vpop.trf.xlu1 }
 0x17a   :  { %1003 = vmatprep.mubr.bf16.mxu1 %v13061_v0  ;;  %v2248_v47 = vmax.bf16 %v13061_v0, %v2120_v24  ;;  %v2250_v48 = vmax.bf16 %v13061_v0, %v2122_v25 }
 0x17b   :  { %v382_v32 = vpop.f32.mrb[12].mxu0  ;;  %v735_v33 = vpop.f32.mrb[12].mxu1  ;;  %v2249_v36 = vmax.bf16 %v13061_v0, %v2121_v29  ;;  %v2251_v37 = vmax.bf16 %v13061_v0, %v2123_v31  ;;  %v1295_v31 = vrot.slane %v11544_v57, %v11561_v3 }
 0x17c   :  { %v384_v34 = vpop.f32.mrb[13].mxu0  ;;  %v737_v35 = vpop.f32.mrb[13].mxu1 }
 0x17d   :  { %v386_v38 = vpop.f32.mrb[14].mxu0  ;;  %v739_v39 = vpop.f32.mrb[14].mxu1  ;;  %3140 = vmatprep.subr.bf16.mxu0 %v2249_v36  ;;  %3846 = vmatprep.subr.bf16.mxu1 %v2251_v37 }
 0x17e   :  { %v1036_v41 = vpack.c.bf16 %v386_v38, %v382_v32  ;;  %v1038_v42 = vpack.c.bf16 %v739_v39, %v735_v33  ;;  %v388_v43 = vpop.f32.mrb[15].mxu0  ;;  %v741_v44 = vpop.f32.mrb[15].mxu1  ;;  %3141 = vmatpush1.bf16.msra.mxu0 %v2248_v47  ;;  %3847 = vmatpush1.bf16.msra.mxu1 %v2250_v48  ;;  %v1283_v32 = vrot.slane %v11523_v51, %v11561_v3 }
 0x17f   :  { %v1037_v56 = vpack.c.bf16 %v388_v43, %v384_v34  ;;  %v1039_v58 = vpack.c.bf16 %v741_v44, %v737_v35  ;;  %v11634_v33 = vpop.permute.xlu0 %1418 }
 0x180   :  { %v2124_v59 = vadd.bf16 %v9619_v40, %v1036_v41  ;;  %v2126_v62 = vadd.bf16 %v9619_v40, %v1038_v42  ;;  %9581 = vmatmul.mubr.msk.bf16.gmra.mrb[120].mxu0 %vm208_vm1, %v206_v55  ;;  %v9621_v51 = vcombine.low %v1283_v32, %v1295_v31 }
 0x181   :  { %9614 = vmatmul.mubr.msk.bf16.gmra.mrb[120].mxu1 %vm208_vm1, %v206_v55  ;;  %v2125_v63 = vadd.bf16 %v9619_v40, %v1037_v56  ;;  %v2127_v4 = vadd.bf16 %v9619_v40, %v1039_v58  ;;  %660 = vmatprep.mubr.bf16.mxu0 %v13061_v0 }
 0x182   :  { %1013 = vmatprep.mubr.bf16.mxu1 %v13061_v0  ;;  %v2252_v16 = vmax.bf16 %v13061_v0, %v2124_v59  ;;  %v2254_v17 = vmax.bf16 %v13061_v0, %v2126_v62 }
 0x183   :  { %v392_v10 = vpop.f32.mrb[16].mxu0  ;;  %v745_v11 = vpop.f32.mrb[16].mxu1  ;;  %v2253_v12 = vmax.bf16 %v13061_v0, %v2125_v63  ;;  %v2255_v13 = vmax.bf16 %v13061_v0, %v2127_v4  ;;  %v1319_v4 = vrot.slane %v11549_v61, %v11561_v3 }
 0x184   :  { %v394_v14 = vpop.f32.mrb[17].mxu0  ;;  %v747_v15 = vpop.f32.mrb[17].mxu1 }
 0x185   :  { %v396_v49 = vpop.f32.mrb[18].mxu0  ;;  %v749_v45 = vpop.f32.mrb[18].mxu1  ;;  %3142 = vmatprep.subr.bf16.mxu0 %v2253_v12  ;;  %3848 = vmatprep.subr.bf16.mxu1 %v2255_v13  ;;  %v9622_v61 = vcombine.low %v1307_v5, %v1319_v4 }
 0x186   :  { %v1040_v46 = vpack.c.bf16 %v396_v49, %v392_v10  ;;  %v1042_v19 = vpack.c.bf16 %v749_v45, %v745_v11  ;;  %v398_v20 = vpop.f32.mrb[19].mxu0  ;;  %v751_v21 = vpop.f32.mrb[19].mxu1  ;;  %3143 = vmatpush1.bf16.msra.mxu0 %v2252_v16  ;;  %3849 = vmatpush1.bf16.msra.mxu1 %v2254_v17 }
 0x187   :  { %v1041_v23 = vpack.c.bf16 %v398_v20, %v394_v14  ;;  %v1043_v24 = vpack.c.bf16 %v751_v21, %v747_v15  ;;  %v11644_v6 = vpop.permute.xlu0 %1430 }
 0x188   :  { %v2128_v25 = vadd.bf16 %v9620_v18, %v1040_v46  ;;  %v2130_v26 = vadd.bf16 %v9620_v18, %v1042_v19  ;;  %9582 = vmatmul.mubr.msk.bf16.gmra.mrb[124].mxu0 %vm208_vm1, %v207_v22 }
 0x189   :  { %9615 = vmatmul.mubr.msk.bf16.gmra.mrb[124].mxu1 %vm208_vm1, %v207_v22  ;;  %v2129_v27 = vadd.bf16 %v9620_v18, %v1041_v23  ;;  %v2131_v29 = vadd.bf16 %v9620_v18, %v1043_v24  ;;  %3168 = vmatprep.mubr.bf16.mxu0 %v10510_v50  ;;  %v1343_v24 = vrot.slane %v11558_v2, %v11561_v3 }
 0x18a   :  { %3874 = vmatprep.mubr.bf16.mxu1 %v10510_v50  ;;  %v2256_v47 = vmax.bf16 %v13061_v0, %v2128_v25  ;;  %v2258_v48 = vmax.bf16 %v13061_v0, %v2130_v26  ;;  %v1331_v25 = vrot.slane %v11535_v53, %v11561_v3 }
 0x18b   :  { %v402_v34 = vpop.f32.mrb[20].mxu0  ;;  %v755_v35 = vpop.f32.mrb[20].mxu1  ;;  %v2257_v36 = vmax.bf16 %v13061_v0, %v2129_v27  ;;  %v2259_v37 = vmax.bf16 %v13061_v0, %v2131_v29 }
 0x18c   :  { %v404_v38 = vpop.f32.mrb[21].mxu0  ;;  %v757_v39 = vpop.f32.mrb[21].mxu1 }
 0x18d   :  { %v406_v40 = vpop.f32.mrb[22].mxu0  ;;  %v759_v57 = vpop.f32.mrb[22].mxu1  ;;  %3144 = vmatprep.subr.bf16.mxu0 %v2257_v36  ;;  %3850 = vmatprep.subr.bf16.mxu1 %v2259_v37 }
 0x18e   :  { %v1044_v41 = vpack.c.bf16 %v406_v40, %v402_v34  ;;  %v1046_v42 = vpack.c.bf16 %v759_v57, %v755_v35  ;;  %v408_v43 = vpop.f32.mrb[23].mxu0  ;;  %v761_v44 = vpop.f32.mrb[23].mxu1  ;;  %3145 = vmatpush1.bf16.msra.mxu0 %v2256_v47  ;;  %3851 = vmatpush1.bf16.msra.mxu1 %v2258_v48 }
 0x18f   :  { %v1045_v55 = vpack.c.bf16 %v408_v43, %v404_v38  ;;  %v1047_v56 = vpack.c.bf16 %v761_v44, %v757_v39  ;;  %v11654_v27 = vpop.permute.xlu0 %1442  ;;  %v9623_v39 = vcombine.low %v1331_v25, %v1343_v24 }
 0x190   :  { %v2132_v58 = vadd.bf16 %v9621_v51, %v1044_v41  ;;  %v2134_v59 = vadd.bf16 %v9621_v51, %v1046_v42 }
 0x191   :  { %v2133_v62 = vadd.bf16 %v9621_v51, %v1045_v55  ;;  %v2135_v63 = vadd.bf16 %v9621_v51, %v1047_v56  ;;  %v1367_v55 = vrot.slane %v11570_v7, %v11561_v3  ;;  %v1355_v56 = vrot.slane %v11538_v54, %v11561_v3 }
 0x192   :  { %v2260_v15 = vmax.bf16 %v13061_v0, %v2132_v58  ;;  %v2262_v16 = vmax.bf16 %v13061_v0, %v2134_v59 }
 0x193   :  { %v412_v10 = vpop.f32.mrb[24].mxu0  ;;  %v2261_v11 = vmax.bf16 %v13061_v0, %v2133_v62  ;;  %v2263_v12 = vmax.bf16 %v13061_v0, %v2135_v63  ;;  %v11664_v59 = vpop.permute.xlu0 %1454 }
 0x194   :  { %v765_v13 = vpop.f32.mrb[24].mxu1  ;;  %v414_v14 = vpop.f32.mrb[25].mxu0 }
 0x195   :  { %v767_v17 = vpop.f32.mrb[25].mxu1  ;;  %v416_v49 = vpop.f32.mrb[26].mxu0  ;;  %3146 = vmatprep.subr.bf16.mxu0 %v2261_v11  ;;  %3852 = vmatprep.subr.bf16.mxu1 %v2263_v12 }
 0x196   :  { %v1048_v45 = vpack.c.bf16 %v416_v49, %v412_v10  ;;  %v769_v52 = vpop.f32.mrb[26].mxu1  ;;  %v418_v50 = vpop.f32.mrb[27].mxu0  ;;  %3147 = vmatpush1.bf16.msra.mxu0 %v2260_v15  ;;  %3853 = vmatpush1.bf16.msra.mxu1 %v2262_v16 }
 0x197   :  { %v1050_v18 = vpack.c.bf16 %v769_v52, %v765_v13  ;;  %v1049_v46 = vpack.c.bf16 %v418_v50, %v414_v14  ;;  %v771_v19 = vpop.f32.mrb[27].mxu1  ;;  %v9624_v14 = vcombine.low %v1355_v56, %v1367_v55 }
 0x198   :  { %v2136_v20 = vadd.bf16 %v9622_v61, %v1048_v45  ;;  %v1051_v21 = vpack.c.bf16 %v771_v19, %v767_v17  ;;  %v1391_v19 = vrot.slane %v11594_v9, %v11561_v3 }
 0x199   :  { %v2138_v22 = vadd.bf16 %v9622_v61, %v1050_v18  ;;  %v2137_v23 = vadd.bf16 %v9622_v61, %v1049_v46  ;;  %v1379_v46 = vrot.slane %v11580_v30, %v11561_v3 }
 0x19a   :  { %v2139_v26 = vadd.bf16 %v9622_v61, %v1051_v21  ;;  %v2264_v36 = vmax.bf16 %v13061_v0, %v2136_v20  ;;  %v11674_v21 = vpop.permute.xlu0 %1466 }
 0x19b   :  { %v422_v29 = vpop.f32.mrb[28].mxu0  ;;  %v2265_v31 = vmax.bf16 %v13061_v0, %v2137_v23  ;;  %v2266_v2 = vmax.bf16 %v13061_v0, %v2138_v22 }
 0x19c   :  { %v775_v32 = vpop.f32.mrb[28].mxu1  ;;  %v424_v34 = vpop.f32.mrb[29].mxu0  ;;  %v2267_v35 = vmax.bf16 %v13061_v0, %v2139_v26 }
 0x19d   :  { %v777_v37 = vpop.f32.mrb[29].mxu1  ;;  %v426_v38 = vpop.f32.mrb[30].mxu0  ;;  %3148 = vmatprep.subr.bf16.mxu0 %v2265_v31 }
 0x19e   :  { %v1052_v47 = vpack.c.bf16 %v426_v38, %v422_v29  ;;  %v779_v53 = vpop.f32.mrb[30].mxu1  ;;  %3854 = vmatprep.subr.bf16.mxu1 %v2267_v35  ;;  %v428_v48 = vpop.f32.mrb[31].mxu0  ;;  %3149 = vmatpush1.bf16.msra.mxu0 %v2264_v36 }
 0x19f   :  { %v1054_v40 = vpack.c.bf16 %v779_v53, %v775_v32  ;;  %v1053_v57 = vpack.c.bf16 %v428_v48, %v424_v34  ;;  %v781_v51 = vpop.f32.mrb[31].mxu1  ;;  %3855 = vmatpush1.bf16.msra.mxu1 %v2266_v2  ;;  %v9625_v34 = vcombine.low %v1379_v46, %v1391_v19 }
 0x1a0   :  { %v2140_v41 = vadd.bf16 %v9623_v39, %v1052_v47  ;;  %v1055_v42 = vpack.c.bf16 %v781_v51, %v777_v37 }
 0x1a1   :  { %v2142_v43 = vadd.bf16 %v9623_v39, %v1054_v40  ;;  %v2141_v44 = vadd.bf16 %v9623_v39, %v1053_v57  ;;  %v1403_v40 = vrot.slane %v11607_v28, %v11561_v3  ;;  %v1415_v57 = vrot.slane %v11621_v8, %v11561_v3 }
 0x1a2   :  { %v2143_v58 = vadd.bf16 %v9623_v39, %v1055_v42  ;;  %v2268_v11 = vmax.bf16 %v13061_v0, %v2140_v41  ;;  %v11684_v41 = vpop.permute.xlu0 %1490 }
 0x1a3   :  { %v432_v62 = vpop.f32.mrb[32].mxu0  ;;  %v2269_v63 = vmax.bf16 %v13061_v0, %v2141_v44  ;;  %v2270_v7 = vmax.bf16 %v13061_v0, %v2142_v43 }
 0x1a4   :  { %v785_v4 = vpop.f32.mrb[32].mxu1  ;;  %v434_v5 = vpop.f32.mrb[33].mxu0  ;;  %v2271_v10 = vmax.bf16 %v13061_v0, %v2143_v58 }
 0x1a5   :  { %v787_v12 = vpop.f32.mrb[33].mxu1  ;;  %v436_v13 = vpop.f32.mrb[34].mxu0  ;;  %3150 = vmatprep.subr.bf16.mxu0 %v2269_v63 }
 0x1a6   :  { %v1056_v15 = vpack.c.bf16 %v436_v13, %v432_v62  ;;  %v789_v54 = vpop.f32.mrb[34].mxu1  ;;  %3856 = vmatprep.subr.bf16.mxu1 %v2271_v10  ;;  %v438_v16 = vpop.f32.mrb[35].mxu0  ;;  %3151 = vmatpush1.bf16.msra.mxu0 %v2268_v11 }
 0x1a7   :  { %v1058_v17 = vpack.c.bf16 %v789_v54, %v785_v4  ;;  %v1057_v49 = vpack.c.bf16 %v438_v16, %v434_v5  ;;  %v791_v61 = vpop.f32.mrb[35].mxu1  ;;  %3857 = vmatpush1.bf16.msra.mxu1 %v2270_v7  ;;  %v9626_v4 = vcombine.low %v1403_v40, %v1415_v57  ;;  %v1427_v16 = vrot.slane %v11634_v33, %v11561_v3 }
 0x1a8   :  { %v2144_v45 = vadd.bf16 %v9624_v14, %v1056_v15  ;;  %v1059_v52 = vpack.c.bf16 %v791_v61, %v787_v12  ;;  %v11694_v61 = vpop.permute.xlu0 %1502 }
 0x1a9   :  { %v2146_v50 = vadd.bf16 %v9624_v14, %v1058_v17  ;;  %v2145_v18 = vadd.bf16 %v9624_v14, %v1057_v49  ;;  %v1439_v17 = vrot.slane %v11644_v6, %v11561_v3 }
 0x1aa   :  { %v2147_v20 = vadd.bf16 %v9624_v14, %v1059_v52  ;;  %v2272_v29 = vmax.bf16 %v13061_v0, %v2144_v45 }
 0x1ab   :  { %v442_v22 = vpop.f32.mrb[36].mxu0  ;;  %v2273_v23 = vmax.bf16 %v13061_v0, %v2145_v18  ;;  %v2274_v30 = vmax.bf16 %v13061_v0, %v2146_v50 }
 0x1ac   :  { %v795_v24 = vpop.f32.mrb[36].mxu1  ;;  %v444_v25 = vpop.f32.mrb[37].mxu0  ;;  %v2275_v26 = vmax.bf16 %v13061_v0, %v2147_v20 }
 0x1ad   :  { %v797_v31 = vpop.f32.mrb[37].mxu1  ;;  %v446_v32 = vpop.f32.mrb[38].mxu0  ;;  %3152 = vmatprep.subr.bf16.mxu0 %v2273_v23  ;;  %v9627_v23 = vcombine.low %v1427_v16, %v1439_v17 }
 0x1ae   :  { %v1060_v35 = vpack.c.bf16 %v446_v32, %v442_v22  ;;  %v799_v9 = vpop.f32.mrb[38].mxu1  ;;  %3858 = vmatprep.subr.bf16.mxu1 %v2275_v26  ;;  %v448_v36 = vpop.f32.mrb[39].mxu0  ;;  %3153 = vmatpush1.bf16.msra.mxu0 %v2272_v29 }
 0x1af   :  { %v1062_v37 = vpack.c.bf16 %v799_v9, %v795_v24  ;;  %v1061_v38 = vpack.c.bf16 %v448_v36, %v444_v25  ;;  %v801_v2 = vpop.f32.mrb[39].mxu1  ;;  %3859 = vmatpush1.bf16.msra.mxu1 %v2274_v30  ;;  %v1451_v9 = vrot.slane %v11654_v27, %v11561_v3  ;;  %v1463_v36 = vrot.slane %v11664_v59, %v11561_v3 }
 0x1b0   :  { %v2148_v39 = vadd.bf16 %v9625_v34, %v1060_v35  ;;  %v1063_v47 = vpack.c.bf16 %v801_v2, %v797_v31 }
 0x1b1   :  { %v2150_v53 = vadd.bf16 %v9625_v34, %v1062_v37  ;;  %v2149_v48 = vadd.bf16 %v9625_v34, %v1061_v38  ;;  %v11704_v38 = vpop.permute.xlu0 %1514 }
 0x1b2   :  { %v2151_v51 = vadd.bf16 %v9625_v34, %v1063_v47  ;;  %v2276_v58 = vmax.bf16 %v13061_v0, %v2148_v39 }
 0x1b3   :  { %v452_v42 = vpop.f32.mrb[40].mxu0  ;;  %v2277_v43 = vmax.bf16 %v13061_v0, %v2149_v48  ;;  %v2278_v28 = vmax.bf16 %v13061_v0, %v2150_v53 }
 0x1b4   :  { %v805_v44 = vpop.f32.mrb[40].mxu1  ;;  %v454_v55 = vpop.f32.mrb[41].mxu0  ;;  %v2279_v56 = vmax.bf16 %v13061_v0, %v2151_v51 }
 0x1b5   :  { %v807_v62 = vpop.f32.mrb[41].mxu1  ;;  %v456_v63 = vpop.f32.mrb[42].mxu0  ;;  %3154 = vmatprep.subr.bf16.mxu0 %v2277_v43 }
 0x1b6   :  { %v1064_v5 = vpack.c.bf16 %v456_v63, %v452_v42  ;;  %v809_v8 = vpop.f32.mrb[42].mxu1  ;;  %3860 = vmatprep.subr.bf16.mxu1 %v2279_v56  ;;  %v458_v10 = vpop.f32.mrb[43].mxu0  ;;  %3155 = vmatpush1.bf16.msra.mxu0 %v2276_v58  ;;  %v9628_v42 = vcombine.low %v1451_v9, %v1463_v36 }
 0x1b7   :  { %v1066_v11 = vpack.c.bf16 %v809_v8, %v805_v44  ;;  %v1065_v12 = vpack.c.bf16 %v458_v10, %v454_v55  ;;  %v811_v13 = vpop.f32.mrb[43].mxu1  ;;  %3861 = vmatpush1.bf16.msra.mxu1 %v2278_v28  ;;  %v1479_v28 = vpop.permute.xlu1 %1478  ;;  %v1475_v8 = vrot.slane %v11674_v21, %v11561_v3 }
 0x1b8   :  { %v2152_v7 = vadd.bf16 %v9626_v4, %v1064_v5  ;;  %v1067_v14 = vpack.c.bf16 %v811_v13, %v807_v62  ;;  %v1487_v10 = vrot.slane %v1479_v28, %v11561_v3 }
 0x1b9   :  { %v2154_v15 = vadd.bf16 %v9626_v4, %v1066_v11  ;;  %v2153_v54 = vadd.bf16 %v9626_v4, %v1065_v12  ;;  %v11713_v12 = vpop.permute.xlu0 %1526 }
 0x1ba   :  { %v2155_v49 = vadd.bf16 %v9626_v4, %v1067_v14  ;;  %v2280_v19 = vmax.bf16 %v13061_v0, %v2152_v7  ;;  %v9629_v21 = vcombine.low %v1475_v8, %v1487_v10 }
 0x1bb   :  { %v462_v45 = vpop.f32.mrb[44].mxu0  ;;  %v2281_v52 = vmax.bf16 %v13061_v0, %v2153_v54  ;;  %v2282_v33 = vmax.bf16 %v13061_v0, %v2154_v15 }
 0x1bc   :  { %v815_v50 = vpop.f32.mrb[44].mxu1  ;;  %v464_v18 = vpop.f32.mrb[45].mxu0  ;;  %v2283_v46 = vmax.bf16 %v13061_v0, %v2155_v49 }
 0x1bd   :  { %v817_v20 = vpop.f32.mrb[45].mxu1  ;;  %v466_v22 = vpop.f32.mrb[46].mxu0  ;;  %3156 = vmatprep.subr.bf16.mxu0 %v2281_v52 }
 0x1be   :  { %v1068_v24 = vpack.c.bf16 %v466_v22, %v462_v45  ;;  %v819_v6 = vpop.f32.mrb[46].mxu1  ;;  %3862 = vmatprep.subr.bf16.mxu1 %v2283_v46  ;;  %v468_v25 = vpop.f32.mrb[47].mxu0  ;;  %3157 = vmatpush1.bf16.msra.mxu0 %v2280_v19 }
 0x1bf   :  { %v1070_v26 = vpack.c.bf16 %v819_v6, %v815_v50  ;;  %v1069_v29 = vpack.c.bf16 %v468_v25, %v464_v18  ;;  %v821_v31 = vpop.f32.mrb[47].mxu1  ;;  %3863 = vmatpush1.bf16.msra.mxu1 %v2282_v33  ;;  %v1499_v6 = vrot.slane %v11684_v41, %v11561_v3  ;;  %v1511_v25 = vrot.slane %v11694_v61, %v11561_v3 }
 0x1c0   :  { %v2156_v32 = vadd.bf16 %v9627_v23, %v1068_v24  ;;  %v1071_v30 = vpack.c.bf16 %v821_v31, %v817_v20 }
 0x1c1   :  { %v2158_v34 = vadd.bf16 %v9627_v23, %v1070_v26  ;;  %v2157_v35 = vadd.bf16 %v9627_v23, %v1069_v29  ;;  %v11723_v29 = vpop.permute.xlu0 %1538 }
 0x1c2   :  { %v2159_v37 = vadd.bf16 %v9627_v23, %v1071_v30  ;;  %v2284_v40 = vmax.bf16 %v13061_v0, %v2156_v32 }
 0x1c3   :  { %v472_v2 = vpop.f32.mrb[48].mxu0  ;;  %v2285_v39 = vmax.bf16 %v13061_v0, %v2157_v35  ;;  %v2286_v27 = vmax.bf16 %v13061_v0, %v2158_v34 }
 0x1c4   :  { %v825_v47 = vpop.f32.mrb[48].mxu1  ;;  %v474_v53 = vpop.f32.mrb[49].mxu0  ;;  %v2287_v48 = vmax.bf16 %v13061_v0, %v2159_v37 }
 0x1c5   :  { %v827_v57 = vpop.f32.mrb[49].mxu1  ;;  %v476_v51 = vpop.f32.mrb[50].mxu0  ;;  %3158 = vmatprep.subr.bf16.mxu0 %v2285_v39 }
 0x1c6   :  { %v1072_v43 = vpack.c.bf16 %v476_v51, %v472_v2  ;;  %v829_v59 = vpop.f32.mrb[50].mxu1  ;;  %3864 = vmatprep.subr.bf16.mxu1 %v2287_v48  ;;  %v478_v44 = vpop.f32.mrb[51].mxu0  ;;  %3159 = vmatpush1.bf16.msra.mxu0 %v2284_v40  ;;  %v9630_v2 = vcombine.low %v1499_v6, %v1511_v25  ;;  %v10508_v25 = vld [vmem:[#allocation3] ss:$16 sps:$4 sm:$0xff]  }
 0x1c7   :  { %v1074_v55 = vpack.c.bf16 %v829_v59, %v825_v47  ;;  %v1073_v56 = vpack.c.bf16 %v478_v44, %v474_v53  ;;  %v831_v58 = vpop.f32.mrb[51].mxu1  ;;  %3865 = vmatpush1.bf16.msra.mxu1 %v2286_v27  ;;  %v1535_v59 = vrot.slane %v11713_v12, %v11561_v3 }
 0x1c8   :  { %v2160_v62 = vadd.bf16 %v9628_v42, %v1072_v43  ;;  %v1075_v63 = vpack.c.bf16 %v831_v58, %v827_v57  ;;  %v1523_v43 = vrot.slane %v11704_v38, %v11561_v3 }
 0x1c9   :  { %v2162_v4 = vadd.bf16 %v9628_v42, %v1074_v55  ;;  %v2161_v5 = vadd.bf16 %v9628_v42, %v1073_v56  ;;  %v1551_v55 = vpop.permute.xlu0 %1550 }
 0x1ca   :  { %v2163_v11 = vadd.bf16 %v9628_v42, %v1075_v63  ;;  %v2288_v16 = vmax.bf16 %v13061_v0, %v2160_v62  ;;  %v9631_v38 = vcombine.low %v1523_v43, %v1535_v59 }
 0x1cb   :  { %v482_v13 = vpop.f32.mrb[52].mxu0  ;;  %v2289_v7 = vmax.bf16 %v13061_v0, %v2161_v5  ;;  %v2290_v45 = vmax.bf16 %v13061_v0, %v2162_v4 }
 0x1cc   :  { %v835_v14 = vpop.f32.mrb[52].mxu1  ;;  %v484_v15 = vpop.f32.mrb[53].mxu0  ;;  %v2291_v54 = vmax.bf16 %v13061_v0, %v2163_v11 }
 0x1cd   :  { %v837_v17 = vpop.f32.mrb[53].mxu1  ;;  %v486_v49 = vpop.f32.mrb[54].mxu0  ;;  %3160 = vmatprep.subr.bf16.mxu0 %v2289_v7 }
 0x1ce   :  { %v1076_v52 = vpack.c.bf16 %v486_v49, %v482_v13  ;;  %v839_v50 = vpop.f32.mrb[54].mxu1  ;;  %3866 = vmatprep.subr.bf16.mxu1 %v2291_v54  ;;  %v488_v18 = vpop.f32.mrb[55].mxu0  ;;  %3161 = vmatpush1.bf16.msra.mxu0 %v2288_v16 }
 0x1cf   :  { %v1078_v46 = vpack.c.bf16 %v839_v50, %v835_v14  ;;  %v1077_v19 = vpack.c.bf16 %v488_v18, %v484_v15  ;;  %v841_v20 = vpop.f32.mrb[55].mxu1  ;;  %3867 = vmatpush1.bf16.msra.mxu1 %v2290_v45  ;;  %v1547_v45 = vrot.slane %v11723_v29, %v11561_v3  ;;  %v1563_v50 = vpop.permute.xlu0 %1562 }
 0x1d0   :  { %v2164_v22 = vadd.bf16 %v9629_v21, %v1076_v52  ;;  %v1079_v33 = vpack.c.bf16 %v841_v20, %v837_v17 }
 0x1d1   :  { %v2166_v23 = vadd.bf16 %v9629_v21, %v1078_v46  ;;  %v2165_v24 = vadd.bf16 %v9629_v21, %v1077_v19 }
 0x1d2   :  { %v2167_v26 = vadd.bf16 %v9629_v21, %v1079_v33  ;;  %v2292_v9 = vmax.bf16 %v13061_v0, %v2164_v22  ;;  %v1559_v21 = vrot.slane %v1551_v55, %v11561_v3  ;;  %v10513_v55 = vld [vmem:[#allocation3 + $0x20] ss:$16 sps:$4 sm:$0xff]  }
 0x1d3   :  { %v492_v31 = vpop.f32.mrb[56].mxu0  ;;  %v2293_v32 = vmax.bf16 %v13061_v0, %v2165_v24  ;;  %v2294_v41 = vmax.bf16 %v13061_v0, %v2166_v23 }
 0x1d4   :  { %v845_v30 = vpop.f32.mrb[56].mxu1  ;;  %v494_v34 = vpop.f32.mrb[57].mxu0  ;;  %v2295_v35 = vmax.bf16 %v13061_v0, %v2167_v26  ;;  %v9632_v26 = vcombine.low %v1547_v45, %v1559_v21 }
 0x1d5   :  { %v847_v36 = vpop.f32.mrb[57].mxu1  ;;  %v496_v37 = vpop.f32.mrb[58].mxu0  ;;  %3162 = vmatprep.subr.bf16.mxu0 %v2293_v32 }
 0x1d6   :  { %v1080_v39 = vpack.c.bf16 %v496_v37, %v492_v31  ;;  %v849_v61 = vpop.f32.mrb[58].mxu1  ;;  %3868 = vmatprep.subr.bf16.mxu1 %v2295_v35  ;;  %v498_v47 = vpop.f32.mrb[59].mxu0  ;;  %3163 = vmatpush1.bf16.msra.mxu0 %v2292_v9 }
 0x1d7   :  { %v1082_v53 = vpack.c.bf16 %v849_v61, %v845_v30  ;;  %v1081_v48 = vpack.c.bf16 %v498_v47, %v494_v34  ;;  %v851_v40 = vpop.f32.mrb[59].mxu1  ;;  %3869 = vmatpush1.bf16.msra.mxu1 %v2294_v41  ;;  %v10511_v30 = vld [vmem:[#allocation3 + $0x24] ss:$16 sps:$4 sm:$0xff]   ;;  %v1575_v41 = vpop.permute.xlu0 %1574  ;;  %v1571_v61 = vrot.slane %v1563_v50, %v11561_v3 }
 0x1d8   :  { %v2168_v57 = vadd.bf16 %v9630_v2, %v1080_v39  ;;  %v1083_v51 = vpack.c.bf16 %v851_v40, %v847_v36  ;;  %v1583_v47 = vrot.slane %v1575_v41, %v11561_v3 }
 0x1d9   :  { %v2170_v27 = vadd.bf16 %v9630_v2, %v1082_v53  ;;  %v2169_v42 = vadd.bf16 %v9630_v2, %v1081_v48 }
 0x1da   :  { %v2171_v44 = vadd.bf16 %v9630_v2, %v1083_v51  ;;  %v2296_v4 = vmax.bf16 %v13061_v0, %v2168_v57 }
 0x1db   :  { %v502_v56 = vpop.f32.mrb[60].mxu0  ;;  %v2297_v58 = vmax.bf16 %v13061_v0, %v2169_v42  ;;  %v2298_v10 = vmax.bf16 %v13061_v0, %v2170_v27 }
 0x1dc   :  { %v855_v62 = vpop.f32.mrb[60].mxu1  ;;  %v504_v63 = vpop.f32.mrb[61].mxu0  ;;  %v2299_v28 = vmax.bf16 %v13061_v0, %v2171_v44 }
 0x1dd   :  { %v857_v5 = vpop.f32.mrb[61].mxu1  ;;  %v506_v8 = vpop.f32.mrb[62].mxu0  ;;  %3164 = vmatprep.subr.bf16.mxu0 %v2297_v58 }
 0x1de   :  { %v1084_v11 = vpack.c.bf16 %v506_v8, %v502_v56  ;;  %v859_v13 = vpop.f32.mrb[62].mxu1  ;;  %3870 = vmatprep.subr.bf16.mxu1 %v2299_v28  ;;  %v508_v12 = vpop.f32.mrb[63].mxu0  ;;  %3165 = vmatpush1.bf16.msra.mxu0 %v2296_v4  ;;  %v9633_v56 = vcombine.low %v1571_v61, %v1583_v47  ;;  %v10514_v28 = vld [vmem:[#allocation3 + $0x44] ss:$16 sps:$4 sm:$0xff]  }
 0x1df   :  { %v1086_v7 = vpack.c.bf16 %v859_v13, %v855_v62  ;;  %v1085_v14 = vpack.c.bf16 %v508_v12, %v504_v63  ;;  %v861_v15 = vpop.f32.mrb[63].mxu1  ;;  %3871 = vmatpush1.bf16.msra.mxu1 %v2298_v10  ;;  %v1599_v13 = vpop.permute.xlu0 %1598 }
 0x1e0   :  { %v2172_v54 = vadd.bf16 %v9631_v38, %v1084_v11  ;;  %v1087_v16 = vpack.c.bf16 %v861_v15, %v857_v5  ;;  %v1587_v11 = vpop.permute.xlu1 %1586  ;;  %v1607_v15 = vrot.slane %v1599_v13, %v11561_v3 }
 0x1e1   :  { %v2174_v17 = vadd.bf16 %v9631_v38, %v1086_v7  ;;  %v2173_v49 = vadd.bf16 %v9631_v38, %v1085_v14  ;;  %v1595_v14 = vrot.slane %v1587_v11, %v11561_v3 }
 0x1e2   :  { %v2175_v52 = vadd.bf16 %v9631_v38, %v1087_v16  ;;  %v2300_v33 = vmax.bf16 %v13061_v0, %v2172_v54 }
 0x1e3   :  { %v512_v18 = vpop.f32.mrb[64].mxu0  ;;  %v2301_v46 = vmax.bf16 %v13061_v0, %v2173_v49  ;;  %v2302_v6 = vmax.bf16 %v13061_v0, %v2174_v17 }
 0x1e4   :  { %v865_v19 = vpop.f32.mrb[64].mxu1  ;;  %v514_v20 = vpop.f32.mrb[65].mxu0  ;;  %v2303_v22 = vmax.bf16 %v13061_v0, %v2175_v52 }
 0x1e5   :  { %v867_v23 = vpop.f32.mrb[65].mxu1  ;;  %v516_v24 = vpop.f32.mrb[66].mxu0  ;;  %3166 = vmatprep.subr.bf16.mxu0 %v2301_v46 }
 0x1e6   :  { %v1088_v29 = vpack.c.bf16 %v516_v24, %v512_v18  ;;  %v869_v31 = vpop.f32.mrb[66].mxu1  ;;  %3872 = vmatprep.subr.bf16.mxu1 %v2303_v22  ;;  %v518_v32 = vpop.f32.mrb[67].mxu0  ;;  %3167 = vmatpush1.bf16.msra.mxu0 %v2300_v33  ;;  %v10517_v24 = vld [vmem:[#allocation3 + $0x64] ss:$16 sps:$4 sm:$0xff]  }
 0x1e7   :  { %v1090_v34 = vpack.c.bf16 %v869_v31, %v865_v19  ;;  %v1089_v35 = vpack.c.bf16 %v518_v32, %v514_v20  ;;  %v871_v9 = vpop.f32.mrb[67].mxu1  ;;  %3873 = vmatpush1.bf16.msra.mxu1 %v2302_v6  ;;  %v10516_v19 = vld [vmem:[#allocation3 + $0x40] ss:$16 sps:$4 sm:$0xff]   ;;  %v9634_v20 = vcombine.low %v1595_v14, %v1607_v15  ;;  %v1611_v32 = vpop.permute.xlu1 %1610 }
 0x1e8   :  { %v2176_v36 = vadd.bf16 %v9632_v26, %v1088_v29  ;;  %v1091_v37 = vpack.c.bf16 %v871_v9, %v867_v23  ;;  %v1619_v9 = vrot.slane %v1611_v32, %v11561_v3 }
 0x1e9   :  { %v2178_v2 = vadd.bf16 %v9632_v26, %v1090_v34  ;;  %3169 = vmatmul.mubr.bf16.vlgmr.msra.gmra.mrb[128].mxu0 %v10508_v25  ;;  %v2177_v39 = vadd.bf16 %v9632_v26, %v1089_v35 }
 0x1ea   :  { %3875 = vmatmul.mubr.bf16.vlgmr.msra.gmra.mrb[128].mxu1 %v10508_v25  ;;  %v2179_v53 = vadd.bf16 %v9632_v26, %v1091_v37  ;;  %3178 = vmatprep.mubr.bf16.mxu0 %v10511_v30  ;;  %v2304_v42 = vmax.bf16 %v13061_v0, %v2176_v36 }
 0x1eb   :  { %v522_v48 = vpop.f32.mrb[68].mxu0  ;;  %v2305_v40 = vmax.bf16 %v13061_v0, %v2177_v39  ;;  %3884 = vmatprep.mubr.bf16.mxu1 %v10511_v30  ;;  %v2306_v44 = vmax.bf16 %v13061_v0, %v2178_v2  ;;  %v1623_v30 = vpop.permute.xlu0 %1622 }
 0x1ec   :  { %v875_v57 = vpop.f32.mrb[68].mxu1  ;;  %v524_v51 = vpop.f32.mrb[69].mxu0  ;;  %v2307_v27 = vmax.bf16 %v13061_v0, %v2179_v53  ;;  %v1631_v36 = vrot.slane %v1623_v30, %v11561_v3 }
 0x1ed   :  { %v877_v43 = vpop.f32.mrb[69].mxu1  ;;  %v526_v59 = vpop.f32.mrb[70].mxu0  ;;  %3489 = vmatprep.subr.bf16.mxu0 %v2305_v40 }
 0x1ee   :  { %v1092_v58 = vpack.c.bf16 %v526_v59, %v522_v48  ;;  %v879_v62 = vpop.f32.mrb[70].mxu1  ;;  %4195 = vmatprep.subr.bf16.mxu1 %v2307_v27  ;;  %v528_v63 = vpop.f32.mrb[71].mxu0  ;;  %3490 = vmatpush1.bf16.msra.mxu0 %v2304_v42  ;;  %v9635_v27 = vcombine.low %v1619_v9, %v1631_v36 }
 0x1ef   :  { %v1094_v4 = vpack.c.bf16 %v879_v62, %v875_v57  ;;  %v1093_v5 = vpack.c.bf16 %v528_v63, %v524_v51  ;;  %v881_v8 = vpop.f32.mrb[71].mxu1  ;;  %4196 = vmatpush1.bf16.msra.mxu1 %v2306_v44  ;;  %v10519_v51 = vld [vmem:[#allocation3 + $0x60] ss:$16 sps:$4 sm:$0xff]   ;;  %v10520_v44 = vld [vmem:[#allocation3 + $0x84] ss:$16 sps:$4 sm:$0xff]  }
 0x1f0   :  { %v2180_v10 = vadd.bf16 %v9633_v56, %v1092_v58  ;;  %v1095_v38 = vpack.c.bf16 %v881_v8, %v877_v43 }
 0x1f1   :  { %v2182_v12 = vadd.bf16 %v9633_v56, %v1094_v4  ;;  %3179 = vmatmul.mubr.bf16.gmra.mrb[132].mxu0 %v10513_v55  ;;  %v2181_v7 = vadd.bf16 %v9633_v56, %v1093_v5  ;;  %v1647_v4 = vpop.permute.xlu0 %1646 }
 0x1f2   :  { %3885 = vmatmul.mubr.bf16.gmra.mrb[132].mxu1 %v10513_v55  ;;  %v2183_v54 = vadd.bf16 %v9633_v56, %v1095_v38  ;;  %3188 = vmatprep.mubr.bf16.mxu0 %v10514_v28  ;;  %v2308_v52 = vmax.bf16 %v13061_v0, %v2180_v10  ;;  %v1655_v38 = vrot.slane %v1647_v4, %v11561_v3 }
 0x1f3   :  { %v532_v16 = vpop.f32.mrb[72].mxu0  ;;  %v2309_v17 = vmax.bf16 %v13061_v0, %v2181_v7  ;;  %3894 = vmatprep.mubr.bf16.mxu1 %v10514_v28  ;;  %v2310_v46 = vmax.bf16 %v13061_v0, %v2182_v12  ;;  %v1635_v28 = vpop.permute.xlu1 %1634 }
 0x1f4   :  { %v885_v49 = vpop.f32.mrb[72].mxu1  ;;  %v534_v45 = vpop.f32.mrb[73].mxu0  ;;  %v2311_v21 = vmax.bf16 %v13061_v0, %v2183_v54  ;;  %v1643_v10 = vrot.slane %v1635_v28, %v11561_v3 }
 0x1f5   :  { %v887_v50 = vpop.f32.mrb[73].mxu1  ;;  %v536_v18 = vpop.f32.mrb[74].mxu0  ;;  %3491 = vmatprep.subr.bf16.mxu0 %v2309_v17 }
 0x1f6   :  { %v1096_v22 = vpack.c.bf16 %v536_v18, %v532_v16  ;;  %v889_v33 = vpop.f32.mrb[74].mxu1  ;;  %4197 = vmatprep.subr.bf16.mxu1 %v2311_v21  ;;  %v538_v23 = vpop.f32.mrb[75].mxu0  ;;  %3492 = vmatpush1.bf16.msra.mxu0 %v2308_v52  ;;  %v9636_v21 = vcombine.low %v1643_v10, %v1655_v38 }
 0x1f7   :  { %v1098_v6 = vpack.c.bf16 %v889_v33, %v885_v49  ;;  %v1097_v25 = vpack.c.bf16 %v538_v23, %v534_v45  ;;  %v891_v26 = vpop.f32.mrb[75].mxu1  ;;  %4198 = vmatpush1.bf16.msra.mxu1 %v2310_v46  ;;  %v10522_v45 = vld [vmem:[#allocation3 + $0x80] ss:$16 sps:$4 sm:$0xff]   ;;  %v10523_v46 = vld [vmem:[#allocation3 + $0xa4] ss:$16 sps:$4 sm:$0xff]  }
 0x1f8   :  { %v2184_v29 = vadd.bf16 %v9634_v20, %v1096_v22  ;;  %v1099_v31 = vpack.c.bf16 %v891_v26, %v887_v50 }
 0x1f9   :  { %v2186_v34 = vadd.bf16 %v9634_v20, %v1098_v6  ;;  %3189 = vmatmul.mubr.bf16.gmra.mrb[136].mxu0 %v10516_v19  ;;  %v2185_v35 = vadd.bf16 %v9634_v20, %v1097_v25  ;;  %v1671_v6 = vpop.permute.xlu0 %1670 }
 0x1fa   :  { %3895 = vmatmul.mubr.bf16.gmra.mrb[136].mxu1 %v10516_v19  ;;  %v2187_v37 = vadd.bf16 %v9634_v20, %v1099_v31  ;;  %3198 = vmatprep.mubr.bf16.mxu0 %v10517_v24  ;;  %v2312_v53 = vmax.bf16 %v13061_v0, %v2184_v29  ;;  %v1679_v31 = vrot.slane %v1671_v6, %v11561_v3 }
 0x1fb   :  { %v542_v41 = vpop.f32.mrb[76].mxu0  ;;  %v2313_v2 = vmax.bf16 %v13061_v0, %v2185_v35  ;;  %3904 = vmatprep.mubr.bf16.mxu1 %v10517_v24  ;;  %v2314_v57 = vmax.bf16 %v13061_v0, %v2186_v34  ;;  %v1659_v24 = vpop.permute.xlu1 %1658 }
 0x1fc   :  { %v895_v39 = vpop.f32.mrb[76].mxu1  ;;  %v544_v61 = vpop.f32.mrb[77].mxu0  ;;  %v2315_v47 = vmax.bf16 %v13061_v0, %v2187_v37  ;;  %v1667_v29 = vrot.slane %v1659_v24, %v11561_v3 }
 0x1fd   :  { %v897_v48 = vpop.f32.mrb[77].mxu1  ;;  %v546_v40 = vpop.f32.mrb[78].mxu0  ;;  %3493 = vmatprep.subr.bf16.mxu0 %v2313_v2 }
 0x1fe   :  { %v1100_v42 = vpack.c.bf16 %v546_v40, %v542_v41  ;;  %v899_v43 = vpop.f32.mrb[78].mxu1  ;;  %4199 = vmatprep.subr.bf16.mxu1 %v2315_v47  ;;  %v548_v59 = vpop.f32.mrb[79].mxu0  ;;  %3494 = vmatpush1.bf16.msra.mxu0 %v2312_v53  ;;  %v9637_v47 = vcombine.low %v1667_v29, %v1679_v31 }
 0x1ff   :  { %v1102_v55 = vpack.c.bf16 %v899_v43, %v895_v39  ;;  %v1101_v56 = vpack.c.bf16 %v548_v59, %v544_v61  ;;  %v901_v58 = vpop.f32.mrb[79].mxu1  ;;  %4200 = vmatpush1.bf16.msra.mxu1 %v2314_v57  ;;  %v10525_v61 = vld [vmem:[#allocation3 + $0xa0] ss:$16 sps:$4 sm:$0xff]   ;;  %v10526_v57 = vld [vmem:[#allocation3 + $0xc4] ss:$16 sps:$4 sm:$0xff]  }
 0x200   :  { %v2188_v62 = vadd.bf16 %v9635_v27, %v1100_v42  ;;  %v1103_v63 = vpack.c.bf16 %v901_v58, %v897_v48 }
 0x201   :  { %v2190_v5 = vadd.bf16 %v9635_v27, %v1102_v55  ;;  %3199 = vmatmul.mubr.bf16.gmra.mrb[140].mxu0 %v10519_v51  ;;  %v2189_v8 = vadd.bf16 %v9635_v27, %v1101_v56  ;;  %v1695_v55 = vpop.permute.xlu0 %1694 }
 0x202   :  { %3905 = vmatmul.mubr.bf16.gmra.mrb[140].mxu1 %v10519_v51  ;;  %v2191_v11 = vadd.bf16 %v9635_v27, %v1103_v63  ;;  %3208 = vmatprep.mubr.bf16.mxu0 %v10520_v44  ;;  %v2316_v54 = vmax.bf16 %v13061_v0, %v2188_v62  ;;  %v1703_v63 = vrot.slane %v1695_v55, %v11561_v3 }
 0x203   :  { %v552_v13 = vpop.f32.mrb[80].mxu0  ;;  %v2317_v12 = vmax.bf16 %v13061_v0, %v2189_v8  ;;  %3914 = vmatprep.mubr.bf16.mxu1 %v10520_v44  ;;  %v2318_v49 = vmax.bf16 %v13061_v0, %v2190_v5  ;;  %v1683_v44 = vpop.permute.xlu1 %1682 }
 0x204   :  { %v905_v7 = vpop.f32.mrb[80].mxu1  ;;  %v554_v14 = vpop.f32.mrb[81].mxu0  ;;  %v2319_v15 = vmax.bf16 %v13061_v0, %v2191_v11  ;;  %v1691_v62 = vrot.slane %v1683_v44, %v11561_v3 }
 0x205   :  { %v907_v16 = vpop.f32.mrb[81].mxu1  ;;  %v556_v17 = vpop.f32.mrb[82].mxu0  ;;  %3495 = vmatprep.subr.bf16.mxu0 %v2317_v12 }
 0x206   :  { %v1104_v52 = vpack.c.bf16 %v556_v17, %v552_v13  ;;  %v909_v50 = vpop.f32.mrb[82].mxu1  ;;  %4201 = vmatprep.subr.bf16.mxu1 %v2319_v15  ;;  %v558_v18 = vpop.f32.mrb[83].mxu0  ;;  %3496 = vmatpush1.bf16.msra.mxu0 %v2316_v54  ;;  %v9638_v15 = vcombine.low %v1691_v62, %v1703_v63 }
 0x207   :  { %v1106_v19 = vpack.c.bf16 %v909_v50, %v905_v7  ;;  %v1105_v20 = vpack.c.bf16 %v558_v18, %v554_v14  ;;  %v911_v22 = vpop.f32.mrb[83].mxu1  ;;  %4202 = vmatpush1.bf16.msra.mxu1 %v2318_v49  ;;  %v10528_v14 = vld [vmem:[#allocation3 + $0xc0] ss:$16 sps:$4 sm:$0xff]   ;;  %v10529_v49 = vld [vmem:[#allocation3 + $0xe4] ss:$16 sps:$4 sm:$0xff]  }
 0x208   :  { %v2192_v33 = vadd.bf16 %v9636_v21, %v1104_v52  ;;  %v1107_v23 = vpack.c.bf16 %v911_v22, %v907_v16 }
 0x209   :  { %v2194_v25 = vadd.bf16 %v9636_v21, %v1106_v19  ;;  %3209 = vmatmul.mubr.bf16.gmra.mrb[144].mxu0 %v10522_v45  ;;  %v2193_v26 = vadd.bf16 %v9636_v21, %v1105_v20  ;;  %v1719_v19 = vpop.permute.xlu0 %1718 }
 0x20a   :  { %3915 = vmatmul.mubr.bf16.gmra.mrb[144].mxu1 %v10522_v45  ;;  %v2195_v32 = vadd.bf16 %v9636_v21, %v1107_v23  ;;  %3218 = vmatprep.mubr.bf16.mxu0 %v10523_v46  ;;  %v2320_v37 = vmax.bf16 %v13061_v0, %v2192_v33  ;;  %v1727_v23 = vrot.slane %v1719_v19, %v11561_v3 }
 0x20b   :  { %v562_v30 = vpop.f32.mrb[84].mxu0  ;;  %v2321_v34 = vmax.bf16 %v13061_v0, %v2193_v26  ;;  %3924 = vmatprep.mubr.bf16.mxu1 %v10523_v46  ;;  %v2322_v39 = vmax.bf16 %v13061_v0, %v2194_v25  ;;  %v1707_v46 = vpop.permute.xlu1 %1706 }
 0x20c   :  { %v915_v35 = vpop.f32.mrb[84].mxu1  ;;  %v564_v9 = vpop.f32.mrb[85].mxu0  ;;  %v2323_v36 = vmax.bf16 %v13061_v0, %v2195_v32  ;;  %v1715_v33 = vrot.slane %v1707_v46, %v11561_v3 }
 0x20d   :  { %v917_v41 = vpop.f32.mrb[85].mxu1  ;;  %v566_v2 = vpop.f32.mrb[86].mxu0  ;;  %3497 = vmatprep.subr.bf16.mxu0 %v2321_v34 }
 0x20e   :  { %v1108_v53 = vpack.c.bf16 %v566_v2, %v562_v30  ;;  %v919_v48 = vpop.f32.mrb[86].mxu1  ;;  %4203 = vmatprep.subr.bf16.mxu1 %v2323_v36  ;;  %v568_v40 = vpop.f32.mrb[87].mxu0  ;;  %3498 = vmatpush1.bf16.msra.mxu0 %v2320_v37  ;;  %v9639_v36 = vcombine.low %v1715_v33, %v1727_v23 }
 0x20f   :  { %v1110_v51 = vpack.c.bf16 %v919_v48, %v915_v35  ;;  %v1109_v27 = vpack.c.bf16 %v568_v40, %v564_v9  ;;  %v921_v42 = vpop.f32.mrb[87].mxu1  ;;  %4204 = vmatpush1.bf16.msra.mxu1 %v2322_v39  ;;  %v10531_v9 = vld [vmem:[#allocation3 + $0xe0] ss:$16 sps:$4 sm:$0xff]   ;;  %v10532_v39 = vld [vmem:[#allocation3 + $0x104] ss:$16 sps:$4 sm:$0xff]  }
 0x210   :  { %v2196_v43 = vadd.bf16 %v9637_v47, %v1108_v53  ;;  %v1111_v59 = vpack.c.bf16 %v921_v42, %v917_v41 }
 0x211   :  { %v2198_v56 = vadd.bf16 %v9637_v47, %v1110_v51  ;;  %3219 = vmatmul.mubr.bf16.gmra.mrb[148].mxu0 %v10525_v61  ;;  %v2197_v58 = vadd.bf16 %v9637_v47, %v1109_v27  ;;  %v1743_v51 = vpop.permute.xlu0 %1742 }
 0x212   :  { %3925 = vmatmul.mubr.bf16.gmra.mrb[148].mxu1 %v10525_v61  ;;  %v2199_v28 = vadd.bf16 %v9637_v47, %v1111_v59  ;;  %3228 = vmatprep.mubr.bf16.mxu0 %v10526_v57  ;;  %v2324_v11 = vmax.bf16 %v13061_v0, %v2196_v43  ;;  %v1751_v59 = vrot.slane %v1743_v51, %v11561_v3 }
 0x213   :  { %v572_v4 = vpop.f32.mrb[88].mxu0  ;;  %v2325_v5 = vmax.bf16 %v13061_v0, %v2197_v58  ;;  %3934 = vmatprep.mubr.bf16.mxu1 %v10526_v57  ;;  %v2326_v7 = vmax.bf16 %v13061_v0, %v2198_v56  ;;  %v1731_v57 = vpop.permute.xlu1 %1730 }
 0x214   :  { %v925_v8 = vpop.f32.mrb[88].mxu1  ;;  %v574_v10 = vpop.f32.mrb[89].mxu0  ;;  %v2327_v38 = vmax.bf16 %v13061_v0, %v2199_v28  ;;  %v1739_v43 = vrot.slane %v1731_v57, %v11561_v3 }
 0x215   :  { %v927_v13 = vpop.f32.mrb[89].mxu1  ;;  %v576_v12 = vpop.f32.mrb[90].mxu0  ;;  %3499 = vmatprep.subr.bf16.mxu0 %v2325_v5 }
 0x216   :  { %v1112_v54 = vpack.c.bf16 %v576_v12, %v572_v4  ;;  %v929_v16 = vpop.f32.mrb[90].mxu1  ;;  %4205 = vmatprep.subr.bf16.mxu1 %v2327_v38  ;;  %v578_v17 = vpop.f32.mrb[91].mxu0  ;;  %3500 = vmatpush1.bf16.msra.mxu0 %v2324_v11  ;;  %v9640_v38 = vcombine.low %v1739_v43, %v1751_v59 }
 0x217   :  { %v1114_v45 = vpack.c.bf16 %v929_v16, %v925_v8  ;;  %v1113_v21 = vpack.c.bf16 %v578_v17, %v574_v10  ;;  %v931_v52 = vpop.f32.mrb[91].mxu1  ;;  %4206 = vmatpush1.bf16.msra.mxu1 %v2326_v7  ;;  %v10534_v10 = vld [vmem:[#allocation3 + $0x100] ss:$16 sps:$4 sm:$0xff]   ;;  %v10535_v7 = vld [vmem:[#allocation3 + $0x124] ss:$16 sps:$4 sm:$0xff]  }
 0x218   :  { %v2200_v50 = vadd.bf16 %v9638_v15, %v1112_v54  ;;  %v1115_v18 = vpack.c.bf16 %v931_v52, %v927_v13 }
 0x219   :  { %v2202_v20 = vadd.bf16 %v9638_v15, %v1114_v45  ;;  %3229 = vmatmul.mubr.bf16.gmra.mrb[152].mxu0 %v10528_v14  ;;  %v2201_v22 = vadd.bf16 %v9638_v15, %v1113_v21  ;;  %v1767_v45 = vpop.permute.xlu0 %1766 }
 0x21a   :  { %3935 = vmatmul.mubr.bf16.gmra.mrb[152].mxu1 %v10528_v14  ;;  %v2203_v24 = vadd.bf16 %v9638_v15, %v1115_v18  ;;  %3238 = vmatprep.mubr.bf16.mxu0 %v10529_v49  ;;  %v2328_v32 = vmax.bf16 %v13061_v0, %v2200_v50  ;;  %v1775_v18 = vrot.slane %v1767_v45, %v11561_v3 }
 0x21b   :  { %v582_v6 = vpop.f32.mrb[92].mxu0  ;;  %v2329_v25 = vmax.bf16 %v13061_v0, %v2201_v22  ;;  %3944 = vmatprep.mubr.bf16.mxu1 %v10529_v49  ;;  %v2330_v35 = vmax.bf16 %v13061_v0, %v2202_v20  ;;  %v1755_v49 = vpop.permute.xlu1 %1754 }
 0x21c   :  { %v935_v26 = vpop.f32.mrb[92].mxu1  ;;  %v584_v29 = vpop.f32.mrb[93].mxu0  ;;  %v2331_v31 = vmax.bf16 %v13061_v0, %v2203_v24  ;;  %v1763_v50 = vrot.slane %v1755_v49, %v11561_v3 }
 0x21d   :  { %v937_v30 = vpop.f32.mrb[93].mxu1  ;;  %v586_v34 = vpop.f32.mrb[94].mxu0  ;;  %3501 = vmatprep.subr.bf16.mxu0 %v2329_v25 }
 0x21e   :  { %v1116_v37 = vpack.c.bf16 %v586_v34, %v582_v6  ;;  %v939_v41 = vpop.f32.mrb[94].mxu1  ;;  %4207 = vmatprep.subr.bf16.mxu1 %v2331_v31  ;;  %v588_v2 = vpop.f32.mrb[95].mxu0  ;;  %3502 = vmatpush1.bf16.msra.mxu0 %v2328_v32  ;;  %v9641_v31 = vcombine.low %v1763_v50, %v1775_v18 }
 0x21f   :  { %v1118_v61 = vpack.c.bf16 %v939_v41, %v935_v26  ;;  %v1117_v47 = vpack.c.bf16 %v588_v2, %v584_v29  ;;  %v941_v53 = vpop.f32.mrb[95].mxu1  ;;  %4208 = vmatpush1.bf16.msra.mxu1 %v2330_v35  ;;  %v10537_v29 = vld [vmem:[#allocation3 + $0x120] ss:$16 sps:$4 sm:$0xff]   ;;  %v10538_v35 = vld [vmem:[#allocation3 + $0x144] ss:$16 sps:$4 sm:$0xff]  }
 0x220   :  { %v2204_v48 = vadd.bf16 %v9639_v36, %v1116_v37  ;;  %v1119_v40 = vpack.c.bf16 %v941_v53, %v937_v30 }
 0x221   :  { %v2206_v27 = vadd.bf16 %v9639_v36, %v1118_v61  ;;  %3239 = vmatmul.mubr.bf16.gmra.mrb[156].mxu0 %v10531_v9  ;;  %v2205_v42 = vadd.bf16 %v9639_v36, %v1117_v47  ;;  %v1779_v61 = vpop.permute.xlu1 %1778 }
 0x222   :  { %3945 = vmatmul.mubr.bf16.gmra.mrb[156].mxu1 %v10531_v9  ;;  %v2207_v44 = vadd.bf16 %v9639_v36, %v1119_v40  ;;  %3248 = vmatprep.mubr.bf16.mxu0 %v10532_v39  ;;  %v2332_v28 = vmax.bf16 %v13061_v0, %v2204_v48  ;;  %v1791_v9 = vpop.permute.xlu0 %1790  ;;  %v1787_v48 = vrot.slane %v1779_v61, %v11561_v3 }
 0x223   :  { %v592_v55 = vpop.f32.mrb[96].mxu0  ;;  %v2333_v56 = vmax.bf16 %v13061_v0, %v2205_v42  ;;  %3954 = vmatprep.mubr.bf16.mxu1 %v10532_v39  ;;  %v2334_v8 = vmax.bf16 %v13061_v0, %v2206_v27  ;;  %v1799_v40 = vrot.slane %v1791_v9, %v11561_v3 }
 0x224   :  { %v945_v58 = vpop.f32.mrb[96].mxu1  ;;  %v594_v62 = vpop.f32.mrb[97].mxu0  ;;  %v2335_v63 = vmax.bf16 %v13061_v0, %v2207_v44 }
 0x225   :  { %v947_v4 = vpop.f32.mrb[97].mxu1  ;;  %v596_v5 = vpop.f32.mrb[98].mxu0  ;;  %3503 = vmatprep.subr.bf16.mxu0 %v2333_v56 }
 0x226   :  { %v1120_v11 = vpack.c.bf16 %v596_v5, %v592_v55  ;;  %v949_v13 = vpop.f32.mrb[98].mxu1  ;;  %4209 = vmatprep.subr.bf16.mxu1 %v2335_v63  ;;  %v598_v12 = vpop.f32.mrb[99].mxu0  ;;  %3504 = vmatpush1.bf16.msra.mxu0 %v2332_v28  ;;  %v9642_v63 = vcombine.low %v1787_v48, %v1799_v40 }
 0x227   :  { %v1122_v14 = vpack.c.bf16 %v949_v13, %v945_v58  ;;  %v1121_v15 = vpack.c.bf16 %v598_v12, %v594_v62  ;;  %v951_v54 = vpop.f32.mrb[99].mxu1  ;;  %4210 = vmatpush1.bf16.msra.mxu1 %v2334_v8  ;;  %v10540_v62 = vld [vmem:[#allocation3 + $0x140] ss:$16 sps:$4 sm:$0xff]   ;;  %v10541_v8 = vld [vmem:[#allocation3 + $0x164] ss:$16 sps:$4 sm:$0xff]  }
 0x228   :  { %v2208_v16 = vadd.bf16 %v9640_v38, %v1120_v11  ;;  %v1123_v17 = vpack.c.bf16 %v951_v54, %v947_v4 }
 0x229   :  { %v2210_v21 = vadd.bf16 %v9640_v38, %v1122_v14  ;;  %3249 = vmatmul.mubr.bf16.gmra.mrb[160].mxu0 %v10534_v10  ;;  %v2209_v52 = vadd.bf16 %v9640_v38, %v1121_v15  ;;  %v1803_v14 = vpop.permute.xlu1 %1802 }
 0x22a   :  { %3955 = vmatmul.mubr.bf16.gmra.mrb[160].mxu1 %v10534_v10  ;;  %v2211_v46 = vadd.bf16 %v9640_v38, %v1123_v17  ;;  %3258 = vmatprep.mubr.bf16.mxu0 %v10535_v7  ;;  %v2336_v24 = vmax.bf16 %v13061_v0, %v2208_v16  ;;  %v1815_v10 = vpop.permute.xlu0 %1814 }
 0x22b   :  { %v602_v19 = vpop.f32.mrb[100].mxu0  ;;  %v2337_v20 = vmax.bf16 %v13061_v0, %v2209_v52  ;;  %3964 = vmatprep.mubr.bf16.mxu1 %v10535_v7  ;;  %v2338_v26 = vmax.bf16 %v13061_v0, %v2210_v21  ;;  %v1823_v16 = vrot.slane %v1815_v10, %v11561_v3  ;;  %v11118_v21 = vmov 1   ;;  %v10547_v10 = vld [vmem:[#allocation3 + $0x1a4] ss:$16 sps:$4 sm:$0xff]  }
 0x22c   :  { %v955_v22 = vpop.f32.mrb[100].mxu1  ;;  %v604_v33 = vpop.f32.mrb[101].mxu0  ;;  %v2339_v23 = vmax.bf16 %v13061_v0, %v2211_v46  ;;  %10500 = vset.pattern.permute.xlu1 %v11118_v21  ;;  %v1811_v52 = vrot.slane %v1803_v14, %v11561_v3  ;;  %10501 = vset.pattern.permute.xlu0 %v11118_v21 }
 0x22d   :  { %v957_v6 = vpop.f32.mrb[101].mxu1  ;;  %v606_v25 = vpop.f32.mrb[102].mxu0  ;;  %3505 = vmatprep.subr.bf16.mxu0 %v2337_v20  ;;  %v10912_v20 = vld [vmem:[%s13057_s4] sm:$0xf] }
 0x22e   :  { %v1124_v32 = vpack.c.bf16 %v606_v25, %v602_v19  ;;  %v959_v30 = vpop.f32.mrb[102].mxu1  ;;  %4211 = vmatprep.subr.bf16.mxu1 %v2339_v23  ;;  %v608_v34 = vpop.f32.mrb[103].mxu0  ;;  %3506 = vmatpush1.bf16.msra.mxu0 %v2336_v24  ;;  %v10543_v24 = vld [vmem:[#allocation3 + $0x160] ss:$16 sps:$4 sm:$0xff]   ;;  %v9643_v25 = vcombine.low %v1811_v52, %v1823_v16 }
 0x22f   :  { %v1126_v36 = vpack.c.bf16 %v959_v30, %v955_v22  ;;  %v1125_v37 = vpack.c.bf16 %v608_v34, %v604_v33  ;;  %v961_v41 = vpop.f32.mrb[103].mxu1  ;;  %4212 = vmatpush1.bf16.msra.mxu1 %v2338_v26  ;;  %4677 = vperm.xlu1 %10500, %v10912_v20   ;;  %v1839_v30 = vpop.permute.xlu0 %1838 }
 0x230   :  { %v2212_v2 = vadd.bf16 %v9641_v31, %v1124_v32  ;;  %v1127_v39 = vpack.c.bf16 %v961_v41, %v957_v6  ;;  %v10913_v6 = vld [vmem:[%s13057_s4 + $0x4] sm:$0xf]  ;;  %v10914_v41 = vld [vmem:[%s13057_s4 + $0x8] sm:$0xf] }
 0x231   :  { %v2214_v47 = vadd.bf16 %v9641_v31, %v1126_v36  ;;  %3259 = vmatmul.mubr.bf16.gmra.mrb[164].mxu0 %v10537_v29  ;;  %v2213_v53 = vadd.bf16 %v9641_v31, %v1125_v37  ;;  %4688 = vperm.xlu0 %10501, %v10913_v6   ;;  %v10544_v32 = vld [vmem:[#allocation3 + $0x184] ss:$16 sps:$4 sm:$0xff]  }
 0x232   :  { %3965 = vmatmul.mubr.bf16.gmra.mrb[164].mxu1 %v10537_v29  ;;  %v2215_v57 = vadd.bf16 %v9641_v31, %v1127_v39  ;;  %3268 = vmatprep.mubr.bf16.mxu0 %v10538_v35  ;;  %v2340_v44 = vmax.bf16 %v13061_v0, %v2212_v2  ;;  %v1827_v2 = vpop.permute.xlu1 %1826 }
 0x233   :  { %v612_v51 = vpop.f32.mrb[104].mxu0  ;;  %v2341_v27 = vmax.bf16 %v13061_v0, %v2213_v53  ;;  %3974 = vmatprep.mubr.bf16.mxu1 %v10538_v35  ;;  %v2342_v58 = vmax.bf16 %v13061_v0, %v2214_v47  ;;  %4699 = vperm.xlu1 %10500, %v10914_v41   ;;  %v10915_v47 = vld [vmem:[%s13057_s4 + $0x10] sm:$0xf]  ;;  %v1847_v53 = vrot.slane %v1839_v30, %v11561_v3 }
 0x234   :  { %v965_v42 = vpop.f32.mrb[104].mxu1  ;;  %v614_v43 = vpop.f32.mrb[105].mxu0  ;;  %v2343_v59 = vmax.bf16 %v13061_v0, %v2215_v57 }
 0x235   :  { %v967_v55 = vpop.f32.mrb[105].mxu1  ;;  %v616_v56 = vpop.f32.mrb[106].mxu0  ;;  %3507 = vmatprep.subr.bf16.mxu0 %v2341_v27  ;;  %4721 = vperm.xlu0 %10501, %v10915_v47  }
 0x236   :  { %v1128_v28 = vpack.c.bf16 %v616_v56, %v612_v51  ;;  %v969_v4 = vpop.f32.mrb[106].mxu1  ;;  %4213 = vmatprep.subr.bf16.mxu1 %v2343_v59  ;;  %v618_v5 = vpop.f32.mrb[107].mxu0  ;;  %3508 = vmatpush1.bf16.msra.mxu0 %v2340_v44  ;;  %v1835_v51 = vrot.slane %v1827_v2, %v11561_v3  ;;  %v10916_v44 = vld [vmem:[%s13057_s4 + $0xc] sm:$0xf] }
 0x237   :  { %v1130_v38 = vpack.c.bf16 %v969_v4, %v965_v42  ;;  %v1129_v11 = vpack.c.bf16 %v618_v5, %v614_v43  ;;  %v971_v13 = vpop.f32.mrb[107].mxu1  ;;  %4214 = vmatpush1.bf16.msra.mxu1 %v2342_v58  ;;  %4710 = vperm.xlu1 %10500, %v10916_v44  }
 0x238   :  { %v2216_v12 = vadd.bf16 %v9642_v63, %v1128_v28  ;;  %v1131_v7 = vpack.c.bf16 %v971_v13, %v967_v55  ;;  %v9644_v28 = vcombine.low %v1835_v51, %v1847_v53 }
 0x239   :  { %v2218_v15 = vadd.bf16 %v9642_v63, %v1130_v38  ;;  %3269 = vmatmul.mubr.bf16.gmra.mrb[168].mxu0 %v10540_v62  ;;  %v2217_v54 = vadd.bf16 %v9642_v63, %v1129_v11  ;;  %v1863_v38 = vpop.permute.xlu0 %1862 }
 0x23a   :  { %3975 = vmatmul.mubr.bf16.gmra.mrb[168].mxu1 %v10540_v62  ;;  %v2219_v17 = vadd.bf16 %v9642_v63, %v1131_v7  ;;  %3278 = vmatprep.mubr.bf16.mxu0 %v10541_v8  ;;  %v2344_v19 = vmax.bf16 %v13061_v0, %v2216_v12  ;;  %v10546_v62 = vld [vmem:[#allocation3 + $0x180] ss:$16 sps:$4 sm:$0xff]   ;;  %v10917_v63 = vld [vmem:[%s13057_s4 + $0x18] sm:$0xf] }
 0x23b   :  { %v622_v49 = vpop.f32.mrb[108].mxu0  ;;  %v2345_v45 = vmax.bf16 %v13061_v0, %v2217_v54  ;;  %3984 = vmatprep.mubr.bf16.mxu1 %v10541_v8  ;;  %v2346_v23 = vmax.bf16 %v13061_v0, %v2218_v15  ;;  %4743 = vperm.xlu0 %10501, %v10917_v63   ;;  %v10918_v15 = vld [vmem:[%s13057_s4 + $0x14] sm:$0xf]  ;;  %v1851_v54 = vpop.permute.xlu1 %1850 }
 0x23c   :  { %v975_v50 = vpop.f32.mrb[108].mxu1  ;;  %v624_v18 = vpop.f32.mrb[109].mxu0  ;;  %v2347_v46 = vmax.bf16 %v13061_v0, %v2219_v17  ;;  %4732 = vperm.xlu1 %10500, %v10918_v15  }
 0x23d   :  { %v977_v22 = vpop.f32.mrb[109].mxu1  ;;  %v626_v33 = vpop.f32.mrb[110].mxu0  ;;  %3509 = vmatprep.subr.bf16.mxu0 %v2345_v45  ;;  %v1871_v45 = vrot.slane %v1863_v38, %v11561_v3 }
 0x23e   :  { %v1132_v26 = vpack.c.bf16 %v626_v33, %v622_v49  ;;  %v979_v29 = vpop.f32.mrb[110].mxu1  ;;  %4215 = vmatprep.subr.bf16.mxu1 %v2347_v46  ;;  %v628_v31 = vpop.f32.mrb[111].mxu0  ;;  %3510 = vmatpush1.bf16.msra.mxu0 %v2344_v19  ;;  %v10919_v49 = vld [vmem:[%s13057_s4 + $0x20] sm:$0xf]  ;;  %v10920_v33 = vld [vmem:[%s13057_s4 + $0x1c] sm:$0xf] }
 0x23f   :  { %v1134_v34 = vpack.c.bf16 %v979_v29, %v975_v50  ;;  %v1133_v35 = vpack.c.bf16 %v628_v31, %v624_v18  ;;  %v981_v9 = vpop.f32.mrb[111].mxu1  ;;  %4216 = vmatpush1.bf16.msra.mxu1 %v2346_v23  ;;  %4765 = vperm.xlu0 %10501, %v10919_v49   ;;  %v1859_v18 = vrot.slane %v1851_v54, %v11561_v3 }
 0x240   :  { %v2220_v36 = vadd.bf16 %v9643_v25, %v1132_v26  ;;  %v1135_v37 = vpack.c.bf16 %v981_v9, %v977_v22  ;;  %4754 = vperm.xlu1 %10500, %v10920_v33   ;;  %v10921_v26 = vld [vmem:[%s13057_s4 + $0x28] sm:$0xf] }
 0x241   :  { %v2222_v39 = vadd.bf16 %v9643_v25, %v1134_v34  ;;  %3279 = vmatmul.mubr.bf16.gmra.mrb[172].mxu0 %v10543_v24  ;;  %v2221_v61 = vadd.bf16 %v9643_v25, %v1133_v35  ;;  %v9645_v29 = vcombine.low %v1859_v18, %v1871_v45  ;;  %v10550_v34 = vld [vmem:[#allocation3 + $0x1c4] ss:$16 sps:$4 sm:$0xff]   ;;  %v1887_v35 = vpop.permute.xlu0 %1886 }
 0x242   :  { %3985 = vmatmul.mubr.bf16.gmra.mrb[172].mxu1 %v10543_v24  ;;  %v2223_v48 = vadd.bf16 %v9643_v25, %v1135_v37  ;;  %3288 = vmatprep.mubr.bf16.mxu0 %v10544_v32  ;;  %v2348_v59 = vmax.bf16 %v13061_v0, %v2220_v36  ;;  %v10549_v25 = vld [vmem:[#allocation3 + $0x1a0] ss:$16 sps:$4 sm:$0xff]  }
 0x243   :  { %v632_v40 = vpop.f32.mrb[112].mxu0  ;;  %v2349_v57 = vmax.bf16 %v13061_v0, %v2221_v61  ;;  %3994 = vmatprep.mubr.bf16.mxu1 %v10544_v32  ;;  %v2350_v58 = vmax.bf16 %v13061_v0, %v2222_v39  ;;  %4787 = vperm.xlu0 %10501, %v10921_v26   ;;  %v10922_v39 = vld [vmem:[%s13057_s4 + $0x24] sm:$0xf]  ;;  %v1875_v61 = vpop.permute.xlu1 %1874 }
 0x244   :  { %v985_v27 = vpop.f32.mrb[112].mxu1  ;;  %v634_v42 = vpop.f32.mrb[113].mxu0  ;;  %v2351_v43 = vmax.bf16 %v13061_v0, %v2223_v48  ;;  %4776 = vperm.xlu1 %10500, %v10922_v39   ;;  %v10923_v48 = vld [vmem:[%s13057_s4 + $0x30] sm:$0xf] }
 0x245   :  { %v987_v55 = vpop.f32.mrb[113].mxu1  ;;  %v636_v56 = vpop.f32.mrb[114].mxu0  ;;  %3511 = vmatprep.subr.bf16.mxu0 %v2349_v57 }
 0x246   :  { %v1136_v4 = vpack.c.bf16 %v636_v56, %v632_v40  ;;  %v989_v5 = vpop.f32.mrb[114].mxu1  ;;  %4217 = vmatprep.subr.bf16.mxu1 %v2351_v43  ;;  %v638_v8 = vpop.f32.mrb[115].mxu0  ;;  %3512 = vmatpush1.bf16.msra.mxu0 %v2348_v59  ;;  %v1895_v40 = vrot.slane %v1887_v35, %v11561_v3  ;;  %v10924_v56 = vld [vmem:[%s13057_s4 + $0x2c] sm:$0xf] }
 0x247   :  { %v1138_v11 = vpack.c.bf16 %v989_v5, %v985_v27  ;;  %v1137_v13 = vpack.c.bf16 %v638_v8, %v634_v42  ;;  %v991_v12 = vpop.f32.mrb[115].mxu1  ;;  %4218 = vmatpush1.bf16.msra.mxu1 %v2350_v58  ;;  %4809 = vperm.xlu0 %10501, %v10923_v48   ;;  %v1883_v42 = vrot.slane %v1875_v61, %v11561_v3  ;;  %v10930_v61 = vld [vmem:[%s13057_s4 + $0x44] sm:$0xf]  ;;  %v10931_v48 = vld [vmem:[%s13057_s4 + $0x50] sm:$0xf] }
 0x248   :  { %v2224_v7 = vadd.bf16 %v9644_v28, %v1136_v4  ;;  %v1139_v14 = vpack.c.bf16 %v991_v12, %v987_v55  ;;  %4798 = vperm.xlu1 %10500, %v10924_v56   ;;  %v10925_v4 = vld [vmem:[%s13057_s4 + $0x38] sm:$0xf]  ;;  %v10934_v56 = vld [vmem:[%s13057_s4 + $0x54] sm:$0xf] }
 0x249   :  { %v2226_v16 = vadd.bf16 %v9644_v28, %v1138_v11  ;;  %3289 = vmatmul.mubr.bf16.gmra.mrb[176].mxu0 %v10546_v62  ;;  %v2225_v17 = vadd.bf16 %v9644_v28, %v1137_v13  ;;  %v9646_v5 = vcombine.low %v1883_v42, %v1895_v40  ;;  %v10553_v11 = vld [vmem:[#allocation3 + $0x1e4] ss:$16 sps:$4 sm:$0xff]   ;;  %v1911_v13 = vpop.permute.xlu0 %1910  ;;  %v10932_v42 = vld [vmem:[%s13057_s4 + $0x4c] sm:$0xf] }
 0x24a   :  { %3995 = vmatmul.mubr.bf16.gmra.mrb[176].mxu1 %v10546_v62  ;;  %v2227_v21 = vadd.bf16 %v9644_v28, %v1139_v14  ;;  %3298 = vmatprep.mubr.bf16.mxu0 %v10547_v10  ;;  %v2352_v22 = vmax.bf16 %v13061_v0, %v2224_v7  ;;  %v10552_v28 = vld [vmem:[#allocation3 + $0x1c0] ss:$16 sps:$4 sm:$0xff]  }
 0x24b   :  { %v642_v52 = vpop.f32.mrb[116].mxu0  ;;  %v2353_v50 = vmax.bf16 %v13061_v0, %v2225_v17  ;;  %4004 = vmatprep.mubr.bf16.mxu1 %v10547_v10  ;;  %v2354_v6 = vmax.bf16 %v13061_v0, %v2226_v16  ;;  %4831 = vperm.xlu0 %10501, %v10925_v4   ;;  %v10926_v16 = vld [vmem:[%s13057_s4 + $0x34] sm:$0xf]  ;;  %v1899_v17 = vpop.permute.xlu1 %1898 }
 0x24c   :  { %v995_v46 = vpop.f32.mrb[116].mxu1  ;;  %v644_v19 = vpop.f32.mrb[117].mxu0  ;;  %v2355_v20 = vmax.bf16 %v13061_v0, %v2227_v21  ;;  %4820 = vperm.xlu1 %10500, %v10926_v16   ;;  %v10927_v21 = vld [vmem:[%s13057_s4 + $0x40] sm:$0xf]  ;;  %v10562_v4 = vld [vmem:[#allocation3 + $0x244] ss:$16 sps:$4 sm:$0xff]  }
 0x24d   :  { %v997_v23 = vpop.f32.mrb[117].mxu1  ;;  %v646_v24 = vpop.f32.mrb[118].mxu0  ;;  %3513 = vmatprep.subr.bf16.mxu0 %v2353_v50  ;;  %v10568_v16 = vld [vmem:[#allocation3 + $0x284] ss:$16 sps:$4 sm:$0xff]  }
 0x24e   :  { %v1140_v31 = vpack.c.bf16 %v646_v24, %v642_v52  ;;  %v999_v32 = vpop.f32.mrb[118].mxu1  ;;  %4219 = vmatprep.subr.bf16.mxu1 %v2355_v20  ;;  %v648_v30 = vpop.f32.mrb[119].mxu0  ;;  %3514 = vmatpush1.bf16.msra.mxu0 %v2352_v22  ;;  %v1919_v52 = vrot.slane %v1911_v13, %v11561_v3  ;;  %v10928_v24 = vld [vmem:[%s13057_s4 + $0x3c] sm:$0xf]  ;;  %v10565_v13 = vld [vmem:[#allocation3 + $0x264] ss:$16 sps:$4 sm:$0xff]  }
 0x24f   :  { %v1142_v9 = vpack.c.bf16 %v999_v32, %v995_v46  ;;  %v1141_v36 = vpack.c.bf16 %v648_v30, %v644_v19  ;;  %v1001_v37 = vpop.f32.mrb[119].mxu1  ;;  %4220 = vmatpush1.bf16.msra.mxu1 %v2354_v6  ;;  %4853 = vperm.xlu0 %10501, %v10927_v21   ;;  %v1907_v19 = vrot.slane %v1899_v17, %v11561_v3  ;;  %v10946_v17 = vld [vmem:[%s13057_s4 + $0x84] sm:$0xf]  ;;  %v10570_v21 = vld [vmem:[#allocation3 + $0x280] ss:$16 sps:$4 sm:$0xff]  }
 0x250   :  { %v2228_v41 = vadd.bf16 %v9645_v29, %v1140_v31  ;;  %v1143_v2 = vpack.c.bf16 %v1001_v37, %v997_v23  ;;  %4842 = vperm.xlu1 %10500, %v10928_v24   ;;  %v10929_v31 = vld [vmem:[%s13057_s4 + $0x48] sm:$0xf]  ;;  %v10955_v24 = vld [vmem:[%s13057_s4 + $0xb0] sm:$0xf] }
 0x251   :  { %v2230_v47 = vadd.bf16 %v9645_v29, %v1142_v9  ;;  %3299 = vmatmul.mubr.bf16.gmra.mrb[180].mxu0 %v10549_v25  ;;  %v2229_v53 = vadd.bf16 %v9645_v29, %v1141_v36  ;;  %v9647_v32 = vcombine.low %v1907_v19, %v1919_v52  ;;  %v10556_v9 = vld [vmem:[#allocation3 + $0x204] ss:$16 sps:$4 sm:$0xff]   ;;  %v10949_v52 = vld [vmem:[%s13057_s4 + $0x98] sm:$0xf]  ;;  %v10952_v19 = vld [vmem:[%s13057_s4 + $0x9c] sm:$0xf] }
 0x252   :  { %4005 = vmatmul.mubr.bf16.gmra.mrb[180].mxu1 %v10549_v25  ;;  %v2231_v57 = vadd.bf16 %v9645_v29, %v1143_v2  ;;  %3308 = vmatprep.mubr.bf16.mxu0 %v10550_v34  ;;  %v2356_v55 = vmax.bf16 %v13061_v0, %v2228_v41  ;;  %v10555_v29 = vld [vmem:[#allocation3 + $0x1e0] ss:$16 sps:$4 sm:$0xff]  }
 0x253   :  { %v652_v51 = vpop.f32.mrb[120].mxu0  ;;  %v2357_v27 = vmax.bf16 %v13061_v0, %v2229_v53  ;;  %4014 = vmatprep.mubr.bf16.mxu1 %v10550_v34  ;;  %v2358_v63 = vmax.bf16 %v13061_v0, %v2230_v47  ;;  %4875 = vperm.xlu0 %10501, %v10929_v31   ;;  %v10958_v31 = vld [vmem:[%s13057_s4 + $0xb4] sm:$0xf] }
 0x254   :  { %v1005_v43 = vpop.f32.mrb[120].mxu1  ;;  %v654_v59 = vpop.f32.mrb[121].mxu0  ;;  %v2359_v44 = vmax.bf16 %v13061_v0, %v2231_v57  ;;  %4864 = vperm.xlu1 %10500, %v10930_v61   ;;  %v10583_v61 = vld [vmem:[#allocation3 + $0x324] ss:$16 sps:$4 sm:$0xff]  }
 0x255   :  { %v1007_v58 = vpop.f32.mrb[121].mxu1  ;;  %v656_v62 = vpop.f32.mrb[122].mxu0  ;;  %3515 = vmatprep.subr.bf16.mxu0 %v2357_v27 }
 0x256   :  { %v1144_v8 = vpack.c.bf16 %v656_v62, %v652_v51  ;;  %v1009_v10 = vpop.f32.mrb[122].mxu1  ;;  %4221 = vmatprep.subr.bf16.mxu1 %v2359_v44  ;;  %v658_v38 = vpop.f32.mrb[123].mxu0  ;;  %3516 = vmatpush1.bf16.msra.mxu0 %v2356_v55  ;;  %v10933_v44 = vld [vmem:[%s13057_s4 + $0x58] sm:$0xf]  ;;  %v10559_v55 = vld [vmem:[#allocation3 + $0x224] ss:$16 sps:$4 sm:$0xff]  }
 0x257   :  { %v1146_v12 = vpack.c.bf16 %v1009_v10, %v1005_v43  ;;  %v1145_v7 = vpack.c.bf16 %v658_v38, %v654_v59  ;;  %v1011_v14 = vpop.f32.mrb[123].mxu1  ;;  %4222 = vmatpush1.bf16.msra.mxu1 %v2358_v63  ;;  %4897 = vperm.xlu0 %10501, %v10931_v48   ;;  %v10558_v59 = vld [vmem:[#allocation3 + $0x200] ss:$16 sps:$4 sm:$0xff]   ;;  %v10936_v62 = vld [vmem:[%s13057_s4 + $0x5c] sm:$0xf] }
 0x258   :  { %v2232_v15 = vadd.bf16 %v9646_v5, %v1144_v8  ;;  %v1147_v54 = vpack.c.bf16 %v1011_v14, %v1007_v58  ;;  %4886 = vperm.xlu1 %10500, %v10932_v42   ;;  %v10935_v58 = vld [vmem:[%s13057_s4 + $0x60] sm:$0xf]  ;;  %v10939_v8 = vld [vmem:[%s13057_s4 + $0x70] sm:$0xf]  ;;  %v10940_v10 = vld [vmem:[%s13057_s4 + $0x6c] sm:$0xf] }
 0x259   :  { %v2234_v49 = vadd.bf16 %v9646_v5, %v1146_v12  ;;  %3309 = vmatmul.mubr.bf16.gmra.mrb[184].mxu0 %v10552_v28  ;;  %v2233_v45 = vadd.bf16 %v9646_v5, %v1145_v7  ;;  %v10561_v63 = vld [vmem:[#allocation3 + $0x220] ss:$16 sps:$4 sm:$0xff]   ;;  %v10942_v12 = vld [vmem:[%s13057_s4 + $0x74] sm:$0xf]  ;;  %v10944_v14 = vld [vmem:[%s13057_s4 + $0x7c] sm:$0xf] }
 0x25a   :  { %4015 = vmatmul.mubr.bf16.gmra.mrb[184].mxu1 %v10552_v28  ;;  %v2235_v50 = vadd.bf16 %v9646_v5, %v1147_v54  ;;  %3318 = vmatprep.mubr.bf16.mxu0 %v10553_v11  ;;  %v2360_v23 = vmax.bf16 %v13061_v0, %v2232_v15  ;;  %v10937_v28 = vld [vmem:[%s13057_s4 + $0x68] sm:$0xf]  ;;  %v10938_v5 = vld [vmem:[%s13057_s4 + $0x64] sm:$0xf]  ;;  %v10564_v38 = vld [vmem:[#allocation3 + $0x240] ss:$16 sps:$4 sm:$0xff]  }
 0x25b   :  { %v662_v18 = vpop.f32.mrb[124].mxu0  ;;  %v2361_v46 = vmax.bf16 %v13061_v0, %v2233_v45  ;;  %4024 = vmatprep.mubr.bf16.mxu1 %v10553_v11  ;;  %v2362_v26 = vmax.bf16 %v13061_v0, %v2234_v49  ;;  %4919 = vperm.xlu0 %10501, %v10933_v44   ;;  %v10941_v11 = vld [vmem:[%s13057_s4 + $0x78] sm:$0xf]  ;;  %v10943_v7 = vld [vmem:[%s13057_s4 + $0x80] sm:$0xf] }
 0x25c   :  { %v1015_v20 = vpop.f32.mrb[124].mxu1  ;;  %v664_v22 = vpop.f32.mrb[125].mxu0  ;;  %v2363_v33 = vmax.bf16 %v13061_v0, %v2235_v50  ;;  %4908 = vperm.xlu1 %10500, %v10934_v56   ;;  %v10567_v15 = vld [vmem:[#allocation3 + $0x260] ss:$16 sps:$4 sm:$0xff]   ;;  %v10945_v54 = vld [vmem:[%s13057_s4 + $0x88] sm:$0xf] }
 0x25d   :  { %v1017_v6 = vpop.f32.mrb[125].mxu1  ;;  %v666_v25 = vpop.f32.mrb[126].mxu0  ;;  %3517 = vmatprep.subr.bf16.mxu0 %v2361_v46  ;;  %v10947_v49 = vld [vmem:[%s13057_s4 + $0x90] sm:$0xf]  ;;  %v10948_v45 = vld [vmem:[%s13057_s4 + $0x8c] sm:$0xf] }
 0x25e   :  { %v1148_v30 = vpack.c.bf16 %v666_v25, %v662_v18  ;;  %v1019_v34 = vpop.f32.mrb[126].mxu1  ;;  %4223 = vmatprep.subr.bf16.mxu1 %v2363_v33  ;;  %v668_v35 = vpop.f32.mrb[127].mxu0  ;;  %3518 = vmatpush1.bf16.msra.mxu0 %v2360_v23  ;;  %v10571_v50 = vld [vmem:[#allocation3 + $0x2a4] ss:$16 sps:$4 sm:$0xff]   ;;  %v10951_v46 = vld [vmem:[%s13057_s4 + $0xa0] sm:$0xf] }
 0x25f   :  { %v1150_v36 = vpack.c.bf16 %v1019_v34, %v1015_v20  ;;  %v1149_v37 = vpack.c.bf16 %v668_v35, %v664_v22  ;;  %v1021_v41 = vpop.f32.mrb[127].mxu1  ;;  %4224 = vmatpush1.bf16.msra.mxu1 %v2362_v26  ;;  %4941 = vperm.xlu0 %10501, %v10935_v58   ;;  %v10950_v18 = vld [vmem:[%s13057_s4 + $0x94] sm:$0xf]  ;;  %v10573_v20 = vld [vmem:[#allocation3 + $0x2a0] ss:$16 sps:$4 sm:$0xff]  }
 0x260   :  { %v2236_v2 = vadd.bf16 %v9647_v32, %v1148_v30  ;;  %v1151_v39 = vpack.c.bf16 %v1021_v41, %v1017_v6  ;;  %4930 = vperm.xlu1 %10500, %v10936_v62   ;;  %v10953_v22 = vld [vmem:[%s13057_s4 + $0xa8] sm:$0xf]  ;;  %v10574_v33 = vld [vmem:[#allocation3 + $0x2c4] ss:$16 sps:$4 sm:$0xff]   ;;  %v10956_v6 = vld [vmem:[%s13057_s4 + $0xac] sm:$0xf] }
 0x261   :  { %v2238_v47 = vadd.bf16 %v9647_v32, %v1150_v36  ;;  %3319 = vmatmul.mubr.bf16.gmra.mrb[188].mxu0 %v10555_v29  ;;  %v2237_v53 = vadd.bf16 %v9647_v32, %v1149_v37  ;;  %v10954_v23 = vld [vmem:[%s13057_s4 + $0xa4] sm:$0xf]  ;;  %v10576_v25 = vld [vmem:[#allocation3 + $0x2c0] ss:$16 sps:$4 sm:$0xff]   ;;  %v10957_v26 = vld [vmem:[%s13057_s4 + $0xb8] sm:$0xf] }
 0x262   :  { %4025 = vmatmul.mubr.bf16.gmra.mrb[188].mxu1 %v10555_v29  ;;  %v2239_v40 = vadd.bf16 %v9647_v32, %v1151_v39  ;;  %3328 = vmatprep.mubr.bf16.mxu0 %v10556_v9  ;;  %v2364_v27 = vmax.bf16 %v13061_v0, %v2236_v2  ;;  %v10577_v29 = vld [vmem:[#allocation3 + $0x2e4] ss:$16 sps:$4 sm:$0xff]   ;;  %v10959_v32 = vld [vmem:[%s13057_s4 + $0xc0] sm:$0xf]  ;;  %v10960_v30 = vld [vmem:[%s13057_s4 + $0xbc] sm:$0xf] }
 0x263   :  { %v2365_v57 = vmax.bf16 %v13061_v0, %v2237_v53  ;;  %4034 = vmatprep.mubr.bf16.mxu1 %v10556_v9  ;;  %v2366_v43 = vmax.bf16 %v13061_v0, %v2238_v47  ;;  %4963 = vperm.xlu0 %10501, %v10937_v28   ;;  %v10579_v34 = vld [vmem:[#allocation3 + $0x2e0] ss:$16 sps:$4 sm:$0xff]   ;;  %v10961_v35 = vld [vmem:[%s13057_s4 + $0xc8] sm:$0xf]  ;;  %v10580_v9 = vld [vmem:[#allocation3 + $0x304] ss:$16 sps:$4 sm:$0xff]  }
 0x264   :  { %v2367_v51 = vmax.bf16 %v13061_v0, %v2239_v40  ;;  %4952 = vperm.xlu1 %10500, %v10938_v5   ;;  %v10962_v36 = vld [vmem:[%s13057_s4 + $0xc4] sm:$0xf]  ;;  %v10963_v37 = vld [vmem:[%s13057_s4 + $0xd0] sm:$0xf]  ;;  %v10964_v41 = vld [vmem:[%s13057_s4 + $0xcc] sm:$0xf] }
 0x265   :  { %3519 = vmatprep.subr.bf16.mxu0 %v2365_v57  ;;  %v10582_v2 = vld [vmem:[#allocation3 + $0x300] ss:$16 sps:$4 sm:$0xff]   ;;  %v10965_v39 = vld [vmem:[%s13057_s4 + $0xd8] sm:$0xf]  ;;  %v10966_v47 = vld [vmem:[%s13057_s4 + $0xd4] sm:$0xf] }
 0x266   :  { %4225 = vmatprep.subr.bf16.mxu1 %v2367_v51  ;;  %3520 = vmatpush1.bf16.msra.mxu0 %v2364_v27  ;;  %v10967_v53 = vld [vmem:[%s13057_s4 + $0xe0] sm:$0xf]  ;;  %v10968_v48 = vld [vmem:[%s13057_s4 + $0xdc] sm:$0xf]  ;;  %v10969_v57 = vld [vmem:[%s13057_s4 + $0xe8] sm:$0xf] }
 0x267   :  { %4226 = vmatpush1.bf16.msra.mxu1 %v2366_v43  ;;  %4985 = vperm.xlu0 %10501, %v10939_v8   ;;  %v10585_v40 = vld [vmem:[#allocation3 + $0x320] ss:$16 sps:$4 sm:$0xff]   ;;  %v10586_v51 = vld [vmem:[#allocation3 + $0x344] ss:$16 sps:$4 sm:$0xff]   ;;  %v10972_v43 = vld [vmem:[%s13057_s4 + $0xec] sm:$0xf] }
 0x268   :  { %4974 = vperm.xlu1 %10500, %v10940_v10   ;;  %v10970_v27 = vld [vmem:[%s13057_s4 + $0xe4] sm:$0xf]  ;;  %v10971_v42 = vld [vmem:[%s13057_s4 + $0xf0] sm:$0xf]  ;;  %v10973_v44 = vld [vmem:[%s13057_s4 + $0xf8] sm:$0xf] }
 0x269   :  { %3329 = vmatmul.mubr.bf16.gmra.mrb[192].mxu0 %v10558_v59  ;;  %v10974_v56 = vld [vmem:[%s13057_s4 + $0xf4] sm:$0xf]  ;;  %v10975_v58 = vld [vmem:[%s13057_s4 + $0xfc] sm:$0xf]  ;;  %v10591_v62 = vld [vmem:[#allocation3 + $0x360] ss:$16 sps:$4 sm:$0xff]  }
 0x26a   :  { %4035 = vmatmul.mubr.bf16.gmra.mrb[192].mxu1 %v10558_v59  ;;  %3338 = vmatprep.mubr.bf16.mxu0 %v10559_v55  ;;  %v10588_v59 = vld [vmem:[#allocation3 + $0x340] ss:$16 sps:$4 sm:$0xff]   ;;  %v10598_v8 = vld [vmem:[#allocation3 + $0x3c4] ss:$16 sps:$4 sm:$0xff]  }
 0x26b   :  { %4044 = vmatprep.mubr.bf16.mxu1 %v10559_v55  ;;  %5007 = vperm.xlu0 %10501, %v10941_v11   ;;  %v10589_v55 = vld [vmem:[#allocation3 + $0x364] ss:$16 sps:$4 sm:$0xff]   ;;  %v10594_v28 = vld [vmem:[#allocation3 + $0x380] ss:$16 sps:$4 sm:$0xff]  }
 0x26c   :  { %4996 = vperm.xlu1 %10500, %v10942_v12   ;;  %v10597_v5 = vld [vmem:[#allocation3 + $0x3a0] ss:$16 sps:$4 sm:$0xff]   ;;  %v10604_v12 = vld [vmem:[#allocation3 + $0x8] ss:$16 sps:$4 sm:$0xff]  }
 0x26d   :  { %v10600_v10 = vld [vmem:[#allocation3 + $0x3c0] ss:$16 sps:$4 sm:$0xff]  }
 0x26e   :  { %v10603_v11 = vld [vmem:[#allocation3 + $0x3e0] ss:$16 sps:$4 sm:$0xff]  }
 0x26f   :  { %5029 = vperm.xlu0 %10501, %v10943_v7   ;;  %v10607_v7 = vld [vmem:[#allocation3 + $0x2c] ss:$16 sps:$4 sm:$0xff]  }
 0x270   :  { %5018 = vperm.xlu1 %10500, %v10944_v14   ;;  %v10609_v14 = vld [vmem:[#allocation3 + $0x28] ss:$16 sps:$4 sm:$0xff]  }
 0x271   :  { %3339 = vmatmul.mubr.bf16.gmra.mrb[196].mxu0 %v10561_v63 }
 0x272   :  { %4045 = vmatmul.mubr.bf16.gmra.mrb[196].mxu1 %v10561_v63  ;;  %3348 = vmatprep.mubr.bf16.mxu0 %v10562_v4  ;;  %v10592_v63 = vld [vmem:[#allocation3 + $0x384] ss:$16 sps:$4 sm:$0xff]  }
 0x273   :  { %4054 = vmatprep.mubr.bf16.mxu1 %v10562_v4  ;;  %5051 = vperm.xlu0 %10501, %v10945_v54   ;;  %v10595_v4 = vld [vmem:[#allocation3 + $0x3a4] ss:$16 sps:$4 sm:$0xff]   ;;  %v10612_v54 = vld [vmem:[#allocation3 + $0x48] ss:$16 sps:$4 sm:$0xff]  }
 0x274   :  { %5040 = vperm.xlu1 %10500, %v10946_v17   ;;  %v10615_v17 = vld [vmem:[#allocation3 + $0x68] ss:$16 sps:$4 sm:$0xff]  }
 0x277   :  { %5073 = vperm.xlu0 %10501, %v10947_v49   ;;  %v10616_v49 = vld [vmem:[#allocation3 + $0x8c] ss:$16 sps:$4 sm:$0xff]  }
 0x278   :  { %5062 = vperm.xlu1 %10500, %v10948_v45   ;;  %v10618_v45 = vld [vmem:[#allocation3 + $0x88] ss:$16 sps:$4 sm:$0xff]  }
 0x279   :  { %3349 = vmatmul.mubr.bf16.gmra.mrb[200].mxu0 %v10564_v38 }
 0x27a   :  { %4055 = vmatmul.mubr.bf16.gmra.mrb[200].mxu1 %v10564_v38  ;;  %3358 = vmatprep.mubr.bf16.mxu0 %v10565_v13  ;;  %v10601_v38 = vld [vmem:[#allocation3 + $0x3e4] ss:$16 sps:$4 sm:$0xff]  }
 0x27b   :  { %4064 = vmatprep.mubr.bf16.mxu1 %v10565_v13  ;;  %5095 = vperm.xlu0 %10501, %v10949_v52   ;;  %v10606_v13 = vld [vmem:[#allocation3 + $0xc] ss:$16 sps:$4 sm:$0xff]   ;;  %v10621_v52 = vld [vmem:[#allocation3 + $0xa8] ss:$16 sps:$4 sm:$0xff]  }
 0x27c   :  { %5084 = vperm.xlu1 %10500, %v10950_v18   ;;  %v10624_v18 = vld [vmem:[#allocation3 + $0xc8] ss:$16 sps:$4 sm:$0xff]  }
 0x27f   :  { %5117 = vperm.xlu0 %10501, %v10951_v46   ;;  %v10625_v46 = vld [vmem:[#allocation3 + $0xec] ss:$16 sps:$4 sm:$0xff]  }
 0x280   :  { %5106 = vperm.xlu1 %10500, %v10952_v19   ;;  %v10627_v19 = vld [vmem:[#allocation3 + $0xe8] ss:$16 sps:$4 sm:$0xff]  }
 0x281   :  { %3359 = vmatmul.mubr.bf16.gmra.mrb[204].mxu0 %v10567_v15 }
 0x282   :  { %4065 = vmatmul.mubr.bf16.gmra.mrb[204].mxu1 %v10567_v15  ;;  %3368 = vmatprep.mubr.bf16.mxu0 %v10568_v16  ;;  %v10610_v15 = vld [vmem:[#allocation3 + $0x4c] ss:$16 sps:$4 sm:$0xff]  }
 0x283   :  { %4074 = vmatprep.mubr.bf16.mxu1 %v10568_v16  ;;  %5139 = vperm.xlu0 %10501, %v10953_v22   ;;  %v10613_v16 = vld [vmem:[#allocation3 + $0x6c] ss:$16 sps:$4 sm:$0xff]   ;;  %v10630_v22 = vld [vmem:[#allocation3 + $0x108] ss:$16 sps:$4 sm:$0xff]  }
 0x284   :  { %5128 = vperm.xlu1 %10500, %v10954_v23   ;;  %v10633_v23 = vld [vmem:[#allocation3 + $0x128] ss:$16 sps:$4 sm:$0xff]  }
 0x287   :  { %5161 = vperm.xlu0 %10501, %v10955_v24   ;;  %v10634_v24 = vld [vmem:[#allocation3 + $0x14c] ss:$16 sps:$4 sm:$0xff]  }
 0x288   :  { %5150 = vperm.xlu1 %10500, %v10956_v6   ;;  %v10636_v6 = vld [vmem:[#allocation3 + $0x148] ss:$16 sps:$4 sm:$0xff]  }
 0x289   :  { %3369 = vmatmul.mubr.bf16.gmra.mrb[208].mxu0 %v10570_v21 }
 0x28a   :  { %4075 = vmatmul.mubr.bf16.gmra.mrb[208].mxu1 %v10570_v21  ;;  %3378 = vmatprep.mubr.bf16.mxu0 %v10571_v50  ;;  %v10619_v21 = vld [vmem:[#allocation3 + $0xac] ss:$16 sps:$4 sm:$0xff]  }
 0x28b   :  { %4084 = vmatprep.mubr.bf16.mxu1 %v10571_v50  ;;  %5183 = vperm.xlu0 %10501, %v10957_v26   ;;  %v10622_v50 = vld [vmem:[#allocation3 + $0xcc] ss:$16 sps:$4 sm:$0xff]   ;;  %v10639_v26 = vld [vmem:[#allocation3 + $0x168] ss:$16 sps:$4 sm:$0xff]  }
 0x28c   :  { %5172 = vperm.xlu1 %10500, %v10958_v31   ;;  %v10642_v31 = vld [vmem:[#allocation3 + $0x188] ss:$16 sps:$4 sm:$0xff]  }
 0x28f   :  { %5205 = vperm.xlu0 %10501, %v10959_v32   ;;  %v10643_v32 = vld [vmem:[#allocation3 + $0x1ac] ss:$16 sps:$4 sm:$0xff]  }
 0x290   :  { %5194 = vperm.xlu1 %10500, %v10960_v30   ;;  %v10645_v30 = vld [vmem:[#allocation3 + $0x1a8] ss:$16 sps:$4 sm:$0xff]  }
 0x291   :  { %3379 = vmatmul.mubr.bf16.gmra.mrb[212].mxu0 %v10573_v20 }
 0x292   :  { %4085 = vmatmul.mubr.bf16.gmra.mrb[212].mxu1 %v10573_v20  ;;  %3388 = vmatprep.mubr.bf16.mxu0 %v10574_v33  ;;  %v10628_v20 = vld [vmem:[#allocation3 + $0x10c] ss:$16 sps:$4 sm:$0xff]  }
 0x293   :  { %4094 = vmatprep.mubr.bf16.mxu1 %v10574_v33  ;;  %5227 = vperm.xlu0 %10501, %v10961_v35   ;;  %v10631_v33 = vld [vmem:[#allocation3 + $0x12c] ss:$16 sps:$4 sm:$0xff]   ;;  %v10648_v35 = vld [vmem:[#allocation3 + $0x1c8] ss:$16 sps:$4 sm:$0xff]  }
 0x294   :  { %5216 = vperm.xlu1 %10500, %v10962_v36   ;;  %v10651_v36 = vld [vmem:[#allocation3 + $0x1e8] ss:$16 sps:$4 sm:$0xff]  }
 0x297   :  { %5249 = vperm.xlu0 %10501, %v10963_v37   ;;  %v10652_v37 = vld [vmem:[#allocation3 + $0x20c] ss:$16 sps:$4 sm:$0xff]  }
 0x298   :  { %5238 = vperm.xlu1 %10500, %v10964_v41   ;;  %v10654_v41 = vld [vmem:[#allocation3 + $0x208] ss:$16 sps:$4 sm:$0xff]  }
 0x299   :  { %3389 = vmatmul.mubr.bf16.gmra.mrb[216].mxu0 %v10576_v25 }
 0x29a   :  { %4095 = vmatmul.mubr.bf16.gmra.mrb[216].mxu1 %v10576_v25  ;;  %3398 = vmatprep.mubr.bf16.mxu0 %v10577_v29  ;;  %v10637_v25 = vld [vmem:[#allocation3 + $0x16c] ss:$16 sps:$4 sm:$0xff]  }
 0x29b   :  { %4104 = vmatprep.mubr.bf16.mxu1 %v10577_v29  ;;  %5271 = vperm.xlu0 %10501, %v10965_v39   ;;  %v10640_v29 = vld [vmem:[#allocation3 + $0x18c] ss:$16 sps:$4 sm:$0xff]   ;;  %v10657_v39 = vld [vmem:[#allocation3 + $0x228] ss:$16 sps:$4 sm:$0xff]  }
 0x29c   :  { %5260 = vperm.xlu1 %10500, %v10966_v47   ;;  %v10660_v47 = vld [vmem:[#allocation3 + $0x248] ss:$16 sps:$4 sm:$0xff]  }
 0x29f   :  { %5293 = vperm.xlu0 %10501, %v10967_v53   ;;  %v10661_v53 = vld [vmem:[#allocation3 + $0x26c] ss:$16 sps:$4 sm:$0xff]  }
 0x2a0   :  { %5282 = vperm.xlu1 %10500, %v10968_v48   ;;  %v10663_v48 = vld [vmem:[#allocation3 + $0x268] ss:$16 sps:$4 sm:$0xff]  }
 0x2a1   :  { %3399 = vmatmul.mubr.bf16.gmra.mrb[220].mxu0 %v10579_v34 }
 0x2a2   :  { %4105 = vmatmul.mubr.bf16.gmra.mrb[220].mxu1 %v10579_v34  ;;  %3408 = vmatprep.mubr.bf16.mxu0 %v10580_v9  ;;  %v10646_v34 = vld [vmem:[#allocation3 + $0x1cc] ss:$16 sps:$4 sm:$0xff]  }
 0x2a3   :  { %4114 = vmatprep.mubr.bf16.mxu1 %v10580_v9  ;;  %5315 = vperm.xlu0 %10501, %v10969_v57   ;;  %v10649_v9 = vld [vmem:[#allocation3 + $0x1ec] ss:$16 sps:$4 sm:$0xff]   ;;  %v10666_v57 = vld [vmem:[#allocation3 + $0x288] ss:$16 sps:$4 sm:$0xff]  }
 0x2a4   :  { %5304 = vperm.xlu1 %10500, %v10970_v27   ;;  %v10669_v27 = vld [vmem:[#allocation3 + $0x2a8] ss:$16 sps:$4 sm:$0xff]  }
 0x2a7   :  { %5337 = vperm.xlu0 %10501, %v10971_v42   ;;  %v10670_v42 = vld [vmem:[#allocation3 + $0x2cc] ss:$16 sps:$4 sm:$0xff]  }
 0x2a8   :  { %5326 = vperm.xlu1 %10500, %v10972_v43   ;;  %v10672_v43 = vld [vmem:[#allocation3 + $0x2c8] ss:$16 sps:$4 sm:$0xff]  }
 0x2a9   :  { %3409 = vmatmul.mubr.bf16.gmra.mrb[224].mxu0 %v10582_v2 }
 0x2aa   :  { %4115 = vmatmul.mubr.bf16.gmra.mrb[224].mxu1 %v10582_v2  ;;  %3418 = vmatprep.mubr.bf16.mxu0 %v10583_v61  ;;  %v10655_v2 = vld [vmem:[#allocation3 + $0x22c] ss:$16 sps:$4 sm:$0xff]  }
 0x2ab   :  { %4124 = vmatprep.mubr.bf16.mxu1 %v10583_v61  ;;  %5359 = vperm.xlu0 %10501, %v10973_v44   ;;  %v10658_v61 = vld [vmem:[#allocation3 + $0x24c] ss:$16 sps:$4 sm:$0xff]   ;;  %v10675_v44 = vld [vmem:[#allocation3 + $0x2e8] ss:$16 sps:$4 sm:$0xff]  }
 0x2ac   :  { %5348 = vperm.xlu1 %10500, %v10974_v56   ;;  %v10678_v56 = vld [vmem:[#allocation3 + $0x308] ss:$16 sps:$4 sm:$0xff]  }
 0x2b0   :  { %5370 = vperm.xlu1 %10500, %v10975_v58   ;;  %v10679_v58 = vld [vmem:[#allocation3 + $0x32c] ss:$16 sps:$4 sm:$0xff]  }
 0x2b1   :  { %3419 = vmatmul.mubr.bf16.gmra.mrb[228].mxu0 %v10585_v40 }
 0x2b2   :  { %4125 = vmatmul.mubr.bf16.gmra.mrb[228].mxu1 %v10585_v40  ;;  %3428 = vmatprep.mubr.bf16.mxu0 %v10586_v51  ;;  %v10664_v40 = vld [vmem:[#allocation3 + $0x28c] ss:$16 sps:$4 sm:$0xff]  }
 0x2b3   :  { %4134 = vmatprep.mubr.bf16.mxu1 %v10586_v51  ;;  %v10667_v51 = vld [vmem:[#allocation3 + $0x2ac] ss:$16 sps:$4 sm:$0xff]  }
 0x2b9   :  { %3429 = vmatmul.mubr.bf16.gmra.mrb[232].mxu0 %v10588_v59 }
 0x2ba   :  { %4135 = vmatmul.mubr.bf16.gmra.mrb[232].mxu1 %v10588_v59  ;;  %3438 = vmatprep.mubr.bf16.mxu0 %v10589_v55  ;;  %v10673_v59 = vld [vmem:[#allocation3 + $0x2ec] ss:$16 sps:$4 sm:$0xff]  }
 0x2bb   :  { %4144 = vmatprep.mubr.bf16.mxu1 %v10589_v55  ;;  %v10676_v55 = vld [vmem:[#allocation3 + $0x30c] ss:$16 sps:$4 sm:$0xff]  }
 0x2c1   :  { %3439 = vmatmul.mubr.bf16.gmra.mrb[236].mxu0 %v10591_v62 }
 0x2c2   :  { %4145 = vmatmul.mubr.bf16.gmra.mrb[236].mxu1 %v10591_v62  ;;  %3448 = vmatprep.mubr.bf16.mxu0 %v10592_v63  ;;  %v10681_v62 = vld [vmem:[#allocation3 + $0x328] ss:$16 sps:$4 sm:$0xff]  }
 0x2c3   :  { %4154 = vmatprep.mubr.bf16.mxu1 %v10592_v63  ;;  %v10682_v63 = vld [vmem:[#allocation3 + $0x34c] ss:$16 sps:$4 sm:$0xff]  }
 0x2c9   :  { %3449 = vmatmul.mubr.bf16.gmra.mrb[240].mxu0 %v10594_v28 }
 0x2ca   :  { %4155 = vmatmul.mubr.bf16.gmra.mrb[240].mxu1 %v10594_v28  ;;  %3458 = vmatprep.mubr.bf16.mxu0 %v10595_v4  ;;  %v4678_v28 = vpop.permute.xlu1 %4677 }
 0x2cb   :  { %4164 = vmatprep.mubr.bf16.mxu1 %v10595_v4  ;;  %v10684_v4 = vld [vmem:[#allocation3 + $0x348] ss:$16 sps:$4 sm:$0xff]  }
 0x2d1   :  { %3459 = vmatmul.mubr.bf16.gmra.mrb[244].mxu0 %v10597_v5 }
 0x2d2   :  { %4165 = vmatmul.mubr.bf16.gmra.mrb[244].mxu1 %v10597_v5  ;;  %3468 = vmatprep.mubr.bf16.mxu0 %v10598_v8  ;;  %v4700_v5 = vpop.permute.xlu1 %4699 }
 0x2d3   :  { %4174 = vmatprep.mubr.bf16.mxu1 %v10598_v8  ;;  %v10685_v8 = vld [vmem:[#allocation3 + $0x36c] ss:$16 sps:$4 sm:$0xff]  }
 0x2d9   :  { %3469 = vmatmul.mubr.bf16.gmra.mrb[248].mxu0 %v10600_v10 }
 0x2da   :  { %4175 = vmatmul.mubr.bf16.gmra.mrb[248].mxu1 %v10600_v10  ;;  %3478 = vmatprep.mubr.bf16.mxu0 %v10601_v38  ;;  %v4689_v10 = vpop.permute.xlu0 %4688 }
 0x2db   :  { %4184 = vmatprep.mubr.bf16.mxu1 %v10601_v38  ;;  %v4686_v38 = vrot.slane %v4678_v28, %v11561_v3 }
 0x2e1   :  { %3479 = vmatmul.mubr.bf16.gmra.mrb[252].mxu0 %v10603_v11 }
 0x2e2   :  { %4185 = vmatmul.mubr.bf16.gmra.mrb[252].mxu1 %v10603_v11  ;;  %3521 = vmatprep.mubr.bf16.mxu0 %v10606_v13  ;;  %v4697_v11 = vrot.slane %v4689_v10, %v11561_v3  ;;  %v10693_v10 = vld [vmem:[#allocation3 + $0x3a8] ss:$16 sps:$4 sm:$0xff]  }
 0x2e3   :  { %4227 = vmatprep.mubr.bf16.mxu1 %v10606_v13  ;;  %v4711_v13 = vpop.permute.xlu1 %4710 }
 0x2e9   :  { %3522 = vmatmul.mubr.bf16.vlgmr.msra.gmra.mrb[128].mxu0 %v10604_v12 }
 0x2ea   :  { %4228 = vmatmul.mubr.bf16.vlgmr.msra.gmra.mrb[128].mxu1 %v10604_v12  ;;  %3531 = vmatprep.mubr.bf16.mxu0 %v10607_v7 }
 0x2eb   :  { %4237 = vmatprep.mubr.bf16.mxu1 %v10607_v7  ;;  %v9776_v7 = vcombine.low %v4686_v38, %v4697_v11 }
 0x2f1   :  { %3532 = vmatmul.mubr.bf16.gmra.mrb[132].mxu0 %v10609_v14 }
 0x2f2   :  { %4238 = vmatmul.mubr.bf16.gmra.mrb[132].mxu1 %v10609_v14  ;;  %3541 = vmatprep.mubr.bf16.mxu0 %v10610_v15 }
 0x2f3   :  { %4247 = vmatprep.mubr.bf16.mxu1 %v10610_v15 }
 0x2f9   :  { %3542 = vmatmul.mubr.bf16.gmra.mrb[136].mxu0 %v10612_v54 }
 0x2fa   :  { %4248 = vmatmul.mubr.bf16.gmra.mrb[136].mxu1 %v10612_v54  ;;  %3551 = vmatprep.mubr.bf16.mxu0 %v10613_v16  ;;  %v10687_v54 = vld [vmem:[#allocation3 + $0x368] ss:$16 sps:$4 sm:$0xff]  }
 0x2fb   :  { %4257 = vmatprep.mubr.bf16.mxu1 %v10613_v16 }
 0x301   :  { %3552 = vmatmul.mubr.bf16.gmra.mrb[140].mxu0 %v10615_v17 }
 0x302   :  { %4258 = vmatmul.mubr.bf16.gmra.mrb[140].mxu1 %v10615_v17  ;;  %3561 = vmatprep.mubr.bf16.mxu0 %v10616_v49 }
 0x303   :  { %4267 = vmatprep.mubr.bf16.mxu1 %v10616_v49  ;;  %v10688_v49 = vld [vmem:[#allocation3 + $0x38c] ss:$16 sps:$4 sm:$0xff]  }
 0x309   :  { %3562 = vmatmul.mubr.bf16.gmra.mrb[144].mxu0 %v10618_v45 }
 0x30a   :  { %4268 = vmatmul.mubr.bf16.gmra.mrb[144].mxu1 %v10618_v45  ;;  %3571 = vmatprep.mubr.bf16.mxu0 %v10619_v21 }
 0x30b   :  { %4277 = vmatprep.mubr.bf16.mxu1 %v10619_v21 }
 0x311   :  { %3572 = vmatmul.mubr.bf16.gmra.mrb[148].mxu0 %v10621_v52 }
 0x312   :  { %4278 = vmatmul.mubr.bf16.gmra.mrb[148].mxu1 %v10621_v52  ;;  %3581 = vmatprep.mubr.bf16.mxu0 %v10622_v50 }
 0x313   :  { %4287 = vmatprep.mubr.bf16.mxu1 %v10622_v50 }
 0x319   :  { %3582 = vmatmul.mubr.bf16.gmra.mrb[152].mxu0 %v10624_v18 }
 0x31a   :  { %4288 = vmatmul.mubr.bf16.gmra.mrb[152].mxu1 %v10624_v18  ;;  %3591 = vmatprep.mubr.bf16.mxu0 %v10625_v46 }
 0x31b   :  { %4297 = vmatprep.mubr.bf16.mxu1 %v10625_v46 }
 0x321   :  { %3592 = vmatmul.mubr.bf16.gmra.mrb[156].mxu0 %v10627_v19 }
 0x322   :  { %4298 = vmatmul.mubr.bf16.gmra.mrb[156].mxu1 %v10627_v19  ;;  %3601 = vmatprep.mubr.bf16.mxu0 %v10628_v20  ;;  %v4708_v19 = vrot.slane %v4700_v5, %v11561_v3 }
 0x323   :  { %4307 = vmatprep.mubr.bf16.mxu1 %v10628_v20  ;;  %v4719_v20 = vrot.slane %v4711_v13, %v11561_v3 }
 0x329   :  { %3602 = vmatmul.mubr.bf16.gmra.mrb[160].mxu0 %v10630_v22 }
 0x32a   :  { %4308 = vmatmul.mubr.bf16.gmra.mrb[160].mxu1 %v10630_v22  ;;  %3611 = vmatprep.mubr.bf16.mxu0 %v10631_v33 }
 0x32b   :  { %4317 = vmatprep.mubr.bf16.mxu1 %v10631_v33 }
 0x331   :  { %3612 = vmatmul.mubr.bf16.gmra.mrb[164].mxu0 %v10633_v23 }
 0x332   :  { %4318 = vmatmul.mubr.bf16.gmra.mrb[164].mxu1 %v10633_v23  ;;  %3621 = vmatprep.mubr.bf16.mxu0 %v10634_v24 }
 0x333   :  { %4327 = vmatprep.mubr.bf16.mxu1 %v10634_v24 }
 0x339   :  { %3622 = vmatmul.mubr.bf16.gmra.mrb[168].mxu0 %v10636_v6 }
 0x33a   :  { %4328 = vmatmul.mubr.bf16.gmra.mrb[168].mxu1 %v10636_v6  ;;  %3631 = vmatprep.mubr.bf16.mxu0 %v10637_v25 }
 0x33b   :  { %4337 = vmatprep.mubr.bf16.mxu1 %v10637_v25  ;;  %v4733_v25 = vpop.permute.xlu1 %4732 }
 0x341   :  { %3632 = vmatmul.mubr.bf16.gmra.mrb[172].mxu0 %v10639_v26 }
 0x342   :  { %4338 = vmatmul.mubr.bf16.gmra.mrb[172].mxu1 %v10639_v26  ;;  %3641 = vmatprep.mubr.bf16.mxu0 %v10640_v29 }
 0x343   :  { %4347 = vmatprep.mubr.bf16.mxu1 %v10640_v29 }
 0x349   :  { %3642 = vmatmul.mubr.bf16.gmra.mrb[176].mxu0 %v10642_v31 }
 0x34a   :  { %4348 = vmatmul.mubr.bf16.gmra.mrb[176].mxu1 %v10642_v31  ;;  %3651 = vmatprep.mubr.bf16.mxu0 %v10643_v32  ;;  %v9777_v31 = vcombine.low %v4708_v19, %v4719_v20 }
 0x34b   :  { %4357 = vmatprep.mubr.bf16.mxu1 %v10643_v32 }
 0x351   :  { %3652 = vmatmul.mubr.bf16.gmra.mrb[180].mxu0 %v10645_v30 }
 0x352   :  { %4358 = vmatmul.mubr.bf16.gmra.mrb[180].mxu1 %v10645_v30  ;;  %3661 = vmatprep.mubr.bf16.mxu0 %v10646_v34 }
 0x353   :  { %4367 = vmatprep.mubr.bf16.mxu1 %v10646_v34 }
 0x359   :  { %3662 = vmatmul.mubr.bf16.gmra.mrb[184].mxu0 %v10648_v35 }
 0x35a   :  { %4368 = vmatmul.mubr.bf16.gmra.mrb[184].mxu1 %v10648_v35  ;;  %3671 = vmatprep.mubr.bf16.mxu0 %v10649_v9 }
 0x35b   :  { %4377 = vmatprep.mubr.bf16.mxu1 %v10649_v9  ;;  %v10690_v9 = vld [vmem:[#allocation3 + $0x388] ss:$16 sps:$4 sm:$0xff]  }
 0x361   :  { %3672 = vmatmul.mubr.bf16.gmra.mrb[188].mxu0 %v10651_v36 }
 0x362   :  { %4378 = vmatmul.mubr.bf16.gmra.mrb[188].mxu1 %v10651_v36  ;;  %3681 = vmatprep.mubr.bf16.mxu0 %v10652_v37 }
 0x363   :  { %4387 = vmatprep.mubr.bf16.mxu1 %v10652_v37 }
 0x369   :  { %3682 = vmatmul.mubr.bf16.gmra.mrb[192].mxu0 %v10654_v41 }
 0x36a   :  { %4388 = vmatmul.mubr.bf16.gmra.mrb[192].mxu1 %v10654_v41  ;;  %3691 = vmatprep.mubr.bf16.mxu0 %v10655_v2 }
 0x36b   :  { %4397 = vmatprep.mubr.bf16.mxu1 %v10655_v2  ;;  %v10691_v2 = vld [vmem:[#allocation3 + $0x3ac] ss:$16 sps:$4 sm:$0xff]  }
 0x371   :  { %3692 = vmatmul.mubr.bf16.gmra.mrb[196].mxu0 %v10657_v39 }
 0x372   :  { %4398 = vmatmul.mubr.bf16.gmra.mrb[196].mxu1 %v10657_v39  ;;  %3701 = vmatprep.mubr.bf16.mxu0 %v10658_v61 }
 0x373   :  { %4407 = vmatprep.mubr.bf16.mxu1 %v10658_v61 }
 0x379   :  { %3702 = vmatmul.mubr.bf16.gmra.mrb[200].mxu0 %v10660_v47 }
 0x37a   :  { %4408 = vmatmul.mubr.bf16.gmra.mrb[200].mxu1 %v10660_v47  ;;  %3711 = vmatprep.mubr.bf16.mxu0 %v10661_v53 }
 0x37b   :  { %4417 = vmatprep.mubr.bf16.mxu1 %v10661_v53  ;;  %v4722_v53 = vpop.permute.xlu0 %4721 }
 0x381   :  { %3712 = vmatmul.mubr.bf16.gmra.mrb[204].mxu0 %v10663_v48 }
 0x382   :  { %4418 = vmatmul.mubr.bf16.gmra.mrb[204].mxu1 %v10663_v48  ;;  %3721 = vmatprep.mubr.bf16.mxu0 %v10664_v40 }
 0x383   :  { %4427 = vmatprep.mubr.bf16.mxu1 %v10664_v40 }
 0x389   :  { %3722 = vmatmul.mubr.bf16.gmra.mrb[208].mxu0 %v10666_v57 }
 0x38a   :  { %4428 = vmatmul.mubr.bf16.gmra.mrb[208].mxu1 %v10666_v57  ;;  %3731 = vmatprep.mubr.bf16.mxu0 %v10667_v51 }
 0x38b   :  { %4437 = vmatprep.mubr.bf16.mxu1 %v10667_v51  ;;  %v4741_v51 = vrot.slane %v4733_v25, %v11561_v3 }
 0x391   :  { %3732 = vmatmul.mubr.bf16.gmra.mrb[212].mxu0 %v10669_v27 }
 0x392   :  { %4438 = vmatmul.mubr.bf16.gmra.mrb[212].mxu1 %v10669_v27  ;;  %3741 = vmatprep.mubr.bf16.mxu0 %v10670_v42  ;;  %v4730_v27 = vrot.slane %v4722_v53, %v11561_v3 }
 0x393   :  { %4447 = vmatprep.mubr.bf16.mxu1 %v10670_v42 }
 0x399   :  { %3742 = vmatmul.mubr.bf16.gmra.mrb[216].mxu0 %v10672_v43 }
 0x39a   :  { %4448 = vmatmul.mubr.bf16.gmra.mrb[216].mxu1 %v10672_v43  ;;  %3751 = vmatprep.mubr.bf16.mxu0 %v10673_v59 }
 0x39b   :  { %4457 = vmatprep.mubr.bf16.mxu1 %v10673_v59 }
 0x3a1   :  { %3752 = vmatmul.mubr.bf16.gmra.mrb[220].mxu0 %v10675_v44 }
 0x3a2   :  { %4458 = vmatmul.mubr.bf16.gmra.mrb[220].mxu1 %v10675_v44  ;;  %3761 = vmatprep.mubr.bf16.mxu0 %v10676_v55 }
 0x3a3   :  { %4467 = vmatprep.mubr.bf16.mxu1 %v10676_v55 }
 0x3a9   :  { %3762 = vmatmul.mubr.bf16.gmra.mrb[224].mxu0 %v10678_v56 }
 0x3aa   :  { %4468 = vmatmul.mubr.bf16.gmra.mrb[224].mxu1 %v10678_v56  ;;  %3771 = vmatprep.mubr.bf16.mxu0 %v10679_v58  ;;  %v4755_v56 = vpop.permute.xlu1 %4754 }
 0x3ab   :  { %4477 = vmatprep.mubr.bf16.mxu1 %v10679_v58 }
 0x3ae   :  { %v4777_v20 = vpop.permute.xlu1 %4776 }
 0x3b1   :  { %3772 = vmatmul.mubr.bf16.gmra.mrb[228].mxu0 %v10681_v62 }
 0x3b2   :  { %4478 = vmatmul.mubr.bf16.gmra.mrb[228].mxu1 %v10681_v62  ;;  %3781 = vmatprep.mubr.bf16.mxu0 %v10682_v63 }
 0x3b3   :  { %4487 = vmatprep.mubr.bf16.mxu1 %v10682_v63  ;;  %v9778_v63 = vcombine.low %v4730_v27, %v4741_v51  ;;  %v4799_v27 = vpop.permute.xlu1 %4798 }
 0x3b9   :  { %3782 = vmatmul.mubr.bf16.gmra.mrb[232].mxu0 %v10684_v4 }
 0x3ba   :  { %4488 = vmatmul.mubr.bf16.gmra.mrb[232].mxu1 %v10684_v4  ;;  %3791 = vmatprep.mubr.bf16.mxu0 %v10685_v8 }
 0x3bb   :  { %4497 = vmatprep.mubr.bf16.mxu1 %v10685_v8 }
 0x3bc   :  { %v3523_v12 = vpop.f32.mrb[128].mxu0 }
 0x3bd   :  { %v4229_v14 = vpop.f32.mrb[128].mxu1  ;;  %v3525_v15 = vpop.f32.mrb[129].mxu0 }
 0x3be   :  { %v4231_v16 = vpop.f32.mrb[129].mxu1  ;;  %v3527_v17 = vpop.f32.mrb[130].mxu0 }
 0x3bf   :  { %v4548_v45 = vpack.c.bf16 %v3527_v17, %v3523_v12  ;;  %v4233_v21 = vpop.f32.mrb[130].mxu1  ;;  %v3529_v52 = vpop.f32.mrb[131].mxu0  ;;  %v10694_v12 = vld [vmem:[#allocation3 + $0x3cc] ss:$16 sps:$4 sm:$0xff]  }
 0x3c0   :  { %v4550_v50 = vpack.c.bf16 %v4233_v21, %v4229_v14  ;;  %v4549_v18 = vpack.c.bf16 %v3529_v52, %v3525_v15  ;;  %v4235_v46 = vpop.f32.mrb[131].mxu1 }
 0x3c1   :  { %v5572_v22 = vadd.bf16 %v9776_v7, %v4548_v45  ;;  %v4551_v33 = vpack.c.bf16 %v4235_v46, %v4231_v16  ;;  %3792 = vmatmul.mubr.bf16.gmra.mrb[236].mxu0 %v10687_v54  ;;  %v4763_v45 = vrot.slane %v4755_v56, %v11561_v3 }
 0x3c2   :  { %v5574_v23 = vadd.bf16 %v9776_v7, %v4550_v50  ;;  %v5573_v24 = vadd.bf16 %v9776_v7, %v4549_v18  ;;  %4498 = vmatmul.mubr.bf16.gmra.mrb[236].mxu1 %v10687_v54  ;;  %3801 = vmatprep.mubr.bf16.mxu0 %v10688_v49  ;;  %v4744_v54 = vpop.permute.xlu0 %4743 }
 0x3c3   :  { %v5575_v6 = vadd.bf16 %v9776_v7, %v4551_v33  ;;  %4507 = vmatprep.mubr.bf16.mxu1 %v10688_v49  ;;  %v5700_v35 = vmax.bf16 %v13061_v0, %v5572_v22  ;;  %v4752_v21 = vrot.slane %v4744_v54, %v11561_v3 }
 0x3c4   :  { %v3533_v26 = vpop.f32.mrb[132].mxu0  ;;  %v5701_v29 = vmax.bf16 %v13061_v0, %v5573_v24  ;;  %v5702_v41 = vmax.bf16 %v13061_v0, %v5574_v23 }
 0x3c5   :  { %v4239_v32 = vpop.f32.mrb[132].mxu1  ;;  %v3535_v30 = vpop.f32.mrb[133].mxu0  ;;  %v5703_v34 = vmax.bf16 %v13061_v0, %v5575_v6  ;;  %v9779_v23 = vcombine.low %v4752_v21, %v4763_v45 }
 0x3c6   :  { %v4241_v36 = vpop.f32.mrb[133].mxu1  ;;  %v3537_v37 = vpop.f32.mrb[134].mxu0  ;;  %6596 = vmatprep.subr.bf16.mxu0 %v5701_v29  ;;  %v10696_v29 = vld [vmem:[#allocation3 + $0x3c8] ss:$16 sps:$4 sm:$0xff]  }
 0x3c7   :  { %v4552_v39 = vpack.c.bf16 %v3537_v37, %v3533_v26  ;;  %v4243_v61 = vpop.f32.mrb[134].mxu1  ;;  %7302 = vmatprep.subr.bf16.mxu1 %v5703_v34  ;;  %v3539_v47 = vpop.f32.mrb[135].mxu0  ;;  %6597 = vmatpush1.bf16.msra.mxu0 %v5700_v35  ;;  %v10697_v34 = vld [vmem:[#allocation3 + $0x3ec] ss:$16 sps:$4 sm:$0xff]  }
 0x3c8   :  { %v4554_v48 = vpack.c.bf16 %v4243_v61, %v4239_v32  ;;  %v4553_v40 = vpack.c.bf16 %v3539_v47, %v3535_v30  ;;  %v4245_v57 = vpop.f32.mrb[135].mxu1  ;;  %7303 = vmatpush1.bf16.msra.mxu1 %v5702_v41  ;;  %v4766_v37 = vpop.permute.xlu0 %4765  ;;  %v4785_v61 = vrot.slane %v4777_v20, %v11561_v3 }
 0x3c9   :  { %v5576_v42 = vadd.bf16 %v9777_v31, %v4552_v39  ;;  %v4555_v43 = vpack.c.bf16 %v4245_v57, %v4241_v36  ;;  %3802 = vmatmul.mubr.bf16.gmra.mrb[240].mxu0 %v10690_v9  ;;  %v4774_v47 = vrot.slane %v4766_v37, %v11561_v3  ;;  %v4821_v21 = vpop.permute.xlu1 %4820 }
 0x3ca   :  { %v5578_v59 = vadd.bf16 %v9777_v31, %v4554_v48  ;;  %v5577_v44 = vadd.bf16 %v9777_v31, %v4553_v40  ;;  %4508 = vmatmul.mubr.bf16.gmra.mrb[240].mxu1 %v10690_v9  ;;  %3811 = vmatprep.mubr.bf16.mxu0 %v10691_v2 }
 0x3cb   :  { %v5579_v55 = vadd.bf16 %v9777_v31, %v4555_v43  ;;  %4517 = vmatprep.mubr.bf16.mxu1 %v10691_v2  ;;  %v5704_v8 = vmax.bf16 %v13061_v0, %v5576_v42 }
 0x3cc   :  { %v3543_v58 = vpop.f32.mrb[136].mxu0  ;;  %v5705_v62 = vmax.bf16 %v13061_v0, %v5577_v44  ;;  %v5706_v13 = vmax.bf16 %v13061_v0, %v5578_v59  ;;  %v9780_v59 = vcombine.low %v4774_v47, %v4785_v61 }
 0x3cd   :  { %v4249_v28 = vpop.f32.mrb[136].mxu1  ;;  %v3545_v4 = vpop.f32.mrb[137].mxu0  ;;  %v5707_v5 = vmax.bf16 %v13061_v0, %v5579_v55 }
 0x3ce   :  { %v4251_v38 = vpop.f32.mrb[137].mxu1  ;;  %v3547_v11 = vpop.f32.mrb[138].mxu0  ;;  %6598 = vmatprep.subr.bf16.mxu0 %v5705_v62  ;;  %v10699_v62 = vld [vmem:[#allocation3 + $0x3e8] ss:$16 sps:$4 sm:$0xff]  }
 0x3cf   :  { %v4556_v7 = vpack.c.bf16 %v3547_v11, %v3543_v58  ;;  %v4253_v14 = vpop.f32.mrb[138].mxu1  ;;  %7304 = vmatprep.subr.bf16.mxu1 %v5707_v5  ;;  %v3549_v15 = vpop.f32.mrb[139].mxu0  ;;  %6599 = vmatpush1.bf16.msra.mxu0 %v5704_v8  ;;  %v10702_v5 = vld [vmem:[#allocation6 + $0x4] ss:$16 sps:$4 sm:$0xff]  }
 0x3d0   :  { %v4558_v16 = vpack.c.bf16 %v4253_v14, %v4249_v28  ;;  %v4557_v17 = vpack.c.bf16 %v3549_v15, %v3545_v4  ;;  %v4255_v49 = vpop.f32.mrb[139].mxu1  ;;  %7305 = vmatpush1.bf16.msra.mxu1 %v5706_v13  ;;  %v4788_v11 = vpop.permute.xlu0 %4787  ;;  %v4807_v14 = vrot.slane %v4799_v27, %v11561_v3 }
 0x3d1   :  { %v5580_v52 = vadd.bf16 %v9778_v63, %v4556_v7  ;;  %v4559_v50 = vpack.c.bf16 %v4255_v49, %v4251_v38  ;;  %3812 = vmatmul.mubr.bf16.gmra.mrb[244].mxu0 %v10693_v10  ;;  %v4796_v15 = vrot.slane %v4788_v11, %v11561_v3 }
 0x3d2   :  { %v5582_v18 = vadd.bf16 %v9778_v63, %v4558_v16  ;;  %v5581_v46 = vadd.bf16 %v9778_v63, %v4557_v17  ;;  %4518 = vmatmul.mubr.bf16.gmra.mrb[244].mxu1 %v10693_v10  ;;  %3821 = vmatprep.mubr.bf16.mxu0 %v10694_v12 }
 0x3d3   :  { %v5583_v19 = vadd.bf16 %v9778_v63, %v4559_v50  ;;  %4527 = vmatprep.mubr.bf16.mxu1 %v10694_v12  ;;  %v5708_v24 = vmax.bf16 %v13061_v0, %v5580_v52 }
 0x3d4   :  { %v3553_v22 = vpop.f32.mrb[140].mxu0  ;;  %v5709_v33 = vmax.bf16 %v13061_v0, %v5581_v46  ;;  %v5710_v31 = vmax.bf16 %v13061_v0, %v5582_v18  ;;  %v9781_v18 = vcombine.low %v4796_v15, %v4807_v14 }
 0x3d5   :  { %v4259_v6 = vpop.f32.mrb[140].mxu1  ;;  %v3555_v25 = vpop.f32.mrb[141].mxu0  ;;  %v5711_v26 = vmax.bf16 %v13061_v0, %v5583_v19 }
 0x3d6   :  { %v4261_v32 = vpop.f32.mrb[141].mxu1  ;;  %v3557_v30 = vpop.f32.mrb[142].mxu0  ;;  %6600 = vmatprep.subr.bf16.mxu0 %v5709_v33 }
 0x3d7   :  { %v4560_v35 = vpack.c.bf16 %v3557_v30, %v3553_v22  ;;  %v4263_v9 = vpop.f32.mrb[142].mxu1  ;;  %7306 = vmatprep.subr.bf16.mxu1 %v5711_v26  ;;  %v3559_v36 = vpop.f32.mrb[143].mxu0  ;;  %6601 = vmatpush1.bf16.msra.mxu0 %v5708_v24 }
 0x3d8   :  { %v4562_v41 = vpack.c.bf16 %v4263_v9, %v4259_v6  ;;  %v4561_v2 = vpack.c.bf16 %v3559_v36, %v3555_v25  ;;  %v4265_v39 = vpop.f32.mrb[143].mxu1  ;;  %7307 = vmatpush1.bf16.msra.mxu1 %v5710_v31 }
 0x3d9   :  { %v5584_v53 = vadd.bf16 %v9779_v23, %v4560_v35  ;;  %v4563_v48 = vpack.c.bf16 %v4265_v39, %v4261_v32  ;;  %3822 = vmatmul.mubr.bf16.gmra.mrb[248].mxu0 %v10696_v29  ;;  %v4843_v39 = vpop.permute.xlu1 %4842 }
 0x3da   :  { %v5586_v40 = vadd.bf16 %v9779_v23, %v4562_v41  ;;  %v5585_v57 = vadd.bf16 %v9779_v23, %v4561_v2  ;;  %4528 = vmatmul.mubr.bf16.gmra.mrb[248].mxu1 %v10696_v29  ;;  %3831 = vmatprep.mubr.bf16.mxu0 %v10697_v34  ;;  %v4810_v29 = vpop.permute.xlu0 %4809 }
 0x3db   :  { %v5587_v51 = vadd.bf16 %v9779_v23, %v4563_v48  ;;  %4537 = vmatprep.mubr.bf16.mxu1 %v10697_v34  ;;  %v5712_v44 = vmax.bf16 %v13061_v0, %v5584_v53  ;;  %v4829_v34 = vrot.slane %v4821_v21, %v11561_v3  ;;  %v4818_v35 = vrot.slane %v4810_v29, %v11561_v3 }
 0x3dc   :  { %v3563_v42 = vpop.f32.mrb[144].mxu0  ;;  %v5713_v43 = vmax.bf16 %v13061_v0, %v5585_v57  ;;  %v5714_v63 = vmax.bf16 %v13061_v0, %v5586_v40 }
 0x3dd   :  { %v4269_v55 = vpop.f32.mrb[144].mxu1  ;;  %v3565_v56 = vpop.f32.mrb[145].mxu0  ;;  %v5715_v58 = vmax.bf16 %v13061_v0, %v5587_v51  ;;  %v9782_v53 = vcombine.low %v4818_v35, %v4829_v34 }
 0x3de   :  { %v4271_v28 = vpop.f32.mrb[145].mxu1  ;;  %v3567_v4 = vpop.f32.mrb[146].mxu0  ;;  %6602 = vmatprep.subr.bf16.mxu0 %v5713_v43 }
 0x3df   :  { %v4564_v8 = vpack.c.bf16 %v3567_v4, %v3563_v42  ;;  %v4273_v10 = vpop.f32.mrb[146].mxu1  ;;  %7308 = vmatprep.subr.bf16.mxu1 %v5715_v58  ;;  %v3569_v38 = vpop.f32.mrb[147].mxu0  ;;  %6603 = vmatpush1.bf16.msra.mxu0 %v5712_v44 }
 0x3e0   :  { %v4566_v13 = vpack.c.bf16 %v4273_v10, %v4269_v55  ;;  %v4565_v12 = vpack.c.bf16 %v3569_v38, %v3565_v56  ;;  %v4275_v7 = vpop.f32.mrb[147].mxu1  ;;  %7309 = vmatpush1.bf16.msra.mxu1 %v5714_v63  ;;  %v4832_v56 = vpop.permute.xlu0 %4831 }
 0x3e1   :  { %v5588_v54 = vadd.bf16 %v9780_v59, %v4564_v8  ;;  %v4567_v16 = vpack.c.bf16 %v4275_v7, %v4271_v28  ;;  %3832 = vmatmul.mubr.bf16.gmra.mrb[252].mxu0 %v10699_v62  ;;  %v4851_v28 = vrot.slane %v4843_v39, %v11561_v3  ;;  %v4840_v4 = vrot.slane %v4832_v56, %v11561_v3 }
 0x3e2   :  { %v5590_v17 = vadd.bf16 %v9780_v59, %v4566_v13  ;;  %v5589_v49 = vadd.bf16 %v9780_v59, %v4565_v12  ;;  %4538 = vmatmul.mubr.bf16.gmra.mrb[252].mxu1 %v10699_v62  ;;  %6628 = vmatprep.mubr.bf16.mxu0 %v10702_v5  ;;  %v4865_v13 = vpop.permute.xlu1 %4864 }
 0x3e3   :  { %v5591_v45 = vadd.bf16 %v9780_v59, %v4567_v16  ;;  %7334 = vmatprep.mubr.bf16.mxu1 %v10702_v5  ;;  %v5716_v46 = vmax.bf16 %v13061_v0, %v5588_v54  ;;  %v9783_v14 = vcombine.low %v4840_v4, %v4851_v28 }
 0x3e4   :  { %v3573_v52 = vpop.f32.mrb[148].mxu0  ;;  %v5717_v50 = vmax.bf16 %v13061_v0, %v5589_v49  ;;  %v5718_v33 = vmax.bf16 %v13061_v0, %v5590_v17 }
 0x3e5   :  { %v4279_v19 = vpop.f32.mrb[148].mxu1  ;;  %v3575_v20 = vpop.f32.mrb[149].mxu0  ;;  %v5719_v22 = vmax.bf16 %v13061_v0, %v5591_v45 }
 0x3e6   :  { %v4281_v23 = vpop.f32.mrb[149].mxu1  ;;  %v3577_v24 = vpop.f32.mrb[150].mxu0  ;;  %6604 = vmatprep.subr.bf16.mxu0 %v5717_v50 }
 0x3e7   :  { %v4568_v6 = vpack.c.bf16 %v3577_v24, %v3573_v52  ;;  %v4283_v25 = vpop.f32.mrb[150].mxu1  ;;  %7310 = vmatprep.subr.bf16.mxu1 %v5719_v22  ;;  %v3579_v26 = vpop.f32.mrb[151].mxu0  ;;  %6605 = vmatpush1.bf16.msra.mxu0 %v5716_v46 }
 0x3e8   :  { %v4570_v31 = vpack.c.bf16 %v4283_v25, %v4279_v19  ;;  %v4569_v32 = vpack.c.bf16 %v3579_v26, %v3575_v20  ;;  %v4285_v30 = vpop.f32.mrb[151].mxu1  ;;  %7311 = vmatpush1.bf16.msra.mxu1 %v5718_v33  ;;  %v4873_v25 = vrot.slane %v4865_v13, %v11561_v3 }
 0x3e9   :  { %v5592_v9 = vadd.bf16 %v9781_v18, %v4568_v6  ;;  %v4571_v36 = vpack.c.bf16 %v4285_v30, %v4281_v23  ;;  %v4854_v23 = vpop.permute.xlu0 %4853 }
 0x3ea   :  { %v5594_v37 = vadd.bf16 %v9781_v18, %v4570_v31  ;;  %v5593_v41 = vadd.bf16 %v9781_v18, %v4569_v32  ;;  %v4862_v26 = vrot.slane %v4854_v23, %v11561_v3  ;;  %v4887_v31 = vpop.permute.xlu1 %4886 }
 0x3eb   :  { %v5595_v2 = vadd.bf16 %v9781_v18, %v4571_v36  ;;  %v5720_v48 = vmax.bf16 %v13061_v0, %v5592_v9 }
 0x3ec   :  { %v3583_v61 = vpop.f32.mrb[152].mxu0  ;;  %v5721_v47 = vmax.bf16 %v13061_v0, %v5593_v41  ;;  %v5722_v27 = vmax.bf16 %v13061_v0, %v5594_v37  ;;  %v9784_v39 = vcombine.low %v4862_v26, %v4873_v25 }
 0x3ed   :  { %v4289_v40 = vpop.f32.mrb[152].mxu1  ;;  %v3585_v57 = vpop.f32.mrb[153].mxu0  ;;  %v5723_v51 = vmax.bf16 %v13061_v0, %v5595_v2 }
 0x3ee   :  { %v4291_v42 = vpop.f32.mrb[153].mxu1  ;;  %v3587_v43 = vpop.f32.mrb[154].mxu0  ;;  %6606 = vmatprep.subr.bf16.mxu0 %v5721_v47 }
 0x3ef   :  { %v4572_v59 = vpack.c.bf16 %v3587_v43, %v3583_v61  ;;  %v4293_v44 = vpop.f32.mrb[154].mxu1  ;;  %7312 = vmatprep.subr.bf16.mxu1 %v5723_v51  ;;  %v3589_v55 = vpop.f32.mrb[155].mxu0  ;;  %6607 = vmatpush1.bf16.msra.mxu0 %v5720_v48 }
 0x3f0   :  { %v4574_v58 = vpack.c.bf16 %v4293_v44, %v4289_v40  ;;  %v4573_v62 = vpack.c.bf16 %v3589_v55, %v3585_v57  ;;  %v4295_v63 = vpop.f32.mrb[155].mxu1  ;;  %7313 = vmatpush1.bf16.msra.mxu1 %v5722_v27  ;;  %v4895_v44 = vrot.slane %v4887_v31, %v11561_v3 }
 0x3f1   :  { %v5596_v5 = vadd.bf16 %v9782_v53, %v4572_v59  ;;  %v4575_v8 = vpack.c.bf16 %v4295_v63, %v4291_v42  ;;  %v4876_v42 = vpop.permute.xlu0 %4875 }
 0x3f2   :  { %v5598_v10 = vadd.bf16 %v9782_v53, %v4574_v58  ;;  %v5597_v38 = vadd.bf16 %v9782_v53, %v4573_v62  ;;  %v4884_v55 = vrot.slane %v4876_v42, %v11561_v3  ;;  %v4909_v58 = vpop.permute.xlu1 %4908 }
 0x3f3   :  { %v5599_v11 = vadd.bf16 %v9782_v53, %v4575_v8  ;;  %v5724_v15 = vmax.bf16 %v13061_v0, %v5596_v5 }
 0x3f4   :  { %v3593_v12 = vpop.f32.mrb[156].mxu0  ;;  %v5725_v7 = vmax.bf16 %v13061_v0, %v5597_v38  ;;  %v5726_v49 = vmax.bf16 %v13061_v0, %v5598_v10  ;;  %v9785_v13 = vcombine.low %v4884_v55, %v4895_v44 }
 0x3f5   :  { %v4299_v54 = vpop.f32.mrb[156].mxu1  ;;  %v3595_v16 = vpop.f32.mrb[157].mxu0  ;;  %v5727_v17 = vmax.bf16 %v13061_v0, %v5599_v11 }
 0x3f6   :  { %v4301_v45 = vpop.f32.mrb[157].mxu1  ;;  %v3597_v21 = vpop.f32.mrb[158].mxu0  ;;  %6608 = vmatprep.subr.bf16.mxu0 %v5725_v7 }
 0x3f7   :  { %v4576_v52 = vpack.c.bf16 %v3597_v21, %v3593_v12  ;;  %v4303_v50 = vpop.f32.mrb[158].mxu1  ;;  %7314 = vmatprep.subr.bf16.mxu1 %v5727_v17  ;;  %v3599_v18 = vpop.f32.mrb[159].mxu0  ;;  %6609 = vmatpush1.bf16.msra.mxu0 %v5724_v15 }
 0x3f8   :  { %v4578_v46 = vpack.c.bf16 %v4303_v50, %v4299_v54  ;;  %v4577_v19 = vpack.c.bf16 %v3599_v18, %v3595_v16  ;;  %v4305_v20 = vpop.f32.mrb[159].mxu1  ;;  %7315 = vmatpush1.bf16.msra.mxu1 %v5726_v49  ;;  %v4917_v50 = vrot.slane %v4909_v58, %v11561_v3 }
 0x3f9   :  { %v5600_v22 = vadd.bf16 %v9783_v14, %v4576_v52  ;;  %v4579_v33 = vpack.c.bf16 %v4305_v20, %v4301_v45  ;;  %v4898_v45 = vpop.permute.xlu0 %4897 }
 0x3fa   :  { %v5602_v24 = vadd.bf16 %v9783_v14, %v4578_v46  ;;  %v5601_v6 = vadd.bf16 %v9783_v14, %v4577_v19  ;;  %v4906_v18 = vrot.slane %v4898_v45, %v11561_v3  ;;  %v4931_v19 = vpop.permute.xlu1 %4930 }
 0x3fb   :  { %v5603_v29 = vadd.bf16 %v9783_v14, %v4579_v33  ;;  %v5728_v34 = vmax.bf16 %v13061_v0, %v5600_v22 }
 0x3fc   :  { %v3603_v32 = vpop.f32.mrb[160].mxu0  ;;  %v5729_v30 = vmax.bf16 %v13061_v0, %v5601_v6  ;;  %v5730_v37 = vmax.bf16 %v13061_v0, %v5602_v24  ;;  %v9786_v31 = vcombine.low %v4906_v18, %v4917_v50 }
 0x3fd   :  { %v4309_v35 = vpop.f32.mrb[160].mxu1  ;;  %v3605_v9 = vpop.f32.mrb[161].mxu0  ;;  %v5731_v36 = vmax.bf16 %v13061_v0, %v5603_v29 }
 0x3fe   :  { %v4311_v41 = vpop.f32.mrb[161].mxu1  ;;  %v3607_v2 = vpop.f32.mrb[162].mxu0  ;;  %6610 = vmatprep.subr.bf16.mxu0 %v5729_v30 }
 0x3ff   :  { %v4580_v61 = vpack.c.bf16 %v3607_v2, %v3603_v32  ;;  %v4313_v47 = vpop.f32.mrb[162].mxu1  ;;  %7316 = vmatprep.subr.bf16.mxu1 %v5731_v36  ;;  %v3609_v53 = vpop.f32.mrb[163].mxu0  ;;  %6611 = vmatpush1.bf16.msra.mxu0 %v5728_v34 }
 0x400   :  { %v4582_v48 = vpack.c.bf16 %v4313_v47, %v4309_v35  ;;  %v4581_v40 = vpack.c.bf16 %v3609_v53, %v3605_v9  ;;  %v4315_v57 = vpop.f32.mrb[163].mxu1  ;;  %7317 = vmatpush1.bf16.msra.mxu1 %v5730_v37  ;;  %v4920_v2 = vpop.permute.xlu0 %4919  ;;  %v4939_v47 = vrot.slane %v4931_v19, %v11561_v3 }
 0x401   :  { %v5604_v51 = vadd.bf16 %v9784_v39, %v4580_v61  ;;  %v4583_v27 = vpack.c.bf16 %v4315_v57, %v4311_v41  ;;  %v4928_v53 = vrot.slane %v4920_v2, %v11561_v3 }
 0x402   :  { %v5606_v43 = vadd.bf16 %v9784_v39, %v4582_v48  ;;  %v5605_v59 = vadd.bf16 %v9784_v39, %v4581_v40  ;;  %v4953_v40 = vpop.permute.xlu1 %4952 }
 0x403   :  { %v5607_v56 = vadd.bf16 %v9784_v39, %v4583_v27  ;;  %v5732_v28 = vmax.bf16 %v13061_v0, %v5604_v51  ;;  %v9787_v58 = vcombine.low %v4928_v53, %v4939_v47 }
 0x404   :  { %v3613_v62 = vpop.f32.mrb[164].mxu0  ;;  %v5733_v63 = vmax.bf16 %v13061_v0, %v5605_v59  ;;  %v5734_v10 = vmax.bf16 %v13061_v0, %v5606_v43 }
 0x405   :  { %v4319_v4 = vpop.f32.mrb[164].mxu1  ;;  %v3615_v5 = vpop.f32.mrb[165].mxu0  ;;  %v5735_v8 = vmax.bf16 %v13061_v0, %v5607_v56 }
 0x406   :  { %v4321_v38 = vpop.f32.mrb[165].mxu1  ;;  %v3617_v11 = vpop.f32.mrb[166].mxu0  ;;  %6612 = vmatprep.subr.bf16.mxu0 %v5733_v63 }
 0x407   :  { %v4584_v12 = vpack.c.bf16 %v3617_v11, %v3613_v62  ;;  %v4323_v7 = vpop.f32.mrb[166].mxu1  ;;  %7318 = vmatprep.subr.bf16.mxu1 %v5735_v8  ;;  %v3619_v14 = vpop.f32.mrb[167].mxu0  ;;  %6613 = vmatpush1.bf16.msra.mxu0 %v5732_v28 }
 0x408   :  { %v4586_v15 = vpack.c.bf16 %v4323_v7, %v4319_v4  ;;  %v4585_v54 = vpack.c.bf16 %v3619_v14, %v3615_v5  ;;  %v4325_v16 = vpop.f32.mrb[167].mxu1  ;;  %7319 = vmatpush1.bf16.msra.mxu1 %v5734_v10  ;;  %v4942_v11 = vpop.permute.xlu0 %4941  ;;  %v4961_v7 = vrot.slane %v4953_v40, %v11561_v3 }
 0x409   :  { %v5608_v17 = vadd.bf16 %v9785_v13, %v4584_v12  ;;  %v4587_v49 = vpack.c.bf16 %v4325_v16, %v4321_v38  ;;  %v4950_v14 = vrot.slane %v4942_v11, %v11561_v3 }
 0x40a   :  { %v5610_v21 = vadd.bf16 %v9785_v13, %v4586_v15  ;;  %v5609_v52 = vadd.bf16 %v9785_v13, %v4585_v54  ;;  %v4975_v54 = vpop.permute.xlu1 %4974 }
 0x40b   :  { %v5611_v46 = vadd.bf16 %v9785_v13, %v4587_v49  ;;  %v5736_v33 = vmax.bf16 %v13061_v0, %v5608_v17  ;;  %v9788_v19 = vcombine.low %v4950_v14, %v4961_v7 }
 0x40c   :  { %v3623_v20 = vpop.f32.mrb[168].mxu0  ;;  %v5737_v22 = vmax.bf16 %v13061_v0, %v5609_v52  ;;  %v5738_v25 = vmax.bf16 %v13061_v0, %v5610_v21 }
 0x40d   :  { %v4329_v23 = vpop.f32.mrb[168].mxu1  ;;  %v3625_v24 = vpop.f32.mrb[169].mxu0  ;;  %v5739_v6 = vmax.bf16 %v13061_v0, %v5611_v46 }
 0x40e   :  { %v4331_v26 = vpop.f32.mrb[169].mxu1  ;;  %v3627_v29 = vpop.f32.mrb[170].mxu0  ;;  %6614 = vmatprep.subr.bf16.mxu0 %v5737_v22 }
 0x40f   :  { %v4588_v32 = vpack.c.bf16 %v3627_v29, %v3623_v20  ;;  %v4333_v30 = vpop.f32.mrb[170].mxu1  ;;  %7320 = vmatprep.subr.bf16.mxu1 %v5739_v6  ;;  %v3629_v34 = vpop.f32.mrb[171].mxu0  ;;  %6615 = vmatpush1.bf16.msra.mxu0 %v5736_v33 }
 0x410   :  { %v4590_v35 = vpack.c.bf16 %v4333_v30, %v4329_v23  ;;  %v4589_v9 = vpack.c.bf16 %v3629_v34, %v3625_v24  ;;  %v4335_v36 = vpop.f32.mrb[171].mxu1  ;;  %7321 = vmatpush1.bf16.msra.mxu1 %v5738_v25  ;;  %v4964_v29 = vpop.permute.xlu0 %4963  ;;  %v4983_v30 = vrot.slane %v4975_v54, %v11561_v3 }
 0x411   :  { %v5612_v37 = vadd.bf16 %v9786_v31, %v4588_v32  ;;  %v4591_v41 = vpack.c.bf16 %v4335_v36, %v4331_v26  ;;  %v4972_v34 = vrot.slane %v4964_v29, %v11561_v3 }
 0x412   :  { %v5614_v39 = vadd.bf16 %v9786_v31, %v4590_v35  ;;  %v5613_v61 = vadd.bf16 %v9786_v31, %v4589_v9  ;;  %v4997_v9 = vpop.permute.xlu1 %4996 }
 0x413   :  { %v5615_v48 = vadd.bf16 %v9786_v31, %v4591_v41  ;;  %v5740_v27 = vmax.bf16 %v13061_v0, %v5612_v37  ;;  %v9789_v40 = vcombine.low %v4972_v34, %v4983_v30 }
 0x414   :  { %v3633_v57 = vpop.f32.mrb[172].mxu0  ;;  %v5741_v51 = vmax.bf16 %v13061_v0, %v5613_v61  ;;  %v5742_v44 = vmax.bf16 %v13061_v0, %v5614_v39 }
 0x415   :  { %v4339_v42 = vpop.f32.mrb[172].mxu1  ;;  %v3635_v43 = vpop.f32.mrb[173].mxu0  ;;  %v5743_v59 = vmax.bf16 %v13061_v0, %v5615_v48 }
 0x416   :  { %v4341_v55 = vpop.f32.mrb[173].mxu1  ;;  %v3637_v56 = vpop.f32.mrb[174].mxu0  ;;  %6616 = vmatprep.subr.bf16.mxu0 %v5741_v51 }
 0x417   :  { %v4592_v62 = vpack.c.bf16 %v3637_v56, %v3633_v57  ;;  %v4343_v63 = vpop.f32.mrb[174].mxu1  ;;  %7322 = vmatprep.subr.bf16.mxu1 %v5743_v59  ;;  %v3639_v28 = vpop.f32.mrb[175].mxu0  ;;  %6617 = vmatpush1.bf16.msra.mxu0 %v5740_v27 }
 0x418   :  { %v4594_v4 = vpack.c.bf16 %v4343_v63, %v4339_v42  ;;  %v4593_v5 = vpack.c.bf16 %v3639_v28, %v3635_v43  ;;  %v4345_v8 = vpop.f32.mrb[175].mxu1  ;;  %7323 = vmatpush1.bf16.msra.mxu1 %v5742_v44  ;;  %v4986_v56 = vpop.permute.xlu0 %4985  ;;  %v5005_v63 = vrot.slane %v4997_v9, %v11561_v3 }
 0x419   :  { %v5616_v10 = vadd.bf16 %v9787_v58, %v4592_v62  ;;  %v4595_v38 = vpack.c.bf16 %v4345_v8, %v4341_v55  ;;  %v4994_v28 = vrot.slane %v4986_v56, %v11561_v3 }
 0x41a   :  { %v5618_v13 = vadd.bf16 %v9787_v58, %v4594_v4  ;;  %v5617_v12 = vadd.bf16 %v9787_v58, %v4593_v5  ;;  %v5019_v5 = vpop.permute.xlu1 %5018 }
 0x41b   :  { %v5619_v15 = vadd.bf16 %v9787_v58, %v4595_v38  ;;  %v5744_v49 = vmax.bf16 %v13061_v0, %v5616_v10  ;;  %v9790_v54 = vcombine.low %v4994_v28, %v5005_v63 }
 0x41c   :  { %v3643_v16 = vpop.f32.mrb[176].mxu0  ;;  %v5745_v17 = vmax.bf16 %v13061_v0, %v5617_v12  ;;  %v5746_v50 = vmax.bf16 %v13061_v0, %v5618_v13 }
 0x41d   :  { %v4349_v45 = vpop.f32.mrb[176].mxu1  ;;  %v3645_v21 = vpop.f32.mrb[177].mxu0  ;;  %v5747_v52 = vmax.bf16 %v13061_v0, %v5619_v15 }
 0x41e   :  { %v4351_v18 = vpop.f32.mrb[177].mxu1  ;;  %v3647_v46 = vpop.f32.mrb[178].mxu0  ;;  %6618 = vmatprep.subr.bf16.mxu0 %v5745_v17 }
 0x41f   :  { %v4596_v20 = vpack.c.bf16 %v3647_v46, %v3643_v16  ;;  %v4353_v22 = vpop.f32.mrb[178].mxu1  ;;  %7324 = vmatprep.subr.bf16.mxu1 %v5747_v52  ;;  %v3649_v33 = vpop.f32.mrb[179].mxu0  ;;  %6619 = vmatpush1.bf16.msra.mxu0 %v5744_v49 }
 0x420   :  { %v4598_v23 = vpack.c.bf16 %v4353_v22, %v4349_v45  ;;  %v4597_v24 = vpack.c.bf16 %v3649_v33, %v3645_v21  ;;  %v4355_v6 = vpop.f32.mrb[179].mxu1  ;;  %7325 = vmatpush1.bf16.msra.mxu1 %v5746_v50  ;;  %v5008_v46 = vpop.permute.xlu0 %5007  ;;  %v5027_v22 = vrot.slane %v5019_v5, %v11561_v3  ;;  %v10700_v5 = vld [vmem:[#allocation6] ss:$16 sps:$4 sm:$0xff]  }
 0x421   :  { %v5620_v25 = vadd.bf16 %v9788_v19, %v4596_v20  ;;  %v4599_v26 = vpack.c.bf16 %v4355_v6, %v4351_v18  ;;  %v5016_v33 = vrot.slane %v5008_v46, %v11561_v3 }
 0x422   :  { %v5622_v31 = vadd.bf16 %v9788_v19, %v4598_v23  ;;  %v5621_v32 = vadd.bf16 %v9788_v19, %v4597_v24  ;;  %v5041_v24 = vpop.permute.xlu1 %5040 }
 0x423   :  { %v5623_v35 = vadd.bf16 %v9788_v19, %v4599_v26  ;;  %v5748_v41 = vmax.bf16 %v13061_v0, %v5620_v25  ;;  %v9791_v9 = vcombine.low %v5016_v33, %v5027_v22 }
 0x424   :  { %v3653_v36 = vpop.f32.mrb[180].mxu0  ;;  %v5749_v37 = vmax.bf16 %v13061_v0, %v5621_v32  ;;  %v5750_v47 = vmax.bf16 %v13061_v0, %v5622_v31 }
 0x425   :  { %v4359_v2 = vpop.f32.mrb[180].mxu1  ;;  %v3655_v39 = vpop.f32.mrb[181].mxu0  ;;  %v5751_v61 = vmax.bf16 %v13061_v0, %v5623_v35 }
 0x426   :  { %v4361_v53 = vpop.f32.mrb[181].mxu1  ;;  %v3657_v48 = vpop.f32.mrb[182].mxu0  ;;  %6620 = vmatprep.subr.bf16.mxu0 %v5749_v37 }
 0x427   :  { %v4600_v57 = vpack.c.bf16 %v3657_v48, %v3653_v36  ;;  %v4363_v51 = vpop.f32.mrb[182].mxu1  ;;  %7326 = vmatprep.subr.bf16.mxu1 %v5751_v61  ;;  %v3659_v27 = vpop.f32.mrb[183].mxu0  ;;  %6621 = vmatpush1.bf16.msra.mxu0 %v5748_v41 }
 0x428   :  { %v4602_v42 = vpack.c.bf16 %v4363_v51, %v4359_v2  ;;  %v4601_v43 = vpack.c.bf16 %v3659_v27, %v3655_v39  ;;  %v4365_v59 = vpop.f32.mrb[183].mxu1  ;;  %7327 = vmatpush1.bf16.msra.mxu1 %v5750_v47  ;;  %v5030_v48 = vpop.permute.xlu0 %5029  ;;  %v5049_v51 = vrot.slane %v5041_v24, %v11561_v3 }
 0x429   :  { %v5624_v44 = vadd.bf16 %v9789_v40, %v4600_v57  ;;  %v4603_v55 = vpack.c.bf16 %v4365_v59, %v4361_v53  ;;  %v5038_v27 = vrot.slane %v5030_v48, %v11561_v3 }
 0x42a   :  { %v5626_v58 = vadd.bf16 %v9789_v40, %v4602_v42  ;;  %v5625_v62 = vadd.bf16 %v9789_v40, %v4601_v43  ;;  %v5063_v43 = vpop.permute.xlu1 %5062 }
 0x42b   :  { %v5627_v4 = vadd.bf16 %v9789_v40, %v4603_v55  ;;  %v5752_v38 = vmax.bf16 %v13061_v0, %v5624_v44 }
 0x42c   :  { %v3663_v8 = vpop.f32.mrb[184].mxu0  ;;  %v5753_v10 = vmax.bf16 %v13061_v0, %v5625_v62  ;;  %v5754_v7 = vmax.bf16 %v13061_v0, %v5626_v58 }
 0x42d   :  { %v4369_v11 = vpop.f32.mrb[184].mxu1  ;;  %v3665_v13 = vpop.f32.mrb[185].mxu0  ;;  %v5755_v12 = vmax.bf16 %v13061_v0, %v5627_v4 }
 0x42e   :  { %v4371_v14 = vpop.f32.mrb[185].mxu1  ;;  %v3667_v15 = vpop.f32.mrb[186].mxu0  ;;  %6622 = vmatprep.subr.bf16.mxu0 %v5753_v10 }
 0x42f   :  { %v4604_v16 = vpack.c.bf16 %v3667_v15, %v3663_v8  ;;  %v4373_v17 = vpop.f32.mrb[186].mxu1  ;;  %7328 = vmatprep.subr.bf16.mxu1 %v5755_v12  ;;  %v3669_v49 = vpop.f32.mrb[187].mxu0  ;;  %6623 = vmatpush1.bf16.msra.mxu0 %v5752_v38  ;;  %v9792_v8 = vcombine.low %v5038_v27, %v5049_v51 }
 0x430   :  { %v4606_v45 = vpack.c.bf16 %v4373_v17, %v4369_v11  ;;  %v4605_v21 = vpack.c.bf16 %v3669_v49, %v3665_v13  ;;  %v4375_v52 = vpop.f32.mrb[187].mxu1  ;;  %7329 = vmatpush1.bf16.msra.mxu1 %v5754_v7  ;;  %v10705_v13 = vld [vmem:[#allocation6 + $0x24] ss:$16 sps:$4 sm:$0xff]  }
 0x431   :  { %v5628_v50 = vadd.bf16 %v9790_v54, %v4604_v16  ;;  %v4607_v18 = vpack.c.bf16 %v4375_v52, %v4371_v14  ;;  %v5052_v16 = vpop.permute.xlu0 %5051 }
 0x432   :  { %v5630_v19 = vadd.bf16 %v9790_v54, %v4606_v45  ;;  %v5629_v20 = vadd.bf16 %v9790_v54, %v4605_v21  ;;  %v5071_v45 = vrot.slane %v5063_v43, %v11561_v3  ;;  %v5060_v21 = vrot.slane %v5052_v16, %v11561_v3 }
 0x433   :  { %v5631_v23 = vadd.bf16 %v9790_v54, %v4607_v18  ;;  %v5756_v26 = vmax.bf16 %v13061_v0, %v5628_v50  ;;  %v5085_v50 = vpop.permute.xlu1 %5084 }
 0x434   :  { %v3673_v6 = vpop.f32.mrb[188].mxu0  ;;  %v5757_v25 = vmax.bf16 %v13061_v0, %v5629_v20  ;;  %v5758_v30 = vmax.bf16 %v13061_v0, %v5630_v19 }
 0x435   :  { %v4379_v29 = vpop.f32.mrb[188].mxu1  ;;  %v3675_v31 = vpop.f32.mrb[189].mxu0  ;;  %v5759_v32 = vmax.bf16 %v13061_v0, %v5631_v23 }
 0x436   :  { %v4381_v34 = vpop.f32.mrb[189].mxu1  ;;  %v3677_v35 = vpop.f32.mrb[190].mxu0  ;;  %6624 = vmatprep.subr.bf16.mxu0 %v5757_v25  ;;  %v10703_v25 = vld [vmem:[#allocation6 + $0x20] ss:$16 sps:$4 sm:$0xff]  }
 0x437   :  { %v4608_v36 = vpack.c.bf16 %v3677_v35, %v3673_v6  ;;  %v4383_v37 = vpop.f32.mrb[190].mxu1  ;;  %7330 = vmatprep.subr.bf16.mxu1 %v5759_v32  ;;  %v3679_v41 = vpop.f32.mrb[191].mxu0  ;;  %6625 = vmatpush1.bf16.msra.mxu0 %v5756_v26  ;;  %v9793_v26 = vcombine.low %v5060_v21, %v5071_v45 }
 0x438   :  { %v4610_v2 = vpack.c.bf16 %v4383_v37, %v4379_v29  ;;  %v4609_v39 = vpack.c.bf16 %v3679_v41, %v3675_v31  ;;  %v4385_v61 = vpop.f32.mrb[191].mxu1  ;;  %7331 = vmatpush1.bf16.msra.mxu1 %v5758_v30  ;;  %v10708_v30 = vld [vmem:[#allocation6 + $0x44] ss:$16 sps:$4 sm:$0xff]   ;;  %v5074_v41 = vpop.permute.xlu0 %5073 }
 0x439   :  { %v5632_v47 = vadd.bf16 %v9791_v9, %v4608_v36  ;;  %v4611_v53 = vpack.c.bf16 %v4385_v61, %v4381_v34  ;;  %v5093_v61 = vrot.slane %v5085_v50, %v11561_v3  ;;  %v5107_v48 = vpop.permute.xlu1 %5106 }
 0x43a   :  { %v5634_v40 = vadd.bf16 %v9791_v9, %v4610_v2  ;;  %v5633_v57 = vadd.bf16 %v9791_v9, %v4609_v39 }
 0x43b   :  { %v5635_v42 = vadd.bf16 %v9791_v9, %v4611_v53  ;;  %v5760_v55 = vmax.bf16 %v13061_v0, %v5632_v47  ;;  %v5082_v47 = vrot.slane %v5074_v41, %v11561_v3 }
 0x43c   :  { %v3683_v59 = vpop.f32.mrb[192].mxu0  ;;  %v5761_v44 = vmax.bf16 %v13061_v0, %v5633_v57  ;;  %v5762_v63 = vmax.bf16 %v13061_v0, %v5634_v40 }
 0x43d   :  { %v4389_v56 = vpop.f32.mrb[192].mxu1  ;;  %v3685_v58 = vpop.f32.mrb[193].mxu0  ;;  %v5763_v62 = vmax.bf16 %v13061_v0, %v5635_v42 }
 0x43e   :  { %v4391_v28 = vpop.f32.mrb[193].mxu1  ;;  %v3687_v4 = vpop.f32.mrb[194].mxu0  ;;  %6626 = vmatprep.subr.bf16.mxu0 %v5761_v44 }
 0x43f   :  { %v4612_v10 = vpack.c.bf16 %v3687_v4, %v3683_v59  ;;  %v4393_v38 = vpop.f32.mrb[194].mxu1  ;;  %7332 = vmatprep.subr.bf16.mxu1 %v5763_v62  ;;  %v3689_v11 = vpop.f32.mrb[195].mxu0  ;;  %6627 = vmatpush1.bf16.msra.mxu0 %v5760_v55  ;;  %v10711_v4 = vld [vmem:[#allocation6 + $0x64] ss:$16 sps:$4 sm:$0xff]  }
 0x440   :  { %v4614_v12 = vpack.c.bf16 %v4393_v38, %v4389_v56  ;;  %v4613_v7 = vpack.c.bf16 %v3689_v11, %v3685_v58  ;;  %v4395_v14 = vpop.f32.mrb[195].mxu1  ;;  %7333 = vmatpush1.bf16.msra.mxu1 %v5762_v63  ;;  %v10706_v56 = vld [vmem:[#allocation6 + $0x40] ss:$16 sps:$4 sm:$0xff]   ;;  %v9794_v58 = vcombine.low %v5082_v47, %v5093_v61  ;;  %v5129_v16 = vpop.permute.xlu1 %5128 }
 0x441   :  { %v5636_v15 = vadd.bf16 %v9792_v8, %v4612_v10  ;;  %v4615_v54 = vpack.c.bf16 %v4395_v14, %v4391_v28  ;;  %v5115_v14 = vrot.slane %v5107_v48, %v11561_v3 }
 0x442   :  { %v5638_v17 = vadd.bf16 %v9792_v8, %v4614_v12  ;;  %v5637_v49 = vadd.bf16 %v9792_v8, %v4613_v7  ;;  %6629 = vmatmul.mubr.bf16.vlgmr.msra.gmra.mrb[0].mxu0 %v10700_v5 }
 0x443   :  { %v5639_v52 = vadd.bf16 %v9792_v8, %v4615_v54  ;;  %7335 = vmatmul.mubr.bf16.vlgmr.msra.gmra.mrb[0].mxu1 %v10700_v5  ;;  %6638 = vmatprep.mubr.bf16.mxu0 %v10705_v13  ;;  %v5764_v19 = vmax.bf16 %v13061_v0, %v5636_v15 }
 0x444   :  { %v3693_v18 = vpop.f32.mrb[196].mxu0  ;;  %v5765_v46 = vmax.bf16 %v13061_v0, %v5637_v49  ;;  %7344 = vmatprep.mubr.bf16.mxu1 %v10705_v13  ;;  %v5766_v23 = vmax.bf16 %v13061_v0, %v5638_v17  ;;  %v5096_v13 = vpop.permute.xlu0 %5095 }
 0x445   :  { %v4399_v20 = vpop.f32.mrb[196].mxu1  ;;  %v3695_v22 = vpop.f32.mrb[197].mxu0  ;;  %v5767_v33 = vmax.bf16 %v13061_v0, %v5639_v52  ;;  %v5104_v15 = vrot.slane %v5096_v13, %v11561_v3 }
 0x446   :  { %v4401_v24 = vpop.f32.mrb[197].mxu1  ;;  %v3697_v6 = vpop.f32.mrb[198].mxu0  ;;  %6949 = vmatprep.subr.bf16.mxu0 %v5765_v46 }
 0x447   :  { %v4616_v29 = vpack.c.bf16 %v3697_v6, %v3693_v18  ;;  %v4403_v31 = vpop.f32.mrb[198].mxu1  ;;  %7655 = vmatprep.subr.bf16.mxu1 %v5767_v33  ;;  %v3699_v32 = vpop.f32.mrb[199].mxu0  ;;  %6950 = vmatpush1.bf16.msra.mxu0 %v5764_v19  ;;  %v10714_v6 = vld [vmem:[#allocation6 + $0x84] ss:$16 sps:$4 sm:$0xff]  }
 0x448   :  { %v4618_v34 = vpack.c.bf16 %v4403_v31, %v4399_v20  ;;  %v4617_v35 = vpack.c.bf16 %v3699_v32, %v3695_v22  ;;  %v4405_v9 = vpop.f32.mrb[199].mxu1  ;;  %7656 = vmatpush1.bf16.msra.mxu1 %v5766_v23  ;;  %v10709_v20 = vld [vmem:[#allocation6 + $0x60] ss:$16 sps:$4 sm:$0xff]   ;;  %v9795_v22 = vcombine.low %v5104_v15, %v5115_v14  ;;  %v5151_v41 = vpop.permute.xlu1 %5150 }
 0x449   :  { %v5640_v36 = vadd.bf16 %v9793_v26, %v4616_v29  ;;  %v4619_v37 = vpack.c.bf16 %v4405_v9, %v4401_v24  ;;  %v5137_v9 = vrot.slane %v5129_v16, %v11561_v3 }
 0x44a   :  { %v5642_v2 = vadd.bf16 %v9793_v26, %v4618_v34  ;;  %v5641_v39 = vadd.bf16 %v9793_v26, %v4617_v35  ;;  %6639 = vmatmul.mubr.bf16.gmra.mrb[4].mxu0 %v10703_v25 }
 0x44b   :  { %v5643_v53 = vadd.bf16 %v9793_v26, %v4619_v37  ;;  %7345 = vmatmul.mubr.bf16.gmra.mrb[4].mxu1 %v10703_v25  ;;  %6648 = vmatprep.mubr.bf16.mxu0 %v10708_v30  ;;  %v5768_v51 = vmax.bf16 %v13061_v0, %v5640_v36 }
 0x44c   :  { %v3703_v40 = vpop.f32.mrb[200].mxu0  ;;  %v5769_v57 = vmax.bf16 %v13061_v0, %v5641_v39  ;;  %7354 = vmatprep.mubr.bf16.mxu1 %v10708_v30  ;;  %v5770_v59 = vmax.bf16 %v13061_v0, %v5642_v2  ;;  %v5118_v30 = vpop.permute.xlu0 %5117 }
 0x44d   :  { %v4409_v27 = vpop.f32.mrb[200].mxu1  ;;  %v3705_v42 = vpop.f32.mrb[201].mxu0  ;;  %v5771_v43 = vmax.bf16 %v13061_v0, %v5643_v53  ;;  %v5126_v36 = vrot.slane %v5118_v30, %v11561_v3 }
 0x44e   :  { %v4411_v44 = vpop.f32.mrb[201].mxu1  ;;  %v3707_v55 = vpop.f32.mrb[202].mxu0  ;;  %6951 = vmatprep.subr.bf16.mxu0 %v5769_v57 }
 0x44f   :  { %v4620_v62 = vpack.c.bf16 %v3707_v55, %v3703_v40  ;;  %v4413_v63 = vpop.f32.mrb[202].mxu1  ;;  %7657 = vmatprep.subr.bf16.mxu1 %v5771_v43  ;;  %v3709_v28 = vpop.f32.mrb[203].mxu0  ;;  %6952 = vmatpush1.bf16.msra.mxu0 %v5768_v51  ;;  %v10717_v55 = vld [vmem:[#allocation6 + $0xa4] ss:$16 sps:$4 sm:$0xff]  }
 0x450   :  { %v4622_v5 = vpack.c.bf16 %v4413_v63, %v4409_v27  ;;  %v4621_v8 = vpack.c.bf16 %v3709_v28, %v3705_v42  ;;  %v4415_v10 = vpop.f32.mrb[203].mxu1  ;;  %7658 = vmatpush1.bf16.msra.mxu1 %v5770_v59  ;;  %v10712_v27 = vld [vmem:[#allocation6 + $0x80] ss:$16 sps:$4 sm:$0xff]   ;;  %v9796_v42 = vcombine.low %v5126_v36, %v5137_v9  ;;  %v5173_v13 = vpop.permute.xlu1 %5172 }
 0x451   :  { %v5644_v38 = vadd.bf16 %v9794_v58, %v4620_v62  ;;  %v4623_v11 = vpack.c.bf16 %v4415_v10, %v4411_v44  ;;  %v5159_v10 = vrot.slane %v5151_v41, %v11561_v3 }
 0x452   :  { %v5646_v12 = vadd.bf16 %v9794_v58, %v4622_v5  ;;  %v5645_v7 = vadd.bf16 %v9794_v58, %v4621_v8  ;;  %6649 = vmatmul.mubr.bf16.gmra.mrb[8].mxu0 %v10706_v56 }
 0x453   :  { %v5647_v54 = vadd.bf16 %v9794_v58, %v4623_v11  ;;  %7355 = vmatmul.mubr.bf16.gmra.mrb[8].mxu1 %v10706_v56  ;;  %6658 = vmatprep.mubr.bf16.mxu0 %v10711_v4  ;;  %v5772_v45 = vmax.bf16 %v13061_v0, %v5644_v38 }
 0x454   :  { %v3713_v17 = vpop.f32.mrb[204].mxu0  ;;  %v5773_v49 = vmax.bf16 %v13061_v0, %v5645_v7  ;;  %7364 = vmatprep.mubr.bf16.mxu1 %v10711_v4  ;;  %v5774_v18 = vmax.bf16 %v13061_v0, %v5646_v12  ;;  %v5140_v4 = vpop.permute.xlu0 %5139 }
 0x455   :  { %v4419_v21 = vpop.f32.mrb[204].mxu1  ;;  %v3715_v52 = vpop.f32.mrb[205].mxu0  ;;  %v5775_v50 = vmax.bf16 %v13061_v0, %v5647_v54  ;;  %v5148_v38 = vrot.slane %v5140_v4, %v11561_v3 }
 0x456   :  { %v4421_v46 = vpop.f32.mrb[205].mxu1  ;;  %v3717_v19 = vpop.f32.mrb[206].mxu0  ;;  %6953 = vmatprep.subr.bf16.mxu0 %v5773_v49 }
 0x457   :  { %v4624_v33 = vpack.c.bf16 %v3717_v19, %v3713_v17  ;;  %v4423_v23 = vpop.f32.mrb[206].mxu1  ;;  %7659 = vmatprep.subr.bf16.mxu1 %v5775_v50  ;;  %v3719_v24 = vpop.f32.mrb[207].mxu0  ;;  %6954 = vmatpush1.bf16.msra.mxu0 %v5772_v45  ;;  %v10720_v19 = vld [vmem:[#allocation6 + $0xc4] ss:$16 sps:$4 sm:$0xff]  }
 0x458   :  { %v4626_v25 = vpack.c.bf16 %v4423_v23, %v4419_v21  ;;  %v4625_v26 = vpack.c.bf16 %v3719_v24, %v3715_v52  ;;  %v4425_v29 = vpop.f32.mrb[207].mxu1  ;;  %7660 = vmatpush1.bf16.msra.mxu1 %v5774_v18  ;;  %v10715_v21 = vld [vmem:[#allocation6 + $0xa0] ss:$16 sps:$4 sm:$0xff]   ;;  %v9797_v52 = vcombine.low %v5148_v38, %v5159_v10  ;;  %v5195_v30 = vpop.permute.xlu1 %5194 }
 0x459   :  { %v5648_v31 = vadd.bf16 %v9795_v22, %v4624_v33  ;;  %v4627_v32 = vpack.c.bf16 %v4425_v29, %v4421_v46  ;;  %v5181_v29 = vrot.slane %v5173_v13, %v11561_v3 }
 0x45a   :  { %v5650_v34 = vadd.bf16 %v9795_v22, %v4626_v25  ;;  %v5649_v35 = vadd.bf16 %v9795_v22, %v4625_v26  ;;  %6659 = vmatmul.mubr.bf16.gmra.mrb[12].mxu0 %v10709_v20 }
 0x45b   :  { %v5651_v37 = vadd.bf16 %v9795_v22, %v4627_v32  ;;  %7365 = vmatmul.mubr.bf16.gmra.mrb[12].mxu1 %v10709_v20  ;;  %6668 = vmatprep.mubr.bf16.mxu0 %v10714_v6  ;;  %v5776_v61 = vmax.bf16 %v13061_v0, %v5648_v31 }
 0x45c   :  { %v3723_v2 = vpop.f32.mrb[208].mxu0  ;;  %v5777_v39 = vmax.bf16 %v13061_v0, %v5649_v35  ;;  %7374 = vmatprep.mubr.bf16.mxu1 %v10714_v6  ;;  %v5778_v40 = vmax.bf16 %v13061_v0, %v5650_v34  ;;  %v5162_v6 = vpop.permute.xlu0 %5161 }
 0x45d   :  { %v4429_v47 = vpop.f32.mrb[208].mxu1  ;;  %v3725_v53 = vpop.f32.mrb[209].mxu0  ;;  %v5779_v48 = vmax.bf16 %v13061_v0, %v5651_v37  ;;  %v5170_v31 = vrot.slane %v5162_v6, %v11561_v3 }
 0x45e   :  { %v4431_v57 = vpop.f32.mrb[209].mxu1  ;;  %v3727_v51 = vpop.f32.mrb[210].mxu0  ;;  %6955 = vmatprep.subr.bf16.mxu0 %v5777_v39 }
 0x45f   :  { %v4628_v43 = vpack.c.bf16 %v3727_v51, %v3723_v2  ;;  %v4433_v59 = vpop.f32.mrb[210].mxu1  ;;  %7661 = vmatprep.subr.bf16.mxu1 %v5779_v48  ;;  %v3729_v44 = vpop.f32.mrb[211].mxu0  ;;  %6956 = vmatpush1.bf16.msra.mxu0 %v5776_v61  ;;  %v10723_v51 = vld [vmem:[#allocation6 + $0xe4] ss:$16 sps:$4 sm:$0xff]  }
 0x460   :  { %v4630_v56 = vpack.c.bf16 %v4433_v59, %v4429_v47  ;;  %v4629_v58 = vpack.c.bf16 %v3729_v44, %v3725_v53  ;;  %v4435_v62 = vpop.f32.mrb[211].mxu1  ;;  %7662 = vmatpush1.bf16.msra.mxu1 %v5778_v40  ;;  %v10718_v47 = vld [vmem:[#allocation6 + $0xc0] ss:$16 sps:$4 sm:$0xff]   ;;  %v9798_v53 = vcombine.low %v5170_v31, %v5181_v29  ;;  %v5217_v4 = vpop.permute.xlu1 %5216 }
 0x461   :  { %v5652_v63 = vadd.bf16 %v9796_v42, %v4628_v43  ;;  %v4631_v28 = vpack.c.bf16 %v4435_v62, %v4431_v57  ;;  %v5203_v62 = vrot.slane %v5195_v30, %v11561_v3 }
 0x462   :  { %v5654_v5 = vadd.bf16 %v9796_v42, %v4630_v56  ;;  %v5653_v8 = vadd.bf16 %v9796_v42, %v4629_v58  ;;  %6669 = vmatmul.mubr.bf16.gmra.mrb[16].mxu0 %v10712_v27 }
 0x463   :  { %v5655_v11 = vadd.bf16 %v9796_v42, %v4631_v28  ;;  %7375 = vmatmul.mubr.bf16.gmra.mrb[16].mxu1 %v10712_v27  ;;  %6678 = vmatprep.mubr.bf16.mxu0 %v10717_v55  ;;  %v5780_v14 = vmax.bf16 %v13061_v0, %v5652_v63 }
 0x464   :  { %v3733_v12 = vpop.f32.mrb[212].mxu0  ;;  %v5781_v7 = vmax.bf16 %v13061_v0, %v5653_v8  ;;  %7384 = vmatprep.mubr.bf16.mxu1 %v10717_v55  ;;  %v5782_v17 = vmax.bf16 %v13061_v0, %v5654_v5  ;;  %v5184_v55 = vpop.permute.xlu0 %5183 }
 0x465   :  { %v4439_v15 = vpop.f32.mrb[212].mxu1  ;;  %v3735_v54 = vpop.f32.mrb[213].mxu0  ;;  %v5783_v16 = vmax.bf16 %v13061_v0, %v5655_v11  ;;  %v5192_v63 = vrot.slane %v5184_v55, %v11561_v3 }
 0x466   :  { %v4441_v49 = vpop.f32.mrb[213].mxu1  ;;  %v3737_v45 = vpop.f32.mrb[214].mxu0  ;;  %6957 = vmatprep.subr.bf16.mxu0 %v5781_v7 }
 0x467   :  { %v4632_v50 = vpack.c.bf16 %v3737_v45, %v3733_v12  ;;  %v4443_v18 = vpop.f32.mrb[214].mxu1  ;;  %7663 = vmatprep.subr.bf16.mxu1 %v5783_v16  ;;  %v3739_v46 = vpop.f32.mrb[215].mxu0  ;;  %6958 = vmatpush1.bf16.msra.mxu0 %v5780_v14  ;;  %v10726_v45 = vld [vmem:[#allocation6 + $0x104] ss:$16 sps:$4 sm:$0xff]  }
 0x468   :  { %v4634_v20 = vpack.c.bf16 %v4443_v18, %v4439_v15  ;;  %v4633_v22 = vpack.c.bf16 %v3739_v46, %v3735_v54  ;;  %v4445_v33 = vpop.f32.mrb[215].mxu1  ;;  %7664 = vmatpush1.bf16.msra.mxu1 %v5782_v17  ;;  %v10721_v15 = vld [vmem:[#allocation6 + $0xe0] ss:$16 sps:$4 sm:$0xff]   ;;  %v9799_v54 = vcombine.low %v5192_v63, %v5203_v62  ;;  %v5239_v6 = vpop.permute.xlu1 %5238 }
 0x469   :  { %v5656_v23 = vadd.bf16 %v9797_v52, %v4632_v50  ;;  %v4635_v24 = vpack.c.bf16 %v4445_v33, %v4441_v49  ;;  %v5225_v33 = vrot.slane %v5217_v4, %v11561_v3 }
 0x46a   :  { %v5658_v25 = vadd.bf16 %v9797_v52, %v4634_v20  ;;  %v5657_v26 = vadd.bf16 %v9797_v52, %v4633_v22  ;;  %6679 = vmatmul.mubr.bf16.gmra.mrb[20].mxu0 %v10715_v21 }
 0x46b   :  { %v5659_v32 = vadd.bf16 %v9797_v52, %v4635_v24  ;;  %7385 = vmatmul.mubr.bf16.gmra.mrb[20].mxu1 %v10715_v21  ;;  %6688 = vmatprep.mubr.bf16.mxu0 %v10720_v19  ;;  %v5784_v9 = vmax.bf16 %v13061_v0, %v5656_v23 }
 0x46c   :  { %v3743_v34 = vpop.f32.mrb[216].mxu0  ;;  %v5785_v35 = vmax.bf16 %v13061_v0, %v5657_v26  ;;  %7394 = vmatprep.mubr.bf16.mxu1 %v10720_v19  ;;  %v5786_v2 = vmax.bf16 %v13061_v0, %v5658_v25  ;;  %v5206_v19 = vpop.permute.xlu0 %5205 }
 0x46d   :  { %v4449_v36 = vpop.f32.mrb[216].mxu1  ;;  %v3745_v37 = vpop.f32.mrb[217].mxu0  ;;  %v5787_v41 = vmax.bf16 %v13061_v0, %v5659_v32  ;;  %v5214_v23 = vrot.slane %v5206_v19, %v11561_v3 }
 0x46e   :  { %v4451_v39 = vpop.f32.mrb[217].mxu1  ;;  %v3747_v61 = vpop.f32.mrb[218].mxu0  ;;  %6959 = vmatprep.subr.bf16.mxu0 %v5785_v35 }
 0x46f   :  { %v4636_v48 = vpack.c.bf16 %v3747_v61, %v3743_v34  ;;  %v4453_v40 = vpop.f32.mrb[218].mxu1  ;;  %7665 = vmatprep.subr.bf16.mxu1 %v5787_v41  ;;  %v3749_v57 = vpop.f32.mrb[219].mxu0  ;;  %6960 = vmatpush1.bf16.msra.mxu0 %v5784_v9  ;;  %v10729_v61 = vld [vmem:[#allocation6 + $0x124] ss:$16 sps:$4 sm:$0xff]  }
 0x470   :  { %v4638_v27 = vpack.c.bf16 %v4453_v40, %v4449_v36  ;;  %v4637_v42 = vpack.c.bf16 %v3749_v57, %v3745_v37  ;;  %v4455_v43 = vpop.f32.mrb[219].mxu1  ;;  %7666 = vmatpush1.bf16.msra.mxu1 %v5786_v2  ;;  %v10724_v36 = vld [vmem:[#allocation6 + $0x100] ss:$16 sps:$4 sm:$0xff]   ;;  %v9800_v37 = vcombine.low %v5214_v23, %v5225_v33  ;;  %v5261_v55 = vpop.permute.xlu1 %5260 }
 0x471   :  { %v5660_v59 = vadd.bf16 %v9798_v53, %v4636_v48  ;;  %v4639_v44 = vpack.c.bf16 %v4455_v43, %v4451_v39  ;;  %v5247_v43 = vrot.slane %v5239_v6, %v11561_v3 }
 0x472   :  { %v5662_v56 = vadd.bf16 %v9798_v53, %v4638_v27  ;;  %v5661_v58 = vadd.bf16 %v9798_v53, %v4637_v42  ;;  %6689 = vmatmul.mubr.bf16.gmra.mrb[24].mxu0 %v10718_v47 }
 0x473   :  { %v5663_v28 = vadd.bf16 %v9798_v53, %v4639_v44  ;;  %7395 = vmatmul.mubr.bf16.gmra.mrb[24].mxu1 %v10718_v47  ;;  %6698 = vmatprep.mubr.bf16.mxu0 %v10723_v51  ;;  %v5788_v10 = vmax.bf16 %v13061_v0, %v5660_v59 }
 0x474   :  { %v3753_v5 = vpop.f32.mrb[220].mxu0  ;;  %v5789_v8 = vmax.bf16 %v13061_v0, %v5661_v58  ;;  %7404 = vmatprep.mubr.bf16.mxu1 %v10723_v51  ;;  %v5790_v12 = vmax.bf16 %v13061_v0, %v5662_v56  ;;  %v5228_v51 = vpop.permute.xlu0 %5227 }
 0x475   :  { %v4459_v38 = vpop.f32.mrb[220].mxu1  ;;  %v3755_v11 = vpop.f32.mrb[221].mxu0  ;;  %v5791_v13 = vmax.bf16 %v13061_v0, %v5663_v28  ;;  %v5236_v59 = vrot.slane %v5228_v51, %v11561_v3 }
 0x476   :  { %v4461_v7 = vpop.f32.mrb[221].mxu1  ;;  %v3757_v14 = vpop.f32.mrb[222].mxu0  ;;  %6961 = vmatprep.subr.bf16.mxu0 %v5789_v8 }
 0x477   :  { %v4640_v16 = vpack.c.bf16 %v3757_v14, %v3753_v5  ;;  %v4463_v17 = vpop.f32.mrb[222].mxu1  ;;  %7667 = vmatprep.subr.bf16.mxu1 %v5791_v13  ;;  %v3759_v49 = vpop.f32.mrb[223].mxu0  ;;  %6962 = vmatpush1.bf16.msra.mxu0 %v5788_v10  ;;  %v10732_v14 = vld [vmem:[#allocation6 + $0x144] ss:$16 sps:$4 sm:$0xff]  }
 0x478   :  { %v4642_v21 = vpack.c.bf16 %v4463_v17, %v4459_v38  ;;  %v4641_v52 = vpack.c.bf16 %v3759_v49, %v3755_v11  ;;  %v4465_v50 = vpop.f32.mrb[223].mxu1  ;;  %7668 = vmatpush1.bf16.msra.mxu1 %v5790_v12  ;;  %v10727_v38 = vld [vmem:[#allocation6 + $0x120] ss:$16 sps:$4 sm:$0xff]   ;;  %v9801_v11 = vcombine.low %v5236_v59, %v5247_v43  ;;  %v5283_v19 = vpop.permute.xlu1 %5282 }
 0x479   :  { %v5664_v18 = vadd.bf16 %v9799_v54, %v4640_v16  ;;  %v4643_v46 = vpack.c.bf16 %v4465_v50, %v4461_v7  ;;  %v5269_v50 = vrot.slane %v5261_v55, %v11561_v3 }
 0x47a   :  { %v5666_v20 = vadd.bf16 %v9799_v54, %v4642_v21  ;;  %v5665_v22 = vadd.bf16 %v9799_v54, %v4641_v52  ;;  %6699 = vmatmul.mubr.bf16.gmra.mrb[28].mxu0 %v10721_v15 }
 0x47b   :  { %v5667_v24 = vadd.bf16 %v9799_v54, %v4643_v46  ;;  %7405 = vmatmul.mubr.bf16.gmra.mrb[28].mxu1 %v10721_v15  ;;  %6708 = vmatprep.mubr.bf16.mxu0 %v10726_v45  ;;  %v5792_v29 = vmax.bf16 %v13061_v0, %v5664_v18 }
 0x47c   :  { %v3763_v25 = vpop.f32.mrb[224].mxu0  ;;  %v5793_v26 = vmax.bf16 %v13061_v0, %v5665_v22  ;;  %7414 = vmatprep.mubr.bf16.mxu1 %v10726_v45  ;;  %v5794_v34 = vmax.bf16 %v13061_v0, %v5666_v20  ;;  %v5250_v45 = vpop.permute.xlu0 %5249 }
 0x47d   :  { %v4469_v31 = vpop.f32.mrb[224].mxu1  ;;  %v3765_v32 = vpop.f32.mrb[225].mxu0  ;;  %v5795_v30 = vmax.bf16 %v13061_v0, %v5667_v24  ;;  %v5258_v18 = vrot.slane %v5250_v45, %v11561_v3 }
 0x47e   :  { %v4471_v35 = vpop.f32.mrb[225].mxu1  ;;  %v3767_v9 = vpop.f32.mrb[226].mxu0  ;;  %6963 = vmatprep.subr.bf16.mxu0 %v5793_v26 }
 0x47f   :  { %v4644_v41 = vpack.c.bf16 %v3767_v9, %v3763_v25  ;;  %v4473_v2 = vpop.f32.mrb[226].mxu1  ;;  %7669 = vmatprep.subr.bf16.mxu1 %v5795_v30  ;;  %v3769_v39 = vpop.f32.mrb[227].mxu0  ;;  %6964 = vmatpush1.bf16.msra.mxu0 %v5792_v29  ;;  %v10735_v9 = vld [vmem:[#allocation6 + $0x164] ss:$16 sps:$4 sm:$0xff]  }
 0x480   :  { %v4646_v47 = vpack.c.bf16 %v4473_v2, %v4469_v31  ;;  %v4645_v53 = vpack.c.bf16 %v3769_v39, %v3765_v32  ;;  %v4475_v48 = vpop.f32.mrb[227].mxu1  ;;  %7670 = vmatpush1.bf16.msra.mxu1 %v5794_v34  ;;  %v10730_v31 = vld [vmem:[#allocation6 + $0x140] ss:$16 sps:$4 sm:$0xff]   ;;  %v9802_v32 = vcombine.low %v5258_v18, %v5269_v50  ;;  %v5305_v51 = vpop.permute.xlu1 %5304 }
 0x481   :  { %v5668_v40 = vadd.bf16 %v9800_v37, %v4644_v41  ;;  %v4647_v57 = vpack.c.bf16 %v4475_v48, %v4471_v35  ;;  %v5291_v48 = vrot.slane %v5283_v19, %v11561_v3 }
 0x482   :  { %v5670_v27 = vadd.bf16 %v9800_v37, %v4646_v47  ;;  %v5669_v42 = vadd.bf16 %v9800_v37, %v4645_v53  ;;  %6709 = vmatmul.mubr.bf16.gmra.mrb[32].mxu0 %v10724_v36 }
 0x483   :  { %v5671_v44 = vadd.bf16 %v9800_v37, %v4647_v57  ;;  %7415 = vmatmul.mubr.bf16.gmra.mrb[32].mxu1 %v10724_v36  ;;  %6718 = vmatprep.mubr.bf16.mxu0 %v10729_v61  ;;  %v5796_v62 = vmax.bf16 %v13061_v0, %v5668_v40 }
 0x484   :  { %v3773_v56 = vpop.f32.mrb[228].mxu0  ;;  %v5797_v58 = vmax.bf16 %v13061_v0, %v5669_v42  ;;  %7424 = vmatprep.mubr.bf16.mxu1 %v10729_v61  ;;  %v5798_v5 = vmax.bf16 %v13061_v0, %v5670_v27  ;;  %v5272_v61 = vpop.permute.xlu0 %5271 }
 0x485   :  { %v4479_v63 = vpop.f32.mrb[228].mxu1  ;;  %v3775_v28 = vpop.f32.mrb[229].mxu0  ;;  %v5799_v4 = vmax.bf16 %v13061_v0, %v5671_v44  ;;  %v5280_v40 = vrot.slane %v5272_v61, %v11561_v3 }
 0x486   :  { %v4481_v8 = vpop.f32.mrb[229].mxu1  ;;  %v3777_v10 = vpop.f32.mrb[230].mxu0  ;;  %6965 = vmatprep.subr.bf16.mxu0 %v5797_v58 }
 0x487   :  { %v4648_v13 = vpack.c.bf16 %v3777_v10, %v3773_v56  ;;  %v4483_v12 = vpop.f32.mrb[230].mxu1  ;;  %7671 = vmatprep.subr.bf16.mxu1 %v5799_v4  ;;  %v3779_v7 = vpop.f32.mrb[231].mxu0  ;;  %6966 = vmatpush1.bf16.msra.mxu0 %v5796_v62  ;;  %v10738_v10 = vld [vmem:[#allocation6 + $0x184] ss:$16 sps:$4 sm:$0xff]  }
 0x488   :  { %v4650_v15 = vpack.c.bf16 %v4483_v12, %v4479_v63  ;;  %v4649_v54 = vpack.c.bf16 %v3779_v7, %v3775_v28  ;;  %v4485_v16 = vpop.f32.mrb[231].mxu1  ;;  %7672 = vmatpush1.bf16.msra.mxu1 %v5798_v5  ;;  %v10733_v63 = vld [vmem:[#allocation6 + $0x160] ss:$16 sps:$4 sm:$0xff]   ;;  %v9803_v28 = vcombine.low %v5280_v40, %v5291_v48  ;;  %v5327_v45 = vpop.permute.xlu1 %5326 }
 0x489   :  { %v5672_v17 = vadd.bf16 %v9801_v11, %v4648_v13  ;;  %v4651_v49 = vpack.c.bf16 %v4485_v16, %v4481_v8  ;;  %v5313_v16 = vrot.slane %v5305_v51, %v11561_v3 }
 0x48a   :  { %v5674_v21 = vadd.bf16 %v9801_v11, %v4650_v15  ;;  %v5673_v52 = vadd.bf16 %v9801_v11, %v4649_v54  ;;  %6719 = vmatmul.mubr.bf16.gmra.mrb[36].mxu0 %v10727_v38 }
 0x48b   :  { %v5675_v46 = vadd.bf16 %v9801_v11, %v4651_v49  ;;  %7425 = vmatmul.mubr.bf16.gmra.mrb[36].mxu1 %v10727_v38  ;;  %6728 = vmatprep.mubr.bf16.mxu0 %v10732_v14  ;;  %v5800_v33 = vmax.bf16 %v13061_v0, %v5672_v17 }
 0x48c   :  { %v3783_v20 = vpop.f32.mrb[232].mxu0  ;;  %v5801_v22 = vmax.bf16 %v13061_v0, %v5673_v52  ;;  %7434 = vmatprep.mubr.bf16.mxu1 %v10732_v14  ;;  %v5802_v25 = vmax.bf16 %v13061_v0, %v5674_v21  ;;  %v5294_v14 = vpop.permute.xlu0 %5293 }
 0x48d   :  { %v4489_v23 = vpop.f32.mrb[232].mxu1  ;;  %v3785_v24 = vpop.f32.mrb[233].mxu0  ;;  %v5803_v6 = vmax.bf16 %v13061_v0, %v5675_v46  ;;  %v5302_v17 = vrot.slane %v5294_v14, %v11561_v3 }
 0x48e   :  { %v4491_v26 = vpop.f32.mrb[233].mxu1  ;;  %v3787_v29 = vpop.f32.mrb[234].mxu0  ;;  %6967 = vmatprep.subr.bf16.mxu0 %v5801_v22 }
 0x48f   :  { %v4652_v30 = vpack.c.bf16 %v3787_v29, %v3783_v20  ;;  %v4493_v34 = vpop.f32.mrb[234].mxu1  ;;  %7673 = vmatprep.subr.bf16.mxu1 %v5803_v6  ;;  %v3789_v35 = vpop.f32.mrb[235].mxu0  ;;  %6968 = vmatpush1.bf16.msra.mxu0 %v5800_v33  ;;  %v10741_v29 = vld [vmem:[#allocation6 + $0x1a4] ss:$16 sps:$4 sm:$0xff]  }
 0x490   :  { %v4654_v36 = vpack.c.bf16 %v4493_v34, %v4489_v23  ;;  %v4653_v37 = vpack.c.bf16 %v3789_v35, %v3785_v24  ;;  %v4495_v41 = vpop.f32.mrb[235].mxu1  ;;  %7674 = vmatpush1.bf16.msra.mxu1 %v5802_v25  ;;  %v10736_v23 = vld [vmem:[#allocation6 + $0x180] ss:$16 sps:$4 sm:$0xff]   ;;  %v9804_v24 = vcombine.low %v5302_v17, %v5313_v16  ;;  %v5349_v61 = vpop.permute.xlu1 %5348 }
 0x491   :  { %v5676_v2 = vadd.bf16 %v9802_v32, %v4652_v30  ;;  %v4655_v39 = vpack.c.bf16 %v4495_v41, %v4491_v26  ;;  %v5335_v41 = vrot.slane %v5327_v45, %v11561_v3 }
 0x492   :  { %v5678_v47 = vadd.bf16 %v9802_v32, %v4654_v36  ;;  %v5677_v53 = vadd.bf16 %v9802_v32, %v4653_v37  ;;  %6729 = vmatmul.mubr.bf16.gmra.mrb[40].mxu0 %v10730_v31 }
 0x493   :  { %v5679_v57 = vadd.bf16 %v9802_v32, %v4655_v39  ;;  %7435 = vmatmul.mubr.bf16.gmra.mrb[40].mxu1 %v10730_v31  ;;  %6738 = vmatprep.mubr.bf16.mxu0 %v10735_v9  ;;  %v5804_v43 = vmax.bf16 %v13061_v0, %v5676_v2 }
 0x494   :  { %v3793_v27 = vpop.f32.mrb[236].mxu0  ;;  %v5805_v42 = vmax.bf16 %v13061_v0, %v5677_v53  ;;  %7444 = vmatprep.mubr.bf16.mxu1 %v10735_v9  ;;  %v5806_v56 = vmax.bf16 %v13061_v0, %v5678_v47  ;;  %v5316_v9 = vpop.permute.xlu0 %5315 }
 0x495   :  { %v4499_v59 = vpop.f32.mrb[236].mxu1  ;;  %v3795_v44 = vpop.f32.mrb[237].mxu0  ;;  %v5807_v55 = vmax.bf16 %v13061_v0, %v5679_v57  ;;  %v5324_v2 = vrot.slane %v5316_v9, %v11561_v3 }
 0x496   :  { %v4501_v58 = vpop.f32.mrb[237].mxu1  ;;  %v3797_v62 = vpop.f32.mrb[238].mxu0  ;;  %6969 = vmatprep.subr.bf16.mxu0 %v5805_v42 }
 0x497   :  { %v4656_v4 = vpack.c.bf16 %v3797_v62, %v3793_v27  ;;  %v4503_v5 = vpop.f32.mrb[238].mxu1  ;;  %7675 = vmatprep.subr.bf16.mxu1 %v5807_v55  ;;  %v3799_v8 = vpop.f32.mrb[239].mxu0  ;;  %6970 = vmatpush1.bf16.msra.mxu0 %v5804_v43  ;;  %v10744_v62 = vld [vmem:[#allocation6 + $0x1c4] ss:$16 sps:$4 sm:$0xff]  }
 0x498   :  { %v4658_v38 = vpack.c.bf16 %v4503_v5, %v4499_v59  ;;  %v4657_v11 = vpack.c.bf16 %v3799_v8, %v3795_v44  ;;  %v4505_v13 = vpop.f32.mrb[239].mxu1  ;;  %7676 = vmatpush1.bf16.msra.mxu1 %v5806_v56  ;;  %v10739_v59 = vld [vmem:[#allocation6 + $0x1a0] ss:$16 sps:$4 sm:$0xff]   ;;  %v9805_v44 = vcombine.low %v5324_v2, %v5335_v41  ;;  %v5371_v14 = vpop.permute.xlu1 %5370 }
 0x499   :  { %v5680_v12 = vadd.bf16 %v9803_v28, %v4656_v4  ;;  %v4659_v7 = vpack.c.bf16 %v4505_v13, %v4501_v58  ;;  %v5357_v13 = vrot.slane %v5349_v61, %v11561_v3 }
 0x49a   :  { %v5682_v15 = vadd.bf16 %v9803_v28, %v4658_v38  ;;  %v5681_v54 = vadd.bf16 %v9803_v28, %v4657_v11  ;;  %6739 = vmatmul.mubr.bf16.gmra.mrb[44].mxu0 %v10733_v63 }
 0x49b   :  { %v5683_v49 = vadd.bf16 %v9803_v28, %v4659_v7  ;;  %7445 = vmatmul.mubr.bf16.gmra.mrb[44].mxu1 %v10733_v63  ;;  %6748 = vmatprep.mubr.bf16.mxu0 %v10738_v10  ;;  %v5808_v50 = vmax.bf16 %v13061_v0, %v5680_v12 }
 0x49c   :  { %v3803_v21 = vpop.f32.mrb[240].mxu0  ;;  %v5809_v52 = vmax.bf16 %v13061_v0, %v5681_v54  ;;  %7454 = vmatprep.mubr.bf16.mxu1 %v10738_v10  ;;  %v5810_v20 = vmax.bf16 %v13061_v0, %v5682_v15  ;;  %v5338_v10 = vpop.permute.xlu0 %5337 }
 0x49d   :  { %v4509_v18 = vpop.f32.mrb[240].mxu1  ;;  %v3805_v46 = vpop.f32.mrb[241].mxu0  ;;  %v5811_v19 = vmax.bf16 %v13061_v0, %v5683_v49  ;;  %v5346_v12 = vrot.slane %v5338_v10, %v11561_v3  ;;  %v10748_v10 = vld [vmem:[#allocation6 + $0x200] ss:$16 sps:$4 sm:$0xff]  }
 0x49e   :  { %v4511_v22 = vpop.f32.mrb[241].mxu1  ;;  %v3807_v33 = vpop.f32.mrb[242].mxu0  ;;  %6971 = vmatprep.subr.bf16.mxu0 %v5809_v52 }
 0x49f   :  { %v4660_v6 = vpack.c.bf16 %v3807_v33, %v3803_v21  ;;  %v4513_v25 = vpop.f32.mrb[242].mxu1  ;;  %7677 = vmatprep.subr.bf16.mxu1 %v5811_v19  ;;  %v3809_v26 = vpop.f32.mrb[243].mxu0  ;;  %6972 = vmatpush1.bf16.msra.mxu0 %v5808_v50  ;;  %v10747_v33 = vld [vmem:[#allocation6 + $0x1e4] ss:$16 sps:$4 sm:$0xff]  }
 0x4a0   :  { %v4662_v31 = vpack.c.bf16 %v4513_v25, %v4509_v18  ;;  %v4661_v32 = vpack.c.bf16 %v3809_v26, %v3805_v46  ;;  %v4515_v30 = vpop.f32.mrb[243].mxu1  ;;  %7678 = vmatpush1.bf16.msra.mxu1 %v5810_v20  ;;  %v10742_v18 = vld [vmem:[#allocation6 + $0x1c0] ss:$16 sps:$4 sm:$0xff]   ;;  %v9806_v46 = vcombine.low %v5346_v12, %v5357_v13  ;;  %v10756_v13 = vld [vmem:[#allocation6 + $0x244] ss:$16 sps:$4 sm:$0xff]  }
 0x4a1   :  { %v5684_v34 = vadd.bf16 %v9804_v24, %v4660_v6  ;;  %v4663_v35 = vpack.c.bf16 %v4515_v30, %v4511_v22  ;;  %v5379_v30 = vrot.slane %v5371_v14, %v11561_v3  ;;  %v10754_v12 = vld [vmem:[#allocation6 + $0x240] ss:$16 sps:$4 sm:$0xff]  }
 0x4a2   :  { %v5686_v36 = vadd.bf16 %v9804_v24, %v4662_v31  ;;  %v5685_v37 = vadd.bf16 %v9804_v24, %v4661_v32  ;;  %6749 = vmatmul.mubr.bf16.gmra.mrb[48].mxu0 %v10736_v23  ;;  %v10757_v14 = vld [vmem:[#allocation6 + $0x260] ss:$16 sps:$4 sm:$0xff]  }
 0x4a3   :  { %v5687_v39 = vadd.bf16 %v9804_v24, %v4663_v35  ;;  %7455 = vmatmul.mubr.bf16.gmra.mrb[48].mxu1 %v10736_v23  ;;  %6758 = vmatprep.mubr.bf16.mxu0 %v10741_v29  ;;  %v5812_v48 = vmax.bf16 %v13061_v0, %v5684_v34  ;;  %v5360_v23 = vpop.permute.xlu0 %5359 }
 0x4a4   :  { %v3813_v47 = vpop.f32.mrb[244].mxu0  ;;  %v5813_v53 = vmax.bf16 %v13061_v0, %v5685_v37  ;;  %7464 = vmatprep.mubr.bf16.mxu1 %v10741_v29  ;;  %v5814_v27 = vmax.bf16 %v13061_v0, %v5686_v36  ;;  %v5368_v34 = vrot.slane %v5360_v23, %v11561_v3  ;;  %v11119_v23 = vmov 2  }
 0x4a5   :  { %v4519_v40 = vpop.f32.mrb[244].mxu1  ;;  %v3815_v57 = vpop.f32.mrb[245].mxu0  ;;  %v5815_v51 = vmax.bf16 %v13061_v0, %v5687_v39  ;;  %10503 = vset.pattern.permute.xlu1 %v11119_v23  ;;  %10502 = vset.pattern.permute.xlu0 %v11119_v23  ;;  %v11015_v23 = vld [vmem:[%s13057_s4 + $0xcc] sm:$0xf] }
 0x4a6   :  { %v4521_v42 = vpop.f32.mrb[245].mxu1  ;;  %v3817_v43 = vpop.f32.mrb[246].mxu0  ;;  %6973 = vmatprep.subr.bf16.mxu0 %v5813_v53 }
 0x4a7   :  { %v4664_v55 = vpack.c.bf16 %v3817_v43, %v3813_v47  ;;  %v4523_v56 = vpop.f32.mrb[246].mxu1  ;;  %7679 = vmatprep.subr.bf16.mxu1 %v5815_v51  ;;  %v3819_v58 = vpop.f32.mrb[247].mxu0  ;;  %6974 = vmatpush1.bf16.msra.mxu0 %v5812_v48  ;;  %v10745_v48 = vld [vmem:[#allocation6 + $0x1e0] ss:$16 sps:$4 sm:$0xff]  }
 0x4a8   :  { %v4666_v63 = vpack.c.bf16 %v4523_v56, %v4519_v40  ;;  %v4665_v28 = vpack.c.bf16 %v3819_v58, %v3815_v57  ;;  %v4525_v4 = vpop.f32.mrb[247].mxu1  ;;  %7680 = vmatpush1.bf16.msra.mxu1 %v5814_v27  ;;  %v9807_v40 = vcombine.low %v5368_v34, %v5379_v30  ;;  %v10784_v30 = vld [vmem:[#allocation6 + $0x380] ss:$16 sps:$4 sm:$0xff]   ;;  %v10981_v34 = vld [vmem:[%s13057_s4 + $0xc] sm:$0xf] }
 0x4a9   :  { %v5688_v5 = vadd.bf16 %v9805_v44, %v4664_v55  ;;  %v4667_v8 = vpack.c.bf16 %v4525_v4, %v4521_v42  ;;  %v10750_v42 = vld [vmem:[#allocation6 + $0x204] ss:$16 sps:$4 sm:$0xff]  }
 0x4aa   :  { %v5690_v38 = vadd.bf16 %v9805_v44, %v4666_v63  ;;  %v5689_v11 = vadd.bf16 %v9805_v44, %v4665_v28  ;;  %6759 = vmatmul.mubr.bf16.gmra.mrb[52].mxu0 %v10739_v59 }
 0x4ab   :  { %v5691_v7 = vadd.bf16 %v9805_v44, %v4667_v8  ;;  %7465 = vmatmul.mubr.bf16.gmra.mrb[52].mxu1 %v10739_v59  ;;  %6768 = vmatprep.mubr.bf16.mxu0 %v10744_v62  ;;  %v5816_v16 = vmax.bf16 %v13061_v0, %v5688_v5 }
 0x4ac   :  { %v3823_v15 = vpop.f32.mrb[248].mxu0  ;;  %v5817_v54 = vmax.bf16 %v13061_v0, %v5689_v11  ;;  %7474 = vmatprep.mubr.bf16.mxu1 %v10744_v62  ;;  %v5818_v21 = vmax.bf16 %v13061_v0, %v5690_v38  ;;  %v10753_v38 = vld [vmem:[#allocation6 + $0x224] ss:$16 sps:$4 sm:$0xff]   ;;  %v10751_v11 = vld [vmem:[#allocation6 + $0x220] ss:$16 sps:$4 sm:$0xff]  }
 0x4ad   :  { %v4529_v17 = vpop.f32.mrb[248].mxu1  ;;  %v3825_v49 = vpop.f32.mrb[249].mxu0  ;;  %v5819_v45 = vmax.bf16 %v13061_v0, %v5691_v7  ;;  %v10759_v7 = vld [vmem:[#allocation6 + $0x264] ss:$16 sps:$4 sm:$0xff]  }
 0x4ae   :  { %v4531_v52 = vpop.f32.mrb[249].mxu1  ;;  %v3827_v50 = vpop.f32.mrb[250].mxu0  ;;  %6975 = vmatprep.subr.bf16.mxu0 %v5817_v54  ;;  %v10760_v54 = vld [vmem:[#allocation6 + $0x280] ss:$16 sps:$4 sm:$0xff]  }
 0x4af   :  { %v4668_v19 = vpack.c.bf16 %v3827_v50, %v3823_v15  ;;  %v4533_v20 = vpop.f32.mrb[250].mxu1  ;;  %7681 = vmatprep.subr.bf16.mxu1 %v5819_v45  ;;  %v3829_v22 = vpop.f32.mrb[251].mxu0  ;;  %6976 = vmatpush1.bf16.msra.mxu0 %v5816_v16  ;;  %v10762_v15 = vld [vmem:[#allocation6 + $0x284] ss:$16 sps:$4 sm:$0xff]   ;;  %v10766_v45 = vld [vmem:[#allocation6 + $0x2c0] ss:$16 sps:$4 sm:$0xff]  }
 0x4b0   :  { %v4670_v24 = vpack.c.bf16 %v4533_v20, %v4529_v17  ;;  %v4669_v6 = vpack.c.bf16 %v3829_v22, %v3825_v49  ;;  %v4535_v25 = vpop.f32.mrb[251].mxu1  ;;  %7682 = vmatpush1.bf16.msra.mxu1 %v5818_v21  ;;  %v10765_v16 = vld [vmem:[#allocation6 + $0x2a4] ss:$16 sps:$4 sm:$0xff]   ;;  %v10763_v17 = vld [vmem:[#allocation6 + $0x2a0] ss:$16 sps:$4 sm:$0xff]  }
 0x4b1   :  { %v5692_v26 = vadd.bf16 %v9806_v46, %v4668_v19  ;;  %v4671_v29 = vpack.c.bf16 %v4535_v25, %v4531_v52  ;;  %v10768_v49 = vld [vmem:[#allocation6 + $0x2c4] ss:$16 sps:$4 sm:$0xff]   ;;  %v10769_v52 = vld [vmem:[#allocation6 + $0x2e0] ss:$16 sps:$4 sm:$0xff]  }
 0x4b2   :  { %v5694_v31 = vadd.bf16 %v9806_v46, %v4670_v24  ;;  %v5693_v32 = vadd.bf16 %v9806_v46, %v4669_v6  ;;  %6769 = vmatmul.mubr.bf16.gmra.mrb[56].mxu0 %v10742_v18  ;;  %v10771_v21 = vld [vmem:[#allocation6 + $0x2e4] ss:$16 sps:$4 sm:$0xff]   ;;  %v10775_v19 = vld [vmem:[#allocation6 + $0x320] ss:$16 sps:$4 sm:$0xff]  }
 0x4b3   :  { %v5695_v35 = vadd.bf16 %v9806_v46, %v4671_v29  ;;  %7475 = vmatmul.mubr.bf16.gmra.mrb[56].mxu1 %v10742_v18  ;;  %6778 = vmatprep.mubr.bf16.mxu0 %v10747_v33  ;;  %v5820_v37 = vmax.bf16 %v13061_v0, %v5692_v26  ;;  %v10774_v50 = vld [vmem:[#allocation6 + $0x304] ss:$16 sps:$4 sm:$0xff]   ;;  %v10772_v18 = vld [vmem:[#allocation6 + $0x300] ss:$16 sps:$4 sm:$0xff]  }
 0x4b4   :  { %v3833_v9 = vpop.f32.mrb[252].mxu0  ;;  %v5821_v36 = vmax.bf16 %v13061_v0, %v5693_v32  ;;  %7484 = vmatprep.mubr.bf16.mxu1 %v10747_v33  ;;  %v5822_v61 = vmax.bf16 %v13061_v0, %v5694_v31  ;;  %v10777_v46 = vld [vmem:[#allocation6 + $0x324] ss:$16 sps:$4 sm:$0xff]   ;;  %v10778_v22 = vld [vmem:[#allocation6 + $0x340] ss:$16 sps:$4 sm:$0xff]  }
 0x4b5   :  { %v4539_v41 = vpop.f32.mrb[252].mxu1  ;;  %v3835_v2 = vpop.f32.mrb[253].mxu0  ;;  %v5823_v39 = vmax.bf16 %v13061_v0, %v5695_v35  ;;  %v10780_v20 = vld [vmem:[#allocation6 + $0x344] ss:$16 sps:$4 sm:$0xff]   ;;  %v10781_v6 = vld [vmem:[#allocation6 + $0x360] ss:$16 sps:$4 sm:$0xff]  }
 0x4b6   :  { %v4541_v47 = vpop.f32.mrb[253].mxu1  ;;  %v3837_v53 = vpop.f32.mrb[254].mxu0  ;;  %6977 = vmatprep.subr.bf16.mxu0 %v5821_v36  ;;  %v10783_v33 = vld [vmem:[#allocation6 + $0x364] ss:$16 sps:$4 sm:$0xff]   ;;  %v10977_v25 = vld [vmem:[%s13057_s4] sm:$0xf] }
 0x4b7   :  { %v4672_v57 = vpack.c.bf16 %v3837_v53, %v3833_v9  ;;  %v4543_v51 = vpop.f32.mrb[254].mxu1  ;;  %7683 = vmatprep.subr.bf16.mxu1 %v5823_v39  ;;  %v3839_v27 = vpop.f32.mrb[255].mxu0  ;;  %6978 = vmatpush1.bf16.msra.mxu0 %v5820_v37  ;;  %v10976_v24 = vld [vmem:[%s13057_s4 + $0x4] sm:$0xf]  ;;  %v10978_v29 = vld [vmem:[%s13057_s4 + $0x80] sm:$0xf] }
 0x4b8   :  { %v4674_v43 = vpack.c.bf16 %v4543_v51, %v4539_v41  ;;  %v4673_v59 = vpack.c.bf16 %v3839_v27, %v3835_v2  ;;  %v4545_v44 = vpop.f32.mrb[255].mxu1  ;;  %7684 = vmatpush1.bf16.msra.mxu1 %v5822_v61  ;;  %8148 = vperm.xlu1 %10503, %v10976_v24   ;;  %v10786_v26 = vld [vmem:[#allocation6 + $0x384] ss:$16 sps:$4 sm:$0xff]   ;;  %v10980_v32 = vld [vmem:[%s13057_s4 + $0x8] sm:$0xf] }
 0x4b9   :  { %v5696_v55 = vadd.bf16 %v9807_v40, %v4672_v57  ;;  %v4675_v56 = vpack.c.bf16 %v4545_v44, %v4541_v47  ;;  %8137 = vperm.xlu0 %10502, %v10977_v25   ;;  %v10979_v31 = vld [vmem:[%s13057_s4 + $0x84] sm:$0xf]  ;;  %v10982_v9 = vld [vmem:[%s13057_s4 + $0x88] sm:$0xf]  ;;  %v10983_v36 = vld [vmem:[%s13057_s4 + $0x8c] sm:$0xf] }
 0x4ba   :  { %v5698_v58 = vadd.bf16 %v9807_v40, %v4674_v43  ;;  %v5697_v62 = vadd.bf16 %v9807_v40, %v4673_v59  ;;  %6779 = vmatmul.mubr.bf16.gmra.mrb[60].mxu0 %v10745_v48  ;;  %v10789_v35 = vld [vmem:[#allocation6 + $0x3a4] ss:$16 sps:$4 sm:$0xff]   ;;  %v10984_v37 = vld [vmem:[%s13057_s4 + $0x10] sm:$0xf]  ;;  %v10988_v53 = vld [vmem:[%s13057_s4 + $0x18] sm:$0xf] }
 0x4bb   :  { %v5699_v63 = vadd.bf16 %v9807_v40, %v4675_v56  ;;  %7485 = vmatmul.mubr.bf16.gmra.mrb[60].mxu1 %v10745_v48  ;;  %6788 = vmatprep.mubr.bf16.mxu0 %v10750_v42  ;;  %v5824_v4 = vmax.bf16 %v13061_v0, %v5696_v55  ;;  %v10787_v41 = vld [vmem:[#allocation6 + $0x3a0] ss:$16 sps:$4 sm:$0xff]   ;;  %v10985_v2 = vld [vmem:[%s13057_s4 + $0x14] sm:$0xf]  ;;  %v10989_v40 = vld [vmem:[%s13057_s4 + $0x1c] sm:$0xf] }
 0x4bc   :  { %v5825_v28 = vmax.bf16 %v13061_v0, %v5697_v62  ;;  %7494 = vmatprep.mubr.bf16.mxu1 %v10750_v42  ;;  %v5826_v8 = vmax.bf16 %v13061_v0, %v5698_v58  ;;  %8489 = vperm.xlu1 %10503, %v10978_v29   ;;  %v10792_v39 = vld [vmem:[#allocation6 + $0x3c4] ss:$16 sps:$4 sm:$0xff]   ;;  %v10986_v61 = vld [vmem:[%s13057_s4 + $0x90] sm:$0xf]  ;;  %v10990_v51 = vld [vmem:[%s13057_s4 + $0x98] sm:$0xf] }
 0x4bd   :  { %v5827_v5 = vmax.bf16 %v13061_v0, %v5699_v63  ;;  %8500 = vperm.xlu0 %10502, %v10979_v31   ;;  %v10987_v47 = vld [vmem:[%s13057_s4 + $0x94] sm:$0xf]  ;;  %v10790_v48 = vld [vmem:[#allocation6 + $0x3c0] ss:$16 sps:$4 sm:$0xff]   ;;  %v10991_v27 = vld [vmem:[%s13057_s4 + $0x9c] sm:$0xf] }
 0x4be   :  { %6979 = vmatprep.subr.bf16.mxu0 %v5825_v28  ;;  %v10795_v57 = vld [vmem:[#allocation6 + $0x3e4] ss:$16 sps:$4 sm:$0xff]   ;;  %v10992_v42 = vld [vmem:[%s13057_s4 + $0x20] sm:$0xf]  ;;  %v10798_v44 = vld [vmem:[#allocation6 + $0xc] ss:$16 sps:$4 sm:$0xff]  }
 0x4bf   :  { %7685 = vmatprep.subr.bf16.mxu1 %v5827_v5  ;;  %6980 = vmatpush1.bf16.msra.mxu0 %v5824_v4  ;;  %v10793_v43 = vld [vmem:[#allocation6 + $0x3e0] ss:$16 sps:$4 sm:$0xff]   ;;  %v10993_v59 = vld [vmem:[%s13057_s4 + $0x24] sm:$0xf]  ;;  %v10996_v58 = vld [vmem:[%s13057_s4 + $0x28] sm:$0xf] }
 0x4c0   :  { %7686 = vmatpush1.bf16.msra.mxu1 %v5826_v8  ;;  %8159 = vperm.xlu1 %10503, %v10980_v32   ;;  %v10994_v55 = vld [vmem:[%s13057_s4 + $0xa0] sm:$0xf]  ;;  %v10995_v56 = vld [vmem:[%s13057_s4 + $0xa4] sm:$0xf]  ;;  %v10796_v62 = vld [vmem:[#allocation6 + $0x8] ss:$16 sps:$4 sm:$0xff]  }
 0x4c1   :  { %8170 = vperm.xlu0 %10502, %v10981_v34   ;;  %v10997_v63 = vld [vmem:[%s13057_s4 + $0x2c] sm:$0xf]  ;;  %v10998_v4 = vld [vmem:[%s13057_s4 + $0xa8] sm:$0xf]  ;;  %v11000_v8 = vld [vmem:[%s13057_s4 + $0x30] sm:$0xf] }
 0x4c2   :  { %6789 = vmatmul.mubr.bf16.gmra.mrb[64].mxu0 %v10748_v10  ;;  %v10801_v28 = vld [vmem:[#allocation6 + $0x2c] ss:$16 sps:$4 sm:$0xff]   ;;  %v11016_v24 = vld [vmem:[%s13057_s4 + $0x50] sm:$0xf]  ;;  %v11017_v25 = vld [vmem:[%s13057_s4 + $0x54] sm:$0xf] }
 0x4c3   :  { %7495 = vmatmul.mubr.bf16.gmra.mrb[64].mxu1 %v10748_v10  ;;  %6798 = vmatprep.mubr.bf16.mxu0 %v10753_v38  ;;  %v10999_v5 = vld [vmem:[%s13057_s4 + $0xac] sm:$0xf]  ;;  %v10799_v10 = vld [vmem:[#allocation6 + $0x28] ss:$16 sps:$4 sm:$0xff]   ;;  %v11018_v29 = vld [vmem:[%s13057_s4 + $0xd0] sm:$0xf] }
 0x4c4   :  { %7504 = vmatprep.mubr.bf16.mxu1 %v10753_v38  ;;  %8511 = vperm.xlu1 %10503, %v10982_v9   ;;  %v11001_v38 = vld [vmem:[%s13057_s4 + $0x34] sm:$0xf]  ;;  %v11020_v32 = vld [vmem:[%s13057_s4 + $0x58] sm:$0xf]  ;;  %v11021_v34 = vld [vmem:[%s13057_s4 + $0x5c] sm:$0xf] }
 0x4c5   :  { %8522 = vperm.xlu0 %10502, %v10983_v36   ;;  %v11019_v31 = vld [vmem:[%s13057_s4 + $0xd4] sm:$0xf]  ;;  %v11022_v9 = vld [vmem:[%s13057_s4 + $0xd8] sm:$0xf]  ;;  %v11023_v36 = vld [vmem:[%s13057_s4 + $0xdc] sm:$0xf] }
 0x4c8   :  { %8181 = vperm.xlu1 %10503, %v10984_v37   ;;  %v11024_v37 = vld [vmem:[%s13057_s4 + $0x60] sm:$0xf] }
 0x4c9   :  { %8192 = vperm.xlu0 %10502, %v10985_v2   ;;  %v11025_v2 = vld [vmem:[%s13057_s4 + $0x64] sm:$0xf] }
 0x4ca   :  { %6799 = vmatmul.mubr.bf16.gmra.mrb[68].mxu0 %v10751_v11 }
 0x4cb   :  { %7505 = vmatmul.mubr.bf16.gmra.mrb[68].mxu1 %v10751_v11  ;;  %6808 = vmatprep.mubr.bf16.mxu0 %v10756_v13  ;;  %v10804_v11 = vld [vmem:[#allocation6 + $0x4c] ss:$16 sps:$4 sm:$0xff]  }
 0x4cc   :  { %7514 = vmatprep.mubr.bf16.mxu1 %v10756_v13  ;;  %8533 = vperm.xlu1 %10503, %v10986_v61   ;;  %v11002_v13 = vld [vmem:[%s13057_s4 + $0xb0] sm:$0xf]  ;;  %v11026_v61 = vld [vmem:[%s13057_s4 + $0xe0] sm:$0xf] }
 0x4cd   :  { %8544 = vperm.xlu0 %10502, %v10987_v47   ;;  %v11027_v47 = vld [vmem:[%s13057_s4 + $0xe4] sm:$0xf] }
 0x4d0   :  { %8203 = vperm.xlu1 %10503, %v10988_v53   ;;  %v11028_v53 = vld [vmem:[%s13057_s4 + $0x68] sm:$0xf] }
 0x4d1   :  { %8214 = vperm.xlu0 %10502, %v10989_v40   ;;  %v11029_v40 = vld [vmem:[%s13057_s4 + $0x6c] sm:$0xf] }
 0x4d2   :  { %6809 = vmatmul.mubr.bf16.gmra.mrb[72].mxu0 %v10754_v12 }
 0x4d3   :  { %7515 = vmatmul.mubr.bf16.gmra.mrb[72].mxu1 %v10754_v12  ;;  %6818 = vmatprep.mubr.bf16.mxu0 %v10759_v7  ;;  %v11003_v12 = vld [vmem:[%s13057_s4 + $0xb4] sm:$0xf] }
 0x4d4   :  { %7524 = vmatprep.mubr.bf16.mxu1 %v10759_v7  ;;  %8555 = vperm.xlu1 %10503, %v10990_v51   ;;  %v11004_v7 = vld [vmem:[%s13057_s4 + $0x38] sm:$0xf]  ;;  %v11030_v51 = vld [vmem:[%s13057_s4 + $0xe8] sm:$0xf] }
 0x4d5   :  { %8566 = vperm.xlu0 %10502, %v10991_v27   ;;  %v11031_v27 = vld [vmem:[%s13057_s4 + $0xec] sm:$0xf] }
 0x4d8   :  { %8225 = vperm.xlu1 %10503, %v10992_v42   ;;  %v11032_v42 = vld [vmem:[%s13057_s4 + $0x70] sm:$0xf] }
 0x4d9   :  { %8236 = vperm.xlu0 %10502, %v10993_v59   ;;  %v11033_v59 = vld [vmem:[%s13057_s4 + $0x74] sm:$0xf] }
 0x4da   :  { %6819 = vmatmul.mubr.bf16.gmra.mrb[76].mxu0 %v10757_v14 }
 0x4db   :  { %7525 = vmatmul.mubr.bf16.gmra.mrb[76].mxu1 %v10757_v14  ;;  %6828 = vmatprep.mubr.bf16.mxu0 %v10762_v15  ;;  %v10802_v14 = vld [vmem:[#allocation6 + $0x48] ss:$16 sps:$4 sm:$0xff]  }
 0x4dc   :  { %7534 = vmatprep.mubr.bf16.mxu1 %v10762_v15  ;;  %8577 = vperm.xlu1 %10503, %v10994_v55   ;;  %v11005_v15 = vld [vmem:[%s13057_s4 + $0x3c] sm:$0xf]  ;;  %v11034_v55 = vld [vmem:[%s13057_s4 + $0xf0] sm:$0xf] }
 0x4dd   :  { %8588 = vperm.xlu0 %10502, %v10995_v56   ;;  %v11035_v56 = vld [vmem:[%s13057_s4 + $0xf4] sm:$0xf] }
 0x4e0   :  { %8247 = vperm.xlu1 %10503, %v10996_v58   ;;  %v11036_v58 = vld [vmem:[%s13057_s4 + $0x78] sm:$0xf] }
 0x4e1   :  { %8258 = vperm.xlu0 %10502, %v10997_v63   ;;  %v11037_v63 = vld [vmem:[%s13057_s4 + $0x7c] sm:$0xf] }
 0x4e2   :  { %6829 = vmatmul.mubr.bf16.gmra.mrb[80].mxu0 %v10760_v54 }
 0x4e3   :  { %7535 = vmatmul.mubr.bf16.gmra.mrb[80].mxu1 %v10760_v54  ;;  %6838 = vmatprep.mubr.bf16.mxu0 %v10765_v16  ;;  %v10807_v54 = vld [vmem:[#allocation6 + $0x6c] ss:$16 sps:$4 sm:$0xff]  }
 0x4e4   :  { %7544 = vmatprep.mubr.bf16.mxu1 %v10765_v16  ;;  %8599 = vperm.xlu1 %10503, %v10998_v4   ;;  %v11006_v16 = vld [vmem:[%s13057_s4 + $0xb8] sm:$0xf] }
 0x4e5   :  { %8610 = vperm.xlu0 %10502, %v10999_v5   ;;  %v11038_v4 = vld [vmem:[%s13057_s4 + $0xf8] sm:$0xf]  ;;  %v11039_v5 = vld [vmem:[%s13057_s4 + $0xfc] sm:$0xf] }
 0x4e8   :  { %8269 = vperm.xlu1 %10503, %v11000_v8  }
 0x4e9   :  { %8280 = vperm.xlu0 %10502, %v11001_v38   ;;  %v10829_v38 = vld [vmem:[#allocation6 + $0x168] ss:$16 sps:$4 sm:$0xff]  }
 0x4ea   :  { %6839 = vmatmul.mubr.bf16.gmra.mrb[84].mxu0 %v10763_v17 }
 0x4eb   :  { %7545 = vmatmul.mubr.bf16.gmra.mrb[84].mxu1 %v10763_v17  ;;  %6848 = vmatprep.mubr.bf16.mxu0 %v10768_v49  ;;  %v11007_v17 = vld [vmem:[%s13057_s4 + $0xbc] sm:$0xf] }
 0x4ec   :  { %7554 = vmatprep.mubr.bf16.mxu1 %v10768_v49  ;;  %8621 = vperm.xlu1 %10503, %v11002_v13   ;;  %v11008_v49 = vld [vmem:[%s13057_s4 + $0x40] sm:$0xf] }
 0x4ed   :  { %8632 = vperm.xlu0 %10502, %v11003_v12  }
 0x4f0   :  { %8291 = vperm.xlu1 %10503, %v11004_v7  }
 0x4f1   :  { %8302 = vperm.xlu0 %10502, %v11005_v15   ;;  %v10832_v15 = vld [vmem:[#allocation6 + $0x188] ss:$16 sps:$4 sm:$0xff]  }
 0x4f2   :  { %6849 = vmatmul.mubr.bf16.gmra.mrb[88].mxu0 %v10766_v45 }
 0x4f3   :  { %7555 = vmatmul.mubr.bf16.gmra.mrb[88].mxu1 %v10766_v45  ;;  %6858 = vmatprep.mubr.bf16.mxu0 %v10771_v21  ;;  %v10805_v45 = vld [vmem:[#allocation6 + $0x68] ss:$16 sps:$4 sm:$0xff]  }
 0x4f4   :  { %7564 = vmatprep.mubr.bf16.mxu1 %v10771_v21  ;;  %8643 = vperm.xlu1 %10503, %v11006_v16   ;;  %v11009_v21 = vld [vmem:[%s13057_s4 + $0x44] sm:$0xf] }
 0x4f5   :  { %8654 = vperm.xlu0 %10502, %v11007_v17   ;;  %v10837_v17 = vld [vmem:[#allocation6 + $0x1ac] ss:$16 sps:$4 sm:$0xff]  }
 0x4f8   :  { %8313 = vperm.xlu1 %10503, %v11008_v49  }
 0x4f9   :  { %8324 = vperm.xlu0 %10502, %v11009_v21  }
 0x4fa   :  { %6859 = vmatmul.mubr.bf16.gmra.mrb[92].mxu0 %v10769_v52 }
 0x4fb   :  { %7565 = vmatmul.mubr.bf16.gmra.mrb[92].mxu1 %v10769_v52  ;;  %6868 = vmatprep.mubr.bf16.mxu0 %v10774_v50  ;;  %v10810_v52 = vld [vmem:[#allocation6 + $0x8c] ss:$16 sps:$4 sm:$0xff]  }
 0x4fc   :  { %7574 = vmatprep.mubr.bf16.mxu1 %v10774_v50  ;;  %v11010_v50 = vld [vmem:[%s13057_s4 + $0xc0] sm:$0xf] }
 0x4fd   :  { %8665 = vperm.xlu1 %10503, %v11010_v50  }
 0x502   :  { %6869 = vmatmul.mubr.bf16.gmra.mrb[96].mxu0 %v10772_v18 }
 0x503   :  { %7575 = vmatmul.mubr.bf16.gmra.mrb[96].mxu1 %v10772_v18  ;;  %6878 = vmatprep.mubr.bf16.mxu0 %v10777_v46  ;;  %v11011_v18 = vld [vmem:[%s13057_s4 + $0xc4] sm:$0xf] }
 0x504   :  { %7584 = vmatprep.mubr.bf16.mxu1 %v10777_v46  ;;  %8676 = vperm.xlu0 %10502, %v11011_v18   ;;  %v11012_v46 = vld [vmem:[%s13057_s4 + $0x48] sm:$0xf] }
 0x505   :  { %8335 = vperm.xlu1 %10503, %v11012_v46   ;;  %v10835_v18 = vld [vmem:[#allocation6 + $0x1a8] ss:$16 sps:$4 sm:$0xff]  }
 0x50a   :  { %6879 = vmatmul.mubr.bf16.gmra.mrb[100].mxu0 %v10775_v19 }
 0x50b   :  { %7585 = vmatmul.mubr.bf16.gmra.mrb[100].mxu1 %v10775_v19  ;;  %6888 = vmatprep.mubr.bf16.mxu0 %v10780_v20  ;;  %v10808_v19 = vld [vmem:[#allocation6 + $0x88] ss:$16 sps:$4 sm:$0xff]  }
 0x50c   :  { %7594 = vmatprep.mubr.bf16.mxu1 %v10780_v20  ;;  %v11013_v20 = vld [vmem:[%s13057_s4 + $0x4c] sm:$0xf] }
 0x50d   :  { %8346 = vperm.xlu0 %10502, %v11013_v20   ;;  %v10840_v20 = vld [vmem:[#allocation6 + $0x1cc] ss:$16 sps:$4 sm:$0xff]  }
 0x511   :  { %8698 = vperm.xlu0 %10502, %v11015_v23  }
 0x512   :  { %6889 = vmatmul.mubr.bf16.gmra.mrb[104].mxu0 %v10778_v22 }
 0x513   :  { %7595 = vmatmul.mubr.bf16.gmra.mrb[104].mxu1 %v10778_v22  ;;  %6898 = vmatprep.mubr.bf16.mxu0 %v10783_v33  ;;  %v10813_v22 = vld [vmem:[#allocation6 + $0xac] ss:$16 sps:$4 sm:$0xff]  }
 0x514   :  { %7604 = vmatprep.mubr.bf16.mxu1 %v10783_v33  ;;  %v11014_v33 = vld [vmem:[%s13057_s4 + $0xc8] sm:$0xf] }
 0x515   :  { %8687 = vperm.xlu1 %10503, %v11014_v33   ;;  %8368 = vperm.xlu0 %10502, %v11017_v25   ;;  %v10838_v25 = vld [vmem:[#allocation6 + $0x1c8] ss:$16 sps:$4 sm:$0xff]  }
 0x519   :  { %8357 = vperm.xlu1 %10503, %v11016_v24   ;;  %8720 = vperm.xlu0 %10502, %v11019_v31   ;;  %v10843_v31 = vld [vmem:[#allocation6 + $0x1ec] ss:$16 sps:$4 sm:$0xff]  }
 0x51a   :  { %6899 = vmatmul.mubr.bf16.gmra.mrb[108].mxu0 %v10781_v6 }
 0x51b   :  { %7605 = vmatmul.mubr.bf16.gmra.mrb[108].mxu1 %v10781_v6  ;;  %6908 = vmatprep.mubr.bf16.mxu0 %v10786_v26  ;;  %v10811_v6 = vld [vmem:[#allocation6 + $0xa8] ss:$16 sps:$4 sm:$0xff]  }
 0x51c   :  { %7614 = vmatprep.mubr.bf16.mxu1 %v10786_v26  ;;  %v10816_v26 = vld [vmem:[#allocation6 + $0xcc] ss:$16 sps:$4 sm:$0xff]  }
 0x51d   :  { %8709 = vperm.xlu1 %10503, %v11018_v29   ;;  %8390 = vperm.xlu0 %10502, %v11021_v34  }
 0x521   :  { %8379 = vperm.xlu1 %10503, %v11020_v32   ;;  %8742 = vperm.xlu0 %10502, %v11023_v36   ;;  %v10841_v36 = vld [vmem:[#allocation6 + $0x1e8] ss:$16 sps:$4 sm:$0xff]  }
 0x522   :  { %6909 = vmatmul.mubr.bf16.gmra.mrb[112].mxu0 %v10784_v30 }
 0x523   :  { %7615 = vmatmul.mubr.bf16.gmra.mrb[112].mxu1 %v10784_v30  ;;  %6918 = vmatprep.mubr.bf16.mxu0 %v10789_v35  ;;  %v10814_v30 = vld [vmem:[#allocation6 + $0xc8] ss:$16 sps:$4 sm:$0xff]  }
 0x524   :  { %7624 = vmatprep.mubr.bf16.mxu1 %v10789_v35  ;;  %v10819_v35 = vld [vmem:[#allocation6 + $0xec] ss:$16 sps:$4 sm:$0xff]  }
 0x525   :  { %8731 = vperm.xlu1 %10503, %v11022_v9   ;;  %8412 = vperm.xlu0 %10502, %v11025_v2   ;;  %v10846_v2 = vld [vmem:[#allocation6 + $0x20c] ss:$16 sps:$4 sm:$0xff]  }
 0x529   :  { %8401 = vperm.xlu1 %10503, %v11024_v37   ;;  %8764 = vperm.xlu0 %10502, %v11027_v47  }
 0x52a   :  { %6919 = vmatmul.mubr.bf16.gmra.mrb[116].mxu0 %v10787_v41 }
 0x52b   :  { %7625 = vmatmul.mubr.bf16.gmra.mrb[116].mxu1 %v10787_v41  ;;  %6928 = vmatprep.mubr.bf16.mxu0 %v10792_v39  ;;  %v10817_v41 = vld [vmem:[#allocation6 + $0xe8] ss:$16 sps:$4 sm:$0xff]  }
 0x52c   :  { %7634 = vmatprep.mubr.bf16.mxu1 %v10792_v39  ;;  %v10822_v39 = vld [vmem:[#allocation6 + $0x10c] ss:$16 sps:$4 sm:$0xff]  }
 0x52d   :  { %8753 = vperm.xlu1 %10503, %v11026_v61   ;;  %8434 = vperm.xlu0 %10502, %v11029_v40   ;;  %v10844_v40 = vld [vmem:[#allocation6 + $0x208] ss:$16 sps:$4 sm:$0xff]  }
 0x531   :  { %8423 = vperm.xlu1 %10503, %v11028_v53   ;;  %8786 = vperm.xlu0 %10502, %v11031_v27   ;;  %v10849_v27 = vld [vmem:[#allocation6 + $0x22c] ss:$16 sps:$4 sm:$0xff]  }
 0x532   :  { %6929 = vmatmul.mubr.bf16.gmra.mrb[120].mxu0 %v10790_v48 }
 0x533   :  { %7635 = vmatmul.mubr.bf16.gmra.mrb[120].mxu1 %v10790_v48  ;;  %6938 = vmatprep.mubr.bf16.mxu0 %v10795_v57  ;;  %v10820_v48 = vld [vmem:[#allocation6 + $0x108] ss:$16 sps:$4 sm:$0xff]  }
 0x534   :  { %7644 = vmatprep.mubr.bf16.mxu1 %v10795_v57  ;;  %v10825_v57 = vld [vmem:[#allocation6 + $0x12c] ss:$16 sps:$4 sm:$0xff]  }
 0x535   :  { %8775 = vperm.xlu1 %10503, %v11030_v51   ;;  %8456 = vperm.xlu0 %10502, %v11033_v59  }
 0x537   :  { %v12414_v8 = vpop.permute.xlu1 %8148 }
 0x539   :  { %8445 = vperm.xlu1 %10503, %v11032_v42   ;;  %8808 = vperm.xlu0 %10502, %v11035_v56   ;;  %v10847_v56 = vld [vmem:[#allocation6 + $0x228] ss:$16 sps:$4 sm:$0xff]  }
 0x53a   :  { %6939 = vmatmul.mubr.bf16.gmra.mrb[124].mxu0 %v10793_v43 }
 0x53b   :  { %7645 = vmatmul.mubr.bf16.gmra.mrb[124].mxu1 %v10793_v43  ;;  %6981 = vmatprep.mubr.bf16.mxu0 %v10798_v44  ;;  %v10823_v43 = vld [vmem:[#allocation6 + $0x128] ss:$16 sps:$4 sm:$0xff]   ;;  %v8490_v13 = vpop.permute.xlu1 %8489 }
 0x53c   :  { %7687 = vmatprep.mubr.bf16.mxu1 %v10798_v44  ;;  %v10828_v44 = vld [vmem:[#allocation6 + $0x14c] ss:$16 sps:$4 sm:$0xff]   ;;  %v8498_v7 = vrot.slane %v8490_v13, %v11561_v3  ;;  %v10850_v13 = vld [vmem:[#allocation6 + $0x248] ss:$16 sps:$4 sm:$0xff]  }
 0x53d   :  { %8797 = vperm.xlu1 %10503, %v11034_v55   ;;  %8478 = vperm.xlu0 %10502, %v11037_v63   ;;  %v10852_v63 = vld [vmem:[#allocation6 + $0x24c] ss:$16 sps:$4 sm:$0xff]  }
 0x541   :  { %8467 = vperm.xlu1 %10503, %v11036_v58   ;;  %8830 = vperm.xlu0 %10502, %v11039_v5  }
 0x542   :  { %6982 = vmatmul.mubr.bf16.vlgmr.msra.gmra.mrb[0].mxu0 %v10796_v62 }
 0x543   :  { %7688 = vmatmul.mubr.bf16.vlgmr.msra.gmra.mrb[0].mxu1 %v10796_v62  ;;  %6991 = vmatprep.mubr.bf16.mxu0 %v10801_v28  ;;  %v10826_v62 = vld [vmem:[#allocation6 + $0x148] ss:$16 sps:$4 sm:$0xff]  }
 0x544   :  { %7697 = vmatprep.mubr.bf16.mxu1 %v10801_v28  ;;  %v10831_v28 = vld [vmem:[#allocation6 + $0x16c] ss:$16 sps:$4 sm:$0xff]  }
 0x545   :  { %8819 = vperm.xlu1 %10503, %v11038_v4  }
 0x54a   :  { %6992 = vmatmul.mubr.bf16.gmra.mrb[4].mxu0 %v10799_v10 }
 0x54b   :  { %7698 = vmatmul.mubr.bf16.gmra.mrb[4].mxu1 %v10799_v10  ;;  %7001 = vmatprep.mubr.bf16.mxu0 %v10804_v11  ;;  %v12416_v10 = vpop.permute.xlu0 %8137 }
 0x54c   :  { %7707 = vmatprep.mubr.bf16.mxu1 %v10804_v11  ;;  %v10834_v11 = vld [vmem:[#allocation6 + $0x18c] ss:$16 sps:$4 sm:$0xff]  }
 0x54f   :  { %v8501_v12 = vpop.permute.xlu0 %8500 }
 0x552   :  { %7002 = vmatmul.mubr.bf16.gmra.mrb[8].mxu0 %v10802_v14 }
 0x553   :  { %7708 = vmatmul.mubr.bf16.gmra.mrb[8].mxu1 %v10802_v14  ;;  %7011 = vmatprep.mubr.bf16.mxu0 %v10807_v54  ;;  %v8509_v14 = vrot.slane %v8501_v12, %v11561_v3  ;;  %v12422_v16 = vpop.permute.xlu0 %8170 }
 0x554   :  { %7717 = vmatprep.mubr.bf16.mxu1 %v10807_v54  ;;  %v12420_v54 = vpop.permute.xlu1 %8159 }
 0x555   :  { %v12424_v49 = vcombine.low %v8498_v7, %v8509_v14  ;;  %v10855_v14 = vld [vmem:[#allocation6 + $0x26c] ss:$16 sps:$4 sm:$0xff]  }
 0x557   :  { %v8523_v21 = vpop.permute.xlu0 %8522 }
 0x558   :  { %v8531_v50 = vrot.slane %v8523_v21, %v11561_v3 }
 0x55a   :  { %7012 = vmatmul.mubr.bf16.gmra.mrb[12].mxu0 %v10805_v45 }
 0x55b   :  { %7718 = vmatmul.mubr.bf16.gmra.mrb[12].mxu1 %v10805_v45  ;;  %7021 = vmatprep.mubr.bf16.mxu0 %v10810_v52  ;;  %v8512_v45 = vpop.permute.xlu1 %8511 }
 0x55c   :  { %7727 = vmatprep.mubr.bf16.mxu1 %v10810_v52  ;;  %v8520_v52 = vrot.slane %v8512_v45, %v11561_v3 }
 0x55f   :  { %v12428_v46 = vpop.permute.xlu1 %8181 }
 0x562   :  { %7022 = vmatmul.mubr.bf16.gmra.mrb[16].mxu0 %v10808_v19 }
 0x563   :  { %7728 = vmatmul.mubr.bf16.gmra.mrb[16].mxu1 %v10808_v19  ;;  %7031 = vmatprep.mubr.bf16.mxu0 %v10813_v22  ;;  %v12430_v19 = vpop.permute.xlu0 %8192  ;;  %v8534_v33 = vpop.permute.xlu1 %8533 }
 0x564   :  { %7737 = vmatprep.mubr.bf16.mxu1 %v10813_v22  ;;  %v12432_v22 = vcombine.low %v8520_v52, %v8531_v50  ;;  %v8542_v24 = vrot.slane %v8534_v33, %v11561_v3  ;;  %v10853_v50 = vld [vmem:[#allocation6 + $0x268] ss:$16 sps:$4 sm:$0xff]   ;;  %v10858_v33 = vld [vmem:[#allocation6 + $0x28c] ss:$16 sps:$4 sm:$0xff]  }
 0x567   :  { %v8545_v23 = vpop.permute.xlu0 %8544 }
 0x56a   :  { %7032 = vmatmul.mubr.bf16.gmra.mrb[20].mxu0 %v10811_v6 }
 0x56b   :  { %7738 = vmatmul.mubr.bf16.gmra.mrb[20].mxu1 %v10811_v6  ;;  %7041 = vmatprep.mubr.bf16.mxu0 %v10816_v26  ;;  %v8553_v6 = vrot.slane %v8545_v23, %v11561_v3  ;;  %v12438_v29 = vpop.permute.xlu0 %8214 }
 0x56c   :  { %7747 = vmatprep.mubr.bf16.mxu1 %v10816_v26  ;;  %v12436_v26 = vpop.permute.xlu1 %8203 }
 0x56d   :  { %v12440_v32 = vcombine.low %v8542_v24, %v8553_v6 }
 0x56f   :  { %v8567_v34 = vpop.permute.xlu0 %8566 }
 0x570   :  { %v8575_v9 = vrot.slane %v8567_v34, %v11561_v3 }
 0x572   :  { %7042 = vmatmul.mubr.bf16.gmra.mrb[24].mxu0 %v10814_v30 }
 0x573   :  { %7748 = vmatmul.mubr.bf16.gmra.mrb[24].mxu1 %v10814_v30  ;;  %7051 = vmatprep.mubr.bf16.mxu0 %v10819_v35  ;;  %v8556_v30 = vpop.permute.xlu1 %8555 }
 0x574   :  { %7757 = vmatprep.mubr.bf16.mxu1 %v10819_v35  ;;  %v8564_v35 = vrot.slane %v8556_v30, %v11561_v3  ;;  %v10856_v30 = vld [vmem:[#allocation6 + $0x288] ss:$16 sps:$4 sm:$0xff]  }
 0x577   :  { %v12444_v37 = vpop.permute.xlu1 %8225 }
 0x57a   :  { %7052 = vmatmul.mubr.bf16.gmra.mrb[28].mxu0 %v10817_v41 }
 0x57b   :  { %7758 = vmatmul.mubr.bf16.gmra.mrb[28].mxu1 %v10817_v41  ;;  %7061 = vmatprep.mubr.bf16.mxu0 %v10822_v39  ;;  %v12446_v41 = vpop.permute.xlu0 %8236  ;;  %v8578_v61 = vpop.permute.xlu1 %8577 }
 0x57c   :  { %7767 = vmatprep.mubr.bf16.mxu1 %v10822_v39  ;;  %v12448_v39 = vcombine.low %v8564_v35, %v8575_v9  ;;  %v8586_v53 = vrot.slane %v8578_v61, %v11561_v3  ;;  %v10861_v9 = vld [vmem:[#allocation6 + $0x2ac] ss:$16 sps:$4 sm:$0xff]  }
 0x57f   :  { %v8589_v47 = vpop.permute.xlu0 %8588 }
 0x582   :  { %7062 = vmatmul.mubr.bf16.gmra.mrb[32].mxu0 %v10820_v48 }
 0x583   :  { %7768 = vmatmul.mubr.bf16.gmra.mrb[32].mxu1 %v10820_v48  ;;  %7071 = vmatprep.mubr.bf16.mxu0 %v10825_v57  ;;  %v8597_v48 = vrot.slane %v8589_v47, %v11561_v3  ;;  %v12454_v51 = vpop.permute.xlu0 %8258 }
 0x584   :  { %7777 = vmatprep.mubr.bf16.mxu1 %v10825_v57  ;;  %v12452_v57 = vpop.permute.xlu1 %8247 }
 0x585   :  { %v12456_v42 = vcombine.low %v8586_v53, %v8597_v48  ;;  %v10859_v48 = vld [vmem:[#allocation6 + $0x2a8] ss:$16 sps:$4 sm:$0xff]  }
 0x587   :  { %v8611_v59 = vpop.permute.xlu0 %8610 }
 0x588   :  { %v8619_v55 = vrot.slane %v8611_v59, %v11561_v3 }
 0x58a   :  { %7072 = vmatmul.mubr.bf16.gmra.mrb[36].mxu0 %v10823_v43 }
 0x58b   :  { %7778 = vmatmul.mubr.bf16.gmra.mrb[36].mxu1 %v10823_v43  ;;  %7081 = vmatprep.mubr.bf16.mxu0 %v10828_v44  ;;  %v8600_v43 = vpop.permute.xlu1 %8599 }
 0x58c   :  { %7787 = vmatprep.mubr.bf16.mxu1 %v10828_v44  ;;  %v8608_v44 = vrot.slane %v8600_v43, %v11561_v3  ;;  %v10864_v43 = vld [vmem:[#allocation6 + $0x2cc] ss:$16 sps:$4 sm:$0xff]  }
 0x58f   :  { %v12460_v58 = vpop.permute.xlu1 %8269 }
 0x592   :  { %7082 = vmatmul.mubr.bf16.gmra.mrb[40].mxu0 %v10826_v62 }
 0x593   :  { %7788 = vmatmul.mubr.bf16.gmra.mrb[40].mxu1 %v10826_v62  ;;  %7091 = vmatprep.mubr.bf16.mxu0 %v10831_v28  ;;  %v12462_v62 = vpop.permute.xlu0 %8280  ;;  %v8622_v4 = vpop.permute.xlu1 %8621 }
 0x594   :  { %7797 = vmatprep.mubr.bf16.mxu1 %v10831_v28  ;;  %v12464_v28 = vcombine.low %v8608_v44, %v8619_v55 }
 0x597   :  { %v8633_v5 = vpop.permute.xlu0 %8632  ;;  %v12468_v12 = vpop.permute.xlu1 %8291 }
 0x59a   :  { %7092 = vmatmul.mubr.bf16.gmra.mrb[44].mxu0 %v10829_v38 }
 0x59b   :  { %7798 = vmatmul.mubr.bf16.gmra.mrb[44].mxu1 %v10829_v38  ;;  %7101 = vmatprep.mubr.bf16.mxu0 %v10834_v11  ;;  %v8630_v38 = vrot.slane %v8622_v4, %v11561_v3  ;;  %v12470_v7 = vpop.permute.xlu0 %8302  ;;  %v10862_v4 = vld [vmem:[#allocation6 + $0x2c8] ss:$16 sps:$4 sm:$0xff]  }
 0x59c   :  { %7807 = vmatprep.mubr.bf16.mxu1 %v10834_v11  ;;  %v8641_v11 = vrot.slane %v8633_v5, %v11561_v3 }
 0x59f   :  { %v8655_v45 = vpop.permute.xlu0 %8654 }
 0x5a0   :  { %v8663_v52 = vrot.slane %v8655_v45, %v11561_v3 }
 0x5a2   :  { %7102 = vmatmul.mubr.bf16.gmra.mrb[48].mxu0 %v10832_v15 }
 0x5a3   :  { %7808 = vmatmul.mubr.bf16.gmra.mrb[48].mxu1 %v10832_v15  ;;  %7111 = vmatprep.mubr.bf16.mxu0 %v10837_v17  ;;  %v12472_v15 = vcombine.low %v8630_v38, %v8641_v11  ;;  %v10867_v11 = vld [vmem:[#allocation6 + $0x2ec] ss:$16 sps:$4 sm:$0xff]  }
 0x5a4   :  { %7817 = vmatprep.mubr.bf16.mxu1 %v10837_v17  ;;  %v8644_v17 = vpop.permute.xlu1 %8643 }
 0x5a5   :  { %v8652_v21 = vrot.slane %v8644_v17, %v11561_v3 }
 0x5a7   :  { %v12480_v23 = vcombine.low %v8652_v21, %v8663_v52  ;;  %v10865_v52 = vld [vmem:[#allocation6 + $0x2e8] ss:$16 sps:$4 sm:$0xff]  }
 0x5aa   :  { %7112 = vmatmul.mubr.bf16.gmra.mrb[52].mxu0 %v10835_v18 }
 0x5ab   :  { %7818 = vmatmul.mubr.bf16.gmra.mrb[52].mxu1 %v10835_v18  ;;  %7121 = vmatprep.mubr.bf16.mxu0 %v10840_v20  ;;  %v12476_v18 = vpop.permute.xlu1 %8313 }
 0x5ac   :  { %7827 = vmatprep.mubr.bf16.mxu1 %v10840_v20  ;;  %v12478_v20 = vpop.permute.xlu0 %8324 }
 0x5af   :  { %v8666_v24 = vpop.permute.xlu1 %8665 }
 0x5b0   :  { %v8677_v6 = vpop.permute.xlu0 %8676 }
 0x5b2   :  { %7122 = vmatmul.mubr.bf16.gmra.mrb[56].mxu0 %v10838_v25 }
 0x5b3   :  { %7828 = vmatmul.mubr.bf16.gmra.mrb[56].mxu1 %v10838_v25  ;;  %7131 = vmatprep.mubr.bf16.mxu0 %v10843_v31  ;;  %v8674_v25 = vrot.slane %v8666_v24, %v11561_v3  ;;  %v12484_v34 = vpop.permute.xlu1 %8335  ;;  %v10870_v24 = vld [vmem:[#allocation6 + $0x30c] ss:$16 sps:$4 sm:$0xff]  }
 0x5b4   :  { %7837 = vmatprep.mubr.bf16.mxu1 %v10843_v31  ;;  %v8685_v31 = vrot.slane %v8677_v6, %v11561_v3  ;;  %v12486_v35 = vpop.permute.xlu0 %8346 }
 0x5b8   :  { %v8699_v61 = vpop.permute.xlu0 %8698 }
 0x5b9   :  { %v8707_v53 = vrot.slane %v8699_v61, %v11561_v3 }
 0x5ba   :  { %7132 = vmatmul.mubr.bf16.gmra.mrb[60].mxu0 %v10841_v36 }
 0x5bb   :  { %7838 = vmatmul.mubr.bf16.gmra.mrb[60].mxu1 %v10841_v36  ;;  %7141 = vmatprep.mubr.bf16.mxu0 %v10846_v2  ;;  %v12488_v36 = vcombine.low %v8674_v25, %v8685_v31 }
 0x5bc   :  { %7847 = vmatprep.mubr.bf16.mxu1 %v10846_v2  ;;  %v8688_v2 = vpop.permute.xlu1 %8687 }
 0x5bd   :  { %13072 = vst [vmem:[#allocation13_spill] sm:$0xff] %v12488_v36  ;;  %v8696_v47 = vrot.slane %v8688_v2, %v11561_v3  ;;  %v10868_v2 = vld [vmem:[#allocation6 + $0x308] ss:$16 sps:$4 sm:$0xff]  }
 0x5bf   :  { %v12496_v59 = vcombine.low %v8696_v47, %v8707_v53  ;;  %v10873_v53 = vld [vmem:[#allocation6 + $0x32c] ss:$16 sps:$4 sm:$0xff]  }
 0x5c1   :  { %13073 = vst [vmem:[#allocation14_spill] sm:$0xff] %v12496_v59 }
 0x5c2   :  { %7142 = vmatmul.mubr.bf16.gmra.mrb[64].mxu0 %v10844_v40 }
 0x5c3   :  { %7848 = vmatmul.mubr.bf16.gmra.mrb[64].mxu1 %v10844_v40  ;;  %7151 = vmatprep.mubr.bf16.mxu0 %v10849_v27  ;;  %v12492_v40 = vpop.permute.xlu1 %8357 }
 0x5c4   :  { %7857 = vmatprep.mubr.bf16.mxu1 %v10849_v27  ;;  %v12494_v27 = vpop.permute.xlu0 %8368 }
 0x5c7   :  { %v8710_v44 = vpop.permute.xlu1 %8709 }
 0x5c8   :  { %v8721_v55 = vpop.permute.xlu0 %8720 }
 0x5ca   :  { %7152 = vmatmul.mubr.bf16.gmra.mrb[68].mxu0 %v10847_v56 }
 0x5cb   :  { %7858 = vmatmul.mubr.bf16.gmra.mrb[68].mxu1 %v10847_v56  ;;  %7161 = vmatprep.mubr.bf16.mxu0 %v10852_v63  ;;  %v8718_v56 = vrot.slane %v8710_v44, %v11561_v3  ;;  %v12500_v5 = vpop.permute.xlu1 %8379 }
 0x5cc   :  { %7867 = vmatprep.mubr.bf16.mxu1 %v10852_v63  ;;  %v8729_v63 = vrot.slane %v8721_v55, %v11561_v3  ;;  %v12502_v38 = vpop.permute.xlu0 %8390 }
 0x5d0   :  { %v8743_v17 = vpop.permute.xlu0 %8742 }
 0x5d1   :  { %v8751_v21 = vrot.slane %v8743_v17, %v11561_v3 }
 0x5d2   :  { %7162 = vmatmul.mubr.bf16.gmra.mrb[72].mxu0 %v10850_v13 }
 0x5d3   :  { %7868 = vmatmul.mubr.bf16.gmra.mrb[72].mxu1 %v10850_v13  ;;  %7171 = vmatprep.mubr.bf16.mxu0 %v10855_v14  ;;  %v12504_v13 = vcombine.low %v8718_v56, %v8729_v63  ;;  %v10871_v63 = vld [vmem:[#allocation6 + $0x328] ss:$16 sps:$4 sm:$0xff]  }
 0x5d4   :  { %7877 = vmatprep.mubr.bf16.mxu1 %v10855_v14  ;;  %v8732_v14 = vpop.permute.xlu1 %8731 }
 0x5d5   :  { %13074 = vst [vmem:[#allocation15_spill] sm:$0xff] %v12504_v13  ;;  %v8740_v45 = vrot.slane %v8732_v14, %v11561_v3  ;;  %v10876_v14 = vld [vmem:[#allocation6 + $0x34c] ss:$16 sps:$4 sm:$0xff]  }
 0x5d7   :  { %v12512_v6 = vcombine.low %v8740_v45, %v8751_v21 }
 0x5d9   :  { %13075 = vst [vmem:[#allocation16_spill] sm:$0xff] %v12512_v6 }
 0x5da   :  { %7172 = vmatmul.mubr.bf16.gmra.mrb[76].mxu0 %v10853_v50 }
 0x5db   :  { %7878 = vmatmul.mubr.bf16.gmra.mrb[76].mxu1 %v10853_v50  ;;  %7181 = vmatprep.mubr.bf16.mxu0 %v10858_v33  ;;  %v12508_v50 = vpop.permute.xlu1 %8401 }
 0x5dc   :  { %7887 = vmatprep.mubr.bf16.mxu1 %v10858_v33  ;;  %v12510_v33 = vpop.permute.xlu0 %8412 }
 0x5df   :  { %v8754_v25 = vpop.permute.xlu1 %8753 }
 0x5e0   :  { %v8765_v31 = vpop.permute.xlu0 %8764 }
 0x5e2   :  { %7182 = vmatmul.mubr.bf16.gmra.mrb[80].mxu0 %v10856_v30 }
 0x5e3   :  { %7888 = vmatmul.mubr.bf16.gmra.mrb[80].mxu1 %v10856_v30  ;;  %7191 = vmatprep.mubr.bf16.mxu0 %v10861_v9  ;;  %v8762_v30 = vrot.slane %v8754_v25, %v11561_v3  ;;  %v12516_v61 = vpop.permute.xlu1 %8423  ;;  %v10874_v25 = vld [vmem:[#allocation6 + $0x348] ss:$16 sps:$4 sm:$0xff]  }
 0x5e4   :  { %7897 = vmatprep.mubr.bf16.mxu1 %v10861_v9  ;;  %v8773_v9 = vrot.slane %v8765_v31, %v11561_v3  ;;  %v12518_v47 = vpop.permute.xlu0 %8434  ;;  %v10879_v31 = vld [vmem:[#allocation6 + $0x36c] ss:$16 sps:$4 sm:$0xff]  }
 0x5e8   :  { %v8787_v44 = vpop.permute.xlu0 %8786 }
 0x5e9   :  { %v8795_v56 = vrot.slane %v8787_v44, %v11561_v3 }
 0x5ea   :  { %7192 = vmatmul.mubr.bf16.gmra.mrb[84].mxu0 %v10859_v48 }
 0x5eb   :  { %7898 = vmatmul.mubr.bf16.gmra.mrb[84].mxu1 %v10859_v48  ;;  %7201 = vmatprep.mubr.bf16.mxu0 %v10864_v43  ;;  %v12520_v48 = vcombine.low %v8762_v30, %v8773_v9  ;;  %v8157_v9 = vrot.slane %v12414_v8, %v11561_v3 }
 0x5ec   :  { %7907 = vmatprep.mubr.bf16.mxu1 %v10864_v43  ;;  %v8776_v43 = vpop.permute.xlu1 %8775 }
 0x5ed   :  { %13076 = vst [vmem:[#allocation17_spill] sm:$0xff] %v12520_v48  ;;  %v8784_v55 = vrot.slane %v8776_v43, %v11561_v3 }
 0x5ef   :  { %v12528_v17 = vcombine.low %v8784_v55, %v8795_v56  ;;  %v10877_v56 = vld [vmem:[#allocation6 + $0x368] ss:$16 sps:$4 sm:$0xff]  }
 0x5f1   :  { %13077 = vst [vmem:[#allocation18_spill] sm:$0xff] %v12528_v17 }
 0x5f2   :  { %7202 = vmatmul.mubr.bf16.gmra.mrb[88].mxu0 %v10862_v4 }
 0x5f3   :  { %7908 = vmatmul.mubr.bf16.gmra.mrb[88].mxu1 %v10862_v4  ;;  %7211 = vmatprep.mubr.bf16.mxu0 %v10867_v11  ;;  %v12524_v4 = vpop.permute.xlu1 %8445 }
 0x5f4   :  { %7917 = vmatprep.mubr.bf16.mxu1 %v10867_v11  ;;  %v12526_v11 = vpop.permute.xlu0 %8456 }
 0x5f7   :  { %v8798_v45 = vpop.permute.xlu1 %8797 }
 0x5f8   :  { %v8809_v21 = vpop.permute.xlu0 %8808 }
 0x5fa   :  { %7212 = vmatmul.mubr.bf16.gmra.mrb[92].mxu0 %v10865_v52 }
 0x5fb   :  { %7918 = vmatmul.mubr.bf16.gmra.mrb[92].mxu1 %v10865_v52  ;;  %7221 = vmatprep.mubr.bf16.mxu0 %v10870_v24  ;;  %v8806_v52 = vrot.slane %v8798_v45, %v11561_v3  ;;  %v10882_v45 = vld [vmem:[#allocation6 + $0x38c] ss:$16 sps:$4 sm:$0xff]  }
 0x5fc   :  { %7927 = vmatprep.mubr.bf16.mxu1 %v10870_v24  ;;  %v8817_v24 = vrot.slane %v8809_v21, %v11561_v3 }
 0x5fe   :  { %v12532_v30 = vcombine.low %v8806_v52, %v8817_v24 }
 0x600   :  { %13078 = vst [vmem:[#allocation19_spill] sm:$0xff] %v12532_v30 }
 0x602   :  { %7222 = vmatmul.mubr.bf16.gmra.mrb[96].mxu0 %v10868_v2 }
 0x603   :  { %7928 = vmatmul.mubr.bf16.gmra.mrb[96].mxu1 %v10868_v2  ;;  %7231 = vmatprep.mubr.bf16.mxu0 %v10873_v53  ;;  %v8146_v2 = vrot.slane %v12416_v10, %v11561_v3  ;;  %v8168_v10 = vrot.slane %v12420_v54, %v11561_v3  ;;  %v10880_v54 = vld [vmem:[#allocation6 + $0x388] ss:$16 sps:$4 sm:$0xff]  }
 0x604   :  { %7937 = vmatprep.mubr.bf16.mxu1 %v10873_v53 }
 0x605   :  { %v9936_v43 = vcombine.low %v8146_v2, %v8157_v9 }
 0x60a   :  { %7232 = vmatmul.mubr.bf16.gmra.mrb[100].mxu0 %v10871_v63 }
 0x60b   :  { %7938 = vmatmul.mubr.bf16.gmra.mrb[100].mxu1 %v10871_v63  ;;  %7241 = vmatprep.mubr.bf16.mxu0 %v10876_v14 }
 0x60c   :  { %7947 = vmatprep.mubr.bf16.mxu1 %v10876_v14 }
 0x612   :  { %7242 = vmatmul.mubr.bf16.gmra.mrb[104].mxu0 %v10874_v25 }
 0x613   :  { %7948 = vmatmul.mubr.bf16.gmra.mrb[104].mxu1 %v10874_v25  ;;  %7251 = vmatprep.mubr.bf16.mxu0 %v10879_v31  ;;  %v8179_v25 = vrot.slane %v12422_v16, %v11561_v3 }
 0x614   :  { %7957 = vmatprep.mubr.bf16.mxu1 %v10879_v31 }
 0x615   :  { %v6983_v53 = vpop.f32.mrb[0].mxu0 }
 0x616   :  { %v7689_v44 = vpop.f32.mrb[0].mxu1  ;;  %v6985_v55 = vpop.f32.mrb[1].mxu0 }
 0x617   :  { %v7691_v63 = vpop.f32.mrb[1].mxu1  ;;  %v6987_v14 = vpop.f32.mrb[2].mxu0 }
 0x618   :  { %v8008_v21 = vpack.c.bf16 %v6987_v14, %v6983_v53  ;;  %v7693_v52 = vpop.f32.mrb[2].mxu1  ;;  %v6989_v24 = vpop.f32.mrb[3].mxu0  ;;  %v9937_v14 = vcombine.low %v8168_v10, %v8179_v25  ;;  %v8201_v10 = vrot.slane %v12430_v19, %v11561_v3  ;;  %v10888_v19 = vld [vmem:[#allocation6 + $0x3cc] ss:$16 sps:$4 sm:$0xff]  }
 0x619   :  { %v8010_v60 = vpack.c.bf16 %v7693_v52, %v7689_v44  ;;  %v8009_v0 = vpack.c.bf16 %v6989_v24, %v6985_v55  ;;  %v7695_v8 = vpop.f32.mrb[3].mxu1  ;;  %v13079_v44 = vmov 0  }
 0x61a   :  { %v9032_v1 = vadd.bf16 %v9936_v43, %v8008_v21  ;;  %v8011_v30 = vpack.c.bf16 %v7695_v8, %v7691_v63  ;;  %7252 = vmatmul.mubr.bf16.gmra.mrb[108].mxu0 %v10877_v56 }
 0x61b   :  { %v12542_v31 = vadd.bf16 %v9936_v43, %v8010_v60  ;;  %v9033_v9 = vadd.bf16 %v9936_v43, %v8009_v0  ;;  %7958 = vmatmul.mubr.bf16.gmra.mrb[108].mxu1 %v10877_v56  ;;  %7261 = vmatprep.mubr.bf16.mxu0 %v10882_v45  ;;  %v10885_v60 = vld [vmem:[#allocation6 + $0x3ac] ss:$16 sps:$4 sm:$0xff]  }
 0x61c   :  { %v12544_v2 = vadd.bf16 %v9936_v43, %v8011_v30  ;;  %7967 = vmatprep.mubr.bf16.mxu1 %v10882_v45  ;;  %v9160_v63 = vmax.bf16 %v13079_v44, %v9032_v1  ;;  %v8190_v1 = vrot.slane %v12428_v46, %v11561_v3  ;;  %v10883_v46 = vld [vmem:[#allocation6 + $0x3a8] ss:$16 sps:$4 sm:$0xff]  }
 0x61d   :  { %v6993_v53 = vpop.f32.mrb[4].mxu0  ;;  %v9161_v55 = vmax.bf16 %v13079_v44, %v9033_v9 }
 0x61e   :  { %v7699_v21 = vpop.f32.mrb[4].mxu1  ;;  %v6995_v52 = vpop.f32.mrb[5].mxu0 }
 0x61f   :  { %v7701_v24 = vpop.f32.mrb[5].mxu1  ;;  %v6997_v8 = vpop.f32.mrb[6].mxu0  ;;  %9302 = vmatprep.subr.bf16.mxu0 %v9161_v55 }
 0x620   :  { %v8012_v16 = vpack.c.bf16 %v6997_v8, %v6993_v53  ;;  %v7703_v0 = vpop.f32.mrb[6].mxu1  ;;  %v6999_v56 = vpop.f32.mrb[7].mxu0  ;;  %9303 = vmatpush1.bf16.msra.mxu0 %v9160_v63 }
 0x621   :  { %v8014_v30 = vpack.c.bf16 %v7703_v0, %v7699_v21  ;;  %v8013_v43 = vpack.c.bf16 %v6999_v56, %v6995_v52  ;;  %v7705_v45 = vpop.f32.mrb[7].mxu1  ;;  %v9938_v52 = vcombine.low %v8190_v1, %v8201_v10  ;;  %v8223_v1 = vrot.slane %v12438_v29, %v11561_v3  ;;  %v10891_v29 = vld [vmem:[#allocation6 + $0x3ec] ss:$16 sps:$4 sm:$0xff]  }
 0x622   :  { %v9036_v17 = vadd.bf16 %v9937_v14, %v8012_v16  ;;  %v8015_v48 = vpack.c.bf16 %v7705_v45, %v7701_v24  ;;  %7262 = vmatmul.mubr.bf16.gmra.mrb[112].mxu0 %v10880_v54 }
 0x623   :  { %v12552_v25 = vadd.bf16 %v9937_v14, %v8014_v30  ;;  %v9037_v9 = vadd.bf16 %v9937_v14, %v8013_v43  ;;  %7968 = vmatmul.mubr.bf16.gmra.mrb[112].mxu1 %v10880_v54  ;;  %7271 = vmatprep.mubr.bf16.mxu0 %v10885_v60 }
 0x624   :  { %v12554_v53 = vadd.bf16 %v9937_v14, %v8015_v48  ;;  %7977 = vmatprep.mubr.bf16.mxu1 %v10885_v60  ;;  %v9164_v21 = vmax.bf16 %v13079_v44, %v9036_v17  ;;  %v8212_v17 = vrot.slane %v12436_v26, %v11561_v3  ;;  %v10886_v26 = vld [vmem:[#allocation6 + $0x3c8] ss:$16 sps:$4 sm:$0xff]  }
 0x625   :  { %v7003_v55 = vpop.f32.mrb[8].mxu0  ;;  %v9165_v63 = vmax.bf16 %v13079_v44, %v9037_v9 }
 0x626   :  { %v7709_v24 = vpop.f32.mrb[8].mxu1  ;;  %v7005_v8 = vpop.f32.mrb[9].mxu0 }
 0x627   :  { %v7711_v16 = vpop.f32.mrb[9].mxu1  ;;  %v7007_v0 = vpop.f32.mrb[10].mxu0  ;;  %9304 = vmatprep.subr.bf16.mxu0 %v9165_v63 }
 0x628   :  { %v8016_v56 = vpack.c.bf16 %v7007_v0, %v7003_v55  ;;  %v7713_v30 = vpop.f32.mrb[10].mxu1  ;;  %v7009_v54 = vpop.f32.mrb[11].mxu0  ;;  %9305 = vmatpush1.bf16.msra.mxu0 %v9164_v21 }
 0x629   :  { %v8018_v48 = vpack.c.bf16 %v7713_v30, %v7709_v24  ;;  %v8017_v14 = vpack.c.bf16 %v7009_v54, %v7005_v8  ;;  %v7715_v60 = vpop.f32.mrb[11].mxu1  ;;  %v9939_v8 = vcombine.low %v8212_v17, %v8223_v1  ;;  %v8245_v17 = vrot.slane %v12446_v41, %v11561_v3 }
 0x62a   :  { %v9040_v43 = vadd.bf16 %v9938_v52, %v8016_v56  ;;  %v8019_v45 = vpack.c.bf16 %v7715_v60, %v7711_v16  ;;  %7272 = vmatmul.mubr.bf16.gmra.mrb[116].mxu0 %v10883_v46 }
 0x62b   :  { %v12562_v10 = vadd.bf16 %v9938_v52, %v8018_v48  ;;  %v9041_v9 = vadd.bf16 %v9938_v52, %v8017_v14  ;;  %7978 = vmatmul.mubr.bf16.gmra.mrb[116].mxu1 %v10883_v46  ;;  %7281 = vmatprep.mubr.bf16.mxu0 %v10888_v19 }
 0x62c   :  { %v12564_v55 = vadd.bf16 %v9938_v52, %v8019_v45  ;;  %7987 = vmatprep.mubr.bf16.mxu1 %v10888_v19  ;;  %v9168_v24 = vmax.bf16 %v13079_v44, %v9040_v43  ;;  %v8234_v43 = vrot.slane %v12444_v37, %v11561_v3 }
 0x62d   :  { %v7013_v63 = vpop.f32.mrb[12].mxu0  ;;  %v9169_v21 = vmax.bf16 %v13079_v44, %v9041_v9 }
 0x62e   :  { %v7719_v16 = vpop.f32.mrb[12].mxu1  ;;  %v7015_v0 = vpop.f32.mrb[13].mxu0 }
 0x62f   :  { %v7721_v56 = vpop.f32.mrb[13].mxu1  ;;  %v7017_v30 = vpop.f32.mrb[14].mxu0  ;;  %9306 = vmatprep.subr.bf16.mxu0 %v9169_v21  ;;  %v12579_v21 = vld [vmem:[%s13054_s1 + $0x10] sm:$0xff] }
 0x630   :  { %v8020_v54 = vpack.c.bf16 %v7017_v30, %v7013_v63  ;;  %v7723_v48 = vpop.f32.mrb[14].mxu1  ;;  %v7019_v46 = vpop.f32.mrb[15].mxu0  ;;  %9307 = vmatpush1.bf16.msra.mxu0 %v9168_v24  ;;  %v10889_v30 = vld [vmem:[#allocation6 + $0x3e8] ss:$16 sps:$4 sm:$0xff]  }
 0x631   :  { %v8022_v52 = vpack.c.bf16 %v7723_v48, %v7719_v16  ;;  %v8021_v14 = vpack.c.bf16 %v7019_v46, %v7015_v0  ;;  %v7725_v19 = vpop.f32.mrb[15].mxu1  ;;  %v9940_v0 = vcombine.low %v8234_v43, %v8245_v17  ;;  %v8256_v43 = vrot.slane %v12452_v57, %v11561_v3 }
 0x632   :  { %v9044_v60 = vadd.bf16 %v9939_v8, %v8020_v54  ;;  %v8023_v45 = vpack.c.bf16 %v7725_v19, %v7721_v56  ;;  %7282 = vmatmul.mubr.bf16.gmra.mrb[120].mxu0 %v10886_v26  ;;  %v8267_v17 = vrot.slane %v12454_v51, %v11561_v3 }
 0x633   :  { %v12572_v1 = vadd.bf16 %v9939_v8, %v8022_v52  ;;  %v9045_v9 = vadd.bf16 %v9939_v8, %v8021_v14  ;;  %7988 = vmatmul.mubr.bf16.gmra.mrb[120].mxu1 %v10886_v26  ;;  %7291 = vmatprep.mubr.bf16.mxu0 %v10891_v29 }
 0x634   :  { %v12574_v63 = vadd.bf16 %v9939_v8, %v8023_v45  ;;  %7997 = vmatprep.mubr.bf16.mxu1 %v10891_v29  ;;  %v9172_v37 = vmax.bf16 %v13079_v44, %v9044_v60  ;;  %v12585_v8 = vcombine.high %v12579_v21, %v12579_v21 }
 0x635   :  { %v7023_v24 = vpop.f32.mrb[16].mxu0  ;;  %v9173_v16 = vmax.bf16 %v13079_v44, %v9045_v9 }
 0x636   :  { %v7729_v41 = vpop.f32.mrb[16].mxu1  ;;  %v7025_v56 = vpop.f32.mrb[17].mxu0 }
 0x637   :  { %v7731_v54 = vpop.f32.mrb[17].mxu1  ;;  %v7027_v26 = vpop.f32.mrb[18].mxu0  ;;  %9308 = vmatprep.subr.bf16.mxu0 %v9173_v16 }
 0x638   :  { %v8024_v29 = vpack.c.bf16 %v7027_v26, %v7023_v24  ;;  %v7733_v48 = vpop.f32.mrb[18].mxu1  ;;  %v7029_v46 = vpop.f32.mrb[19].mxu0  ;;  %9309 = vmatpush1.bf16.msra.mxu0 %v9172_v37 }
 0x639   :  { %v8026_v52 = vpack.c.bf16 %v7733_v48, %v7729_v41  ;;  %v8025_v14 = vpack.c.bf16 %v7029_v46, %v7025_v56  ;;  %v7735_v19 = vpop.f32.mrb[19].mxu1 }
 0x63a   :  { %v9048_v45 = vadd.bf16 %v9940_v0, %v8024_v29  ;;  %v8027_v60 = vpack.c.bf16 %v7735_v19, %v7731_v54  ;;  %7292 = vmatmul.mubr.bf16.gmra.mrb[124].mxu0 %v10889_v30  ;;  %v9941_v54 = vcombine.low %v8256_v43, %v8267_v17 }
 0x63b   :  { %v12591_v9 = vadd.bf16 %v9940_v0, %v8026_v52  ;;  %v9049_v16 = vadd.bf16 %v9940_v0, %v8025_v14  ;;  %7998 = vmatmul.mubr.bf16.gmra.mrb[124].mxu1 %v10889_v30  ;;  %9334 = vmatprep.mubr.bf16.mxu0 %v12585_v8 }
 0x63c   :  { %v12594_v24 = vadd.bf16 %v9940_v0, %v8027_v60  ;;  %v9176_v56 = vmax.bf16 %v13079_v44, %v9048_v45  ;;  %v8289_v45 = vrot.slane %v12462_v62, %v11561_v3 }
 0x63d   :  { %v7033_v37 = vpop.f32.mrb[20].mxu0  ;;  %v9177_v41 = vmax.bf16 %v13079_v44, %v9049_v16  ;;  %v8278_v16 = vrot.slane %v12460_v58, %v11561_v3 }
 0x63e   :  { %v7739_v26 = vpop.f32.mrb[20].mxu1  ;;  %v7035_v29 = vpop.f32.mrb[21].mxu0 }
 0x63f   :  { %v7741_v57 = vpop.f32.mrb[21].mxu1  ;;  %v7037_v48 = vpop.f32.mrb[22].mxu0  ;;  %9310 = vmatprep.subr.bf16.mxu0 %v9177_v41 }
 0x640   :  { %v8028_v51 = vpack.c.bf16 %v7037_v48, %v7033_v37  ;;  %v7743_v46 = vpop.f32.mrb[22].mxu1  ;;  %v7039_v52 = vpop.f32.mrb[23].mxu0  ;;  %9311 = vmatpush1.bf16.msra.mxu0 %v9176_v56 }
 0x641   :  { %v8030_v30 = vpack.c.bf16 %v7743_v46, %v7739_v26  ;;  %v8029_v14 = vpack.c.bf16 %v7039_v52, %v7035_v29  ;;  %v7745_v19 = vpop.f32.mrb[23].mxu1  ;;  %v9942_v26 = vcombine.low %v8278_v16, %v8289_v45 }
 0x642   :  { %v9052_v0 = vadd.bf16 %v9941_v54, %v8028_v51  ;;  %v8031_v60 = vpack.c.bf16 %v7745_v19, %v7741_v57 }
 0x643   :  { %v12602_v43 = vadd.bf16 %v9941_v54, %v8030_v30  ;;  %v9053_v17 = vadd.bf16 %v9941_v54, %v8029_v14 }
 0x644   :  { %v12604_v6 = vadd.bf16 %v9941_v54, %v8031_v60  ;;  %v9180_v56 = vmax.bf16 %v13079_v44, %v9052_v0  ;;  %v8300_v60 = vrot.slane %v12468_v12, %v11561_v3  ;;  %v8311_v0 = vrot.slane %v12470_v7, %v11561_v3 }
 0x645   :  { %v7043_v37 = vpop.f32.mrb[24].mxu0  ;;  %v9181_v41 = vmax.bf16 %v13079_v44, %v9053_v17 }
 0x646   :  { %v7749_v29 = vpop.f32.mrb[24].mxu1  ;;  %v7045_v48 = vpop.f32.mrb[25].mxu0 }
 0x647   :  { %v7751_v57 = vpop.f32.mrb[25].mxu1  ;;  %v7047_v51 = vpop.f32.mrb[26].mxu0  ;;  %9312 = vmatprep.subr.bf16.mxu0 %v9181_v41 }
 0x648   :  { %v8032_v58 = vpack.c.bf16 %v7047_v51, %v7043_v37  ;;  %v7753_v46 = vpop.f32.mrb[26].mxu1  ;;  %v7049_v52 = vpop.f32.mrb[27].mxu0  ;;  %9313 = vmatpush1.bf16.msra.mxu0 %v9180_v56 }
 0x649   :  { %v8034_v62 = vpack.c.bf16 %v7753_v46, %v7749_v29  ;;  %v8033_v30 = vpack.c.bf16 %v7049_v52, %v7045_v48  ;;  %v7755_v14 = vpop.f32.mrb[27].mxu1  ;;  %v9943_v29 = vcombine.low %v8300_v60, %v8311_v0 }
 0x64a   :  { %v9056_v54 = vadd.bf16 %v9942_v26, %v8032_v58  ;;  %v8035_v19 = vpack.c.bf16 %v7755_v14, %v7751_v57 }
 0x64b   :  { %v12612_v16 = vadd.bf16 %v9942_v26, %v8034_v62  ;;  %v9057_v45 = vadd.bf16 %v9942_v26, %v8033_v30 }
 0x64c   :  { %v12614_v17 = vadd.bf16 %v9942_v26, %v8035_v19  ;;  %v9184_v56 = vmax.bf16 %v13079_v44, %v9056_v54  ;;  %v8322_v19 = vrot.slane %v12476_v18, %v11561_v3  ;;  %v8333_v54 = vrot.slane %v12478_v20, %v11561_v3 }
 0x64d   :  { %v7053_v37 = vpop.f32.mrb[28].mxu0  ;;  %v9185_v41 = vmax.bf16 %v13079_v44, %v9057_v45 }
 0x64e   :  { %v7759_v48 = vpop.f32.mrb[28].mxu1  ;;  %v7055_v51 = vpop.f32.mrb[29].mxu0 }
 0x64f   :  { %v7761_v57 = vpop.f32.mrb[29].mxu1  ;;  %v7057_v58 = vpop.f32.mrb[30].mxu0  ;;  %9314 = vmatprep.subr.bf16.mxu0 %v9185_v41 }
 0x650   :  { %v8036_v12 = vpack.c.bf16 %v7057_v58, %v7053_v37  ;;  %v7763_v46 = vpop.f32.mrb[30].mxu1  ;;  %v7059_v52 = vpop.f32.mrb[31].mxu0  ;;  %9315 = vmatpush1.bf16.msra.mxu0 %v9184_v56 }
 0x651   :  { %v8038_v7 = vpack.c.bf16 %v7763_v46, %v7759_v48  ;;  %v8037_v62 = vpack.c.bf16 %v7059_v52, %v7055_v51  ;;  %v7765_v30 = vpop.f32.mrb[31].mxu1  ;;  %v9944_v48 = vcombine.low %v8322_v19, %v8333_v54 }
 0x652   :  { %v9060_v26 = vadd.bf16 %v9943_v29, %v8036_v12  ;;  %v8039_v14 = vpack.c.bf16 %v7765_v30, %v7761_v57 }
 0x653   :  { %v12622_v60 = vadd.bf16 %v9943_v29, %v8038_v7  ;;  %v9061_v0 = vadd.bf16 %v9943_v29, %v8037_v62 }
 0x654   :  { %v12624_v45 = vadd.bf16 %v9943_v29, %v8039_v14  ;;  %v9188_v56 = vmax.bf16 %v13079_v44, %v9060_v26  ;;  %v8344_v14 = vrot.slane %v12484_v34, %v11561_v3  ;;  %v8355_v26 = vrot.slane %v12486_v35, %v11561_v3 }
 0x655   :  { %v7063_v37 = vpop.f32.mrb[32].mxu0  ;;  %v9189_v41 = vmax.bf16 %v13079_v44, %v9061_v0 }
 0x656   :  { %v7769_v51 = vpop.f32.mrb[32].mxu1  ;;  %v7065_v58 = vpop.f32.mrb[33].mxu0 }
 0x657   :  { %v7771_v57 = vpop.f32.mrb[33].mxu1  ;;  %v7067_v12 = vpop.f32.mrb[34].mxu0  ;;  %9316 = vmatprep.subr.bf16.mxu0 %v9189_v41 }
 0x658   :  { %v8040_v18 = vpack.c.bf16 %v7067_v12, %v7063_v37  ;;  %v7773_v46 = vpop.f32.mrb[34].mxu1  ;;  %v7069_v52 = vpop.f32.mrb[35].mxu0  ;;  %9317 = vmatpush1.bf16.msra.mxu0 %v9188_v56 }
 0x659   :  { %v8042_v20 = vpack.c.bf16 %v7773_v46, %v7769_v51  ;;  %v8041_v7 = vpack.c.bf16 %v7069_v52, %v7065_v58  ;;  %v7775_v62 = vpop.f32.mrb[35].mxu1  ;;  %v9945_v51 = vcombine.low %v8344_v14, %v8355_v26 }
 0x65a   :  { %v9064_v29 = vadd.bf16 %v9944_v48, %v8040_v18  ;;  %v8043_v30 = vpack.c.bf16 %v7775_v62, %v7771_v57 }
 0x65b   :  { %v12632_v19 = vadd.bf16 %v9944_v48, %v8042_v20  ;;  %v9065_v54 = vadd.bf16 %v9944_v48, %v8041_v7 }
 0x65c   :  { %v12634_v0 = vadd.bf16 %v9944_v48, %v8043_v30  ;;  %v9192_v56 = vmax.bf16 %v13079_v44, %v9064_v29  ;;  %v8366_v30 = vrot.slane %v12492_v40, %v11561_v3  ;;  %v8377_v29 = vrot.slane %v12494_v27, %v11561_v3 }
 0x65d   :  { %v7073_v37 = vpop.f32.mrb[36].mxu0  ;;  %v9193_v41 = vmax.bf16 %v13079_v44, %v9065_v54 }
 0x65e   :  { %v7779_v58 = vpop.f32.mrb[36].mxu1  ;;  %v7075_v12 = vpop.f32.mrb[37].mxu0 }
 0x65f   :  { %v7781_v57 = vpop.f32.mrb[37].mxu1  ;;  %v7077_v18 = vpop.f32.mrb[38].mxu0  ;;  %9318 = vmatprep.subr.bf16.mxu0 %v9193_v41 }
 0x660   :  { %v8044_v34 = vpack.c.bf16 %v7077_v18, %v7073_v37  ;;  %v7783_v46 = vpop.f32.mrb[38].mxu1  ;;  %v7079_v52 = vpop.f32.mrb[39].mxu0  ;;  %9319 = vmatpush1.bf16.msra.mxu0 %v9192_v56 }
 0x661   :  { %v8046_v35 = vpack.c.bf16 %v7783_v46, %v7779_v58  ;;  %v8045_v20 = vpack.c.bf16 %v7079_v52, %v7075_v12  ;;  %v7785_v7 = vpop.f32.mrb[39].mxu1  ;;  %v9946_v58 = vcombine.low %v8366_v30, %v8377_v29 }
 0x662   :  { %v9068_v48 = vadd.bf16 %v9945_v51, %v8044_v34  ;;  %v8047_v62 = vpack.c.bf16 %v7785_v7, %v7781_v57 }
 0x663   :  { %v12642_v14 = vadd.bf16 %v9945_v51, %v8046_v35  ;;  %v9069_v26 = vadd.bf16 %v9945_v51, %v8045_v20 }
 0x664   :  { %v12644_v54 = vadd.bf16 %v9945_v51, %v8047_v62  ;;  %v9196_v56 = vmax.bf16 %v13079_v44, %v9068_v48  ;;  %v8388_v62 = vrot.slane %v12500_v5, %v11561_v3  ;;  %v8399_v48 = vrot.slane %v12502_v38, %v11561_v3 }
 0x665   :  { %v7083_v37 = vpop.f32.mrb[40].mxu0  ;;  %v9197_v41 = vmax.bf16 %v13079_v44, %v9069_v26 }
 0x666   :  { %v7789_v12 = vpop.f32.mrb[40].mxu1  ;;  %v7085_v18 = vpop.f32.mrb[41].mxu0 }
 0x667   :  { %v7791_v57 = vpop.f32.mrb[41].mxu1  ;;  %v7087_v34 = vpop.f32.mrb[42].mxu0  ;;  %9320 = vmatprep.subr.bf16.mxu0 %v9197_v41 }
 0x668   :  { %v8048_v40 = vpack.c.bf16 %v7087_v34, %v7083_v37  ;;  %v7793_v46 = vpop.f32.mrb[42].mxu1  ;;  %v7089_v52 = vpop.f32.mrb[43].mxu0  ;;  %9321 = vmatpush1.bf16.msra.mxu0 %v9196_v56 }
 0x669   :  { %v8050_v27 = vpack.c.bf16 %v7793_v46, %v7789_v12  ;;  %v8049_v35 = vpack.c.bf16 %v7089_v52, %v7085_v18  ;;  %v7795_v20 = vpop.f32.mrb[43].mxu1  ;;  %v9947_v12 = vcombine.low %v8388_v62, %v8399_v48 }
 0x66a   :  { %v9072_v51 = vadd.bf16 %v9946_v58, %v8048_v40  ;;  %v8051_v7 = vpack.c.bf16 %v7795_v20, %v7791_v57 }
 0x66b   :  { %v12652_v30 = vadd.bf16 %v9946_v58, %v8050_v27  ;;  %v9073_v29 = vadd.bf16 %v9946_v58, %v8049_v35 }
 0x66c   :  { %v12654_v26 = vadd.bf16 %v9946_v58, %v8051_v7  ;;  %v9200_v56 = vmax.bf16 %v13079_v44, %v9072_v51  ;;  %v8410_v7 = vrot.slane %v12508_v50, %v11561_v3  ;;  %v8421_v51 = vrot.slane %v12510_v33, %v11561_v3 }
 0x66d   :  { %v7093_v37 = vpop.f32.mrb[44].mxu0  ;;  %v9201_v41 = vmax.bf16 %v13079_v44, %v9073_v29 }
 0x66e   :  { %v7799_v18 = vpop.f32.mrb[44].mxu1  ;;  %v7095_v34 = vpop.f32.mrb[45].mxu0 }
 0x66f   :  { %v7801_v57 = vpop.f32.mrb[45].mxu1  ;;  %v7097_v40 = vpop.f32.mrb[46].mxu0  ;;  %9322 = vmatprep.subr.bf16.mxu0 %v9201_v41 }
 0x670   :  { %v8052_v5 = vpack.c.bf16 %v7097_v40, %v7093_v37  ;;  %v7803_v46 = vpop.f32.mrb[46].mxu1  ;;  %v7099_v52 = vpop.f32.mrb[47].mxu0  ;;  %9323 = vmatpush1.bf16.msra.mxu0 %v9200_v56 }
 0x671   :  { %v8054_v38 = vpack.c.bf16 %v7803_v46, %v7799_v18  ;;  %v8053_v27 = vpack.c.bf16 %v7099_v52, %v7095_v34  ;;  %v7805_v35 = vpop.f32.mrb[47].mxu1  ;;  %v9948_v18 = vcombine.low %v8410_v7, %v8421_v51 }
 0x672   :  { %v9076_v58 = vadd.bf16 %v9947_v12, %v8052_v5  ;;  %v8055_v20 = vpack.c.bf16 %v7805_v35, %v7801_v57 }
 0x673   :  { %v12662_v62 = vadd.bf16 %v9947_v12, %v8054_v38  ;;  %v9077_v48 = vadd.bf16 %v9947_v12, %v8053_v27 }
 0x674   :  { %v12664_v29 = vadd.bf16 %v9947_v12, %v8055_v20  ;;  %v9204_v56 = vmax.bf16 %v13079_v44, %v9076_v58  ;;  %v8432_v20 = vrot.slane %v12516_v61, %v11561_v3  ;;  %v8443_v58 = vrot.slane %v12518_v47, %v11561_v3 }
 0x675   :  { %v7103_v37 = vpop.f32.mrb[48].mxu0  ;;  %v9205_v41 = vmax.bf16 %v13079_v44, %v9077_v48 }
 0x676   :  { %v7809_v34 = vpop.f32.mrb[48].mxu1  ;;  %v7105_v40 = vpop.f32.mrb[49].mxu0 }
 0x677   :  { %v7811_v57 = vpop.f32.mrb[49].mxu1  ;;  %v7107_v5 = vpop.f32.mrb[50].mxu0  ;;  %9324 = vmatprep.subr.bf16.mxu0 %v9205_v41 }
 0x678   :  { %v8056_v50 = vpack.c.bf16 %v7107_v5, %v7103_v37  ;;  %v7813_v46 = vpop.f32.mrb[50].mxu1  ;;  %v7109_v52 = vpop.f32.mrb[51].mxu0  ;;  %9325 = vmatpush1.bf16.msra.mxu0 %v9204_v56 }
 0x679   :  { %v8058_v33 = vpack.c.bf16 %v7813_v46, %v7809_v34  ;;  %v8057_v38 = vpack.c.bf16 %v7109_v52, %v7105_v40  ;;  %v7815_v27 = vpop.f32.mrb[51].mxu1  ;;  %v9949_v34 = vcombine.low %v8432_v20, %v8443_v58 }
 0x67a   :  { %v9080_v12 = vadd.bf16 %v9948_v18, %v8056_v50  ;;  %v8059_v35 = vpack.c.bf16 %v7815_v27, %v7811_v57 }
 0x67b   :  { %v12672_v7 = vadd.bf16 %v9948_v18, %v8058_v33  ;;  %v9081_v51 = vadd.bf16 %v9948_v18, %v8057_v38 }
 0x67c   :  { %v12674_v48 = vadd.bf16 %v9948_v18, %v8059_v35  ;;  %v9208_v56 = vmax.bf16 %v13079_v44, %v9080_v12  ;;  %v8454_v35 = vrot.slane %v12524_v4, %v11561_v3  ;;  %v8465_v12 = vrot.slane %v12526_v11, %v11561_v3 }
 0x67d   :  { %v7113_v37 = vpop.f32.mrb[52].mxu0  ;;  %v9209_v41 = vmax.bf16 %v13079_v44, %v9081_v51 }
 0x67e   :  { %v7819_v40 = vpop.f32.mrb[52].mxu1  ;;  %v7115_v5 = vpop.f32.mrb[53].mxu0 }
 0x67f   :  { %v7821_v57 = vpop.f32.mrb[53].mxu1  ;;  %v7117_v50 = vpop.f32.mrb[54].mxu0  ;;  %9326 = vmatprep.subr.bf16.mxu0 %v9209_v41 }
 0x680   :  { %v8060_v61 = vpack.c.bf16 %v7117_v50, %v7113_v37  ;;  %v7823_v46 = vpop.f32.mrb[54].mxu1  ;;  %v7119_v52 = vpop.f32.mrb[55].mxu0  ;;  %9327 = vmatpush1.bf16.msra.mxu0 %v9208_v56  ;;  %v9950_v50 = vcombine.low %v8454_v35, %v8465_v12 }
 0x681   :  { %v8062_v47 = vpack.c.bf16 %v7823_v46, %v7819_v40  ;;  %v8061_v33 = vpack.c.bf16 %v7119_v52, %v7115_v5  ;;  %v7825_v38 = vpop.f32.mrb[55].mxu1  ;;  %v8468_v37 = vpop.permute.xlu1 %8467 }
 0x682   :  { %v9084_v18 = vadd.bf16 %v9949_v34, %v8060_v61  ;;  %v8063_v27 = vpack.c.bf16 %v7825_v38, %v7821_v57  ;;  %v8479_v40 = vpop.permute.xlu0 %8478 }
 0x683   :  { %v12682_v20 = vadd.bf16 %v9949_v34, %v8062_v47  ;;  %v9085_v58 = vadd.bf16 %v9949_v34, %v8061_v33  ;;  %v8487_v59 = vrot.slane %v8479_v40, %v11561_v3 }
 0x684   :  { %v12684_v51 = vadd.bf16 %v9949_v34, %v8063_v27  ;;  %v9212_v5 = vmax.bf16 %v13079_v44, %v9084_v18 }
 0x685   :  { %v7123_v41 = vpop.f32.mrb[56].mxu0  ;;  %v9213_v56 = vmax.bf16 %v13079_v44, %v9085_v58  ;;  %v8476_v58 = vrot.slane %v8468_v37, %v11561_v3 }
 0x686   :  { %v7829_v57 = vpop.f32.mrb[56].mxu1  ;;  %v7125_v61 = vpop.f32.mrb[57].mxu0 }
 0x687   :  { %v7831_v46 = vpop.f32.mrb[57].mxu1  ;;  %v7127_v4 = vpop.f32.mrb[58].mxu0  ;;  %9328 = vmatprep.subr.bf16.mxu0 %v9213_v56 }
 0x688   :  { %v8064_v52 = vpack.c.bf16 %v7127_v4, %v7123_v41  ;;  %v7833_v11 = vpop.f32.mrb[58].mxu1  ;;  %v7129_v47 = vpop.f32.mrb[59].mxu0  ;;  %9329 = vmatpush1.bf16.msra.mxu0 %v9212_v5  ;;  %v12696_v5 = vcombine.low %v8476_v58, %v8487_v59 }
 0x689   :  { %v8066_v33 = vpack.c.bf16 %v7833_v11, %v7829_v57  ;;  %v8065_v34 = vpack.c.bf16 %v7129_v47, %v7125_v61  ;;  %v7835_v38 = vpop.f32.mrb[59].mxu1 }
 0x68a   :  { %v9088_v27 = vadd.bf16 %v9950_v50, %v8064_v52  ;;  %v8067_v13 = vpack.c.bf16 %v7835_v38, %v7831_v46 }
 0x68b   :  { %v12690_v18 = vadd.bf16 %v9950_v50, %v8066_v33  ;;  %v9089_v35 = vadd.bf16 %v9950_v50, %v8065_v34 }
 0x68c   :  { %v12692_v12 = vadd.bf16 %v9950_v50, %v8067_v13  ;;  %v9216_v56 = vmax.bf16 %v13079_v44, %v9088_v27 }
 0x68d   :  { %v7133_v36 = vpop.f32.mrb[60].mxu0  ;;  %v9217_v41 = vmax.bf16 %v13079_v44, %v9089_v35 }
 0x68e   :  { %v7839_v57 = vpop.f32.mrb[60].mxu1  ;;  %v7135_v61 = vpop.f32.mrb[61].mxu0 }
 0x68f   :  { %v12698_v4 = vpop.f32.mrb[61].mxu1  ;;  %v7137_v46 = vpop.f32.mrb[62].mxu0  ;;  %9330 = vmatprep.subr.bf16.mxu0 %v9217_v41 }
 0x690   :  { %v8068_v37 = vpack.c.bf16 %v7137_v46, %v7133_v36  ;;  %v7843_v40 = vpop.f32.mrb[62].mxu1  ;;  %v7139_v52 = vpop.f32.mrb[63].mxu0  ;;  %9331 = vmatpush1.bf16.msra.mxu0 %v9216_v56 }
 0x691   :  { %v8070_v11 = vpack.c.bf16 %v7843_v40, %v7839_v57  ;;  %v8069_v13 = vpack.c.bf16 %v7139_v52, %v7135_v61  ;;  %v12700_v50 = vpop.f32.mrb[63].mxu1  ;;  %v9163_v57 = vmax.bf16 %v13079_v44, %v12544_v2  ;;  %v12715_v61 = vcombine.low %v12579_v21, %v12579_v21  ;;  %v12720_v52 = vld [vmem:[%s13054_s1 + $0x18] sm:$0xff] }
 0x692   :  { %v9092_v47 = vadd.bf16 %v12696_v5, %v8068_v37  ;;  %v8071_v59 = vpack.c.bf16 %v12700_v50, %v12698_v4  ;;  %v12724_v2 = vcombine.high %v12720_v52, %v12720_v52  ;;  %v9162_v21 = vmax.bf16 %v13079_v44, %v12542_v31 }
 0x693   :  { %v12706_v33 = vadd.bf16 %v12696_v5, %v8070_v11  ;;  %v9093_v34 = vadd.bf16 %v12696_v5, %v8069_v13  ;;  %v9218_v4 = vmax.bf16 %v13079_v44, %v12690_v18 }
 0x694   :  { %v9220_v27 = vmax.bf16 %v13079_v44, %v9092_v47  ;;  %9375 = vmatprep.mubr.bf16.mxu1 %v12724_v2 }
 0x695   :  { %v7143_v38 = vpop.f32.mrb[64].mxu0  ;;  %v9221_v36 = vmax.bf16 %v13079_v44, %v9093_v34  ;;  %v9222_v18 = vmax.bf16 %v13079_v44, %v12706_v33 }
 0x696   :  { %v7849_v58 = vpop.f32.mrb[64].mxu1  ;;  %v7145_v35 = vpop.f32.mrb[65].mxu0 }
 0x697   :  { %v7851_v41 = vpop.f32.mrb[65].mxu1  ;;  %v7147_v56 = vpop.f32.mrb[66].mxu0  ;;  %9332 = vmatprep.subr.bf16.mxu0 %v9221_v36 }
 0x698   :  { %v8072_v46 = vpack.c.bf16 %v7147_v56, %v7143_v38  ;;  %v7853_v37 = vpop.f32.mrb[66].mxu1  ;;  %v7149_v40 = vpop.f32.mrb[67].mxu0  ;;  %9333 = vmatpush1.bf16.msra.mxu0 %v9220_v27  ;;  %v9166_v56 = vmax.bf16 %v13079_v44, %v12552_v25  ;;  %v9170_v25 = vmax.bf16 %v13079_v44, %v12562_v10  ;;  %v9174_v10 = vmax.bf16 %v13079_v44, %v12572_v1 }
 0x699   :  { %v8074_v11 = vpack.c.bf16 %v7853_v37, %v7849_v58  ;;  %v8073_v13 = vpack.c.bf16 %v7149_v40, %v7145_v35  ;;  %v7855_v47 = vpop.f32.mrb[67].mxu1  ;;  %9384 = vmatprep.subr.bf16.mxu0 %v9163_v57  ;;  %v9167_v58 = vmax.bf16 %v13079_v44, %v12554_v53  ;;  %v9178_v1 = vmax.bf16 %v13079_v44, %v12591_v9 }
 0x69a   :  { %v9096_v34 = vadd.bf16 %v12424_v49, %v8072_v46  ;;  %v8075_v38 = vpack.c.bf16 %v7855_v47, %v7851_v41  ;;  %v9182_v9 = vmax.bf16 %v13079_v44, %v12602_v43  ;;  %v9186_v43 = vmax.bf16 %v13079_v44, %v12612_v16 }
 0x69b   :  { %v12730_v36 = vadd.bf16 %v12424_v49, %v8074_v11  ;;  %v9097_v27 = vadd.bf16 %v12424_v49, %v8073_v13  ;;  %9335 = vmatmul.mubr.bf16.vlgmr.msra.gmra.mrb[128].mxu0 %v12715_v61  ;;  %v9190_v16 = vmax.bf16 %v13079_v44, %v12622_v60  ;;  %v9194_v60 = vmax.bf16 %v13079_v44, %v12632_v19 }
 0x69c   :  { %v12738_v35 = vadd.bf16 %v12424_v49, %v8075_v38  ;;  %9385 = vmatpush1.bf16.msra.mxu0 %v9162_v21  ;;  %9416 = vmatprep.mubr.bf16.mxu0 %v12585_v8  ;;  %v9224_v57 = vmax.bf16 %v13079_v44, %v9096_v34  ;;  %v9171_v49 = vmax.bf16 %v13079_v44, %v12564_v55 }
 0x69d   :  { %v7153_v31 = vpop.f32.mrb[68].mxu0  ;;  %9386 = vmatprep.subr.bf16.mxu0 %v9167_v58  ;;  %v9225_v41 = vmax.bf16 %v13079_v44, %v9097_v27  ;;  %v9198_v19 = vmax.bf16 %v13079_v44, %v12642_v14  ;;  %v9202_v14 = vmax.bf16 %v13079_v44, %v12652_v30  ;;  %v9206_v30 = vmax.bf16 %v13079_v44, %v12662_v62 }
 0x69e   :  { %v7859_v46 = vpop.f32.mrb[68].mxu1  ;;  %v7155_v37 = vpop.f32.mrb[69].mxu0  ;;  %v9210_v62 = vmax.bf16 %v13079_v44, %v12672_v7  ;;  %v9214_v7 = vmax.bf16 %v13079_v44, %v12682_v20 }
 0x69f   :  { %v7861_v53 = vpop.f32.mrb[69].mxu1  ;;  %v7157_v40 = vpop.f32.mrb[70].mxu0  ;;  %9343 = vmatprep.subr.bf16.mxu1 %v9225_v41 }
 0x6a0   :  { %v8076_v11 = vpack.c.bf16 %v7157_v40, %v7153_v31  ;;  %v7863_v13 = vpop.f32.mrb[70].mxu1  ;;  %v7159_v8 = vpop.f32.mrb[71].mxu0  ;;  %9344 = vmatpush1.bf16.msra.mxu1 %v9224_v57  ;;  %9387 = vmatpush1.bf16.msra.mxu0 %v9166_v56  ;;  %v9175_v31 = vmax.bf16 %v13079_v44, %v12574_v63  ;;  %v9179_v63 = vmax.bf16 %v13079_v44, %v12594_v24 }
 0x6a1   :  { %v8078_v47 = vpack.c.bf16 %v7863_v13, %v7859_v46  ;;  %v8077_v21 = vpack.c.bf16 %v7159_v8, %v7155_v37  ;;  %v7865_v38 = vpop.f32.mrb[71].mxu1  ;;  %9388 = vmatprep.subr.bf16.mxu0 %v9171_v49 }
 0x6a2   :  { %v9100_v34 = vadd.bf16 %v12432_v22, %v8076_v11  ;;  %v8079_v27 = vpack.c.bf16 %v7865_v38, %v7861_v53 }
 0x6a3   :  { %v12751_v58 = vadd.bf16 %v12432_v22, %v8078_v47  ;;  %v9101_v55 = vadd.bf16 %v12432_v22, %v8077_v21 }
 0x6a4   :  { %v12757_v41 = vadd.bf16 %v12432_v22, %v8079_v27  ;;  %9389 = vmatpush1.bf16.msra.mxu0 %v9170_v25  ;;  %v9228_v46 = vmax.bf16 %v13079_v44, %v9100_v34  ;;  %v9183_v27 = vmax.bf16 %v13079_v44, %v12604_v6  ;;  %v9187_v6 = vmax.bf16 %v13079_v44, %v12614_v17 }
 0x6a5   :  { %v7163_v56 = vpop.f32.mrb[72].mxu0  ;;  %9390 = vmatprep.subr.bf16.mxu0 %v9175_v31  ;;  %v9229_v57 = vmax.bf16 %v13079_v44, %v9101_v55 }
 0x6a6   :  { %v7869_v37 = vpop.f32.mrb[72].mxu1  ;;  %v7165_v53 = vpop.f32.mrb[73].mxu0 }
 0x6a7   :  { %v7871_v40 = vpop.f32.mrb[73].mxu1  ;;  %v7167_v49 = vpop.f32.mrb[74].mxu0  ;;  %9345 = vmatprep.subr.bf16.mxu1 %v9229_v57 }
 0x6a8   :  { %v8080_v22 = vpack.c.bf16 %v7167_v49, %v7163_v56  ;;  %v7873_v11 = vpop.f32.mrb[74].mxu1  ;;  %v7169_v13 = vpop.f32.mrb[75].mxu0  ;;  %9346 = vmatpush1.bf16.msra.mxu1 %v9228_v46  ;;  %9391 = vmatpush1.bf16.msra.mxu0 %v9174_v10 }
 0x6a9   :  { %v8082_v8 = vpack.c.bf16 %v7873_v11, %v7869_v37  ;;  %v8081_v47 = vpack.c.bf16 %v7169_v13, %v7165_v53  ;;  %v7875_v21 = vpop.f32.mrb[75].mxu1  ;;  %9392 = vmatprep.subr.bf16.mxu0 %v9179_v63 }
 0x6aa   :  { %v9104_v38 = vadd.bf16 %v12440_v32, %v8080_v22  ;;  %v8083_v25 = vpack.c.bf16 %v7875_v21, %v7871_v40  ;;  %v9191_v21 = vmax.bf16 %v13079_v44, %v12624_v45  ;;  %v9195_v45 = vmax.bf16 %v13079_v44, %v12634_v0 }
 0x6ab   :  { %v12769_v34 = vadd.bf16 %v12440_v32, %v8082_v8  ;;  %v9105_v24 = vadd.bf16 %v12440_v32, %v8081_v47 }
 0x6ac   :  { %v12775_v55 = vadd.bf16 %v12440_v32, %v8083_v25  ;;  %9393 = vmatpush1.bf16.msra.mxu0 %v9178_v1  ;;  %v9232_v57 = vmax.bf16 %v13079_v44, %v9104_v38 }
 0x6ad   :  { %v7173_v31 = vpop.f32.mrb[76].mxu0  ;;  %9394 = vmatprep.subr.bf16.mxu0 %v9183_v27  ;;  %v9233_v56 = vmax.bf16 %v13079_v44, %v9105_v24 }
 0x6ae   :  { %v7879_v10 = vpop.f32.mrb[76].mxu1  ;;  %v7175_v46 = vpop.f32.mrb[77].mxu0 }
 0x6af   :  { %v7881_v37 = vpop.f32.mrb[77].mxu1  ;;  %v7177_v53 = vpop.f32.mrb[78].mxu0  ;;  %9347 = vmatprep.subr.bf16.mxu1 %v9233_v56 }
 0x6b0   :  { %v8084_v32 = vpack.c.bf16 %v7177_v53, %v7173_v31  ;;  %v7883_v40 = vpop.f32.mrb[78].mxu1  ;;  %v7179_v49 = vpop.f32.mrb[79].mxu0  ;;  %9348 = vmatpush1.bf16.msra.mxu1 %v9232_v57  ;;  %9395 = vmatpush1.bf16.msra.mxu0 %v9182_v9 }
 0x6b1   :  { %v8086_v63 = vpack.c.bf16 %v7883_v40, %v7879_v10  ;;  %v8085_v22 = vpack.c.bf16 %v7179_v49, %v7175_v46  ;;  %v7885_v11 = vpop.f32.mrb[79].mxu1  ;;  %9396 = vmatprep.subr.bf16.mxu0 %v9187_v6  ;;  %v9199_v49 = vmax.bf16 %v13079_v44, %v12644_v54  ;;  %v9203_v54 = vmax.bf16 %v13079_v44, %v12654_v26 }
 0x6b2   :  { %v9108_v13 = vadd.bf16 %v12448_v39, %v8084_v32  ;;  %v8087_v8 = vpack.c.bf16 %v7885_v11, %v7881_v37 }
 0x6b3   :  { %v12787_v47 = vadd.bf16 %v12448_v39, %v8086_v63  ;;  %v9109_v17 = vadd.bf16 %v12448_v39, %v8085_v22 }
 0x6b4   :  { %v12793_v1 = vadd.bf16 %v12448_v39, %v8087_v8  ;;  %9397 = vmatpush1.bf16.msra.mxu0 %v9186_v43  ;;  %v9236_v24 = vmax.bf16 %v13079_v44, %v9108_v13 }
 0x6b5   :  { %v7183_v38 = vpop.f32.mrb[80].mxu0  ;;  %9398 = vmatprep.subr.bf16.mxu0 %v9191_v21  ;;  %v9237_v25 = vmax.bf16 %v13079_v44, %v9109_v17 }
 0x6b6   :  { %v7889_v27 = vpop.f32.mrb[80].mxu1  ;;  %v7185_v31 = vpop.f32.mrb[81].mxu0 }
 0x6b7   :  { %v7891_v56 = vpop.f32.mrb[81].mxu1  ;;  %v7187_v9 = vpop.f32.mrb[82].mxu0  ;;  %9349 = vmatprep.subr.bf16.mxu1 %v9237_v25 }
 0x6b8   :  { %v8088_v39 = vpack.c.bf16 %v7187_v9, %v7183_v38  ;;  %v7893_v57 = vpop.f32.mrb[82].mxu1  ;;  %v7189_v10 = vpop.f32.mrb[83].mxu0  ;;  %9350 = vmatpush1.bf16.msra.mxu1 %v9236_v24  ;;  %9399 = vmatpush1.bf16.msra.mxu0 %v9190_v16 }
 0x6b9   :  { %v8090_v46 = vpack.c.bf16 %v7893_v57, %v7889_v27  ;;  %v8089_v37 = vpack.c.bf16 %v7189_v10, %v7185_v31  ;;  %v7895_v53 = vpop.f32.mrb[83].mxu1  ;;  %9400 = vmatprep.subr.bf16.mxu0 %v9195_v45  ;;  %v9207_v45 = vmax.bf16 %v13079_v44, %v12664_v29  ;;  %v9211_v29 = vmax.bf16 %v13079_v44, %v12674_v48 }
 0x6ba   :  { %v9112_v6 = vadd.bf16 %v12456_v42, %v8088_v39  ;;  %v8091_v32 = vpack.c.bf16 %v7895_v53, %v7891_v56 }
 0x6bb   :  { %v12805_v40 = vadd.bf16 %v12456_v42, %v8090_v46  ;;  %v9113_v0 = vadd.bf16 %v12456_v42, %v8089_v37 }
 0x6bc   :  { %v12811_v63 = vadd.bf16 %v12456_v42, %v8091_v32  ;;  %9401 = vmatpush1.bf16.msra.mxu0 %v9194_v60  ;;  %v9240_v43 = vmax.bf16 %v13079_v44, %v9112_v6 }
 0x6bd   :  { %v7193_v22 = vpop.f32.mrb[84].mxu0  ;;  %9402 = vmatprep.subr.bf16.mxu0 %v9199_v49  ;;  %v9241_v11 = vmax.bf16 %v13079_v44, %v9113_v0 }
 0x6be   :  { %v7899_v13 = vpop.f32.mrb[84].mxu1  ;;  %v7195_v8 = vpop.f32.mrb[85].mxu0 }
 0x6bf   :  { %v7901_v17 = vpop.f32.mrb[85].mxu1  ;;  %v7197_v21 = vpop.f32.mrb[86].mxu0  ;;  %9351 = vmatprep.subr.bf16.mxu1 %v9241_v11 }
 0x6c0   :  { %v8092_v42 = vpack.c.bf16 %v7197_v21, %v7193_v22  ;;  %v7903_v38 = vpop.f32.mrb[86].mxu1  ;;  %v7199_v25 = vpop.f32.mrb[87].mxu0  ;;  %9352 = vmatpush1.bf16.msra.mxu1 %v9240_v43  ;;  %9403 = vmatpush1.bf16.msra.mxu0 %v9198_v19 }
 0x6c1   :  { %v8094_v16 = vpack.c.bf16 %v7903_v38, %v7899_v13  ;;  %v8093_v24 = vpack.c.bf16 %v7199_v25, %v7195_v8  ;;  %v7905_v27 = vpop.f32.mrb[87].mxu1  ;;  %9404 = vmatprep.subr.bf16.mxu0 %v9203_v54  ;;  %v9215_v8 = vmax.bf16 %v13079_v44, %v12684_v51  ;;  %v9095_v51 = vadd.bf16 %v12696_v5, %v8071_v59 }
 0x6c2   :  { %v9116_v31 = vadd.bf16 %v12464_v28, %v8092_v42  ;;  %v8095_v56 = vpack.c.bf16 %v7905_v27, %v7901_v17 }
 0x6c3   :  { %v12823_v9 = vadd.bf16 %v12464_v28, %v8094_v16  ;;  %v9117_v26 = vadd.bf16 %v12464_v28, %v8093_v24  ;;  %v9219_v24 = vmax.bf16 %v13079_v44, %v12692_v12 }
 0x6c4   :  { %v12829_v39 = vadd.bf16 %v12464_v28, %v8095_v56  ;;  %9405 = vmatpush1.bf16.msra.mxu0 %v9202_v14  ;;  %v9244_v46 = vmax.bf16 %v13079_v44, %v9116_v31 }
 0x6c5   :  { %v7203_v57 = vpop.f32.mrb[88].mxu0  ;;  %9406 = vmatprep.subr.bf16.mxu0 %v9207_v45  ;;  %v9245_v10 = vmax.bf16 %v13079_v44, %v9117_v26  ;;  %v9223_v45 = vmax.bf16 %v13079_v44, %v9095_v51 }
 0x6c6   :  { %v7909_v37 = vpop.f32.mrb[88].mxu1  ;;  %v7205_v53 = vpop.f32.mrb[89].mxu0 }
 0x6c7   :  { %v7911_v60 = vpop.f32.mrb[89].mxu1  ;;  %v7207_v6 = vpop.f32.mrb[90].mxu0  ;;  %9353 = vmatprep.subr.bf16.mxu1 %v9245_v10 }
 0x6c8   :  { %v8096_v28 = vpack.c.bf16 %v7207_v6, %v7203_v57  ;;  %v7913_v32 = vpop.f32.mrb[90].mxu1  ;;  %v7209_v0 = vpop.f32.mrb[91].mxu0  ;;  %9354 = vmatpush1.bf16.msra.mxu1 %v9244_v46  ;;  %9407 = vmatpush1.bf16.msra.mxu0 %v9206_v30 }
 0x6c9   :  { %v8098_v49 = vpack.c.bf16 %v7913_v32, %v7909_v37  ;;  %v8097_v22 = vpack.c.bf16 %v7209_v0, %v7205_v53  ;;  %v7915_v11 = vpop.f32.mrb[91].mxu1  ;;  %9408 = vmatprep.subr.bf16.mxu0 %v9211_v29 }
 0x6ca   :  { %v9120_v19 = vadd.bf16 %v12472_v15, %v8096_v28  ;;  %v8099_v43 = vpack.c.bf16 %v7915_v11, %v7911_v60 }
 0x6cb   :  { %v12841_v13 = vadd.bf16 %v12472_v15, %v8098_v49  ;;  %v9121_v48 = vadd.bf16 %v12472_v15, %v8097_v22  ;;  %v13080_v22 = vld [vmem:[#allocation13_spill] sm:$0xff] }
 0x6cc   :  { %v12847_v17 = vadd.bf16 %v12472_v15, %v8099_v43  ;;  %9409 = vmatpush1.bf16.msra.mxu0 %v9210_v62  ;;  %v9248_v42 = vmax.bf16 %v13079_v44, %v9120_v19 }
 0x6cd   :  { %v7213_v21 = vpop.f32.mrb[92].mxu0  ;;  %9410 = vmatprep.subr.bf16.mxu0 %v9215_v8  ;;  %v9249_v54 = vmax.bf16 %v13079_v44, %v9121_v48 }
 0x6ce   :  { %v7919_v38 = vpop.f32.mrb[92].mxu1  ;;  %v7215_v25 = vpop.f32.mrb[93].mxu0 }
 0x6cf   :  { %v7921_v16 = vpop.f32.mrb[93].mxu1  ;;  %v7217_v15 = vpop.f32.mrb[94].mxu0  ;;  %9355 = vmatprep.subr.bf16.mxu1 %v9249_v54 }
 0x6d0   :  { %v8100_v27 = vpack.c.bf16 %v7217_v15, %v7213_v21  ;;  %v7923_v14 = vpop.f32.mrb[94].mxu1  ;;  %v7219_v31 = vpop.f32.mrb[95].mxu0  ;;  %9356 = vmatpush1.bf16.msra.mxu1 %v9248_v42  ;;  %9411 = vmatpush1.bf16.msra.mxu0 %v9214_v7 }
 0x6d1   :  { %v8102_v20 = vpack.c.bf16 %v7923_v14, %v7919_v38  ;;  %v8101_v56 = vpack.c.bf16 %v7219_v31, %v7215_v25  ;;  %v7925_v26 = vpop.f32.mrb[95].mxu1  ;;  %9412 = vmatprep.subr.bf16.mxu0 %v9219_v24 }
 0x6d2   :  { %v9124_v5 = vadd.bf16 %v12480_v23, %v8100_v27  ;;  %v8103_v50 = vpack.c.bf16 %v7925_v26, %v7921_v16  ;;  %v13081_v27 = vld [vmem:[#allocation14_spill] sm:$0xff] }
 0x6d3   :  { %v12863_v59 = vadd.bf16 %v12480_v23, %v8102_v20  ;;  %v9125_v12 = vadd.bf16 %v12480_v23, %v8101_v56 }
 0x6d4   :  { %v12868_v57 = vadd.bf16 %v12480_v23, %v8103_v50  ;;  %9413 = vmatpush1.bf16.msra.mxu0 %v9218_v4  ;;  %v9252_v46 = vmax.bf16 %v13079_v44, %v9124_v5 }
 0x6d5   :  { %v7223_v10 = vpop.f32.mrb[96].mxu0  ;;  %9414 = vmatprep.subr.bf16.mxu0 %v9223_v45  ;;  %v9253_v30 = vmax.bf16 %v13079_v44, %v9125_v12 }
 0x6d6   :  { %v7929_v37 = vpop.f32.mrb[96].mxu1  ;;  %v7225_v53 = vpop.f32.mrb[97].mxu0 }
 0x6d7   :  { %v7931_v60 = vpop.f32.mrb[97].mxu1  ;;  %v7227_v6 = vpop.f32.mrb[98].mxu0  ;;  %9357 = vmatprep.subr.bf16.mxu1 %v9253_v30 }
 0x6d8   :  { %v8104_v29 = vpack.c.bf16 %v7227_v6, %v7223_v10  ;;  %v7933_v28 = vpop.f32.mrb[98].mxu1  ;;  %v7229_v32 = vpop.f32.mrb[99].mxu0  ;;  %9358 = vmatpush1.bf16.msra.mxu1 %v9252_v46  ;;  %9415 = vmatpush1.bf16.msra.mxu0 %v9222_v18 }
 0x6d9   :  { %v8106_v23 = vpack.c.bf16 %v7933_v28, %v7929_v37  ;;  %v8105_v0 = vpack.c.bf16 %v7229_v32, %v7225_v53  ;;  %v7935_v49 = vpop.f32.mrb[99].mxu1 }
 0x6da   :  { %v9128_v11 = vadd.bf16 %v13080_v22, %v8104_v29  ;;  %v8107_v62 = vpack.c.bf16 %v7935_v49, %v7931_v60  ;;  %v13082_v29 = vld [vmem:[#allocation15_spill] sm:$0xff] }
 0x6db   :  { %v12876_v33 = vadd.bf16 %v13080_v22, %v8106_v23  ;;  %v9129_v19 = vadd.bf16 %v13080_v22, %v8105_v0  ;;  %9417 = vmatmul.mubr.bf16.vlgmr.msra.gmra.mrb[132].mxu0 %v12715_v61 }
 0x6dc   :  { %v12881_v43 = vadd.bf16 %v13080_v22, %v8107_v62  ;;  %v9256_v21 = vmax.bf16 %v13079_v44, %v9128_v11 }
 0x6dd   :  { %v7233_v48 = vpop.f32.mrb[100].mxu0  ;;  %v9257_v8 = vmax.bf16 %v13079_v44, %v9129_v19 }
 0x6de   :  { %v7939_v54 = vpop.f32.mrb[100].mxu1  ;;  %v7235_v7 = vpop.f32.mrb[101].mxu0 }
 0x6df   :  { %v7941_v42 = vpop.f32.mrb[101].mxu1  ;;  %v7237_v38 = vpop.f32.mrb[102].mxu0  ;;  %9359 = vmatprep.subr.bf16.mxu1 %v9257_v8 }
 0x6e0   :  { %v8108_v25 = vpack.c.bf16 %v7237_v38, %v7233_v48  ;;  %v7943_v51 = vpop.f32.mrb[102].mxu1  ;;  %v7239_v16 = vpop.f32.mrb[103].mxu0  ;;  %9360 = vmatpush1.bf16.msra.mxu1 %v9256_v21 }
 0x6e1   :  { %v8110_v15 = vpack.c.bf16 %v7943_v51, %v7939_v54  ;;  %v8109_v24 = vpack.c.bf16 %v7239_v16, %v7235_v7  ;;  %v7945_v61 = vpop.f32.mrb[103].mxu1  ;;  %v13083_v16 = vld [vmem:[#allocation16_spill] sm:$0xff] }
 0x6e2   :  { %v9132_v14 = vadd.bf16 %v13081_v27, %v8108_v25  ;;  %v8111_v31 = vpack.c.bf16 %v7945_v61, %v7941_v42 }
 0x6e3   :  { %v12887_v20 = vadd.bf16 %v13081_v27, %v8110_v15  ;;  %v9133_v56 = vadd.bf16 %v13081_v27, %v8109_v24 }
 0x6e4   :  { %v12891_v26 = vadd.bf16 %v13081_v27, %v8111_v31  ;;  %v9260_v50 = vmax.bf16 %v13079_v44, %v9132_v14 }
 0x6e5   :  { %v7243_v4 = vpop.f32.mrb[104].mxu0  ;;  %v9261_v5 = vmax.bf16 %v13079_v44, %v9133_v56 }
 0x6e6   :  { %v7949_v12 = vpop.f32.mrb[104].mxu1  ;;  %v7245_v45 = vpop.f32.mrb[105].mxu0 }
 0x6e7   :  { %v7951_v10 = vpop.f32.mrb[105].mxu1  ;;  %v7247_v30 = vpop.f32.mrb[106].mxu0  ;;  %9361 = vmatprep.subr.bf16.mxu1 %v9261_v5 }
 0x6e8   :  { %v8112_v18 = vpack.c.bf16 %v7247_v30, %v7243_v4  ;;  %v7953_v46 = vpop.f32.mrb[106].mxu1  ;;  %v7249_v37 = vpop.f32.mrb[107].mxu0  ;;  %9362 = vmatpush1.bf16.msra.mxu1 %v9260_v50 }
 0x6e9   :  { %v8114_v53 = vpack.c.bf16 %v7953_v46, %v7949_v12  ;;  %v8113_v60 = vpack.c.bf16 %v7249_v37, %v7245_v45  ;;  %v7955_v6 = vpop.f32.mrb[107].mxu1 }
 0x6ea   :  { %v9136_v28 = vadd.bf16 %v13082_v29, %v8112_v18  ;;  %v8115_v32 = vpack.c.bf16 %v7955_v6, %v7951_v10 }
 0x6eb   :  { %v12897_v23 = vadd.bf16 %v13082_v29, %v8114_v53  ;;  %v9137_v0 = vadd.bf16 %v13082_v29, %v8113_v60  ;;  %v13084_v60 = vld [vmem:[#allocation17_spill] sm:$0xff] }
 0x6ec   :  { %v12901_v49 = vadd.bf16 %v13082_v29, %v8115_v32  ;;  %v9264_v62 = vmax.bf16 %v13079_v44, %v9136_v28 }
 0x6ed   :  { %v7253_v22 = vpop.f32.mrb[108].mxu0  ;;  %v9265_v11 = vmax.bf16 %v13079_v44, %v9137_v0 }
 0x6ee   :  { %v7959_v19 = vpop.f32.mrb[108].mxu1  ;;  %v7255_v48 = vpop.f32.mrb[109].mxu0 }
 0x6ef   :  { %v7961_v8 = vpop.f32.mrb[109].mxu1  ;;  %v7257_v21 = vpop.f32.mrb[110].mxu0  ;;  %9363 = vmatprep.subr.bf16.mxu1 %v9265_v11 }
 0x6f0   :  { %v8116_v54 = vpack.c.bf16 %v7257_v21, %v7253_v22  ;;  %v7963_v7 = vpop.f32.mrb[110].mxu1  ;;  %v7259_v42 = vpop.f32.mrb[111].mxu0  ;;  %9364 = vmatpush1.bf16.msra.mxu1 %v9264_v62 }
 0x6f1   :  { %v8118_v38 = vpack.c.bf16 %v7963_v7, %v7959_v19  ;;  %v8117_v25 = vpack.c.bf16 %v7259_v42, %v7255_v48  ;;  %v7965_v51 = vpop.f32.mrb[111].mxu1 }
 0x6f2   :  { %v9140_v15 = vadd.bf16 %v13083_v16, %v8116_v54  ;;  %v8119_v24 = vpack.c.bf16 %v7965_v51, %v7961_v8 }
 0x6f3   :  { %v12907_v61 = vadd.bf16 %v13083_v16, %v8118_v38  ;;  %v9141_v27 = vadd.bf16 %v13083_v16, %v8117_v25 }
 0x6f4   :  { %v12911_v14 = vadd.bf16 %v13083_v16, %v8119_v24  ;;  %v9268_v4 = vmax.bf16 %v13079_v44, %v9140_v15  ;;  %v13085_v16 = vld [vmem:[#allocation18_spill] sm:$0xff] }
 0x6f5   :  { %v7263_v31 = vpop.f32.mrb[112].mxu0  ;;  %v9269_v56 = vmax.bf16 %v13079_v44, %v9141_v27 }
 0x6f6   :  { %v7969_v5 = vpop.f32.mrb[112].mxu1  ;;  %v7265_v50 = vpop.f32.mrb[113].mxu0 }
 0x6f7   :  { %v7971_v12 = vpop.f32.mrb[113].mxu1  ;;  %v7267_v45 = vpop.f32.mrb[114].mxu0  ;;  %9365 = vmatprep.subr.bf16.mxu1 %v9269_v56 }
 0x6f8   :  { %v8120_v10 = vpack.c.bf16 %v7267_v45, %v7263_v31  ;;  %v7973_v30 = vpop.f32.mrb[114].mxu1  ;;  %v7269_v18 = vpop.f32.mrb[115].mxu0  ;;  %9366 = vmatpush1.bf16.msra.mxu1 %v9268_v4 }
 0x6f9   :  { %v8122_v46 = vpack.c.bf16 %v7973_v30, %v7969_v5  ;;  %v8121_v37 = vpack.c.bf16 %v7269_v18, %v7265_v50  ;;  %v7975_v53 = vpop.f32.mrb[115].mxu1  ;;  %v8820_v4 = vpop.permute.xlu1 %8819 }
 0x6fa   :  { %v9144_v6 = vadd.bf16 %v13084_v60, %v8120_v10  ;;  %v8123_v29 = vpack.c.bf16 %v7975_v53, %v7971_v12 }
 0x6fb   :  { %v12917_v28 = vadd.bf16 %v13084_v60, %v8122_v46  ;;  %v9145_v32 = vadd.bf16 %v13084_v60, %v8121_v37 }
 0x6fc   :  { %v12921_v0 = vadd.bf16 %v13084_v60, %v8123_v29  ;;  %v9272_v62 = vmax.bf16 %v13079_v44, %v9144_v6  ;;  %v8831_v60 = vpop.permute.xlu0 %8830 }
 0x6fd   :  { %v7273_v22 = vpop.f32.mrb[116].mxu0  ;;  %v9273_v11 = vmax.bf16 %v13079_v44, %v9145_v32 }
 0x6fe   :  { %v7979_v19 = vpop.f32.mrb[116].mxu1  ;;  %v7275_v48 = vpop.f32.mrb[117].mxu0 }
 0x6ff   :  { %v7981_v8 = vpop.f32.mrb[117].mxu1  ;;  %v7277_v21 = vpop.f32.mrb[118].mxu0  ;;  %9367 = vmatprep.subr.bf16.mxu1 %v9273_v11 }
 0x700   :  { %v8124_v54 = vpack.c.bf16 %v7277_v21, %v7273_v22  ;;  %v7983_v7 = vpop.f32.mrb[118].mxu1  ;;  %v7279_v42 = vpop.f32.mrb[119].mxu0  ;;  %9368 = vmatpush1.bf16.msra.mxu1 %v9272_v62  ;;  %v13086_v22 = vld [vmem:[#allocation19_spill] sm:$0xff]  ;;  %v8839_v21 = vrot.slane %v8831_v60, %v11561_v3  ;;  %v12966_v60 = vcombine.low %v12720_v52, %v12720_v52  ;;  %v9235_v52 = vmax.bf16 %v13079_v44, %v12775_v55 }
 0x701   :  { %v8126_v38 = vpack.c.bf16 %v7983_v7, %v7979_v19  ;;  %v8125_v25 = vpack.c.bf16 %v7279_v42, %v7275_v48  ;;  %v7985_v51 = vpop.f32.mrb[119].mxu1  ;;  %v9247_v55 = vmax.bf16 %v13079_v44, %v12829_v39  ;;  %v9259_v39 = vmax.bf16 %v13079_v44, %v12881_v43 }
 0x702   :  { %v9148_v15 = vadd.bf16 %v13085_v16, %v8124_v54  ;;  %v8127_v24 = vpack.c.bf16 %v7985_v51, %v7981_v8  ;;  %v8828_v8 = vrot.slane %v8820_v4, %v11561_v3  ;;  %v9271_v43 = vmax.bf16 %v13079_v44, %v12911_v14 }
 0x703   :  { %v12927_v27 = vadd.bf16 %v13085_v16, %v8126_v38  ;;  %v9149_v31 = vadd.bf16 %v13085_v16, %v8125_v25 }
 0x704   :  { %v12931_v56 = vadd.bf16 %v13085_v16, %v8127_v24  ;;  %v9276_v12 = vmax.bf16 %v13079_v44, %v9148_v15  ;;  %v12949_v24 = vcombine.low %v8828_v8, %v8839_v21 }
 0x705   :  { %v7283_v5 = vpop.f32.mrb[120].mxu0  ;;  %v9277_v50 = vmax.bf16 %v13079_v44, %v9149_v31 }
 0x706   :  { %v7989_v45 = vpop.f32.mrb[120].mxu1  ;;  %v7285_v10 = vpop.f32.mrb[121].mxu0 }
 0x707   :  { %v7991_v30 = vpop.f32.mrb[121].mxu1  ;;  %v7287_v18 = vpop.f32.mrb[122].mxu0  ;;  %9369 = vmatprep.subr.bf16.mxu1 %v9277_v50 }
 0x708   :  { %v8128_v46 = vpack.c.bf16 %v7287_v18, %v7283_v5  ;;  %v7993_v37 = vpop.f32.mrb[122].mxu1  ;;  %v7289_v53 = vpop.f32.mrb[123].mxu0  ;;  %9370 = vmatpush1.bf16.msra.mxu1 %v9276_v12 }
 0x709   :  { %v8130_v6 = vpack.c.bf16 %v7993_v37, %v7989_v45  ;;  %v8129_v29 = vpack.c.bf16 %v7289_v53, %v7285_v10  ;;  %v7995_v32 = vpop.f32.mrb[123].mxu1  ;;  %v9227_v53 = vmax.bf16 %v13079_v44, %v12738_v35  ;;  %v9230_v35 = vmax.bf16 %v13079_v44, %v12751_v58 }
 0x70a   :  { %v9152_v11 = vadd.bf16 %v13086_v22, %v8128_v46  ;;  %v8131_v62 = vpack.c.bf16 %v7995_v32, %v7991_v30  ;;  %v9239_v32 = vmax.bf16 %v13079_v44, %v12793_v1  ;;  %v9242_v58 = vmax.bf16 %v13079_v44, %v12805_v40 }
 0x70b   :  { %v12937_v19 = vadd.bf16 %v13086_v22, %v8130_v6  ;;  %v9153_v48 = vadd.bf16 %v13086_v22, %v8129_v29  ;;  %v9226_v6 = vmax.bf16 %v13079_v44, %v12730_v36  ;;  %v9231_v29 = vmax.bf16 %v13079_v44, %v12757_v41 }
 0x70c   :  { %v12943_v54 = vadd.bf16 %v13086_v22, %v8131_v62  ;;  %v9280_v38 = vmax.bf16 %v13079_v44, %v9152_v11  ;;  %v9234_v36 = vmax.bf16 %v13079_v44, %v12769_v34  ;;  %v9243_v41 = vmax.bf16 %v13079_v44, %v12811_v63 }
 0x70d   :  { %v7293_v7 = vpop.f32.mrb[124].mxu0  ;;  %v9281_v42 = vmax.bf16 %v13079_v44, %v9153_v48  ;;  %v9246_v34 = vmax.bf16 %v13079_v44, %v12823_v9  ;;  %v9251_v1 = vmax.bf16 %v13079_v44, %v12847_v17  ;;  %v9255_v63 = vmax.bf16 %v13079_v44, %v12868_v57 }
 0x70e   :  { %v7999_v25 = vpop.f32.mrb[124].mxu1  ;;  %v7295_v51 = vpop.f32.mrb[125].mxu0  ;;  %v9254_v40 = vmax.bf16 %v13079_v44, %v12863_v59  ;;  %v9258_v9 = vmax.bf16 %v13079_v44, %v12876_v33  ;;  %v9263_v17 = vmax.bf16 %v13079_v44, %v12891_v26  ;;  %v9267_v57 = vmax.bf16 %v13079_v44, %v12901_v49 }
 0x70f   :  { %v12947_v16 = vpop.f32.mrb[125].mxu1  ;;  %v7297_v15 = vpop.f32.mrb[126].mxu0  ;;  %9371 = vmatprep.subr.bf16.mxu1 %v9281_v42  ;;  %v9266_v59 = vmax.bf16 %v13079_v44, %v12897_v23  ;;  %v9270_v33 = vmax.bf16 %v13079_v44, %v12907_v61  ;;  %v9275_v26 = vmax.bf16 %v13079_v44, %v12921_v0  ;;  %v9279_v49 = vmax.bf16 %v13079_v44, %v12931_v56 }
 0x710   :  { %v8132_v31 = vpack.c.bf16 %v7297_v15, %v7293_v7  ;;  %v8003_v4 = vpop.f32.mrb[126].mxu1  ;;  %v7299_v5 = vpop.f32.mrb[127].mxu0  ;;  %9372 = vmatpush1.bf16.msra.mxu1 %v9280_v38  ;;  %v9278_v23 = vmax.bf16 %v13079_v44, %v12927_v27  ;;  %v9283_v14 = vmax.bf16 %v13079_v44, %v12943_v54 }
 0x711   :  { %v8134_v3 = vpack.c.bf16 %v8003_v4, %v7999_v25  ;;  %v8133_v50 = vpack.c.bf16 %v7299_v5, %v7295_v51  ;;  %v12951_v12 = vpop.f32.mrb[127].mxu1 }
 0x712   :  { %v9156_v45 = vadd.bf16 %v12949_v24, %v8132_v31  ;;  %v8135_v10 = vpack.c.bf16 %v12951_v12, %v12947_v16 }
 0x713   :  { %v12957_v30 = vadd.bf16 %v12949_v24, %v8134_v3  ;;  %v9157_v18 = vadd.bf16 %v12949_v24, %v8133_v50 }
 0x714   :  { %v9284_v37 = vmax.bf16 %v13079_v44, %v9156_v45  ;;  %v9159_v61 = vadd.bf16 %v12949_v24, %v8135_v10 }
 0x715   :  { %v9285_v46 = vmax.bf16 %v13079_v44, %v9157_v18  ;;  %v9286_v27 = vmax.bf16 %v13079_v44, %v12957_v30 }
 0x716   :  { %v9287_v0 = vmax.bf16 %v13079_v44, %v9159_v61 }
 0x717   :  { %9373 = vmatprep.subr.bf16.mxu1 %v9285_v46 }
 0x718   :  { %9374 = vmatpush1.bf16.msra.mxu1 %v9284_v37 }
 0x719   :  { %9425 = vmatprep.subr.bf16.mxu1 %v9227_v53 }
 0x71b   :  { %9376 = vmatmul.mubr.bf16.vlgmr.msra.gmra.mrb[128].mxu1 %v12966_v60 }
 0x71c   :  { %9426 = vmatpush1.bf16.msra.mxu1 %v9226_v6  ;;  %9457 = vmatprep.mubr.bf16.mxu1 %v12724_v2  ;;  %v9238_v2 = vmax.bf16 %v13079_v44, %v12787_v47  ;;  %v9250_v47 = vmax.bf16 %v13079_v44, %v12841_v13  ;;  %v9262_v13 = vmax.bf16 %v13079_v44, %v12887_v20 }
 0x71d   :  { %9427 = vmatprep.subr.bf16.mxu1 %v9231_v29  ;;  %v9274_v20 = vmax.bf16 %v13079_v44, %v12917_v28  ;;  %v9282_v28 = vmax.bf16 %v13079_v44, %v12937_v19  ;;  %v9467_v19 = vstv %s13058_s5  ;;  %s11121_s5 = smov [#allocation8]  }
 0x71e   :  { %s9536_s18 = sshll.u32 %s11121_s5, 4  ;;  %s9537_s18 = int_to_ptr.vmem [resolvable:$true] %s9536_s18 }
 0x71f   :  { %s11084_s19 = scalar_lea.vmem %s9537_s18, 64  ;;  %p11089_p3 = scmp.lt.s32.totalorder %s9537_s18, %s9537_s18 }
 0x720   :  { %9428 = vmatpush1.bf16.msra.mxu1 %v9230_v35  ;;  %p11085_p2 = scmp.ne.s32.totalorder %s9537_s18, %s11084_s19  ;;  %p11090_p4 = scmp.lt.s32.totalorder %s11084_s19, %s11084_s19 }
 0x721   :  { %9429 = vmatprep.subr.bf16.mxu1 %v9235_v52 }
 0x722   :  { %p11091_p5 = por %p11090_p4, %p11089_p3 }
 0x724   :  { %9430 = vmatpush1.bf16.msra.mxu1 %v9234_v36  ;;  %p11092_p6 = pnand %p11091_p5, %p11085_p2 }
 0x725   :  { %9431 = vmatprep.subr.bf16.mxu1 %v9239_v32 }
 0x728   :  { %9432 = vmatpush1.bf16.msra.mxu1 %v9238_v2 }
 0x729   :  { %9433 = vmatprep.subr.bf16.mxu1 %v9243_v41 }
 0x72c   :  { %9434 = vmatpush1.bf16.msra.mxu1 %v9242_v58  ;;  %v11120_v58 = vmov 1966171168  }
 0x72d   :  { %9435 = vmatprep.subr.bf16.mxu1 %v9247_v55  ;;  %v9503_v55 = vunpack.c.l.s4 %v11120_v58 }
 0x730   :  { %9436 = vmatpush1.bf16.msra.mxu1 %v9246_v34  ;;  %v9504_v34 = vunpack.c.0.s8 %v9503_v55 }
 0x731   :  { %9437 = vmatprep.subr.bf16.mxu1 %v9251_v1 }
 0x734   :  { %9438 = vmatpush1.bf16.msra.mxu1 %v9250_v47  ;;  %v13087_v47 = vld [vmem:[#allocation12_spill] sm:$0xff] }
 0x735   :  { %9439 = vmatprep.subr.bf16.mxu1 %v9255_v63  ;;  %v9507_v63 = vsub.s32 %v9504_v34, %v13087_v47 }
 0x738   :  { %9440 = vmatpush1.bf16.msra.mxu1 %v9254_v40 }
 0x739   :  { %9441 = vmatprep.subr.bf16.mxu1 %v9259_v39 }
 0x73c   :  { %9442 = vmatpush1.bf16.msra.mxu1 %v9258_v9 }
 0x73d   :  { %9443 = vmatprep.subr.bf16.mxu1 %v9263_v17 }
 0x740   :  { %9444 = vmatpush1.bf16.msra.mxu1 %v9262_v13 }
 0x741   :  { %9445 = vmatprep.subr.bf16.mxu1 %v9267_v57  ;;  %v13088_v57 = vlaneseq }
 0x743   :  { %vm9527_vm2 = vcmp.lt.s32.totalorder %v13088_v57, 512 }
 0x744   :  { %9446 = vmatpush1.bf16.msra.mxu1 %v9266_v59 }
 0x745   :  { %9447 = vmatprep.subr.bf16.mxu1 %v9271_v43 }
 0x748   :  { %9448 = vmatpush1.bf16.msra.mxu1 %v9270_v33 }
 0x749   :  { %9449 = vmatprep.subr.bf16.mxu1 %v9275_v26 }
 0x74c   :  { %9450 = vmatpush1.bf16.msra.mxu1 %v9274_v20 }
 0x74d   :  { %9451 = vmatprep.subr.bf16.mxu1 %v9279_v49 }
 0x750   :  { %9452 = vmatpush1.bf16.msra.mxu1 %v9278_v23 }
 0x751   :  { %9453 = vmatprep.subr.bf16.mxu1 %v9283_v14 }
 0x754   :  { %9454 = vmatpush1.bf16.msra.mxu1 %v9282_v28 }
 0x755   :  { %9455 = vmatprep.subr.bf16.mxu1 %v9287_v0 }
 0x758   :  { %9456 = vmatpush1.bf16.msra.mxu1 %v9286_v27 }
 0x75b   :  { %9458 = vmatmul.mubr.bf16.vlgmr.msra.gmra.mrb[132].mxu1 %v12966_v60 }
 0x76e   :  { %v9336_v56 = vpop.f32.mrb[128].mxu0 }
 0x76f   :  { %v9338_v22 = vpop.f32.mrb[129].mxu0 }
 0x770   :  { %v9340_v11 = vpop.f32.mrb[130].mxu0 }
 0x771   :  { %v9341_v62 = vpop.f32.mrb[131].mxu0 }
 0x7ae   :  { %v9418_v48 = vpop.f32.mrb[132].mxu0 }
 0x7af   :  { %v9420_v8 = vpop.f32.mrb[133].mxu0 }
 0x7b0   :  { %v9422_v21 = vpop.f32.mrb[134].mxu0 }
 0x7b1   :  { %v9423_v54 = vpop.f32.mrb[135].mxu0 }
 0x7ee   :  { %v9377_v7 = vpop.f32.mrb[128].mxu1 }
 0x7ef   :  { %v9378_v42 = vadd.f32 %v9377_v7, %v9336_v56  ;;  %v9379_v38 = vpop.f32.mrb[129].mxu1 }
 0x7f0   :  { %v9380_v25 = vadd.f32 %v9379_v38, %v9338_v22  ;;  %v9381_v44 = vpop.f32.mrb[130].mxu1 }
 0x7f1   :  { %v9468_v51 = vadd.f32 %v9467_v19, %v9378_v42  ;;  %v9382_v16 = vpop.f32.mrb[131].mxu1 }
 0x7f2   :  { %v9469_v15 = vadd.f32 %v9467_v19, %v9380_v25 }
 0x7f3   :  { %v9972_v24 = vmul.f32 -1.442695, %v9468_v51 }
 0x7f4   :  { %v9973_v31 = vmul.f32 -1.442695, %v9469_v15 }
 0x7f5   :  { %10896 = vpow2.f32 %v9972_v24 }
 0x7f6   :  { %10898 = vpow2.f32 %v9973_v31 }
 0x7ff   :  { %v10897_v4 = vpop.eup %10896 }
 0x800   :  { %v10899_v5 = vpop.eup %10898  ;;  %v9484_v3 = vadd.f32 1.0, %v10897_v4 }
 0x801   :  { %v9485_v50 = vadd.f32 1.0, %v10899_v5 }
 0x802   :  { %10900 = vrcp.f32 %v9484_v3 }
 0x803   :  { %10902 = vrcp.f32 %v9485_v50 }
 0x80c   :  { %v10901_v12 = vpop.eup %10900 }
 0x80d   :  { %v10903_v45 = vpop.eup %10902 }
 0x80e   :  { %v9500_v10 = vcombine.low %v10901_v12, %v10903_v45 }
 0x810   :  { %v9508_v9 = vrot.slane %v9500_v10, %v9507_v63 }
 0x82e   :  { %v9459_v30 = vpop.f32.mrb[132].mxu1 }
 0x82f   :  { %v9460_v18 = vadd.f32 %v9459_v30, %v9418_v48  ;;  %v9461_v46 = vpop.f32.mrb[133].mxu1 }
 0x830   :  { %v9462_v37 = vadd.f32 %v9461_v46, %v9420_v8  ;;  %v9463_v53 = vpop.f32.mrb[134].mxu1 }
 0x831   :  { %v9470_v60 = vadd.f32 %v9467_v19, %v9460_v18  ;;  %v9464_v6 = vpop.f32.mrb[135].mxu1 }
 0x832   :  { %v9471_v29 = vadd.f32 %v9467_v19, %v9462_v37 }
 0x833   :  { %v9974_v35 = vmul.f32 -1.442695, %v9470_v60 }
 0x834   :  { %v9975_v52 = vmul.f32 -1.442695, %v9471_v29 }
 0x835   :  { %10904 = vpow2.f32 %v9974_v35 }
 0x836   :  { %10906 = vpow2.f32 %v9975_v52 }
 0x83f   :  { %v10905_v36 = vpop.eup %10904 }
 0x840   :  { %v10907_v32 = vpop.eup %10906  ;;  %v9486_v2 = vadd.f32 1.0, %v10905_v36 }
 0x841   :  { %v9487_v41 = vadd.f32 1.0, %v10907_v32 }
 0x842   :  { %10908 = vrcp.f32 %v9486_v2 }
 0x843   :  { %10910 = vrcp.f32 %v9487_v41 }
 0x84c   :  { %v10909_v1 = vpop.eup %10908 }
 0x84d   :  { %v10911_v40 = vpop.eup %10910 }
 0x84e   :  { %v9501_v39 = vcombine.low %v10909_v1, %v10911_v40 }
 0x850   :  { %v9515_v17 = vrot.slane %v9501_v39, %v9507_v63 }
 0x852   :  { %v9516_v13 = vcombine.low %v9508_v9, %v9515_v17 }
 0x854   :  { %v9523_v59 = vrot.slane %v9516_v13, %v9507_v63 }
 0x856   :  { %9529 = vst.msk [vmem:[#allocation8] sm:$0xf] %vm9527_vm2, %v9523_v59 }
 0x857   :  { %11095 = shalt.err (!%p11092_p6)
}
 0x858   :  { %s11096_s21 = scalar_lea.hbm %s13059_s6, 64 }
 0x859   :  { %p11097_p7 = scmp.ne.s32.totalorder %s13059_s6, %s11096_s21  ;;  %p11100_p8 = scmp.lt.u32.totalorder %s11096_s21, %s13059_s6 }
 0x85b   :  { %p11102_p9 = pnand %p11100_p8, %p11097_p7 }
 0x85d   :  { %11105 = shalt.err (!%p11102_p9)
}
 0x85e   :  { %9539 = dma.vmem_to_hbm [thread:$0]  %s9537_s18, 64, %s13059_s6, [#allocation5]  }
 0x85f   :  { %11110 = dma.done.wait [#allocation5], 64  }
 0x860   :  { %11111 = vsyncadd [#allocation5], 4294967232 }
 0x861   :  { %9543 = vsyncpa [#allocation4], 1 }
 0x862   :  { %9544 = vsyncpa [#allocation7], 1 }
 0x863   :  { %9545 = vsyncpa [#allocation5], 1 }

</bundles_post_ra>
